<compile_context>
chip_gen: v7x
topology: tpu7x:2x2x1
jax: 0.10.0
libtpu: 0.0.40
codegen_flags: <defaults>
</compile_context>

<pallas_src>
import math
from functools import partial

import jax
import jax.numpy as jnp
from jax.experimental import pallas as pl
from jax.experimental.pallas import tpu as pltpu

# ----- small, module-consistent hyperparameters ------------------------------------
VOCAB = 64        # input_dim (vocabulary), shrunk from 10000
D_MODEL = 32      # d_model,            shrunk from 512
NHEAD = 4         # nhead,              shrunk from 8
NUM_ENC = 2       # num_encoder_layers, shrunk from 6
NUM_DEC = 2       # num_decoder_layers, shrunk from 6
D_FF = 64         # dim_feedforward,    shrunk from 2048
EPS = 1e-5        # nn.LayerNorm default eps used by nn.Transformer
MAX_LEN = 64      # PositionalEncoding max_len (5000 in the module; 64 suffices here)
LANES = 128       # slab lane width; also the padded (lane-dense) logits width

_VMEM = pl.BlockSpec(memory_space=pltpu.MemorySpace.VMEM)


# =========================== host-side parameter packing ===========================
class _SlabPacker:
    """Packs many small 2-D params into one (rows, 128) slab (host side, once)."""

    def __init__(self, dtype, row_align):
        self.dtype = dtype
        self.row_align = row_align
        self.bufs = []
        self.layout = {}          # name -> (row_offset, n_rows, n_cols); static metadata
        self.rows = 0

    def add(self, name, arr):
        arr = jnp.asarray(arr, jnp.float32)
        if arr.ndim == 1:
            arr = arr[None, :]
        r, c = arr.shape
        rp = ((r + self.row_align - 1) // self.row_align) * self.row_align
        buf = jnp.zeros((rp, LANES), jnp.float32).at[:r, :c].set(arr)
        self.bufs.append(buf)
        self.layout[name] = (self.rows, r, c)
        self.rows += rp

    def finalize(self):
        return jnp.concatenate(self.bufs, axis=0).astype(self.dtype)


def pack_params(params):
    """Pack the param pytree into (weight_slab bf16, vector_slab f32, layouts)."""
    D = D_MODEL
    wp = _SlabPacker(jnp.bfloat16, 16)   # MXU weight matrices (bf16 tile = 16x128)
    vp = _SlabPacker(jnp.float32, 8)     # PE / biases / LayerNorm vectors (f32)

    wp.add("emb", params["emb"])
    wp.add("fc_w", params["fc_w"])       # zero-padded to 128 lanes -> lane-dense logits
    vp.add("pe", params["pe"])
    vp.add("fc_b", params["fc_b"])
    vp.add("enc_norm_g", params["enc_norm_g"]); vp.add("enc_norm_b", params["enc_norm_b"])
    vp.add("dec_norm_g", params["dec_norm_g"]); vp.add("dec_norm_b", params["dec_norm_b"])

    def add_attn(prefix, q_w, q_b, k_w, k_b, v_w, v_b, wo, bo):
        wp.add(prefix + "q_w", q_w); vp.add(prefix + "q_b", q_b)
        wp.add(prefix + "k_w", k_w); vp.add(prefix + "k_b", k_b)
        wp.add(prefix + "v_w", v_w); vp.add(prefix + "v_b", v_b)
        wp.add(prefix + "wo", wo);   vp.add(prefix + "bo", bo)

    for i, lp in enumerate(params["enc"]):
        pre = f"enc{i}."
        sa = lp["sa"]
        add_attn(pre + "sa.",
                 sa["qkv_w"][:, 0:D], sa["qkv_b"][:, 0:D],
                 sa["qkv_w"][:, D:2 * D], sa["qkv_b"][:, D:2 * D],
                 sa["qkv_w"][:, 2 * D:], sa["qkv_b"][:, 2 * D:],
                 sa["wo"], sa["bo"])
        wp.add(pre + "w1", lp["w1"]); vp.add(pre + "b1", lp["b1"])
        wp.add(pre + "w2", lp["w2"]); vp.add(pre + "b2", lp["b2"])
        vp.add(pre + "ln1_g", lp["ln1_g"]); vp.add(pre + "ln1_b", lp["ln1_b"])
        vp.add(pre + "ln2_g", lp["ln2_g"]); vp.add(pre + "ln2_b", lp["ln2_b"])

    for i, lp in enumerate(params["dec"]):
        pre = f"dec{i}."
        sa, ca = lp["sa"], lp["ca"]
        add_attn(pre + "sa.",
                 sa["qkv_w"][:, 0:D], sa["qkv_b"][:, 0:D],
                 sa["qkv_w"][:, D:2 * D], sa["qkv_b"][:, D:2 * D],
                 sa["qkv_w"][:, 2 * D:], sa["qkv_b"][:, 2 * D:],
                 sa["wo"], sa["bo"])
        add_attn(pre + "ca.",
                 ca["q_w"], ca["q_b"],
                 ca["kv_w"][:, 0:D], ca["kv_b"][:, 0:D],
                 ca["kv_w"][:, D:], ca["kv_b"][:, D:],
                 ca["wo"], ca["bo"])
        wp.add(pre + "w1", lp["w1"]); vp.add(pre + "b1", lp["b1"])
        wp.add(pre + "w2", lp["w2"]); vp.add(pre + "b2", lp["b2"])
        vp.add(pre + "ln1_g", lp["ln1_g"]); vp.add(pre + "ln1_b", lp["ln1_b"])
        vp.add(pre + "ln2_g", lp["ln2_g"]); vp.add(pre + "ln2_b", lp["ln2_b"])
        vp.add(pre + "ln3_g", lp["ln3_g"]); vp.add(pre + "ln3_b", lp["ln3_b"])

    return wp.finalize(), vp.finalize(), wp.layout, vp.layout


# =========================== the single fused Pallas kernel =========================
def _transformer_kernel(wlay, vlay, B, Ss, St,
                        src_ref, tgt_ref, wslab_ref, vslab_ref, o_ref):
    """Whole TransformerModel forward in one kernel; everything stays in VMEM."""
    D, H = D_MODEL, NHEAD
    Dh = D // H
    scale = 1.0 / math.sqrt(Dh)
    bf16 = jnp.bfloat16

    # ---- static slab views (zero-cost ref slices; offsets are 8/16-aligned) -------
    def W(name, full_lanes=False):               # bf16 weight matrix
        r0, nr, nc = wlay[name]
        return wslab_ref[r0:r0 + nr, :] if full_lanes else wslab_ref[r0:r0 + nr, 0:nc]

    def V(name, full_lanes=False):               # f32 bias / LN / PE rows
        r0, nr, nc = vlay[name]
        return vslab_ref[r0:r0 + nr, :] if full_lanes else vslab_ref[r0:r0 + nr, 0:nc]

    def mm(x, w):                                # bf16 MXU matmul, f32 accumulate
        return jnp.dot(x.astype(bf16), w, preferred_element_type=jnp.float32)

    # ---- per-head lane masks, built once (VPU only; no lane slicing anywhere) -----
    lane = jax.lax.broadcasted_iota(jnp.int32, (H, D), 1)
    hrow = jax.lax.broadcasted_iota(jnp.int32, (H, D), 0)
    head_mask = ((lane >= hrow * Dh) & (lane < (hrow + 1) * Dh)
                 ).astype(jnp.float32).reshape(H, 1, 1, D)

    # ---------------- helpers on VALUES (f32 residual stream) ----------------------
    def layernorm(x, g, b):
        mu = jnp.mean(x, axis=-1, keepdims=True)
        var = jnp.mean(jnp.square(x - mu), axis=-1, keepdims=True)
        return (x - mu) * jax.lax.rsqrt(var + EPS) * g + b

    def attention_core(q2d, k2d, v2d, Sq, Sk):
        # (B*S, D) -> (B, S, D); heads handled by lane masks + batch stacking:
        q3 = q2d.reshape(B, Sq, D)
        k3 = k2d.reshape(B, Sk, D)
        v3 = v2d.reshape(B, Sk, D)
        qm = (q3[None] * head_mask).reshape(H * B, Sq, D)   # masked q  -> exact scores
        km = (k3[None] * head_mask).reshape(H * B, Sk, D)
        vm = (v3[None] * head_mask).reshape(H * B, Sk, D)   # masked v  -> concat-free merge
        s = jnp.einsum("bqd,bkd->bqk", qm.astype(bf16), km.astype(bf16),
                       preferred_element_type=jnp.float32) * scale     # (H*B,Sq,Sk)
        m = jnp.max(s, axis=-1, keepdims=True)
        e = jnp.exp(s - m)
        inv = pl.reciprocal(jnp.sum(e, axis=-1, keepdims=True), approx=True)
        pr = e * inv
        o = jnp.einsum("bqk,bkd->bqd", pr.astype(bf16), vm.astype(bf16),
                       preferred_element_type=jnp.float32)              # (H*B,Sq,D)
        return jnp.sum(o.reshape(H, B * Sq, D), axis=0)                 # (B*Sq, D)

    def attn_block(x2d, kv2d, Sq, Sk, pre):
        q = mm(x2d, W(pre + "q_w")) + V(pre + "q_b")
        k = mm(kv2d, W(pre + "k_w")) + V(pre + "k_b")
        v = mm(kv2d, W(pre + "v_w")) + V(pre + "v_b")
        o = attention_core(q, k, v, Sq, Sk)
        return mm(o, W(pre + "wo")) + V(pre + "bo")

    def ffn(x2d, pre):
        h = mm(x2d, W(pre + "w1")) + V(pre + "b1")
        h = jnp.maximum(h, 0.0)                  # ReLU (nn.Transformer default)
        return mm(h, W(pre + "w2")) + V(pre + "b2")

    def embed(tok_ref, S):
        # gather-free embedding: one-hot(token) @ emb on the MXU, then + PE (broadcast)
        tok = tok_ref[...]                                               # (B*S, 1) i32
        iot = jax.lax.broadcasted_iota(jnp.int32, (B * S, VOCAB), 1)
        onehot = (tok == iot).astype(bf16)                               # (B*S, VOCAB)
        x = jnp.dot(onehot, W("emb"), preferred_element_type=jnp.float32)
        r0, _, _ = vlay["pe"]
        pe_s = vslab_ref[r0:r0 + S, 0:D]                                 # (S, D) f32
        return (x.reshape(B, S, D) + pe_s[None]).reshape(B * S, D)

    # ---------------- encoder stack (post-norm) + final encoder LayerNorm ----------
    mem = embed(src_ref, Ss)                                             # (B*Ss, D)
    for i in range(NUM_ENC):
        pre = f"enc{i}."
        mem = layernorm(mem + attn_block(mem, mem, Ss, Ss, pre + "sa."),
                        V(pre + "ln1_g"), V(pre + "ln1_b"))
        mem = layernorm(mem + ffn(mem, pre), V(pre + "ln2_g"), V(pre + "ln2_b"))
    mem = layernorm(mem, V("enc_norm_g"), V("enc_norm_b"))

    # ---------------- decoder stack (post-norm) + final decoder LayerNorm ----------
    x = embed(tgt_ref, St)                                               # (B*St, D)
    for i in range(NUM_DEC):
        pre = f"dec{i}."
        x = layernorm(x + attn_block(x, x, St, St, pre + "sa."),
                      V(pre + "ln1_g"), V(pre + "ln1_b"))
        x = layernorm(x + attn_block(x, mem, St, Ss, pre + "ca."),
                      V(pre + "ln2_g"), V(pre + "ln2_b"))
        x = layernorm(x + ffn(x, pre), V(pre + "ln3_g"), V(pre + "ln3_b"))
    x = layernorm(x, V("dec_norm_g"), V("dec_norm_b"))

    # ---------------- fc_out: lane-dense (B*St, 128) store (sliced to VOCAB outside)
    logits = mm(x, W("fc_w", full_lanes=True)) + V("fc_b", full_lanes=True)
    o_ref[...] = logits.astype(o_ref.dtype)


def transformer_forward(wslab, vslab, src, tgt, *, wlay, vlay):
    B, Ss = src.shape
    _, St = tgt.shape
    out2d = pl.pallas_call(
        partial(_transformer_kernel, wlay, vlay, B, Ss, St),
        out_shape=jax.ShapeDtypeStruct((B * St, LANES), jnp.float32),
        in_specs=[_VMEM] * 4,
        out_specs=_VMEM,
    )(src.reshape(B * Ss, 1), tgt.reshape(B * St, 1), wslab, vslab)
    return out2d[:, :VOCAB].reshape(B, St, VOCAB)


# =========================== pure-JAX reference (for validation) ====================
def transformer_forward_ref(params, src, tgt):
    B, Ss = src.shape
    _, St = tgt.shape
    D, H = D_MODEL, NHEAD
    Dh = D // H

    def layernorm(x, g, b):
        mu = jnp.mean(x, -1, keepdims=True)
        var = jnp.mean(jnp.square(x - mu), -1, keepdims=True)
        return (x - mu) * jax.lax.rsqrt(var + EPS) * g + b

    def attention_core(q2d, k2d, v2d, Sq, Sk):
        q = q2d.reshape(B, Sq, H, Dh).transpose(0, 2, 1, 3)
        k = k2d.reshape(B, Sk, H, Dh).transpose(0, 2, 1, 3)
        v = v2d.reshape(B, Sk, H, Dh).transpose(0, 2, 1, 3)
        s = jnp.einsum("bhqd,bhkd->bhqk", q, k) / math.sqrt(Dh)
        pr = jax.nn.softmax(s, axis=-1)
        o = jnp.einsum("bhqk,bhkd->bhqd", pr, v)
        return o.transpose(0, 2, 1, 3).reshape(B * Sq, D)

    def self_attention(x2d, S, ap):
        qkv = x2d @ ap["qkv_w"] + ap["qkv_b"]
        q, k, v = qkv[:, :D], qkv[:, D:2 * D], qkv[:, 2 * D:]
        return attention_core(q, k, v, S, S) @ ap["wo"] + ap["bo"]

    def cross_attention(x2d, mem2d, ap):
        q = x2d @ ap["q_w"] + ap["q_b"]
        kv = mem2d @ ap["kv_w"] + ap["kv_b"]
        k, v = kv[:, :D], kv[:, D:]
        return attention_core(q, k, v, St, Ss) @ ap["wo"] + ap["bo"]

    def ffn(x, lp):
        return jnp.maximum(x @ lp["w1"] + lp["b1"], 0.0) @ lp["w2"] + lp["b2"]

    pe = params["pe"]
    mem = (params["emb"][src] + pe[:Ss][None]).reshape(B * Ss, D)
    for lp in params["enc"]:
        mem = layernorm(mem + self_attention(mem, Ss, lp["sa"]), lp["ln1_g"], lp["ln1_b"])
        mem = layernorm(mem + ffn(mem, lp), lp["ln2_g"], lp["ln2_b"])
    mem = layernorm(mem, params["enc_norm_g"], params["enc_norm_b"])

    x = (params["emb"][tgt] + pe[:St][None]).reshape(B * St, D)
    for lp in params["dec"]:
        x = layernorm(x + self_attention(x, St, lp["sa"]), lp["ln1_g"], lp["ln1_b"])
        x = layernorm(x + cross_attention(x, mem, lp["ca"]), lp["ln2_g"], lp["ln2_b"])
        x = layernorm(x + ffn(x, lp), lp["ln3_g"], lp["ln3_b"])
    x = layernorm(x, params["dec_norm_g"], params["dec_norm_b"])

    return (x @ params["fc_w"] + params["fc_b"]).reshape(B, St, VOCAB)


# =========================== deterministic parameter init ===========================
def make_positional_encoding(max_len, d_model):
    position = jnp.arange(max_len, dtype=jnp.float32)[:, None]
    div_term = jnp.exp(jnp.arange(0, d_model, 2, dtype=jnp.float32)
                       * (-math.log(10000.0) / d_model))
    pe = jnp.zeros((max_len, d_model), jnp.float32)
    pe = pe.at[:, 0::2].set(jnp.sin(position * div_term))
    pe = pe.at[:, 1::2].set(jnp.cos(position * div_term))
    return pe


def _init_lin(key, d_in, d_out):
    k1, k2 = jax.random.split(key)
    w = 0.02 * jax.random.normal(k1, (d_in, d_out), jnp.float32)
    b = 0.02 * jax.random.normal(k2, (1, d_out), jnp.float32)
    return w, b


def _init_ln(d):
    return jnp.ones((1, d), jnp.float32), jnp.zeros((1, d), jnp.float32)


def _init_self_attn(key, d):
    k1, k2 = jax.random.split(key)
    qkv_w, qkv_b = _init_lin(k1, d, 3 * d)
    wo, bo = _init_lin(k2, d, d)
    return dict(qkv_w=qkv_w, qkv_b=qkv_b, wo=wo, bo=bo)


def _init_cross_attn(key, d):
    k1, k2, k3 = jax.random.split(key, 3)
    q_w, q_b = _init_lin(k1, d, d)
    kv_w, kv_b = _init_lin(k2, d, 2 * d)
    wo, bo = _init_lin(k3, d, d)
    return dict(q_w=q_w, q_b=q_b, kv_w=kv_w, kv_b=kv_b, wo=wo, bo=bo)


def init_params(key):
    keys = jax.random.split(key, 2 + NUM_ENC + NUM_DEC)
    params = {}
    params["emb"] = 0.02 * jax.random.normal(keys[0], (VOCAB, D_MODEL), jnp.float32)
    params["pe"] = make_positional_encoding(MAX_LEN, D_MODEL)
    params["fc_w"], params["fc_b"] = _init_lin(keys[1], D_MODEL, VOCAB)
    params["enc_norm_g"], params["enc_norm_b"] = _init_ln(D_MODEL)
    params["dec_norm_g"], params["dec_norm_b"] = _init_ln(D_MODEL)

    enc = []
    for i in range(NUM_ENC):
        ks = jax.random.split(keys[2 + i], 3)
        w1, b1 = _init_lin(ks[1], D_MODEL, D_FF)
        w2, b2 = _init_lin(ks[2], D_FF, D_MODEL)
        g1, be1 = _init_ln(D_MODEL)
        g2, be2 = _init_ln(D_MODEL)
        enc.append(dict(sa=_init_self_attn(ks[0], D_MODEL),
                        w1=w1, b1=b1, w2=w2, b2=b2,
                        ln1_g=g1, ln1_b=be1, ln2_g=g2, ln2_b=be2))
    params["enc"] = enc

    dec = []
    for i in range(NUM_DEC):
        ks = jax.random.split(keys[2 + NUM_ENC + i], 4)
        w1, b1 = _init_lin(ks[2], D_MODEL, D_FF)
        w2, b2 = _init_lin(ks[3], D_FF, D_MODEL)
        g1, be1 = _init_ln(D_MODEL)
        g2, be2 = _init_ln(D_MODEL)
        g3, be3 = _init_ln(D_MODEL)
        dec.append(dict(sa=_init_self_attn(ks[0], D_MODEL),
                        ca=_init_cross_attn(ks[1], D_MODEL),
                        w1=w1, b1=b1, w2=w2, b2=b2,
                        ln1_g=g1, ln1_b=be1, ln2_g=g2, ln2_b=be2,
                        ln3_g=g3, ln3_b=be3))
    params["dec"] = dec
    return params


# =========================== main ====================================================
if __name__ == "__main__":
    key = jax.random.PRNGKey(0)
    kp, ks, kt = jax.random.split(key, 3)
    params = init_params(kp)

    # one-time host-side packing into two contiguous VMEM slabs
    wslab, vslab, wlay, vlay = pack_params(params)

    B, S_SRC, S_TGT = 2, 8, 8
    src = jax.random.randint(ks, (B, S_SRC), 0, VOCAB, dtype=jnp.int32)
    tgt = jax.random.randint(kt, (B, S_TGT), 0, VOCAB, dtype=jnp.int32)

    fwd = jax.jit(lambda w, v, s, t: transformer_forward(w, v, s, t, wlay=wlay, vlay=vlay))
    out = jax.block_until_ready(fwd(wslab, vslab, src, tgt))

    assert out.shape == (B, S_TGT, VOCAB), out.shape
    assert bool(jnp.all(jnp.isfinite(out)))

    # sanity-check against a pure-JAX f32 reference (loose tolerance: bf16 MXU
    # operands + approx reciprocal in softmax)
    ref = transformer_forward_ref(params, src, tgt)
    assert float(jnp.max(jnp.abs(out - ref))) < 5e-2

    print("KERNEL_OK")
</pallas_src>

<mosaic_0001>
module attributes {stable_mosaic.version = 11 : i64} {
  func.func @_transformer_kernel(%arg0: memref<16x1xi32, #tpu.memory_space<vmem>>, %arg1: memref<16x1xi32, #tpu.memory_space<vmem>>, %arg2: memref<1248x128xbf16, #tpu.memory_space<vmem>>, %arg3: memref<520x128xf32, #tpu.memory_space<vmem>>, %arg4: memref<16x128xf32, #tpu.memory_space<vmem>>) attributes {dimension_semantics = [], scalar_prefetch = 0 : i64, scratch_operands = 0 : i64, tpu.core_type = #tpu.core_type<tc>} {
    %0 = tpu.iota {dimensions = array<i32: 1>} : vector<4x32xi32>
    %1 = tpu.iota {dimensions = array<i32: 0>} : vector<4x32xi32>
    %c8_i32 = arith.constant 8 : i32
    %2 = vector.broadcast %c8_i32 : i32 to vector<4x32xi32>
    %3 = arith.muli %1, %2 : vector<4x32xi32>
    %4 = arith.cmpi sge, %0, %3 : vector<4x32xi32>
    %c1_i32 = arith.constant 1 : i32
    %5 = vector.broadcast %c1_i32 : i32 to vector<4x32xi32>
    %6 = arith.addi %1, %5 : vector<4x32xi32>
    %c8_i32_0 = arith.constant 8 : i32
    %7 = vector.broadcast %c8_i32_0 : i32 to vector<4x32xi32>
    %8 = arith.muli %6, %7 : vector<4x32xi32>
    %9 = arith.cmpi slt, %0, %8 : vector<4x32xi32>
    %10 = arith.andi %4, %9 : vector<4x32xi1>
    %11 = arith.extui %10 : vector<4x32xi1> to vector<4x32xi32>
    %12 = arith.sitofp %11 : vector<4x32xi32> to vector<4x32xf32>
    %13 = vector.shape_cast %12 : vector<4x32xf32> to vector<4x1x1x32xf32>
    %c0 = arith.constant 0 : index
    %c0_1 = arith.constant 0 : index
    %14 = vector.load %arg0[%c0, %c0_1] : memref<16x1xi32, #tpu.memory_space<vmem>>, vector<16x1xi32>
    %15 = tpu.iota {dimensions = array<i32: 1>} : vector<16x64xi32>
    %16 = vector.broadcast %14 : vector<16x1xi32> to vector<16x64xi32>
    %17 = arith.cmpi eq, %16, %15 : vector<16x64xi32>
    %18 = arith.extui %17 : vector<16x64xi1> to vector<16x64xi32>
    %19 = arith.sitofp %18 : vector<16x64xi32> to vector<16x64xf32>
    %20 = arith.truncf %19 : vector<16x64xf32> to vector<16x64xbf16>
    %c0_2 = arith.constant 0 : index
    %c0_3 = arith.constant 0 : index
    %21 = vector.load %arg2[%c0_2, %c0_3] : memref<1248x128xbf16, #tpu.memory_space<vmem>>, vector<64x32xbf16>
    %cst = arith.constant dense<0.000000e+00> : vector<16x32xf32>
    %22 = tpu.matmul %20, %21, %cst {dimension_numbers = #tpu.dot_dimension_numbers<[1], [0], [0], [1], [0, 0, 1, 1], [], []>} : vector<16x64xbf16>, vector<64x32xbf16>, vector<16x32xf32> -> vector<16x32xf32>
    %c0_4 = arith.constant 0 : index
    %c0_5 = arith.constant 0 : index
    %23 = vector.load %arg3[%c0_4, %c0_5] : memref<520x128xf32, #tpu.memory_space<vmem>>, vector<8x32xf32>
    %24 = vector.shape_cast %22 : vector<16x32xf32> to vector<2x8x32xf32>
    %25 = vector.shape_cast %23 : vector<8x32xf32> to vector<1x8x32xf32>
    %26 = vector.broadcast %25 : vector<1x8x32xf32> to vector<2x8x32xf32>
    %27 = arith.addf %24, %26 : vector<2x8x32xf32>
    %28 = vector.shape_cast %27 : vector<2x8x32xf32> to vector<16x32xf32>
    %c96 = arith.constant 96 : index
    %c0_6 = arith.constant 0 : index
    %29 = vector.load %arg2[%c96, %c0_6] : memref<1248x128xbf16, #tpu.memory_space<vmem>>, vector<32x32xbf16>
    %30 = arith.truncf %28 : vector<16x32xf32> to vector<16x32xbf16>
    %cst_7 = arith.constant dense<0.000000e+00> : vector<16x32xf32>
    %31 = tpu.matmul %30, %29, %cst_7 {dimension_numbers = #tpu.dot_dimension_numbers<[1], [0], [0], [1], [0, 0, 1, 1], [], []>} : vector<16x32xbf16>, vector<32x32xbf16>, vector<16x32xf32> -> vector<16x32xf32>
    %c104 = arith.constant 104 : index
    %c0_8 = arith.constant 0 : index
    %32 = vector.load %arg3[%c104, %c0_8] : memref<520x128xf32, #tpu.memory_space<vmem>>, vector<1x32xf32>
    %33 = vector.broadcast %32 : vector<1x32xf32> to vector<16x32xf32>
    %34 = arith.addf %31, %33 : vector<16x32xf32>
    %c128 = arith.constant 128 : index
    %c0_9 = arith.constant 0 : index
    %35 = vector.load %arg2[%c128, %c0_9] : memref<1248x128xbf16, #tpu.memory_space<vmem>>, vector<32x32xbf16>
    %36 = arith.truncf %28 : vector<16x32xf32> to vector<16x32xbf16>
    %cst_10 = arith.constant dense<0.000000e+00> : vector<16x32xf32>
    %37 = tpu.matmul %36, %35, %cst_10 {dimension_numbers = #tpu.dot_dimension_numbers<[1], [0], [0], [1], [0, 0, 1, 1], [], []>} : vector<16x32xbf16>, vector<32x32xbf16>, vector<16x32xf32> -> vector<16x32xf32>
    %c112 = arith.constant 112 : index
    %c0_11 = arith.constant 0 : index
    %38 = vector.load %arg3[%c112, %c0_11] : memref<520x128xf32, #tpu.memory_space<vmem>>, vector<1x32xf32>
    %39 = vector.broadcast %38 : vector<1x32xf32> to vector<16x32xf32>
    %40 = arith.addf %37, %39 : vector<16x32xf32>
    %c160 = arith.constant 160 : index
    %c0_12 = arith.constant 0 : index
    %41 = vector.load %arg2[%c160, %c0_12] : memref<1248x128xbf16, #tpu.memory_space<vmem>>, vector<32x32xbf16>
    %42 = arith.truncf %28 : vector<16x32xf32> to vector<16x32xbf16>
    %cst_13 = arith.constant dense<0.000000e+00> : vector<16x32xf32>
    %43 = tpu.matmul %42, %41, %cst_13 {dimension_numbers = #tpu.dot_dimension_numbers<[1], [0], [0], [1], [0, 0, 1, 1], [], []>} : vector<16x32xbf16>, vector<32x32xbf16>, vector<16x32xf32> -> vector<16x32xf32>
    %c120 = arith.constant 120 : index
    %c0_14 = arith.constant 0 : index
    %44 = vector.load %arg3[%c120, %c0_14] : memref<520x128xf32, #tpu.memory_space<vmem>>, vector<1x32xf32>
    %45 = vector.broadcast %44 : vector<1x32xf32> to vector<16x32xf32>
    %46 = arith.addf %43, %45 : vector<16x32xf32>
    %47 = vector.shape_cast %34 : vector<16x32xf32> to vector<2x8x32xf32>
    %48 = vector.shape_cast %40 : vector<16x32xf32> to vector<2x8x32xf32>
    %49 = vector.shape_cast %46 : vector<16x32xf32> to vector<2x8x32xf32>
    %50 = vector.shape_cast %47 : vector<2x8x32xf32> to vector<1x2x8x32xf32>
    %51 = vector.broadcast %50 : vector<1x2x8x32xf32> to vector<4x2x8x32xf32>
    %52 = vector.broadcast %13 : vector<4x1x1x32xf32> to vector<4x2x8x32xf32>
    %53 = arith.mulf %51, %52 : vector<4x2x8x32xf32>
    %54 = vector.shape_cast %53 : vector<4x2x8x32xf32> to vector<8x8x32xf32>
    %55 = vector.shape_cast %48 : vector<2x8x32xf32> to vector<1x2x8x32xf32>
    %56 = vector.broadcast %55 : vector<1x2x8x32xf32> to vector<4x2x8x32xf32>
    %57 = vector.broadcast %13 : vector<4x1x1x32xf32> to vector<4x2x8x32xf32>
    %58 = arith.mulf %56, %57 : vector<4x2x8x32xf32>
    %59 = vector.shape_cast %58 : vector<4x2x8x32xf32> to vector<8x8x32xf32>
    %60 = vector.shape_cast %49 : vector<2x8x32xf32> to vector<1x2x8x32xf32>
    %61 = vector.broadcast %60 : vector<1x2x8x32xf32> to vector<4x2x8x32xf32>
    %62 = vector.broadcast %13 : vector<4x1x1x32xf32> to vector<4x2x8x32xf32>
    %63 = arith.mulf %61, %62 : vector<4x2x8x32xf32>
    %64 = vector.shape_cast %63 : vector<4x2x8x32xf32> to vector<8x8x32xf32>
    %65 = arith.truncf %54 : vector<8x8x32xf32> to vector<8x8x32xbf16>
    %66 = arith.truncf %59 : vector<8x8x32xf32> to vector<8x8x32xbf16>
    "tpu.trace_start"() <{level = 10 : i32, message = "bqd,bkd->bqk"}> : () -> ()
    %cst_15 = arith.constant dense<0.000000e+00> : vector<8x8x8xf32>
    %67 = tpu.matmul %65, %66, %cst_15 {dimension_numbers = #tpu.dot_dimension_numbers<[2], [2], [1], [1], [0, 0, 0, 1, 1, 1], [0], [0]>} : vector<8x8x32xbf16>, vector<8x8x32xbf16>, vector<8x8x8xf32> -> vector<8x8x8xf32>
    "tpu.trace_stop"() : () -> ()
    %cst_16 = arith.constant 0.353553385 : f32
    %68 = vector.broadcast %cst_16 : f32 to vector<8x8x8xf32>
    %69 = arith.mulf %67, %68 : vector<8x8x8xf32>
    %cst_17 = arith.constant dense<0xFF800000> : vector<8x8xf32>
    %70 = vector.multi_reduction <maximumf>, %69, %cst_17 [2] : vector<8x8x8xf32> to vector<8x8xf32>
    %71 = vector.shape_cast %70 : vector<8x8xf32> to vector<8x8x1xf32>
    %72 = vector.broadcast %71 : vector<8x8x1xf32> to vector<8x8x8xf32>
    %73 = arith.subf %69, %72 : vector<8x8x8xf32>
    %74 = math.exp %73 : vector<8x8x8xf32>
    %cst_18 = arith.constant dense<0.000000e+00> : vector<8x8xf32>
    %75 = vector.multi_reduction <add>, %74, %cst_18 [2] : vector<8x8x8xf32> to vector<8x8xf32>
    %76 = vector.shape_cast %75 : vector<8x8xf32> to vector<8x8x1xf32>
    %77 = tpu.reciprocal %76 {approx = true} : vector<8x8x1xf32> -> vector<8x8x1xf32>
    %78 = vector.broadcast %77 : vector<8x8x1xf32> to vector<8x8x8xf32>
    %79 = arith.mulf %74, %78 : vector<8x8x8xf32>
    %80 = arith.truncf %79 : vector<8x8x8xf32> to vector<8x8x8xbf16>
    %81 = arith.truncf %64 : vector<8x8x32xf32> to vector<8x8x32xbf16>
    "tpu.trace_start"() <{level = 10 : i32, message = "bqk,bkd->bqd"}> : () -> ()
    %cst_19 = arith.constant dense<0.000000e+00> : vector<8x8x32xf32>
    %82 = tpu.matmul %80, %81, %cst_19 {dimension_numbers = #tpu.dot_dimension_numbers<[2], [1], [1], [2], [0, 0, 0, 1, 1, 2], [0], [0]>} : vector<8x8x8xbf16>, vector<8x8x32xbf16>, vector<8x8x32xf32> -> vector<8x8x32xf32>
    "tpu.trace_stop"() : () -> ()
    %83 = vector.shape_cast %82 : vector<8x8x32xf32> to vector<4x16x32xf32>
    %cst_20 = arith.constant dense<0.000000e+00> : vector<16x32xf32>
    %84 = vector.multi_reduction <add>, %83, %cst_20 [0] : vector<4x16x32xf32> to vector<16x32xf32>
    %c192 = arith.constant 192 : index
    %c0_21 = arith.constant 0 : index
    %85 = vector.load %arg2[%c192, %c0_21] : memref<1248x128xbf16, #tpu.memory_space<vmem>>, vector<32x32xbf16>
    %86 = arith.truncf %84 : vector<16x32xf32> to vector<16x32xbf16>
    %cst_22 = arith.constant dense<0.000000e+00> : vector<16x32xf32>
    %87 = tpu.matmul %86, %85, %cst_22 {dimension_numbers = #tpu.dot_dimension_numbers<[1], [0], [0], [1], [0, 0, 1, 1], [], []>} : vector<16x32xbf16>, vector<32x32xbf16>, vector<16x32xf32> -> vector<16x32xf32>
    %c128_23 = arith.constant 128 : index
    %c0_24 = arith.constant 0 : index
    %88 = vector.load %arg3[%c128_23, %c0_24] : memref<520x128xf32, #tpu.memory_space<vmem>>, vector<1x32xf32>
    %89 = vector.broadcast %88 : vector<1x32xf32> to vector<16x32xf32>
    %90 = arith.addf %87, %89 : vector<16x32xf32>
    %91 = arith.addf %28, %90 : vector<16x32xf32>
    %c152 = arith.constant 152 : index
    %c0_25 = arith.constant 0 : index
    %92 = vector.load %arg3[%c152, %c0_25] : memref<520x128xf32, #tpu.memory_space<vmem>>, vector<1x32xf32>
    %c160_26 = arith.constant 160 : index
    %c0_27 = arith.constant 0 : index
    %93 = vector.load %arg3[%c160_26, %c0_27] : memref<520x128xf32, #tpu.memory_space<vmem>>, vector<1x32xf32>
    %cst_28 = arith.constant dense<0.000000e+00> : vector<16xf32>
    %94 = vector.multi_reduction <add>, %91, %cst_28 [1] : vector<16x32xf32> to vector<16xf32>
    %95 = vector.shape_cast %94 : vector<16xf32> to vector<16x1xf32>
    %cst_29 = arith.constant 3.200000e+01 : f32
    %96 = vector.broadcast %cst_29 : f32 to vector<16x1xf32>
    %97 = arith.divf %95, %96 : vector<16x1xf32>
    %98 = vector.broadcast %97 : vector<16x1xf32> to vector<16x32xf32>
    %99 = arith.subf %91, %98 : vector<16x32xf32>
    %100 = arith.mulf %99, %99 : vector<16x32xf32>
    %cst_30 = arith.constant dense<0.000000e+00> : vector<16xf32>
    %101 = vector.multi_reduction <add>, %100, %cst_30 [1] : vector<16x32xf32> to vector<16xf32>
    %102 = vector.shape_cast %101 : vector<16xf32> to vector<16x1xf32>
    %cst_31 = arith.constant 3.200000e+01 : f32
    %103 = vector.broadcast %cst_31 : f32 to vector<16x1xf32>
    %104 = arith.divf %102, %103 : vector<16x1xf32>
    %105 = vector.broadcast %97 : vector<16x1xf32> to vector<16x32xf32>
    %106 = arith.subf %91, %105 : vector<16x32xf32>
    %cst_32 = arith.constant 9.99999974E-6 : f32
    %107 = vector.broadcast %cst_32 : f32 to vector<16x1xf32>
    %108 = arith.addf %104, %107 : vector<16x1xf32>
    %109 = math.rsqrt %108 : vector<16x1xf32>
    %110 = vector.broadcast %109 : vector<16x1xf32> to vector<16x32xf32>
    %111 = arith.mulf %106, %110 : vector<16x32xf32>
    %112 = vector.broadcast %92 : vector<1x32xf32> to vector<16x32xf32>
    %113 = arith.mulf %111, %112 : vector<16x32xf32>
    %114 = vector.broadcast %93 : vector<1x32xf32> to vector<16x32xf32>
    %115 = arith.addf %113, %114 : vector<16x32xf32>
    %c224 = arith.constant 224 : index
    %c0_33 = arith.constant 0 : index
    %116 = vector.load %arg2[%c224, %c0_33] : memref<1248x128xbf16, #tpu.memory_space<vmem>>, vector<32x64xbf16>
    %117 = arith.truncf %115 : vector<16x32xf32> to vector<16x32xbf16>
    %cst_34 = arith.constant dense<0.000000e+00> : vector<16x64xf32>
    %118 = tpu.matmul %117, %116, %cst_34 {dimension_numbers = #tpu.dot_dimension_numbers<[1], [0], [0], [1], [0, 0, 1, 1], [], []>} : vector<16x32xbf16>, vector<32x64xbf16>, vector<16x64xf32> -> vector<16x64xf32>
    %c136 = arith.constant 136 : index
    %c0_35 = arith.constant 0 : index
    %119 = vector.load %arg3[%c136, %c0_35] : memref<520x128xf32, #tpu.memory_space<vmem>>, vector<1x64xf32>
    %120 = vector.broadcast %119 : vector<1x64xf32> to vector<16x64xf32>
    %121 = arith.addf %118, %120 : vector<16x64xf32>
    %cst_36 = arith.constant 0.000000e+00 : f32
    %122 = vector.broadcast %cst_36 : f32 to vector<16x64xf32>
    %123 = arith.maximumf %121, %122 : vector<16x64xf32>
    %c256 = arith.constant 256 : index
    %c0_37 = arith.constant 0 : index
    %124 = vector.load %arg2[%c256, %c0_37] : memref<1248x128xbf16, #tpu.memory_space<vmem>>, vector<64x32xbf16>
    %125 = arith.truncf %123 : vector<16x64xf32> to vector<16x64xbf16>
    %cst_38 = arith.constant dense<0.000000e+00> : vector<16x32xf32>
    %126 = tpu.matmul %125, %124, %cst_38 {dimension_numbers = #tpu.dot_dimension_numbers<[1], [0], [0], [1], [0, 0, 1, 1], [], []>} : vector<16x64xbf16>, vector<64x32xbf16>, vector<16x32xf32> -> vector<16x32xf32>
    %c144 = arith.constant 144 : index
    %c0_39 = arith.constant 0 : index
    %127 = vector.load %arg3[%c144, %c0_39] : memref<520x128xf32, #tpu.memory_space<vmem>>, vector<1x32xf32>
    %128 = vector.broadcast %127 : vector<1x32xf32> to vector<16x32xf32>
    %129 = arith.addf %126, %128 : vector<16x32xf32>
    %130 = arith.addf %115, %129 : vector<16x32xf32>
    %c168 = arith.constant 168 : index
    %c0_40 = arith.constant 0 : index
    %131 = vector.load %arg3[%c168, %c0_40] : memref<520x128xf32, #tpu.memory_space<vmem>>, vector<1x32xf32>
    %c176 = arith.constant 176 : index
    %c0_41 = arith.constant 0 : index
    %132 = vector.load %arg3[%c176, %c0_41] : memref<520x128xf32, #tpu.memory_space<vmem>>, vector<1x32xf32>
    %cst_42 = arith.constant dense<0.000000e+00> : vector<16xf32>
    %133 = vector.multi_reduction <add>, %130, %cst_42 [1] : vector<16x32xf32> to vector<16xf32>
    %134 = vector.shape_cast %133 : vector<16xf32> to vector<16x1xf32>
    %cst_43 = arith.constant 3.200000e+01 : f32
    %135 = vector.broadcast %cst_43 : f32 to vector<16x1xf32>
    %136 = arith.divf %134, %135 : vector<16x1xf32>
    %137 = vector.broadcast %136 : vector<16x1xf32> to vector<16x32xf32>
    %138 = arith.subf %130, %137 : vector<16x32xf32>
    %139 = arith.mulf %138, %138 : vector<16x32xf32>
    %cst_44 = arith.constant dense<0.000000e+00> : vector<16xf32>
    %140 = vector.multi_reduction <add>, %139, %cst_44 [1] : vector<16x32xf32> to vector<16xf32>
    %141 = vector.shape_cast %140 : vector<16xf32> to vector<16x1xf32>
    %cst_45 = arith.constant 3.200000e+01 : f32
    %142 = vector.broadcast %cst_45 : f32 to vector<16x1xf32>
    %143 = arith.divf %141, %142 : vector<16x1xf32>
    %144 = vector.broadcast %136 : vector<16x1xf32> to vector<16x32xf32>
    %145 = arith.subf %130, %144 : vector<16x32xf32>
    %cst_46 = arith.constant 9.99999974E-6 : f32
    %146 = vector.broadcast %cst_46 : f32 to vector<16x1xf32>
    %147 = arith.addf %143, %146 : vector<16x1xf32>
    %148 = math.rsqrt %147 : vector<16x1xf32>
    %149 = vector.broadcast %148 : vector<16x1xf32> to vector<16x32xf32>
    %150 = arith.mulf %145, %149 : vector<16x32xf32>
    %151 = vector.broadcast %131 : vector<1x32xf32> to vector<16x32xf32>
    %152 = arith.mulf %150, %151 : vector<16x32xf32>
    %153 = vector.broadcast %132 : vector<1x32xf32> to vector<16x32xf32>
    %154 = arith.addf %152, %153 : vector<16x32xf32>
    %c320 = arith.constant 320 : index
    %c0_47 = arith.constant 0 : index
    %155 = vector.load %arg2[%c320, %c0_47] : memref<1248x128xbf16, #tpu.memory_space<vmem>>, vector<32x32xbf16>
    %156 = arith.truncf %154 : vector<16x32xf32> to vector<16x32xbf16>
    %cst_48 = arith.constant dense<0.000000e+00> : vector<16x32xf32>
    %157 = tpu.matmul %156, %155, %cst_48 {dimension_numbers = #tpu.dot_dimension_numbers<[1], [0], [0], [1], [0, 0, 1, 1], [], []>} : vector<16x32xbf16>, vector<32x32xbf16>, vector<16x32xf32> -> vector<16x32xf32>
    %c184 = arith.constant 184 : index
    %c0_49 = arith.constant 0 : index
    %158 = vector.load %arg3[%c184, %c0_49] : memref<520x128xf32, #tpu.memory_space<vmem>>, vector<1x32xf32>
    %159 = vector.broadcast %158 : vector<1x32xf32> to vector<16x32xf32>
    %160 = arith.addf %157, %159 : vector<16x32xf32>
    %c352 = arith.constant 352 : index
    %c0_50 = arith.constant 0 : index
    %161 = vector.load %arg2[%c352, %c0_50] : memref<1248x128xbf16, #tpu.memory_space<vmem>>, vector<32x32xbf16>
    %162 = arith.truncf %154 : vector<16x32xf32> to vector<16x32xbf16>
    %cst_51 = arith.constant dense<0.000000e+00> : vector<16x32xf32>
    %163 = tpu.matmul %162, %161, %cst_51 {dimension_numbers = #tpu.dot_dimension_numbers<[1], [0], [0], [1], [0, 0, 1, 1], [], []>} : vector<16x32xbf16>, vector<32x32xbf16>, vector<16x32xf32> -> vector<16x32xf32>
    %c192_52 = arith.constant 192 : index
    %c0_53 = arith.constant 0 : index
    %164 = vector.load %arg3[%c192_52, %c0_53] : memref<520x128xf32, #tpu.memory_space<vmem>>, vector<1x32xf32>
    %165 = vector.broadcast %164 : vector<1x32xf32> to vector<16x32xf32>
    %166 = arith.addf %163, %165 : vector<16x32xf32>
    %c384 = arith.constant 384 : index
    %c0_54 = arith.constant 0 : index
    %167 = vector.load %arg2[%c384, %c0_54] : memref<1248x128xbf16, #tpu.memory_space<vmem>>, vector<32x32xbf16>
    %168 = arith.truncf %154 : vector<16x32xf32> to vector<16x32xbf16>
    %cst_55 = arith.constant dense<0.000000e+00> : vector<16x32xf32>
    %169 = tpu.matmul %168, %167, %cst_55 {dimension_numbers = #tpu.dot_dimension_numbers<[1], [0], [0], [1], [0, 0, 1, 1], [], []>} : vector<16x32xbf16>, vector<32x32xbf16>, vector<16x32xf32> -> vector<16x32xf32>
    %c200 = arith.constant 200 : index
    %c0_56 = arith.constant 0 : index
    %170 = vector.load %arg3[%c200, %c0_56] : memref<520x128xf32, #tpu.memory_space<vmem>>, vector<1x32xf32>
    %171 = vector.broadcast %170 : vector<1x32xf32> to vector<16x32xf32>
    %172 = arith.addf %169, %171 : vector<16x32xf32>
    %173 = vector.shape_cast %160 : vector<16x32xf32> to vector<2x8x32xf32>
    %174 = vector.shape_cast %166 : vector<16x32xf32> to vector<2x8x32xf32>
    %175 = vector.shape_cast %172 : vector<16x32xf32> to vector<2x8x32xf32>
    %176 = vector.shape_cast %173 : vector<2x8x32xf32> to vector<1x2x8x32xf32>
    %177 = vector.broadcast %176 : vector<1x2x8x32xf32> to vector<4x2x8x32xf32>
    %178 = vector.broadcast %13 : vector<4x1x1x32xf32> to vector<4x2x8x32xf32>
    %179 = arith.mulf %177, %178 : vector<4x2x8x32xf32>
    %180 = vector.shape_cast %179 : vector<4x2x8x32xf32> to vector<8x8x32xf32>
    %181 = vector.shape_cast %174 : vector<2x8x32xf32> to vector<1x2x8x32xf32>
    %182 = vector.broadcast %181 : vector<1x2x8x32xf32> to vector<4x2x8x32xf32>
    %183 = vector.broadcast %13 : vector<4x1x1x32xf32> to vector<4x2x8x32xf32>
    %184 = arith.mulf %182, %183 : vector<4x2x8x32xf32>
    %185 = vector.shape_cast %184 : vector<4x2x8x32xf32> to vector<8x8x32xf32>
    %186 = vector.shape_cast %175 : vector<2x8x32xf32> to vector<1x2x8x32xf32>
    %187 = vector.broadcast %186 : vector<1x2x8x32xf32> to vector<4x2x8x32xf32>
    %188 = vector.broadcast %13 : vector<4x1x1x32xf32> to vector<4x2x8x32xf32>
    %189 = arith.mulf %187, %188 : vector<4x2x8x32xf32>
    %190 = vector.shape_cast %189 : vector<4x2x8x32xf32> to vector<8x8x32xf32>
    %191 = arith.truncf %180 : vector<8x8x32xf32> to vector<8x8x32xbf16>
    %192 = arith.truncf %185 : vector<8x8x32xf32> to vector<8x8x32xbf16>
    "tpu.trace_start"() <{level = 10 : i32, message = "bqd,bkd->bqk"}> : () -> ()
    %cst_57 = arith.constant dense<0.000000e+00> : vector<8x8x8xf32>
    %193 = tpu.matmul %191, %192, %cst_57 {dimension_numbers = #tpu.dot_dimension_numbers<[2], [2], [1], [1], [0, 0, 0, 1, 1, 1], [0], [0]>} : vector<8x8x32xbf16>, vector<8x8x32xbf16>, vector<8x8x8xf32> -> vector<8x8x8xf32>
    "tpu.trace_stop"() : () -> ()
    %cst_58 = arith.constant 0.353553385 : f32
    %194 = vector.broadcast %cst_58 : f32 to vector<8x8x8xf32>
    %195 = arith.mulf %193, %194 : vector<8x8x8xf32>
    %cst_59 = arith.constant dense<0xFF800000> : vector<8x8xf32>
    %196 = vector.multi_reduction <maximumf>, %195, %cst_59 [2] : vector<8x8x8xf32> to vector<8x8xf32>
    %197 = vector.shape_cast %196 : vector<8x8xf32> to vector<8x8x1xf32>
    %198 = vector.broadcast %197 : vector<8x8x1xf32> to vector<8x8x8xf32>
    %199 = arith.subf %195, %198 : vector<8x8x8xf32>
    %200 = math.exp %199 : vector<8x8x8xf32>
    %cst_60 = arith.constant dense<0.000000e+00> : vector<8x8xf32>
    %201 = vector.multi_reduction <add>, %200, %cst_60 [2] : vector<8x8x8xf32> to vector<8x8xf32>
    %202 = vector.shape_cast %201 : vector<8x8xf32> to vector<8x8x1xf32>
    %203 = tpu.reciprocal %202 {approx = true} : vector<8x8x1xf32> -> vector<8x8x1xf32>
    %204 = vector.broadcast %203 : vector<8x8x1xf32> to vector<8x8x8xf32>
    %205 = arith.mulf %200, %204 : vector<8x8x8xf32>
    %206 = arith.truncf %205 : vector<8x8x8xf32> to vector<8x8x8xbf16>
    %207 = arith.truncf %190 : vector<8x8x32xf32> to vector<8x8x32xbf16>
    "tpu.trace_start"() <{level = 10 : i32, message = "bqk,bkd->bqd"}> : () -> ()
    %cst_61 = arith.constant dense<0.000000e+00> : vector<8x8x32xf32>
    %208 = tpu.matmul %206, %207, %cst_61 {dimension_numbers = #tpu.dot_dimension_numbers<[2], [1], [1], [2], [0, 0, 0, 1, 1, 2], [0], [0]>} : vector<8x8x8xbf16>, vector<8x8x32xbf16>, vector<8x8x32xf32> -> vector<8x8x32xf32>
    "tpu.trace_stop"() : () -> ()
    %209 = vector.shape_cast %208 : vector<8x8x32xf32> to vector<4x16x32xf32>
    %cst_62 = arith.constant dense<0.000000e+00> : vector<16x32xf32>
    %210 = vector.multi_reduction <add>, %209, %cst_62 [0] : vector<4x16x32xf32> to vector<16x32xf32>
    %c416 = arith.constant 416 : index
    %c0_63 = arith.constant 0 : index
    %211 = vector.load %arg2[%c416, %c0_63] : memref<1248x128xbf16, #tpu.memory_space<vmem>>, vector<32x32xbf16>
    %212 = arith.truncf %210 : vector<16x32xf32> to vector<16x32xbf16>
    %cst_64 = arith.constant dense<0.000000e+00> : vector<16x32xf32>
    %213 = tpu.matmul %212, %211, %cst_64 {dimension_numbers = #tpu.dot_dimension_numbers<[1], [0], [0], [1], [0, 0, 1, 1], [], []>} : vector<16x32xbf16>, vector<32x32xbf16>, vector<16x32xf32> -> vector<16x32xf32>
    %c208 = arith.constant 208 : index
    %c0_65 = arith.constant 0 : index
    %214 = vector.load %arg3[%c208, %c0_65] : memref<520x128xf32, #tpu.memory_space<vmem>>, vector<1x32xf32>
    %215 = vector.broadcast %214 : vector<1x32xf32> to vector<16x32xf32>
    %216 = arith.addf %213, %215 : vector<16x32xf32>
    %217 = arith.addf %154, %216 : vector<16x32xf32>
    %c232 = arith.constant 232 : index
    %c0_66 = arith.constant 0 : index
    %218 = vector.load %arg3[%c232, %c0_66] : memref<520x128xf32, #tpu.memory_space<vmem>>, vector<1x32xf32>
    %c240 = arith.constant 240 : index
    %c0_67 = arith.constant 0 : index
    %219 = vector.load %arg3[%c240, %c0_67] : memref<520x128xf32, #tpu.memory_space<vmem>>, vector<1x32xf32>
    %cst_68 = arith.constant dense<0.000000e+00> : vector<16xf32>
    %220 = vector.multi_reduction <add>, %217, %cst_68 [1] : vector<16x32xf32> to vector<16xf32>
    %221 = vector.shape_cast %220 : vector<16xf32> to vector<16x1xf32>
    %cst_69 = arith.constant 3.200000e+01 : f32
    %222 = vector.broadcast %cst_69 : f32 to vector<16x1xf32>
    %223 = arith.divf %221, %222 : vector<16x1xf32>
    %224 = vector.broadcast %223 : vector<16x1xf32> to vector<16x32xf32>
    %225 = arith.subf %217, %224 : vector<16x32xf32>
    %226 = arith.mulf %225, %225 : vector<16x32xf32>
    %cst_70 = arith.constant dense<0.000000e+00> : vector<16xf32>
    %227 = vector.multi_reduction <add>, %226, %cst_70 [1] : vector<16x32xf32> to vector<16xf32>
    %228 = vector.shape_cast %227 : vector<16xf32> to vector<16x1xf32>
    %cst_71 = arith.constant 3.200000e+01 : f32
    %229 = vector.broadcast %cst_71 : f32 to vector<16x1xf32>
    %230 = arith.divf %228, %229 : vector<16x1xf32>
    %231 = vector.broadcast %223 : vector<16x1xf32> to vector<16x32xf32>
    %232 = arith.subf %217, %231 : vector<16x32xf32>
    %cst_72 = arith.constant 9.99999974E-6 : f32
    %233 = vector.broadcast %cst_72 : f32 to vector<16x1xf32>
    %234 = arith.addf %230, %233 : vector<16x1xf32>
    %235 = math.rsqrt %234 : vector<16x1xf32>
    %236 = vector.broadcast %235 : vector<16x1xf32> to vector<16x32xf32>
    %237 = arith.mulf %232, %236 : vector<16x32xf32>
    %238 = vector.broadcast %218 : vector<1x32xf32> to vector<16x32xf32>
    %239 = arith.mulf %237, %238 : vector<16x32xf32>
    %240 = vector.broadcast %219 : vector<1x32xf32> to vector<16x32xf32>
    %241 = arith.addf %239, %240 : vector<16x32xf32>
    %c448 = arith.constant 448 : index
    %c0_73 = arith.constant 0 : index
    %242 = vector.load %arg2[%c448, %c0_73] : memref<1248x128xbf16, #tpu.memory_space<vmem>>, vector<32x64xbf16>
    %243 = arith.truncf %241 : vector<16x32xf32> to vector<16x32xbf16>
    %cst_74 = arith.constant dense<0.000000e+00> : vector<16x64xf32>
    %244 = tpu.matmul %243, %242, %cst_74 {dimension_numbers = #tpu.dot_dimension_numbers<[1], [0], [0], [1], [0, 0, 1, 1], [], []>} : vector<16x32xbf16>, vector<32x64xbf16>, vector<16x64xf32> -> vector<16x64xf32>
    %c216 = arith.constant 216 : index
    %c0_75 = arith.constant 0 : index
    %245 = vector.load %arg3[%c216, %c0_75] : memref<520x128xf32, #tpu.memory_space<vmem>>, vector<1x64xf32>
    %246 = vector.broadcast %245 : vector<1x64xf32> to vector<16x64xf32>
    %247 = arith.addf %244, %246 : vector<16x64xf32>
    %cst_76 = arith.constant 0.000000e+00 : f32
    %248 = vector.broadcast %cst_76 : f32 to vector<16x64xf32>
    %249 = arith.maximumf %247, %248 : vector<16x64xf32>
    %c480 = arith.constant 480 : index
    %c0_77 = arith.constant 0 : index
    %250 = vector.load %arg2[%c480, %c0_77] : memref<1248x128xbf16, #tpu.memory_space<vmem>>, vector<64x32xbf16>
    %251 = arith.truncf %249 : vector<16x64xf32> to vector<16x64xbf16>
    %cst_78 = arith.constant dense<0.000000e+00> : vector<16x32xf32>
    %252 = tpu.matmul %251, %250, %cst_78 {dimension_numbers = #tpu.dot_dimension_numbers<[1], [0], [0], [1], [0, 0, 1, 1], [], []>} : vector<16x64xbf16>, vector<64x32xbf16>, vector<16x32xf32> -> vector<16x32xf32>
    %c224_79 = arith.constant 224 : index
    %c0_80 = arith.constant 0 : index
    %253 = vector.load %arg3[%c224_79, %c0_80] : memref<520x128xf32, #tpu.memory_space<vmem>>, vector<1x32xf32>
    %254 = vector.broadcast %253 : vector<1x32xf32> to vector<16x32xf32>
    %255 = arith.addf %252, %254 : vector<16x32xf32>
    %256 = arith.addf %241, %255 : vector<16x32xf32>
    %c248 = arith.constant 248 : index
    %c0_81 = arith.constant 0 : index
    %257 = vector.load %arg3[%c248, %c0_81] : memref<520x128xf32, #tpu.memory_space<vmem>>, vector<1x32xf32>
    %c256_82 = arith.constant 256 : index
    %c0_83 = arith.constant 0 : index
    %258 = vector.load %arg3[%c256_82, %c0_83] : memref<520x128xf32, #tpu.memory_space<vmem>>, vector<1x32xf32>
    %cst_84 = arith.constant dense<0.000000e+00> : vector<16xf32>
    %259 = vector.multi_reduction <add>, %256, %cst_84 [1] : vector<16x32xf32> to vector<16xf32>
    %260 = vector.shape_cast %259 : vector<16xf32> to vector<16x1xf32>
    %cst_85 = arith.constant 3.200000e+01 : f32
    %261 = vector.broadcast %cst_85 : f32 to vector<16x1xf32>
    %262 = arith.divf %260, %261 : vector<16x1xf32>
    %263 = vector.broadcast %262 : vector<16x1xf32> to vector<16x32xf32>
    %264 = arith.subf %256, %263 : vector<16x32xf32>
    %265 = arith.mulf %264, %264 : vector<16x32xf32>
    %cst_86 = arith.constant dense<0.000000e+00> : vector<16xf32>
    %266 = vector.multi_reduction <add>, %265, %cst_86 [1] : vector<16x32xf32> to vector<16xf32>
    %267 = vector.shape_cast %266 : vector<16xf32> to vector<16x1xf32>
    %cst_87 = arith.constant 3.200000e+01 : f32
    %268 = vector.broadcast %cst_87 : f32 to vector<16x1xf32>
    %269 = arith.divf %267, %268 : vector<16x1xf32>
    %270 = vector.broadcast %262 : vector<16x1xf32> to vector<16x32xf32>
    %271 = arith.subf %256, %270 : vector<16x32xf32>
    %cst_88 = arith.constant 9.99999974E-6 : f32
    %272 = vector.broadcast %cst_88 : f32 to vector<16x1xf32>
    %273 = arith.addf %269, %272 : vector<16x1xf32>
    %274 = math.rsqrt %273 : vector<16x1xf32>
    %275 = vector.broadcast %274 : vector<16x1xf32> to vector<16x32xf32>
    %276 = arith.mulf %271, %275 : vector<16x32xf32>
    %277 = vector.broadcast %257 : vector<1x32xf32> to vector<16x32xf32>
    %278 = arith.mulf %276, %277 : vector<16x32xf32>
    %279 = vector.broadcast %258 : vector<1x32xf32> to vector<16x32xf32>
    %280 = arith.addf %278, %279 : vector<16x32xf32>
    %c72 = arith.constant 72 : index
    %c0_89 = arith.constant 0 : index
    %281 = vector.load %arg3[%c72, %c0_89] : memref<520x128xf32, #tpu.memory_space<vmem>>, vector<1x32xf32>
    %c80 = arith.constant 80 : index
    %c0_90 = arith.constant 0 : index
    %282 = vector.load %arg3[%c80, %c0_90] : memref<520x128xf32, #tpu.memory_space<vmem>>, vector<1x32xf32>
    %cst_91 = arith.constant dense<0.000000e+00> : vector<16xf32>
    %283 = vector.multi_reduction <add>, %280, %cst_91 [1] : vector<16x32xf32> to vector<16xf32>
    %284 = vector.shape_cast %283 : vector<16xf32> to vector<16x1xf32>
    %cst_92 = arith.constant 3.200000e+01 : f32
    %285 = vector.broadcast %cst_92 : f32 to vector<16x1xf32>
    %286 = arith.divf %284, %285 : vector<16x1xf32>
    %287 = vector.broadcast %286 : vector<16x1xf32> to vector<16x32xf32>
    %288 = arith.subf %280, %287 : vector<16x32xf32>
    %289 = arith.mulf %288, %288 : vector<16x32xf32>
    %cst_93 = arith.constant dense<0.000000e+00> : vector<16xf32>
    %290 = vector.multi_reduction <add>, %289, %cst_93 [1] : vector<16x32xf32> to vector<16xf32>
    %291 = vector.shape_cast %290 : vector<16xf32> to vector<16x1xf32>
    %cst_94 = arith.constant 3.200000e+01 : f32
    %292 = vector.broadcast %cst_94 : f32 to vector<16x1xf32>
    %293 = arith.divf %291, %292 : vector<16x1xf32>
    %294 = vector.broadcast %286 : vector<16x1xf32> to vector<16x32xf32>
    %295 = arith.subf %280, %294 : vector<16x32xf32>
    %cst_95 = arith.constant 9.99999974E-6 : f32
    %296 = vector.broadcast %cst_95 : f32 to vector<16x1xf32>
    %297 = arith.addf %293, %296 : vector<16x1xf32>
    %298 = math.rsqrt %297 : vector<16x1xf32>
    %299 = vector.broadcast %298 : vector<16x1xf32> to vector<16x32xf32>
    %300 = arith.mulf %295, %299 : vector<16x32xf32>
    %301 = vector.broadcast %281 : vector<1x32xf32> to vector<16x32xf32>
    %302 = arith.mulf %300, %301 : vector<16x32xf32>
    %303 = vector.broadcast %282 : vector<1x32xf32> to vector<16x32xf32>
    %304 = arith.addf %302, %303 : vector<16x32xf32>
    %c0_96 = arith.constant 0 : index
    %c0_97 = arith.constant 0 : index
    %305 = vector.load %arg1[%c0_96, %c0_97] : memref<16x1xi32, #tpu.memory_space<vmem>>, vector<16x1xi32>
    %306 = tpu.iota {dimensions = array<i32: 1>} : vector<16x64xi32>
    %307 = vector.broadcast %305 : vector<16x1xi32> to vector<16x64xi32>
    %308 = arith.cmpi eq, %307, %306 : vector<16x64xi32>
    %309 = arith.extui %308 : vector<16x64xi1> to vector<16x64xi32>
    %310 = arith.sitofp %309 : vector<16x64xi32> to vector<16x64xf32>
    %311 = arith.truncf %310 : vector<16x64xf32> to vector<16x64xbf16>
    %c0_98 = arith.constant 0 : index
    %c0_99 = arith.constant 0 : index
    %312 = vector.load %arg2[%c0_98, %c0_99] : memref<1248x128xbf16, #tpu.memory_space<vmem>>, vector<64x32xbf16>
    %cst_100 = arith.constant dense<0.000000e+00> : vector<16x32xf32>
    %313 = tpu.matmul %311, %312, %cst_100 {dimension_numbers = #tpu.dot_dimension_numbers<[1], [0], [0], [1], [0, 0, 1, 1], [], []>} : vector<16x64xbf16>, vector<64x32xbf16>, vector<16x32xf32> -> vector<16x32xf32>
    %c0_101 = arith.constant 0 : index
    %c0_102 = arith.constant 0 : index
    %314 = vector.load %arg3[%c0_101, %c0_102] : memref<520x128xf32, #tpu.memory_space<vmem>>, vector<8x32xf32>
    %315 = vector.shape_cast %313 : vector<16x32xf32> to vector<2x8x32xf32>
    %316 = vector.shape_cast %314 : vector<8x32xf32> to vector<1x8x32xf32>
    %317 = vector.broadcast %316 : vector<1x8x32xf32> to vector<2x8x32xf32>
    %318 = arith.addf %315, %317 : vector<2x8x32xf32>
    %319 = vector.shape_cast %318 : vector<2x8x32xf32> to vector<16x32xf32>
    %c544 = arith.constant 544 : index
    %c0_103 = arith.constant 0 : index
    %320 = vector.load %arg2[%c544, %c0_103] : memref<1248x128xbf16, #tpu.memory_space<vmem>>, vector<32x32xbf16>
    %321 = arith.truncf %319 : vector<16x32xf32> to vector<16x32xbf16>
    %cst_104 = arith.constant dense<0.000000e+00> : vector<16x32xf32>
    %322 = tpu.matmul %321, %320, %cst_104 {dimension_numbers = #tpu.dot_dimension_numbers<[1], [0], [0], [1], [0, 0, 1, 1], [], []>} : vector<16x32xbf16>, vector<32x32xbf16>, vector<16x32xf32> -> vector<16x32xf32>
    %c264 = arith.constant 264 : index
    %c0_105 = arith.constant 0 : index
    %323 = vector.load %arg3[%c264, %c0_105] : memref<520x128xf32, #tpu.memory_space<vmem>>, vector<1x32xf32>
    %324 = vector.broadcast %323 : vector<1x32xf32> to vector<16x32xf32>
    %325 = arith.addf %322, %324 : vector<16x32xf32>
    %c576 = arith.constant 576 : index
    %c0_106 = arith.constant 0 : index
    %326 = vector.load %arg2[%c576, %c0_106] : memref<1248x128xbf16, #tpu.memory_space<vmem>>, vector<32x32xbf16>
    %327 = arith.truncf %319 : vector<16x32xf32> to vector<16x32xbf16>
    %cst_107 = arith.constant dense<0.000000e+00> : vector<16x32xf32>
    %328 = tpu.matmul %327, %326, %cst_107 {dimension_numbers = #tpu.dot_dimension_numbers<[1], [0], [0], [1], [0, 0, 1, 1], [], []>} : vector<16x32xbf16>, vector<32x32xbf16>, vector<16x32xf32> -> vector<16x32xf32>
    %c272 = arith.constant 272 : index
    %c0_108 = arith.constant 0 : index
    %329 = vector.load %arg3[%c272, %c0_108] : memref<520x128xf32, #tpu.memory_space<vmem>>, vector<1x32xf32>
    %330 = vector.broadcast %329 : vector<1x32xf32> to vector<16x32xf32>
    %331 = arith.addf %328, %330 : vector<16x32xf32>
    %c608 = arith.constant 608 : index
    %c0_109 = arith.constant 0 : index
    %332 = vector.load %arg2[%c608, %c0_109] : memref<1248x128xbf16, #tpu.memory_space<vmem>>, vector<32x32xbf16>
    %333 = arith.truncf %319 : vector<16x32xf32> to vector<16x32xbf16>
    %cst_110 = arith.constant dense<0.000000e+00> : vector<16x32xf32>
    %334 = tpu.matmul %333, %332, %cst_110 {dimension_numbers = #tpu.dot_dimension_numbers<[1], [0], [0], [1], [0, 0, 1, 1], [], []>} : vector<16x32xbf16>, vector<32x32xbf16>, vector<16x32xf32> -> vector<16x32xf32>
    %c280 = arith.constant 280 : index
    %c0_111 = arith.constant 0 : index
    %335 = vector.load %arg3[%c280, %c0_111] : memref<520x128xf32, #tpu.memory_space<vmem>>, vector<1x32xf32>
    %336 = vector.broadcast %335 : vector<1x32xf32> to vector<16x32xf32>
    %337 = arith.addf %334, %336 : vector<16x32xf32>
    %338 = vector.shape_cast %325 : vector<16x32xf32> to vector<2x8x32xf32>
    %339 = vector.shape_cast %331 : vector<16x32xf32> to vector<2x8x32xf32>
    %340 = vector.shape_cast %337 : vector<16x32xf32> to vector<2x8x32xf32>
    %341 = vector.shape_cast %338 : vector<2x8x32xf32> to vector<1x2x8x32xf32>
    %342 = vector.broadcast %341 : vector<1x2x8x32xf32> to vector<4x2x8x32xf32>
    %343 = vector.broadcast %13 : vector<4x1x1x32xf32> to vector<4x2x8x32xf32>
    %344 = arith.mulf %342, %343 : vector<4x2x8x32xf32>
    %345 = vector.shape_cast %344 : vector<4x2x8x32xf32> to vector<8x8x32xf32>
    %346 = vector.shape_cast %339 : vector<2x8x32xf32> to vector<1x2x8x32xf32>
    %347 = vector.broadcast %346 : vector<1x2x8x32xf32> to vector<4x2x8x32xf32>
    %348 = vector.broadcast %13 : vector<4x1x1x32xf32> to vector<4x2x8x32xf32>
    %349 = arith.mulf %347, %348 : vector<4x2x8x32xf32>
    %350 = vector.shape_cast %349 : vector<4x2x8x32xf32> to vector<8x8x32xf32>
    %351 = vector.shape_cast %340 : vector<2x8x32xf32> to vector<1x2x8x32xf32>
    %352 = vector.broadcast %351 : vector<1x2x8x32xf32> to vector<4x2x8x32xf32>
    %353 = vector.broadcast %13 : vector<4x1x1x32xf32> to vector<4x2x8x32xf32>
    %354 = arith.mulf %352, %353 : vector<4x2x8x32xf32>
    %355 = vector.shape_cast %354 : vector<4x2x8x32xf32> to vector<8x8x32xf32>
    %356 = arith.truncf %345 : vector<8x8x32xf32> to vector<8x8x32xbf16>
    %357 = arith.truncf %350 : vector<8x8x32xf32> to vector<8x8x32xbf16>
    "tpu.trace_start"() <{level = 10 : i32, message = "bqd,bkd->bqk"}> : () -> ()
    %cst_112 = arith.constant dense<0.000000e+00> : vector<8x8x8xf32>
    %358 = tpu.matmul %356, %357, %cst_112 {dimension_numbers = #tpu.dot_dimension_numbers<[2], [2], [1], [1], [0, 0, 0, 1, 1, 1], [0], [0]>} : vector<8x8x32xbf16>, vector<8x8x32xbf16>, vector<8x8x8xf32> -> vector<8x8x8xf32>
    "tpu.trace_stop"() : () -> ()
    %cst_113 = arith.constant 0.353553385 : f32
    %359 = vector.broadcast %cst_113 : f32 to vector<8x8x8xf32>
    %360 = arith.mulf %358, %359 : vector<8x8x8xf32>
    %cst_114 = arith.constant dense<0xFF800000> : vector<8x8xf32>
    %361 = vector.multi_reduction <maximumf>, %360, %cst_114 [2] : vector<8x8x8xf32> to vector<8x8xf32>
    %362 = vector.shape_cast %361 : vector<8x8xf32> to vector<8x8x1xf32>
    %363 = vector.broadcast %362 : vector<8x8x1xf32> to vector<8x8x8xf32>
    %364 = arith.subf %360, %363 : vector<8x8x8xf32>
    %365 = math.exp %364 : vector<8x8x8xf32>
    %cst_115 = arith.constant dense<0.000000e+00> : vector<8x8xf32>
    %366 = vector.multi_reduction <add>, %365, %cst_115 [2] : vector<8x8x8xf32> to vector<8x8xf32>
    %367 = vector.shape_cast %366 : vector<8x8xf32> to vector<8x8x1xf32>
    %368 = tpu.reciprocal %367 {approx = true} : vector<8x8x1xf32> -> vector<8x8x1xf32>
    %369 = vector.broadcast %368 : vector<8x8x1xf32> to vector<8x8x8xf32>
    %370 = arith.mulf %365, %369 : vector<8x8x8xf32>
    %371 = arith.truncf %370 : vector<8x8x8xf32> to vector<8x8x8xbf16>
    %372 = arith.truncf %355 : vector<8x8x32xf32> to vector<8x8x32xbf16>
    "tpu.trace_start"() <{level = 10 : i32, message = "bqk,bkd->bqd"}> : () -> ()
    %cst_116 = arith.constant dense<0.000000e+00> : vector<8x8x32xf32>
    %373 = tpu.matmul %371, %372, %cst_116 {dimension_numbers = #tpu.dot_dimension_numbers<[2], [1], [1], [2], [0, 0, 0, 1, 1, 2], [0], [0]>} : vector<8x8x8xbf16>, vector<8x8x32xbf16>, vector<8x8x32xf32> -> vector<8x8x32xf32>
    "tpu.trace_stop"() : () -> ()
    %374 = vector.shape_cast %373 : vector<8x8x32xf32> to vector<4x16x32xf32>
    %cst_117 = arith.constant dense<0.000000e+00> : vector<16x32xf32>
    %375 = vector.multi_reduction <add>, %374, %cst_117 [0] : vector<4x16x32xf32> to vector<16x32xf32>
    %c640 = arith.constant 640 : index
    %c0_118 = arith.constant 0 : index
    %376 = vector.load %arg2[%c640, %c0_118] : memref<1248x128xbf16, #tpu.memory_space<vmem>>, vector<32x32xbf16>
    %377 = arith.truncf %375 : vector<16x32xf32> to vector<16x32xbf16>
    %cst_119 = arith.constant dense<0.000000e+00> : vector<16x32xf32>
    %378 = tpu.matmul %377, %376, %cst_119 {dimension_numbers = #tpu.dot_dimension_numbers<[1], [0], [0], [1], [0, 0, 1, 1], [], []>} : vector<16x32xbf16>, vector<32x32xbf16>, vector<16x32xf32> -> vector<16x32xf32>
    %c288 = arith.constant 288 : index
    %c0_120 = arith.constant 0 : index
    %379 = vector.load %arg3[%c288, %c0_120] : memref<520x128xf32, #tpu.memory_space<vmem>>, vector<1x32xf32>
    %380 = vector.broadcast %379 : vector<1x32xf32> to vector<16x32xf32>
    %381 = arith.addf %378, %380 : vector<16x32xf32>
    %382 = arith.addf %319, %381 : vector<16x32xf32>
    %c344 = arith.constant 344 : index
    %c0_121 = arith.constant 0 : index
    %383 = vector.load %arg3[%c344, %c0_121] : memref<520x128xf32, #tpu.memory_space<vmem>>, vector<1x32xf32>
    %c352_122 = arith.constant 352 : index
    %c0_123 = arith.constant 0 : index
    %384 = vector.load %arg3[%c352_122, %c0_123] : memref<520x128xf32, #tpu.memory_space<vmem>>, vector<1x32xf32>
    %cst_124 = arith.constant dense<0.000000e+00> : vector<16xf32>
    %385 = vector.multi_reduction <add>, %382, %cst_124 [1] : vector<16x32xf32> to vector<16xf32>
    %386 = vector.shape_cast %385 : vector<16xf32> to vector<16x1xf32>
    %cst_125 = arith.constant 3.200000e+01 : f32
    %387 = vector.broadcast %cst_125 : f32 to vector<16x1xf32>
    %388 = arith.divf %386, %387 : vector<16x1xf32>
    %389 = vector.broadcast %388 : vector<16x1xf32> to vector<16x32xf32>
    %390 = arith.subf %382, %389 : vector<16x32xf32>
    %391 = arith.mulf %390, %390 : vector<16x32xf32>
    %cst_126 = arith.constant dense<0.000000e+00> : vector<16xf32>
    %392 = vector.multi_reduction <add>, %391, %cst_126 [1] : vector<16x32xf32> to vector<16xf32>
    %393 = vector.shape_cast %392 : vector<16xf32> to vector<16x1xf32>
    %cst_127 = arith.constant 3.200000e+01 : f32
    %394 = vector.broadcast %cst_127 : f32 to vector<16x1xf32>
    %395 = arith.divf %393, %394 : vector<16x1xf32>
    %396 = vector.broadcast %388 : vector<16x1xf32> to vector<16x32xf32>
    %397 = arith.subf %382, %396 : vector<16x32xf32>
    %cst_128 = arith.constant 9.99999974E-6 : f32
    %398 = vector.broadcast %cst_128 : f32 to vector<16x1xf32>
    %399 = arith.addf %395, %398 : vector<16x1xf32>
    %400 = math.rsqrt %399 : vector<16x1xf32>
    %401 = vector.broadcast %400 : vector<16x1xf32> to vector<16x32xf32>
    %402 = arith.mulf %397, %401 : vector<16x32xf32>
    %403 = vector.broadcast %383 : vector<1x32xf32> to vector<16x32xf32>
    %404 = arith.mulf %402, %403 : vector<16x32xf32>
    %405 = vector.broadcast %384 : vector<1x32xf32> to vector<16x32xf32>
    %406 = arith.addf %404, %405 : vector<16x32xf32>
    %c672 = arith.constant 672 : index
    %c0_129 = arith.constant 0 : index
    %407 = vector.load %arg2[%c672, %c0_129] : memref<1248x128xbf16, #tpu.memory_space<vmem>>, vector<32x32xbf16>
    %408 = arith.truncf %406 : vector<16x32xf32> to vector<16x32xbf16>
    %cst_130 = arith.constant dense<0.000000e+00> : vector<16x32xf32>
    %409 = tpu.matmul %408, %407, %cst_130 {dimension_numbers = #tpu.dot_dimension_numbers<[1], [0], [0], [1], [0, 0, 1, 1], [], []>} : vector<16x32xbf16>, vector<32x32xbf16>, vector<16x32xf32> -> vector<16x32xf32>
    %c296 = arith.constant 296 : index
    %c0_131 = arith.constant 0 : index
    %410 = vector.load %arg3[%c296, %c0_131] : memref<520x128xf32, #tpu.memory_space<vmem>>, vector<1x32xf32>
    %411 = vector.broadcast %410 : vector<1x32xf32> to vector<16x32xf32>
    %412 = arith.addf %409, %411 : vector<16x32xf32>
    %c704 = arith.constant 704 : index
    %c0_132 = arith.constant 0 : index
    %413 = vector.load %arg2[%c704, %c0_132] : memref<1248x128xbf16, #tpu.memory_space<vmem>>, vector<32x32xbf16>
    %414 = arith.truncf %304 : vector<16x32xf32> to vector<16x32xbf16>
    %cst_133 = arith.constant dense<0.000000e+00> : vector<16x32xf32>
    %415 = tpu.matmul %414, %413, %cst_133 {dimension_numbers = #tpu.dot_dimension_numbers<[1], [0], [0], [1], [0, 0, 1, 1], [], []>} : vector<16x32xbf16>, vector<32x32xbf16>, vector<16x32xf32> -> vector<16x32xf32>
    %c304 = arith.constant 304 : index
    %c0_134 = arith.constant 0 : index
    %416 = vector.load %arg3[%c304, %c0_134] : memref<520x128xf32, #tpu.memory_space<vmem>>, vector<1x32xf32>
    %417 = vector.broadcast %416 : vector<1x32xf32> to vector<16x32xf32>
    %418 = arith.addf %415, %417 : vector<16x32xf32>
    %c736 = arith.constant 736 : index
    %c0_135 = arith.constant 0 : index
    %419 = vector.load %arg2[%c736, %c0_135] : memref<1248x128xbf16, #tpu.memory_space<vmem>>, vector<32x32xbf16>
    %420 = arith.truncf %304 : vector<16x32xf32> to vector<16x32xbf16>
    %cst_136 = arith.constant dense<0.000000e+00> : vector<16x32xf32>
    %421 = tpu.matmul %420, %419, %cst_136 {dimension_numbers = #tpu.dot_dimension_numbers<[1], [0], [0], [1], [0, 0, 1, 1], [], []>} : vector<16x32xbf16>, vector<32x32xbf16>, vector<16x32xf32> -> vector<16x32xf32>
    %c312 = arith.constant 312 : index
    %c0_137 = arith.constant 0 : index
    %422 = vector.load %arg3[%c312, %c0_137] : memref<520x128xf32, #tpu.memory_space<vmem>>, vector<1x32xf32>
    %423 = vector.broadcast %422 : vector<1x32xf32> to vector<16x32xf32>
    %424 = arith.addf %421, %423 : vector<16x32xf32>
    %425 = vector.shape_cast %412 : vector<16x32xf32> to vector<2x8x32xf32>
    %426 = vector.shape_cast %418 : vector<16x32xf32> to vector<2x8x32xf32>
    %427 = vector.shape_cast %424 : vector<16x32xf32> to vector<2x8x32xf32>
    %428 = vector.shape_cast %425 : vector<2x8x32xf32> to vector<1x2x8x32xf32>
    %429 = vector.broadcast %428 : vector<1x2x8x32xf32> to vector<4x2x8x32xf32>
    %430 = vector.broadcast %13 : vector<4x1x1x32xf32> to vector<4x2x8x32xf32>
    %431 = arith.mulf %429, %430 : vector<4x2x8x32xf32>
    %432 = vector.shape_cast %431 : vector<4x2x8x32xf32> to vector<8x8x32xf32>
    %433 = vector.shape_cast %426 : vector<2x8x32xf32> to vector<1x2x8x32xf32>
    %434 = vector.broadcast %433 : vector<1x2x8x32xf32> to vector<4x2x8x32xf32>
    %435 = vector.broadcast %13 : vector<4x1x1x32xf32> to vector<4x2x8x32xf32>
    %436 = arith.mulf %434, %435 : vector<4x2x8x32xf32>
    %437 = vector.shape_cast %436 : vector<4x2x8x32xf32> to vector<8x8x32xf32>
    %438 = vector.shape_cast %427 : vector<2x8x32xf32> to vector<1x2x8x32xf32>
    %439 = vector.broadcast %438 : vector<1x2x8x32xf32> to vector<4x2x8x32xf32>
    %440 = vector.broadcast %13 : vector<4x1x1x32xf32> to vector<4x2x8x32xf32>
    %441 = arith.mulf %439, %440 : vector<4x2x8x32xf32>
    %442 = vector.shape_cast %441 : vector<4x2x8x32xf32> to vector<8x8x32xf32>
    %443 = arith.truncf %432 : vector<8x8x32xf32> to vector<8x8x32xbf16>
    %444 = arith.truncf %437 : vector<8x8x32xf32> to vector<8x8x32xbf16>
    "tpu.trace_start"() <{level = 10 : i32, message = "bqd,bkd->bqk"}> : () -> ()
    %cst_138 = arith.constant dense<0.000000e+00> : vector<8x8x8xf32>
    %445 = tpu.matmul %443, %444, %cst_138 {dimension_numbers = #tpu.dot_dimension_numbers<[2], [2], [1], [1], [0, 0, 0, 1, 1, 1], [0], [0]>} : vector<8x8x32xbf16>, vector<8x8x32xbf16>, vector<8x8x8xf32> -> vector<8x8x8xf32>
    "tpu.trace_stop"() : () -> ()
    %cst_139 = arith.constant 0.353553385 : f32
    %446 = vector.broadcast %cst_139 : f32 to vector<8x8x8xf32>
    %447 = arith.mulf %445, %446 : vector<8x8x8xf32>
    %cst_140 = arith.constant dense<0xFF800000> : vector<8x8xf32>
    %448 = vector.multi_reduction <maximumf>, %447, %cst_140 [2] : vector<8x8x8xf32> to vector<8x8xf32>
    %449 = vector.shape_cast %448 : vector<8x8xf32> to vector<8x8x1xf32>
    %450 = vector.broadcast %449 : vector<8x8x1xf32> to vector<8x8x8xf32>
    %451 = arith.subf %447, %450 : vector<8x8x8xf32>
    %452 = math.exp %451 : vector<8x8x8xf32>
    %cst_141 = arith.constant dense<0.000000e+00> : vector<8x8xf32>
    %453 = vector.multi_reduction <add>, %452, %cst_141 [2] : vector<8x8x8xf32> to vector<8x8xf32>
    %454 = vector.shape_cast %453 : vector<8x8xf32> to vector<8x8x1xf32>
    %455 = tpu.reciprocal %454 {approx = true} : vector<8x8x1xf32> -> vector<8x8x1xf32>
    %456 = vector.broadcast %455 : vector<8x8x1xf32> to vector<8x8x8xf32>
    %457 = arith.mulf %452, %456 : vector<8x8x8xf32>
    %458 = arith.truncf %457 : vector<8x8x8xf32> to vector<8x8x8xbf16>
    %459 = arith.truncf %442 : vector<8x8x32xf32> to vector<8x8x32xbf16>
    "tpu.trace_start"() <{level = 10 : i32, message = "bqk,bkd->bqd"}> : () -> ()
    %cst_142 = arith.constant dense<0.000000e+00> : vector<8x8x32xf32>
    %460 = tpu.matmul %458, %459, %cst_142 {dimension_numbers = #tpu.dot_dimension_numbers<[2], [1], [1], [2], [0, 0, 0, 1, 1, 2], [0], [0]>} : vector<8x8x8xbf16>, vector<8x8x32xbf16>, vector<8x8x32xf32> -> vector<8x8x32xf32>
    "tpu.trace_stop"() : () -> ()
    %461 = vector.shape_cast %460 : vector<8x8x32xf32> to vector<4x16x32xf32>
    %cst_143 = arith.constant dense<0.000000e+00> : vector<16x32xf32>
    %462 = vector.multi_reduction <add>, %461, %cst_143 [0] : vector<4x16x32xf32> to vector<16x32xf32>
    %c768 = arith.constant 768 : index
    %c0_144 = arith.constant 0 : index
    %463 = vector.load %arg2[%c768, %c0_144] : memref<1248x128xbf16, #tpu.memory_space<vmem>>, vector<32x32xbf16>
    %464 = arith.truncf %462 : vector<16x32xf32> to vector<16x32xbf16>
    %cst_145 = arith.constant dense<0.000000e+00> : vector<16x32xf32>
    %465 = tpu.matmul %464, %463, %cst_145 {dimension_numbers = #tpu.dot_dimension_numbers<[1], [0], [0], [1], [0, 0, 1, 1], [], []>} : vector<16x32xbf16>, vector<32x32xbf16>, vector<16x32xf32> -> vector<16x32xf32>
    %c320_146 = arith.constant 320 : index
    %c0_147 = arith.constant 0 : index
    %466 = vector.load %arg3[%c320_146, %c0_147] : memref<520x128xf32, #tpu.memory_space<vmem>>, vector<1x32xf32>
    %467 = vector.broadcast %466 : vector<1x32xf32> to vector<16x32xf32>
    %468 = arith.addf %465, %467 : vector<16x32xf32>
    %469 = arith.addf %406, %468 : vector<16x32xf32>
    %c360 = arith.constant 360 : index
    %c0_148 = arith.constant 0 : index
    %470 = vector.load %arg3[%c360, %c0_148] : memref<520x128xf32, #tpu.memory_space<vmem>>, vector<1x32xf32>
    %c368 = arith.constant 368 : index
    %c0_149 = arith.constant 0 : index
    %471 = vector.load %arg3[%c368, %c0_149] : memref<520x128xf32, #tpu.memory_space<vmem>>, vector<1x32xf32>
    %cst_150 = arith.constant dense<0.000000e+00> : vector<16xf32>
    %472 = vector.multi_reduction <add>, %469, %cst_150 [1] : vector<16x32xf32> to vector<16xf32>
    %473 = vector.shape_cast %472 : vector<16xf32> to vector<16x1xf32>
    %cst_151 = arith.constant 3.200000e+01 : f32
    %474 = vector.broadcast %cst_151 : f32 to vector<16x1xf32>
    %475 = arith.divf %473, %474 : vector<16x1xf32>
    %476 = vector.broadcast %475 : vector<16x1xf32> to vector<16x32xf32>
    %477 = arith.subf %469, %476 : vector<16x32xf32>
    %478 = arith.mulf %477, %477 : vector<16x32xf32>
    %cst_152 = arith.constant dense<0.000000e+00> : vector<16xf32>
    %479 = vector.multi_reduction <add>, %478, %cst_152 [1] : vector<16x32xf32> to vector<16xf32>
    %480 = vector.shape_cast %479 : vector<16xf32> to vector<16x1xf32>
    %cst_153 = arith.constant 3.200000e+01 : f32
    %481 = vector.broadcast %cst_153 : f32 to vector<16x1xf32>
    %482 = arith.divf %480, %481 : vector<16x1xf32>
    %483 = vector.broadcast %475 : vector<16x1xf32> to vector<16x32xf32>
    %484 = arith.subf %469, %483 : vector<16x32xf32>
    %cst_154 = arith.constant 9.99999974E-6 : f32
    %485 = vector.broadcast %cst_154 : f32 to vector<16x1xf32>
    %486 = arith.addf %482, %485 : vector<16x1xf32>
    %487 = math.rsqrt %486 : vector<16x1xf32>
    %488 = vector.broadcast %487 : vector<16x1xf32> to vector<16x32xf32>
    %489 = arith.mulf %484, %488 : vector<16x32xf32>
    %490 = vector.broadcast %470 : vector<1x32xf32> to vector<16x32xf32>
    %491 = arith.mulf %489, %490 : vector<16x32xf32>
    %492 = vector.broadcast %471 : vector<1x32xf32> to vector<16x32xf32>
    %493 = arith.addf %491, %492 : vector<16x32xf32>
    %c800 = arith.constant 800 : index
    %c0_155 = arith.constant 0 : index
    %494 = vector.load %arg2[%c800, %c0_155] : memref<1248x128xbf16, #tpu.memory_space<vmem>>, vector<32x64xbf16>
    %495 = arith.truncf %493 : vector<16x32xf32> to vector<16x32xbf16>
    %cst_156 = arith.constant dense<0.000000e+00> : vector<16x64xf32>
    %496 = tpu.matmul %495, %494, %cst_156 {dimension_numbers = #tpu.dot_dimension_numbers<[1], [0], [0], [1], [0, 0, 1, 1], [], []>} : vector<16x32xbf16>, vector<32x64xbf16>, vector<16x64xf32> -> vector<16x64xf32>
    %c328 = arith.constant 328 : index
    %c0_157 = arith.constant 0 : index
    %497 = vector.load %arg3[%c328, %c0_157] : memref<520x128xf32, #tpu.memory_space<vmem>>, vector<1x64xf32>
    %498 = vector.broadcast %497 : vector<1x64xf32> to vector<16x64xf32>
    %499 = arith.addf %496, %498 : vector<16x64xf32>
    %cst_158 = arith.constant 0.000000e+00 : f32
    %500 = vector.broadcast %cst_158 : f32 to vector<16x64xf32>
    %501 = arith.maximumf %499, %500 : vector<16x64xf32>
    %c832 = arith.constant 832 : index
    %c0_159 = arith.constant 0 : index
    %502 = vector.load %arg2[%c832, %c0_159] : memref<1248x128xbf16, #tpu.memory_space<vmem>>, vector<64x32xbf16>
    %503 = arith.truncf %501 : vector<16x64xf32> to vector<16x64xbf16>
    %cst_160 = arith.constant dense<0.000000e+00> : vector<16x32xf32>
    %504 = tpu.matmul %503, %502, %cst_160 {dimension_numbers = #tpu.dot_dimension_numbers<[1], [0], [0], [1], [0, 0, 1, 1], [], []>} : vector<16x64xbf16>, vector<64x32xbf16>, vector<16x32xf32> -> vector<16x32xf32>
    %c336 = arith.constant 336 : index
    %c0_161 = arith.constant 0 : index
    %505 = vector.load %arg3[%c336, %c0_161] : memref<520x128xf32, #tpu.memory_space<vmem>>, vector<1x32xf32>
    %506 = vector.broadcast %505 : vector<1x32xf32> to vector<16x32xf32>
    %507 = arith.addf %504, %506 : vector<16x32xf32>
    %508 = arith.addf %493, %507 : vector<16x32xf32>
    %c376 = arith.constant 376 : index
    %c0_162 = arith.constant 0 : index
    %509 = vector.load %arg3[%c376, %c0_162] : memref<520x128xf32, #tpu.memory_space<vmem>>, vector<1x32xf32>
    %c384_163 = arith.constant 384 : index
    %c0_164 = arith.constant 0 : index
    %510 = vector.load %arg3[%c384_163, %c0_164] : memref<520x128xf32, #tpu.memory_space<vmem>>, vector<1x32xf32>
    %cst_165 = arith.constant dense<0.000000e+00> : vector<16xf32>
    %511 = vector.multi_reduction <add>, %508, %cst_165 [1] : vector<16x32xf32> to vector<16xf32>
    %512 = vector.shape_cast %511 : vector<16xf32> to vector<16x1xf32>
    %cst_166 = arith.constant 3.200000e+01 : f32
    %513 = vector.broadcast %cst_166 : f32 to vector<16x1xf32>
    %514 = arith.divf %512, %513 : vector<16x1xf32>
    %515 = vector.broadcast %514 : vector<16x1xf32> to vector<16x32xf32>
    %516 = arith.subf %508, %515 : vector<16x32xf32>
    %517 = arith.mulf %516, %516 : vector<16x32xf32>
    %cst_167 = arith.constant dense<0.000000e+00> : vector<16xf32>
    %518 = vector.multi_reduction <add>, %517, %cst_167 [1] : vector<16x32xf32> to vector<16xf32>
    %519 = vector.shape_cast %518 : vector<16xf32> to vector<16x1xf32>
    %cst_168 = arith.constant 3.200000e+01 : f32
    %520 = vector.broadcast %cst_168 : f32 to vector<16x1xf32>
    %521 = arith.divf %519, %520 : vector<16x1xf32>
    %522 = vector.broadcast %514 : vector<16x1xf32> to vector<16x32xf32>
    %523 = arith.subf %508, %522 : vector<16x32xf32>
    %cst_169 = arith.constant 9.99999974E-6 : f32
    %524 = vector.broadcast %cst_169 : f32 to vector<16x1xf32>
    %525 = arith.addf %521, %524 : vector<16x1xf32>
    %526 = math.rsqrt %525 : vector<16x1xf32>
    %527 = vector.broadcast %526 : vector<16x1xf32> to vector<16x32xf32>
    %528 = arith.mulf %523, %527 : vector<16x32xf32>
    %529 = vector.broadcast %509 : vector<1x32xf32> to vector<16x32xf32>
    %530 = arith.mulf %528, %529 : vector<16x32xf32>
    %531 = vector.broadcast %510 : vector<1x32xf32> to vector<16x32xf32>
    %532 = arith.addf %530, %531 : vector<16x32xf32>
    %c896 = arith.constant 896 : index
    %c0_170 = arith.constant 0 : index
    %533 = vector.load %arg2[%c896, %c0_170] : memref<1248x128xbf16, #tpu.memory_space<vmem>>, vector<32x32xbf16>
    %534 = arith.truncf %532 : vector<16x32xf32> to vector<16x32xbf16>
    %cst_171 = arith.constant dense<0.000000e+00> : vector<16x32xf32>
    %535 = tpu.matmul %534, %533, %cst_171 {dimension_numbers = #tpu.dot_dimension_numbers<[1], [0], [0], [1], [0, 0, 1, 1], [], []>} : vector<16x32xbf16>, vector<32x32xbf16>, vector<16x32xf32> -> vector<16x32xf32>
    %c392 = arith.constant 392 : index
    %c0_172 = arith.constant 0 : index
    %536 = vector.load %arg3[%c392, %c0_172] : memref<520x128xf32, #tpu.memory_space<vmem>>, vector<1x32xf32>
    %537 = vector.broadcast %536 : vector<1x32xf32> to vector<16x32xf32>
    %538 = arith.addf %535, %537 : vector<16x32xf32>
    %c928 = arith.constant 928 : index
    %c0_173 = arith.constant 0 : index
    %539 = vector.load %arg2[%c928, %c0_173] : memref<1248x128xbf16, #tpu.memory_space<vmem>>, vector<32x32xbf16>
    %540 = arith.truncf %532 : vector<16x32xf32> to vector<16x32xbf16>
    %cst_174 = arith.constant dense<0.000000e+00> : vector<16x32xf32>
    %541 = tpu.matmul %540, %539, %cst_174 {dimension_numbers = #tpu.dot_dimension_numbers<[1], [0], [0], [1], [0, 0, 1, 1], [], []>} : vector<16x32xbf16>, vector<32x32xbf16>, vector<16x32xf32> -> vector<16x32xf32>
    %c400 = arith.constant 400 : index
    %c0_175 = arith.constant 0 : index
    %542 = vector.load %arg3[%c400, %c0_175] : memref<520x128xf32, #tpu.memory_space<vmem>>, vector<1x32xf32>
    %543 = vector.broadcast %542 : vector<1x32xf32> to vector<16x32xf32>
    %544 = arith.addf %541, %543 : vector<16x32xf32>
    %c960 = arith.constant 960 : index
    %c0_176 = arith.constant 0 : index
    %545 = vector.load %arg2[%c960, %c0_176] : memref<1248x128xbf16, #tpu.memory_space<vmem>>, vector<32x32xbf16>
    %546 = arith.truncf %532 : vector<16x32xf32> to vector<16x32xbf16>
    %cst_177 = arith.constant dense<0.000000e+00> : vector<16x32xf32>
    %547 = tpu.matmul %546, %545, %cst_177 {dimension_numbers = #tpu.dot_dimension_numbers<[1], [0], [0], [1], [0, 0, 1, 1], [], []>} : vector<16x32xbf16>, vector<32x32xbf16>, vector<16x32xf32> -> vector<16x32xf32>
    %c408 = arith.constant 408 : index
    %c0_178 = arith.constant 0 : index
    %548 = vector.load %arg3[%c408, %c0_178] : memref<520x128xf32, #tpu.memory_space<vmem>>, vector<1x32xf32>
    %549 = vector.broadcast %548 : vector<1x32xf32> to vector<16x32xf32>
    %550 = arith.addf %547, %549 : vector<16x32xf32>
    %551 = vector.shape_cast %538 : vector<16x32xf32> to vector<2x8x32xf32>
    %552 = vector.shape_cast %544 : vector<16x32xf32> to vector<2x8x32xf32>
    %553 = vector.shape_cast %550 : vector<16x32xf32> to vector<2x8x32xf32>
    %554 = vector.shape_cast %551 : vector<2x8x32xf32> to vector<1x2x8x32xf32>
    %555 = vector.broadcast %554 : vector<1x2x8x32xf32> to vector<4x2x8x32xf32>
    %556 = vector.broadcast %13 : vector<4x1x1x32xf32> to vector<4x2x8x32xf32>
    %557 = arith.mulf %555, %556 : vector<4x2x8x32xf32>
    %558 = vector.shape_cast %557 : vector<4x2x8x32xf32> to vector<8x8x32xf32>
    %559 = vector.shape_cast %552 : vector<2x8x32xf32> to vector<1x2x8x32xf32>
    %560 = vector.broadcast %559 : vector<1x2x8x32xf32> to vector<4x2x8x32xf32>
    %561 = vector.broadcast %13 : vector<4x1x1x32xf32> to vector<4x2x8x32xf32>
    %562 = arith.mulf %560, %561 : vector<4x2x8x32xf32>
    %563 = vector.shape_cast %562 : vector<4x2x8x32xf32> to vector<8x8x32xf32>
    %564 = vector.shape_cast %553 : vector<2x8x32xf32> to vector<1x2x8x32xf32>
    %565 = vector.broadcast %564 : vector<1x2x8x32xf32> to vector<4x2x8x32xf32>
    %566 = vector.broadcast %13 : vector<4x1x1x32xf32> to vector<4x2x8x32xf32>
    %567 = arith.mulf %565, %566 : vector<4x2x8x32xf32>
    %568 = vector.shape_cast %567 : vector<4x2x8x32xf32> to vector<8x8x32xf32>
    %569 = arith.truncf %558 : vector<8x8x32xf32> to vector<8x8x32xbf16>
    %570 = arith.truncf %563 : vector<8x8x32xf32> to vector<8x8x32xbf16>
    "tpu.trace_start"() <{level = 10 : i32, message = "bqd,bkd->bqk"}> : () -> ()
    %cst_179 = arith.constant dense<0.000000e+00> : vector<8x8x8xf32>
    %571 = tpu.matmul %569, %570, %cst_179 {dimension_numbers = #tpu.dot_dimension_numbers<[2], [2], [1], [1], [0, 0, 0, 1, 1, 1], [0], [0]>} : vector<8x8x32xbf16>, vector<8x8x32xbf16>, vector<8x8x8xf32> -> vector<8x8x8xf32>
    "tpu.trace_stop"() : () -> ()
    %cst_180 = arith.constant 0.353553385 : f32
    %572 = vector.broadcast %cst_180 : f32 to vector<8x8x8xf32>
    %573 = arith.mulf %571, %572 : vector<8x8x8xf32>
    %cst_181 = arith.constant dense<0xFF800000> : vector<8x8xf32>
    %574 = vector.multi_reduction <maximumf>, %573, %cst_181 [2] : vector<8x8x8xf32> to vector<8x8xf32>
    %575 = vector.shape_cast %574 : vector<8x8xf32> to vector<8x8x1xf32>
    %576 = vector.broadcast %575 : vector<8x8x1xf32> to vector<8x8x8xf32>
    %577 = arith.subf %573, %576 : vector<8x8x8xf32>
    %578 = math.exp %577 : vector<8x8x8xf32>
    %cst_182 = arith.constant dense<0.000000e+00> : vector<8x8xf32>
    %579 = vector.multi_reduction <add>, %578, %cst_182 [2] : vector<8x8x8xf32> to vector<8x8xf32>
    %580 = vector.shape_cast %579 : vector<8x8xf32> to vector<8x8x1xf32>
    %581 = tpu.reciprocal %580 {approx = true} : vector<8x8x1xf32> -> vector<8x8x1xf32>
    %582 = vector.broadcast %581 : vector<8x8x1xf32> to vector<8x8x8xf32>
    %583 = arith.mulf %578, %582 : vector<8x8x8xf32>
    %584 = arith.truncf %583 : vector<8x8x8xf32> to vector<8x8x8xbf16>
    %585 = arith.truncf %568 : vector<8x8x32xf32> to vector<8x8x32xbf16>
    "tpu.trace_start"() <{level = 10 : i32, message = "bqk,bkd->bqd"}> : () -> ()
    %cst_183 = arith.constant dense<0.000000e+00> : vector<8x8x32xf32>
    %586 = tpu.matmul %584, %585, %cst_183 {dimension_numbers = #tpu.dot_dimension_numbers<[2], [1], [1], [2], [0, 0, 0, 1, 1, 2], [0], [0]>} : vector<8x8x8xbf16>, vector<8x8x32xbf16>, vector<8x8x32xf32> -> vector<8x8x32xf32>
    "tpu.trace_stop"() : () -> ()
    %587 = vector.shape_cast %586 : vector<8x8x32xf32> to vector<4x16x32xf32>
    %cst_184 = arith.constant dense<0.000000e+00> : vector<16x32xf32>
    %588 = vector.multi_reduction <add>, %587, %cst_184 [0] : vector<4x16x32xf32> to vector<16x32xf32>
    %c992 = arith.constant 992 : index
    %c0_185 = arith.constant 0 : index
    %589 = vector.load %arg2[%c992, %c0_185] : memref<1248x128xbf16, #tpu.memory_space<vmem>>, vector<32x32xbf16>
    %590 = arith.truncf %588 : vector<16x32xf32> to vector<16x32xbf16>
    %cst_186 = arith.constant dense<0.000000e+00> : vector<16x32xf32>
    %591 = tpu.matmul %590, %589, %cst_186 {dimension_numbers = #tpu.dot_dimension_numbers<[1], [0], [0], [1], [0, 0, 1, 1], [], []>} : vector<16x32xbf16>, vector<32x32xbf16>, vector<16x32xf32> -> vector<16x32xf32>
    %c416_187 = arith.constant 416 : index
    %c0_188 = arith.constant 0 : index
    %592 = vector.load %arg3[%c416_187, %c0_188] : memref<520x128xf32, #tpu.memory_space<vmem>>, vector<1x32xf32>
    %593 = vector.broadcast %592 : vector<1x32xf32> to vector<16x32xf32>
    %594 = arith.addf %591, %593 : vector<16x32xf32>
    %595 = arith.addf %532, %594 : vector<16x32xf32>
    %c472 = arith.constant 472 : index
    %c0_189 = arith.constant 0 : index
    %596 = vector.load %arg3[%c472, %c0_189] : memref<520x128xf32, #tpu.memory_space<vmem>>, vector<1x32xf32>
    %c480_190 = arith.constant 480 : index
    %c0_191 = arith.constant 0 : index
    %597 = vector.load %arg3[%c480_190, %c0_191] : memref<520x128xf32, #tpu.memory_space<vmem>>, vector<1x32xf32>
    %cst_192 = arith.constant dense<0.000000e+00> : vector<16xf32>
    %598 = vector.multi_reduction <add>, %595, %cst_192 [1] : vector<16x32xf32> to vector<16xf32>
    %599 = vector.shape_cast %598 : vector<16xf32> to vector<16x1xf32>
    %cst_193 = arith.constant 3.200000e+01 : f32
    %600 = vector.broadcast %cst_193 : f32 to vector<16x1xf32>
    %601 = arith.divf %599, %600 : vector<16x1xf32>
    %602 = vector.broadcast %601 : vector<16x1xf32> to vector<16x32xf32>
    %603 = arith.subf %595, %602 : vector<16x32xf32>
    %604 = arith.mulf %603, %603 : vector<16x32xf32>
    %cst_194 = arith.constant dense<0.000000e+00> : vector<16xf32>
    %605 = vector.multi_reduction <add>, %604, %cst_194 [1] : vector<16x32xf32> to vector<16xf32>
    %606 = vector.shape_cast %605 : vector<16xf32> to vector<16x1xf32>
    %cst_195 = arith.constant 3.200000e+01 : f32
    %607 = vector.broadcast %cst_195 : f32 to vector<16x1xf32>
    %608 = arith.divf %606, %607 : vector<16x1xf32>
    %609 = vector.broadcast %601 : vector<16x1xf32> to vector<16x32xf32>
    %610 = arith.subf %595, %609 : vector<16x32xf32>
    %cst_196 = arith.constant 9.99999974E-6 : f32
    %611 = vector.broadcast %cst_196 : f32 to vector<16x1xf32>
    %612 = arith.addf %608, %611 : vector<16x1xf32>
    %613 = math.rsqrt %612 : vector<16x1xf32>
    %614 = vector.broadcast %613 : vector<16x1xf32> to vector<16x32xf32>
    %615 = arith.mulf %610, %614 : vector<16x32xf32>
    %616 = vector.broadcast %596 : vector<1x32xf32> to vector<16x32xf32>
    %617 = arith.mulf %615, %616 : vector<16x32xf32>
    %618 = vector.broadcast %597 : vector<1x32xf32> to vector<16x32xf32>
    %619 = arith.addf %617, %618 : vector<16x32xf32>
    %c1024 = arith.constant 1024 : index
    %c0_197 = arith.constant 0 : index
    %620 = vector.load %arg2[%c1024, %c0_197] : memref<1248x128xbf16, #tpu.memory_space<vmem>>, vector<32x32xbf16>
    %621 = arith.truncf %619 : vector<16x32xf32> to vector<16x32xbf16>
    %cst_198 = arith.constant dense<0.000000e+00> : vector<16x32xf32>
    %622 = tpu.matmul %621, %620, %cst_198 {dimension_numbers = #tpu.dot_dimension_numbers<[1], [0], [0], [1], [0, 0, 1, 1], [], []>} : vector<16x32xbf16>, vector<32x32xbf16>, vector<16x32xf32> -> vector<16x32xf32>
    %c424 = arith.constant 424 : index
    %c0_199 = arith.constant 0 : index
    %623 = vector.load %arg3[%c424, %c0_199] : memref<520x128xf32, #tpu.memory_space<vmem>>, vector<1x32xf32>
    %624 = vector.broadcast %623 : vector<1x32xf32> to vector<16x32xf32>
    %625 = arith.addf %622, %624 : vector<16x32xf32>
    %c1056 = arith.constant 1056 : index
    %c0_200 = arith.constant 0 : index
    %626 = vector.load %arg2[%c1056, %c0_200] : memref<1248x128xbf16, #tpu.memory_space<vmem>>, vector<32x32xbf16>
    %627 = arith.truncf %304 : vector<16x32xf32> to vector<16x32xbf16>
    %cst_201 = arith.constant dense<0.000000e+00> : vector<16x32xf32>
    %628 = tpu.matmul %627, %626, %cst_201 {dimension_numbers = #tpu.dot_dimension_numbers<[1], [0], [0], [1], [0, 0, 1, 1], [], []>} : vector<16x32xbf16>, vector<32x32xbf16>, vector<16x32xf32> -> vector<16x32xf32>
    %c432 = arith.constant 432 : index
    %c0_202 = arith.constant 0 : index
    %629 = vector.load %arg3[%c432, %c0_202] : memref<520x128xf32, #tpu.memory_space<vmem>>, vector<1x32xf32>
    %630 = vector.broadcast %629 : vector<1x32xf32> to vector<16x32xf32>
    %631 = arith.addf %628, %630 : vector<16x32xf32>
    %c1088 = arith.constant 1088 : index
    %c0_203 = arith.constant 0 : index
    %632 = vector.load %arg2[%c1088, %c0_203] : memref<1248x128xbf16, #tpu.memory_space<vmem>>, vector<32x32xbf16>
    %633 = arith.truncf %304 : vector<16x32xf32> to vector<16x32xbf16>
    %cst_204 = arith.constant dense<0.000000e+00> : vector<16x32xf32>
    %634 = tpu.matmul %633, %632, %cst_204 {dimension_numbers = #tpu.dot_dimension_numbers<[1], [0], [0], [1], [0, 0, 1, 1], [], []>} : vector<16x32xbf16>, vector<32x32xbf16>, vector<16x32xf32> -> vector<16x32xf32>
    %c440 = arith.constant 440 : index
    %c0_205 = arith.constant 0 : index
    %635 = vector.load %arg3[%c440, %c0_205] : memref<520x128xf32, #tpu.memory_space<vmem>>, vector<1x32xf32>
    %636 = vector.broadcast %635 : vector<1x32xf32> to vector<16x32xf32>
    %637 = arith.addf %634, %636 : vector<16x32xf32>
    %638 = vector.shape_cast %625 : vector<16x32xf32> to vector<2x8x32xf32>
    %639 = vector.shape_cast %631 : vector<16x32xf32> to vector<2x8x32xf32>
    %640 = vector.shape_cast %637 : vector<16x32xf32> to vector<2x8x32xf32>
    %641 = vector.shape_cast %638 : vector<2x8x32xf32> to vector<1x2x8x32xf32>
    %642 = vector.broadcast %641 : vector<1x2x8x32xf32> to vector<4x2x8x32xf32>
    %643 = vector.broadcast %13 : vector<4x1x1x32xf32> to vector<4x2x8x32xf32>
    %644 = arith.mulf %642, %643 : vector<4x2x8x32xf32>
    %645 = vector.shape_cast %644 : vector<4x2x8x32xf32> to vector<8x8x32xf32>
    %646 = vector.shape_cast %639 : vector<2x8x32xf32> to vector<1x2x8x32xf32>
    %647 = vector.broadcast %646 : vector<1x2x8x32xf32> to vector<4x2x8x32xf32>
    %648 = vector.broadcast %13 : vector<4x1x1x32xf32> to vector<4x2x8x32xf32>
    %649 = arith.mulf %647, %648 : vector<4x2x8x32xf32>
    %650 = vector.shape_cast %649 : vector<4x2x8x32xf32> to vector<8x8x32xf32>
    %651 = vector.shape_cast %640 : vector<2x8x32xf32> to vector<1x2x8x32xf32>
    %652 = vector.broadcast %651 : vector<1x2x8x32xf32> to vector<4x2x8x32xf32>
    %653 = vector.broadcast %13 : vector<4x1x1x32xf32> to vector<4x2x8x32xf32>
    %654 = arith.mulf %652, %653 : vector<4x2x8x32xf32>
    %655 = vector.shape_cast %654 : vector<4x2x8x32xf32> to vector<8x8x32xf32>
    %656 = arith.truncf %645 : vector<8x8x32xf32> to vector<8x8x32xbf16>
    %657 = arith.truncf %650 : vector<8x8x32xf32> to vector<8x8x32xbf16>
    "tpu.trace_start"() <{level = 10 : i32, message = "bqd,bkd->bqk"}> : () -> ()
    %cst_206 = arith.constant dense<0.000000e+00> : vector<8x8x8xf32>
    %658 = tpu.matmul %656, %657, %cst_206 {dimension_numbers = #tpu.dot_dimension_numbers<[2], [2], [1], [1], [0, 0, 0, 1, 1, 1], [0], [0]>} : vector<8x8x32xbf16>, vector<8x8x32xbf16>, vector<8x8x8xf32> -> vector<8x8x8xf32>
    "tpu.trace_stop"() : () -> ()
    %cst_207 = arith.constant 0.353553385 : f32
    %659 = vector.broadcast %cst_207 : f32 to vector<8x8x8xf32>
    %660 = arith.mulf %658, %659 : vector<8x8x8xf32>
    %cst_208 = arith.constant dense<0xFF800000> : vector<8x8xf32>
    %661 = vector.multi_reduction <maximumf>, %660, %cst_208 [2] : vector<8x8x8xf32> to vector<8x8xf32>
    %662 = vector.shape_cast %661 : vector<8x8xf32> to vector<8x8x1xf32>
    %663 = vector.broadcast %662 : vector<8x8x1xf32> to vector<8x8x8xf32>
    %664 = arith.subf %660, %663 : vector<8x8x8xf32>
    %665 = math.exp %664 : vector<8x8x8xf32>
    %cst_209 = arith.constant dense<0.000000e+00> : vector<8x8xf32>
    %666 = vector.multi_reduction <add>, %665, %cst_209 [2] : vector<8x8x8xf32> to vector<8x8xf32>
    %667 = vector.shape_cast %666 : vector<8x8xf32> to vector<8x8x1xf32>
    %668 = tpu.reciprocal %667 {approx = true} : vector<8x8x1xf32> -> vector<8x8x1xf32>
    %669 = vector.broadcast %668 : vector<8x8x1xf32> to vector<8x8x8xf32>
    %670 = arith.mulf %665, %669 : vector<8x8x8xf32>
    %671 = arith.truncf %670 : vector<8x8x8xf32> to vector<8x8x8xbf16>
    %672 = arith.truncf %655 : vector<8x8x32xf32> to vector<8x8x32xbf16>
    "tpu.trace_start"() <{level = 10 : i32, message = "bqk,bkd->bqd"}> : () -> ()
    %cst_210 = arith.constant dense<0.000000e+00> : vector<8x8x32xf32>
    %673 = tpu.matmul %671, %672, %cst_210 {dimension_numbers = #tpu.dot_dimension_numbers<[2], [1], [1], [2], [0, 0, 0, 1, 1, 2], [0], [0]>} : vector<8x8x8xbf16>, vector<8x8x32xbf16>, vector<8x8x32xf32> -> vector<8x8x32xf32>
    "tpu.trace_stop"() : () -> ()
    %674 = vector.shape_cast %673 : vector<8x8x32xf32> to vector<4x16x32xf32>
    %cst_211 = arith.constant dense<0.000000e+00> : vector<16x32xf32>
    %675 = vector.multi_reduction <add>, %674, %cst_211 [0] : vector<4x16x32xf32> to vector<16x32xf32>
    %c1120 = arith.constant 1120 : index
    %c0_212 = arith.constant 0 : index
    %676 = vector.load %arg2[%c1120, %c0_212] : memref<1248x128xbf16, #tpu.memory_space<vmem>>, vector<32x32xbf16>
    %677 = arith.truncf %675 : vector<16x32xf32> to vector<16x32xbf16>
    %cst_213 = arith.constant dense<0.000000e+00> : vector<16x32xf32>
    %678 = tpu.matmul %677, %676, %cst_213 {dimension_numbers = #tpu.dot_dimension_numbers<[1], [0], [0], [1], [0, 0, 1, 1], [], []>} : vector<16x32xbf16>, vector<32x32xbf16>, vector<16x32xf32> -> vector<16x32xf32>
    %c448_214 = arith.constant 448 : index
    %c0_215 = arith.constant 0 : index
    %679 = vector.load %arg3[%c448_214, %c0_215] : memref<520x128xf32, #tpu.memory_space<vmem>>, vector<1x32xf32>
    %680 = vector.broadcast %679 : vector<1x32xf32> to vector<16x32xf32>
    %681 = arith.addf %678, %680 : vector<16x32xf32>
    %682 = arith.addf %619, %681 : vector<16x32xf32>
    %c488 = arith.constant 488 : index
    %c0_216 = arith.constant 0 : index
    %683 = vector.load %arg3[%c488, %c0_216] : memref<520x128xf32, #tpu.memory_space<vmem>>, vector<1x32xf32>
    %c496 = arith.constant 496 : index
    %c0_217 = arith.constant 0 : index
    %684 = vector.load %arg3[%c496, %c0_217] : memref<520x128xf32, #tpu.memory_space<vmem>>, vector<1x32xf32>
    %cst_218 = arith.constant dense<0.000000e+00> : vector<16xf32>
    %685 = vector.multi_reduction <add>, %682, %cst_218 [1] : vector<16x32xf32> to vector<16xf32>
    %686 = vector.shape_cast %685 : vector<16xf32> to vector<16x1xf32>
    %cst_219 = arith.constant 3.200000e+01 : f32
    %687 = vector.broadcast %cst_219 : f32 to vector<16x1xf32>
    %688 = arith.divf %686, %687 : vector<16x1xf32>
    %689 = vector.broadcast %688 : vector<16x1xf32> to vector<16x32xf32>
    %690 = arith.subf %682, %689 : vector<16x32xf32>
    %691 = arith.mulf %690, %690 : vector<16x32xf32>
    %cst_220 = arith.constant dense<0.000000e+00> : vector<16xf32>
    %692 = vector.multi_reduction <add>, %691, %cst_220 [1] : vector<16x32xf32> to vector<16xf32>
    %693 = vector.shape_cast %692 : vector<16xf32> to vector<16x1xf32>
    %cst_221 = arith.constant 3.200000e+01 : f32
    %694 = vector.broadcast %cst_221 : f32 to vector<16x1xf32>
    %695 = arith.divf %693, %694 : vector<16x1xf32>
    %696 = vector.broadcast %688 : vector<16x1xf32> to vector<16x32xf32>
    %697 = arith.subf %682, %696 : vector<16x32xf32>
    %cst_222 = arith.constant 9.99999974E-6 : f32
    %698 = vector.broadcast %cst_222 : f32 to vector<16x1xf32>
    %699 = arith.addf %695, %698 : vector<16x1xf32>
    %700 = math.rsqrt %699 : vector<16x1xf32>
    %701 = vector.broadcast %700 : vector<16x1xf32> to vector<16x32xf32>
    %702 = arith.mulf %697, %701 : vector<16x32xf32>
    %703 = vector.broadcast %683 : vector<1x32xf32> to vector<16x32xf32>
    %704 = arith.mulf %702, %703 : vector<16x32xf32>
    %705 = vector.broadcast %684 : vector<1x32xf32> to vector<16x32xf32>
    %706 = arith.addf %704, %705 : vector<16x32xf32>
    %c1152 = arith.constant 1152 : index
    %c0_223 = arith.constant 0 : index
    %707 = vector.load %arg2[%c1152, %c0_223] : memref<1248x128xbf16, #tpu.memory_space<vmem>>, vector<32x64xbf16>
    %708 = arith.truncf %706 : vector<16x32xf32> to vector<16x32xbf16>
    %cst_224 = arith.constant dense<0.000000e+00> : vector<16x64xf32>
    %709 = tpu.matmul %708, %707, %cst_224 {dimension_numbers = #tpu.dot_dimension_numbers<[1], [0], [0], [1], [0, 0, 1, 1], [], []>} : vector<16x32xbf16>, vector<32x64xbf16>, vector<16x64xf32> -> vector<16x64xf32>
    %c456 = arith.constant 456 : index
    %c0_225 = arith.constant 0 : index
    %710 = vector.load %arg3[%c456, %c0_225] : memref<520x128xf32, #tpu.memory_space<vmem>>, vector<1x64xf32>
    %711 = vector.broadcast %710 : vector<1x64xf32> to vector<16x64xf32>
    %712 = arith.addf %709, %711 : vector<16x64xf32>
    %cst_226 = arith.constant 0.000000e+00 : f32
    %713 = vector.broadcast %cst_226 : f32 to vector<16x64xf32>
    %714 = arith.maximumf %712, %713 : vector<16x64xf32>
    %c1184 = arith.constant 1184 : index
    %c0_227 = arith.constant 0 : index
    %715 = vector.load %arg2[%c1184, %c0_227] : memref<1248x128xbf16, #tpu.memory_space<vmem>>, vector<64x32xbf16>
    %716 = arith.truncf %714 : vector<16x64xf32> to vector<16x64xbf16>
    %cst_228 = arith.constant dense<0.000000e+00> : vector<16x32xf32>
    %717 = tpu.matmul %716, %715, %cst_228 {dimension_numbers = #tpu.dot_dimension_numbers<[1], [0], [0], [1], [0, 0, 1, 1], [], []>} : vector<16x64xbf16>, vector<64x32xbf16>, vector<16x32xf32> -> vector<16x32xf32>
    %c464 = arith.constant 464 : index
    %c0_229 = arith.constant 0 : index
    %718 = vector.load %arg3[%c464, %c0_229] : memref<520x128xf32, #tpu.memory_space<vmem>>, vector<1x32xf32>
    %719 = vector.broadcast %718 : vector<1x32xf32> to vector<16x32xf32>
    %720 = arith.addf %717, %719 : vector<16x32xf32>
    %721 = arith.addf %706, %720 : vector<16x32xf32>
    %c504 = arith.constant 504 : index
    %c0_230 = arith.constant 0 : index
    %722 = vector.load %arg3[%c504, %c0_230] : memref<520x128xf32, #tpu.memory_space<vmem>>, vector<1x32xf32>
    %c512 = arith.constant 512 : index
    %c0_231 = arith.constant 0 : index
    %723 = vector.load %arg3[%c512, %c0_231] : memref<520x128xf32, #tpu.memory_space<vmem>>, vector<1x32xf32>
    %cst_232 = arith.constant dense<0.000000e+00> : vector<16xf32>
    %724 = vector.multi_reduction <add>, %721, %cst_232 [1] : vector<16x32xf32> to vector<16xf32>
    %725 = vector.shape_cast %724 : vector<16xf32> to vector<16x1xf32>
    %cst_233 = arith.constant 3.200000e+01 : f32
    %726 = vector.broadcast %cst_233 : f32 to vector<16x1xf32>
    %727 = arith.divf %725, %726 : vector<16x1xf32>
    %728 = vector.broadcast %727 : vector<16x1xf32> to vector<16x32xf32>
    %729 = arith.subf %721, %728 : vector<16x32xf32>
    %730 = arith.mulf %729, %729 : vector<16x32xf32>
    %cst_234 = arith.constant dense<0.000000e+00> : vector<16xf32>
    %731 = vector.multi_reduction <add>, %730, %cst_234 [1] : vector<16x32xf32> to vector<16xf32>
    %732 = vector.shape_cast %731 : vector<16xf32> to vector<16x1xf32>
    %cst_235 = arith.constant 3.200000e+01 : f32
    %733 = vector.broadcast %cst_235 : f32 to vector<16x1xf32>
    %734 = arith.divf %732, %733 : vector<16x1xf32>
    %735 = vector.broadcast %727 : vector<16x1xf32> to vector<16x32xf32>
    %736 = arith.subf %721, %735 : vector<16x32xf32>
    %cst_236 = arith.constant 9.99999974E-6 : f32
    %737 = vector.broadcast %cst_236 : f32 to vector<16x1xf32>
    %738 = arith.addf %734, %737 : vector<16x1xf32>
    %739 = math.rsqrt %738 : vector<16x1xf32>
    %740 = vector.broadcast %739 : vector<16x1xf32> to vector<16x32xf32>
    %741 = arith.mulf %736, %740 : vector<16x32xf32>
    %742 = vector.broadcast %722 : vector<1x32xf32> to vector<16x32xf32>
    %743 = arith.mulf %741, %742 : vector<16x32xf32>
    %744 = vector.broadcast %723 : vector<1x32xf32> to vector<16x32xf32>
    %745 = arith.addf %743, %744 : vector<16x32xf32>
    %c88 = arith.constant 88 : index
    %c0_237 = arith.constant 0 : index
    %746 = vector.load %arg3[%c88, %c0_237] : memref<520x128xf32, #tpu.memory_space<vmem>>, vector<1x32xf32>
    %c96_238 = arith.constant 96 : index
    %c0_239 = arith.constant 0 : index
    %747 = vector.load %arg3[%c96_238, %c0_239] : memref<520x128xf32, #tpu.memory_space<vmem>>, vector<1x32xf32>
    %cst_240 = arith.constant dense<0.000000e+00> : vector<16xf32>
    %748 = vector.multi_reduction <add>, %745, %cst_240 [1] : vector<16x32xf32> to vector<16xf32>
    %749 = vector.shape_cast %748 : vector<16xf32> to vector<16x1xf32>
    %cst_241 = arith.constant 3.200000e+01 : f32
    %750 = vector.broadcast %cst_241 : f32 to vector<16x1xf32>
    %751 = arith.divf %749, %750 : vector<16x1xf32>
    %752 = vector.broadcast %751 : vector<16x1xf32> to vector<16x32xf32>
    %753 = arith.subf %745, %752 : vector<16x32xf32>
    %754 = arith.mulf %753, %753 : vector<16x32xf32>
    %cst_242 = arith.constant dense<0.000000e+00> : vector<16xf32>
    %755 = vector.multi_reduction <add>, %754, %cst_242 [1] : vector<16x32xf32> to vector<16xf32>
    %756 = vector.shape_cast %755 : vector<16xf32> to vector<16x1xf32>
    %cst_243 = arith.constant 3.200000e+01 : f32
    %757 = vector.broadcast %cst_243 : f32 to vector<16x1xf32>
    %758 = arith.divf %756, %757 : vector<16x1xf32>
    %759 = vector.broadcast %751 : vector<16x1xf32> to vector<16x32xf32>
    %760 = arith.subf %745, %759 : vector<16x32xf32>
    %cst_244 = arith.constant 9.99999974E-6 : f32
    %761 = vector.broadcast %cst_244 : f32 to vector<16x1xf32>
    %762 = arith.addf %758, %761 : vector<16x1xf32>
    %763 = math.rsqrt %762 : vector<16x1xf32>
    %764 = vector.broadcast %763 : vector<16x1xf32> to vector<16x32xf32>
    %765 = arith.mulf %760, %764 : vector<16x32xf32>
    %766 = vector.broadcast %746 : vector<1x32xf32> to vector<16x32xf32>
    %767 = arith.mulf %765, %766 : vector<16x32xf32>
    %768 = vector.broadcast %747 : vector<1x32xf32> to vector<16x32xf32>
    %769 = arith.addf %767, %768 : vector<16x32xf32>
    %c64 = arith.constant 64 : index
    %c0_245 = arith.constant 0 : index
    %770 = vector.load %arg2[%c64, %c0_245] : memref<1248x128xbf16, #tpu.memory_space<vmem>>, vector<32x128xbf16>
    %771 = arith.truncf %769 : vector<16x32xf32> to vector<16x32xbf16>
    %cst_246 = arith.constant dense<0.000000e+00> : vector<16x128xf32>
    %772 = tpu.matmul %771, %770, %cst_246 {dimension_numbers = #tpu.dot_dimension_numbers<[1], [0], [0], [1], [0, 0, 1, 1], [], []>} : vector<16x32xbf16>, vector<32x128xbf16>, vector<16x128xf32> -> vector<16x128xf32>
    %c64_247 = arith.constant 64 : index
    %c0_248 = arith.constant 0 : index
    %773 = vector.load %arg3[%c64_247, %c0_248] : memref<520x128xf32, #tpu.memory_space<vmem>>, vector<1x128xf32>
    %774 = vector.broadcast %773 : vector<1x128xf32> to vector<16x128xf32>
    %775 = arith.addf %772, %774 : vector<16x128xf32>
    %c0_249 = arith.constant 0 : index
    %c0_250 = arith.constant 0 : index
    %776 = vector.load %arg4[%c0_249, %c0_250] : memref<16x128xf32, #tpu.memory_space<vmem>>, vector<16x128xf32>
    tpu.vector_store %arg4[%c0_249, %c0_250], %775 {strides = array<i32>} : memref<16x128xf32, #tpu.memory_space<vmem>>, vector<16x128xf32>,
    return
  }
}

</mosaic_0001>

<bundles_post_ra>
// kernel: _lambda_.1
= control target key start
LH: loop header
LB: loop body
LE: loop exit
PB: predicated region body
PF: predicated region fallthrough
CT: control target
= control target key end

     0   :  { %9 = vsyncpa [#allocation3], 0  ;;  %s11707_s0 = inlined_call_operand.vmem [shape: s32[16,1], index: 0, kind: input, shape index: {}]   ;;  %s11708_s1 = inlined_call_operand.vmem [shape: s32[16,1], index: 1, kind: input, shape index: {}]   ;;  %s11709_s2 = inlined_call_operand.hbm [shape: bf16[1248,128], index: 2, kind: input, shape index: {}]   ;;  %s11710_s3 = inlined_call_operand.hbm [shape: f32[520,128], index: 3, kind: input, shape index: {}]   ;;  %s11711_s4 = inlined_call_operand.vmem [shape: f32[16,128], index: 4, kind: output, shape index: {}]  }
   0x1   :  { %10 = vsyncpa [#allocation5], 0  ;;  %s10268_s15 = smov [#allocation2]   ;;  %s10220_s19 = scalar_lea.hbm %s11709_s2, 9984 }
   0x2   :  { %s20_s16 = sshll.u32 %s10268_s15, 4  ;;  %p10221_p0 = scmp.ne.s32.totalorder %s11709_s2, %s10220_s19  ;;  %s21_s16 = int_to_ptr.vmem [resolvable:$true] %s20_s16 }
   0x3   :  { %p10224_p1 = scmp.lt.u32.totalorder %s10220_s19, %s11709_s2 }
   0x5   :  { %p10226_p2 = pnand %p10224_p1, %p10221_p0 }
   0x7   :  { %10229 = shalt.err (!%p10226_p2)
}
   0x8   :  { %s10230_s24 = scalar_lea.vmem %s21_s16, 9984  ;;  %p10235_p4 = scmp.lt.s32.totalorder %s21_s16, %s21_s16 }
   0x9   :  { %p10231_p3 = scmp.ne.s32.totalorder %s21_s16, %s10230_s24  ;;  %p10236_p5 = scmp.lt.s32.totalorder %s10230_s24, %s10230_s24 }
   0xb   :  { %p10237_p6 = por %p10236_p5, %p10235_p4 }
   0xd   :  { %p10238_p7 = pnand %p10237_p6, %p10231_p3 }
   0xf   :  { %10241 = shalt.err (!%p10238_p7)
}
  0x10   :  { %s10269_s25 = smov 64   ;;  %s10270_s26 = smov 4  }
  0x11   :  { %26 = dma.hbm_to_vmem [thread:$0]  %s11709_s2, 9984, %s21_s16, [#allocation3], %s10269_s25, %s10269_s25, %s10270_s26  }
  0x12   :  { %s10271_s29 = smov [#allocation4]   ;;  %s10242_s7 = scalar_lea.hbm %s11710_s3, 8320 }
  0x13   :  { %s32_s30 = sshll.u32 %s10271_s29, 4  ;;  %p10243_p8 = scmp.ne.s32.totalorder %s11710_s3, %s10242_s7  ;;  %s33_s30 = int_to_ptr.vmem [resolvable:$true] %s32_s30 }
  0x14   :  { %p10246_p9 = scmp.lt.u32.totalorder %s10242_s7, %s11710_s3 }
  0x16   :  { %p10248_p10 = pnand %p10246_p9, %p10243_p8 }
  0x18   :  { %10251 = shalt.err (!%p10248_p10)
}
  0x19   :  { %s10252_s12 = scalar_lea.vmem %s33_s30, 8320  ;;  %p10257_p12 = scmp.lt.s32.totalorder %s33_s30, %s33_s30 }
  0x1a   :  { %p10253_p11 = scmp.ne.s32.totalorder %s33_s30, %s10252_s12  ;;  %p10258_p13 = scmp.lt.s32.totalorder %s10252_s12, %s10252_s12 }
  0x1c   :  { %p10259_p0 = por %p10258_p13, %p10257_p12 }
  0x1e   :  { %p10260_p1 = pnand %p10259_p0, %p10253_p11 }
  0x20   :  { %10263 = shalt.err (!%p10260_p1)
}
  0x21   :  { %s10272_s2 = smov 128   ;;  %s10273_s13 = smov 8  }
  0x22   :  { %38 = dma.hbm_to_vmem [thread:$0]  %s11710_s3, 8320, %s33_s30, [#allocation5], %s10272_s2, %s10272_s2, %s10273_s13  }
  0x23   :  { %10264 = dma.done.wait [#allocation3], 9984  }
  0x24   :  { %10265 = vsyncadd [#allocation3], 4294957312 }
  0x25   :  { %10266 = dma.done.wait [#allocation5], 8320  }
  0x26   :  { %10267 = vsyncadd [#allocation5], 4294958976  ;;  %v10274_v0 = vmov 0   ;;  %v10275_v1 = vmov 0.0   ;;  %v83_v2 = vld [vmem:[%s11707_s0] sm:$0xff]  ;;  %v84_v4 = vld [vmem:[%s11707_s0 + $0x8] sm:$0xff]  ;;  %v46_v8 = vlaneseq }
  0x27   :  { %9896 = vset.pattern.permute.xlu0 %v10274_v0  ;;  %9006 = vmatprep.subr.bf16.mxu0 %v10275_v1  ;;  %v9898_v3 = vld [vmem:[#allocation2] sm:$0xff]   ;;  %v9899_v5 = vld [vmem:[#allocation2 + $0x8] sm:$0xff]   ;;  %v9900_v6 = vld [vmem:[#allocation2 + $0x10] sm:$0xff]   ;;  %vm10276_vm0 = vmmov 0   ;;  %vm130_vm3 = vcmask 523264   ;;  %vm200_vm4 = vcmask 261120  }
  0x28   :  { %9018 = vmatprep.subr.bf16.mxu1 %v10275_v1  ;;  %9897 = vset.pattern.permute.xlu1 %v10274_v0  ;;  %v9901_v7 = vld [vmem:[#allocation2 + $0x18] sm:$0xff]   ;;  %v10343_v9 = vand.u32 127, %v46_v8  ;;  %v9902_v15 = vld [vmem:[#allocation2 + $0x30] sm:$0xff]   ;;  %v9906_v26 = vld [vmem:[#allocation2 + $0x40] sm:$0xff]   ;;  %v49_v29 = vshrl.u32 %v46_v8, 7  ;;  %vm913_vm8 = vcmask 1043456  }
  0x29   :  { %86 = vperm.xlu0 %9896, %v83_v2   ;;  %9007 = vmatpush3.bf16.msra.mxu0 %v9898_v3  ;;  %v9903_v16 = vld [vmem:[#allocation2 + $0x50] sm:$0xff]   ;;  %v9904_v17 = vld [vmem:[#allocation2 + $0x38] sm:$0xff]   ;;  %v9907_v28 = vld [vmem:[#allocation2 + $0x48] sm:$0xff]   ;;  %v10277_v33 = vmov 1966171168   ;;  %vm805_vm9 = vcmask 64512  }
  0x2a   :  { %9008 = vmatprep.subr.bf16.mxu0 %v10275_v1  ;;  %9014 = vmatprep.mubr.msk.bf16.mxu0 %vm10276_vm0, %v10275_v1  ;;  %v9905_v18 = vld [vmem:[#allocation2 + $0x58] sm:$0xff]   ;;  %v175_v20 = vld [vmem:[#allocation4] sm:$0xff]  ;;  %v52_v30 = vadd.s32 1, %v49_v29  ;;  %v50_v31 = vmul.u32 8, %v49_v29  ;;  %v60_v34 = vunpack.c.l.s4 %v10277_v33  ;;  %v371_v47 = vsub.s32 0, %v49_v29 }
  0x2b   :  { %9022 = vmatprep.mubr.msk.bf16.mxu1 %vm10276_vm0, %v10275_v1  ;;  %9019 = vmatpush3.bf16.msra.mxu1 %v9902_v15  ;;  %v8434_v48 = vld [vmem:[#allocation4 + $0x70] ss:$0 sm:$0xff]  ;;  %v8430_v55 = vld [vmem:[#allocation4 + $0x68] ss:$0 sm:$0xff]  ;;  %v8438_v33 = vld [vmem:[#allocation4 + $0x78] ss:$0 sm:$0xff] }
  0x2c   :  { %9020 = vmatprep.subr.bf16.mxu1 %v10275_v1  ;;  %v53_v32 = vmul.u32 8, %v52_v30  ;;  %vm51_vm5 = vcmp.ge.s32.totalorder %v10343_v9, %v50_v31  ;;  %v61_v35 = vunpack.c.0.s8 %v60_v34 }
  0x2d   :  { %89 = vperm.xlu0 %9896, %v84_v4   ;;  %9009 = vmatpush3.bf16.msra.mxu0 %v9899_v5 }
  0x2e   :  { %9010 = vmatprep.subr.bf16.mxu0 %v10275_v1  ;;  %vm54_vm6 = vcmp.lt.s32.totalorder %v10343_v9, %v53_v32  ;;  %v64_v36 = vsub.s32 %v61_v35, %v49_v29 }
  0x2f   :  { %9021 = vmatpush3.bf16.msra.mxu1 %v9904_v17  ;;  %vm55_vm7 = vmand %vm51_vm5, %vm54_vm6 }
  0x30   :  { %9026 = vmatprep.subr.bf16.mxu1 %v10275_v1  ;;  %v8422_v37 = vsel %vm55_vm7, 1.0, %v10275_v1 }
  0x31   :  { %9011 = vmatpush3.bf16.msra.mxu0 %v9900_v6  ;;  %v65_v44 = vrot.slane %v8422_v37, %v64_v36 }
  0x32   :  { %9012 = vmatprep.subr.bf16.mxu0 %v10275_v1 }
  0x33   :  { %v66_v49 = vcombine.high %v65_v44, %v65_v44  ;;  %v73_v50 = vrot.slane %v65_v44, %v64_v36 }
  0x35   :  { %9013 = vmatpush3.bf16.msra.mxu0 %v9901_v7  ;;  %v10380_v52 = vrot.slane %v73_v50, %v371_v47  ;;  %v80_v57 = vrot.slane %v66_v49, %v64_v36  ;;  %v81_v6 = vcombine.high %v73_v50, %v73_v50 }
  0x36   :  { %9034 = vmatprep.subr.bf16.mxu0 %v10275_v1 }
  0x37   :  { %v10383_v61 = vrot.slane %v80_v57, %v371_v47 }
  0xa8   :  { %v87_v10 = vpop.permute.xlu0 %86 }
  0xa9   :  { %vm91_vm1 = vcmp.eq.s32.totalorder %v87_v10, %v10343_v9 }
  0xaa   :  { %v8423_v12 = vsel %vm91_vm1, 1.0, %v10275_v1 }
  0xac   :  { %v90_v11 = vpop.permute.xlu0 %89 }
  0xad   :  { %vm92_vm2 = vcmp.eq.s32.totalorder %v90_v11, %v10343_v9 }
  0xae   :  { %v8424_v13 = vsel %vm92_vm2, 1.0, %v10275_v1 }
  0xaf   :  { %v97_v14 = vpack.c.bf16 %v8424_v13, %v8423_v12  ;;  %v10400_v13 = vrot.slane %v81_v6, %v371_v47 }
  0xb1   :  { %9015 = vmatmul.mubr.msk.bf16.vlgmr.msra.gmra.mrb[0].mxu0 %vm130_vm3, %v97_v14 }
  0xb2   :  { %9038 = vmatprep.mubr.msk.bf16.mxu0 %vm10276_vm0, %v10275_v1  ;;  %9035 = vmatpush3.bf16.msra.mxu0 %v9903_v16 }
  0xb3   :  { %9036 = vmatprep.subr.bf16.mxu0 %v10275_v1 }
  0xb6   :  { %9037 = vmatpush3.bf16.msra.mxu0 %v9905_v18 }
  0xb7   :  { %9048 = vmatprep.subr.bf16.mxu0 %v10275_v1 }
 0x184   :  { %v168_v19 = vpop.f32.mrb[0].mxu0 }
 0x185   :  { %v9016_v21 = vpop.f32.mrb[1].mxu0  ;;  %v10356_v23 = vadd.f32 %v175_v20, %v168_v19  ;;  %v82_v19 = vcombine.high %v80_v57, %v80_v57 }
 0x186   :  { %v171_v22 = vpop.f32.mrb[2].mxu0 }
 0x187   :  { %v10358_v24 = vadd.f32 %v175_v20, %v171_v22  ;;  %v9017_v25 = vpop.f32.mrb[3].mxu0 }
 0x189   :  { %v182_v27 = vpack.c.bf16 %v10358_v24, %v10356_v23 }
 0x18b   :  { %9023 = vmatmul.mubr.msk.bf16.vlgmr.msra.gmra.mrb[0].mxu1 %vm200_vm4, %v182_v27  ;;  %9039 = vmatmul.mubr.msk.bf16.vlgmr.msra.gmra.mrb[4].mxu0 %vm200_vm4, %v182_v27 }
 0x18c   :  { %9027 = vmatpush3.bf16.msra.mxu1 %v9906_v26  ;;  %9030 = vmatprep.mubr.msk.bf16.mxu1 %vm10276_vm0, %v10275_v1 }
 0x18d   :  { %9028 = vmatprep.subr.bf16.mxu1 %v10275_v1  ;;  %9050 = vmatprep.mubr.msk.bf16.mxu0 %vm10276_vm0, %v10275_v1 }
 0x190   :  { %9029 = vmatpush3.bf16.msra.mxu1 %v9907_v28 }
 0x191   :  { %9042 = vmatprep.subr.bf16.mxu1 %v10275_v1 }
 0x193   :  { %9031 = vmatmul.mubr.msk.bf16.vlgmr.msra.gmra.mrb[4].mxu1 %vm200_vm4, %v182_v27  ;;  %v10418_v27 = vrot.slane %v82_v19, %v371_v47 }
 0x194   :  { %9044 = vmatprep.mubr.msk.bf16.mxu1 %vm10276_vm0, %v10275_v1 }
 0x25e   :  { %v238_v38 = vpop.f32.mrb[0].mxu1  ;;  %v10376_v39 = vpop.f32.mrb[4].mxu0 }
 0x25f   :  { %v9024_v40 = vpop.f32.mrb[1].mxu1  ;;  %v9040_v41 = vpop.f32.mrb[5].mxu0  ;;  %v10385_v62 = vadd.f32 %v8430_v55, %v238_v38  ;;  %v10434_v37 = vadd.f32 %v8438_v33, %v10376_v39 }
 0x260   :  { %v241_v42 = vpop.f32.mrb[2].mxu1  ;;  %v10378_v43 = vpop.f32.mrb[6].mxu0 }
 0x261   :  { %v9025_v45 = vpop.f32.mrb[3].mxu1  ;;  %v9041_v46 = vpop.f32.mrb[7].mxu0  ;;  %v10388_v2 = vadd.f32 %v8430_v55, %v241_v42  ;;  %v389_v7 = vmul.f32 %v10380_v52, %v10385_v62  ;;  %v391_v20 = vmul.f32 %v10383_v61, %v10385_v62  ;;  %v393_v34 = vmul.f32 %v10400_v13, %v10385_v62 }
 0x262   :  { %v10440_v41 = vadd.f32 %v8438_v33, %v10378_v43  ;;  %v405_v39 = vmul.f32 %v10380_v52, %v10434_v37  ;;  %v395_v47 = vmul.f32 %v10418_v27, %v10385_v62 }
 0x263   :  { %v390_v11 = vmul.f32 %v10380_v52, %v10388_v2  ;;  %v413_v14 = vpack.c.bf16 %v389_v7, %v389_v7  ;;  %v392_v25 = vmul.f32 %v10383_v61, %v10388_v2  ;;  %v415_v28 = vpack.c.bf16 %v391_v20, %v391_v20 }
 0x264   :  { %v394_v38 = vmul.f32 %v10400_v13, %v10388_v2  ;;  %v417_v42 = vpack.c.bf16 %v393_v34, %v393_v34  ;;  %v396_v49 = vmul.f32 %v10418_v27, %v10388_v2  ;;  %v902_v50 = vpack.c.bf16 %v405_v39, %v405_v39 }
 0x265   :  { %v414_v17 = vpack.c.bf16 %v390_v11, %v390_v11  ;;  %v416_v31 = vpack.c.bf16 %v392_v25, %v392_v25 }
 0x266   :  { %v300_v51 = vpop.f32.mrb[4].mxu1  ;;  %v418_v46 = vpack.c.bf16 %v394_v38, %v394_v38  ;;  %v420_v55 = vpack.c.bf16 %v396_v49, %v396_v49 }
 0x267   :  { %v301_v53 = vadd.f32 %v8434_v48, %v300_v51  ;;  %v9032_v54 = vpop.f32.mrb[5].mxu1  ;;  %v419_v51 = vpack.c.bf16 %v395_v47, %v395_v47 }
 0x268   :  { %v303_v56 = vpop.f32.mrb[6].mxu1  ;;  %v915_v54 = vsel %vm913_vm8, %v902_v50, 0 }
 0x269   :  { %v304_v58 = vadd.f32 %v8434_v48, %v303_v56  ;;  %v9033_v59 = vpop.f32.mrb[7].mxu1  ;;  %v397_v60 = vmul.f32 %v10380_v52, %v301_v53  ;;  %v399_v5 = vmul.f32 %v10383_v61, %v301_v53  ;;  %v401_v18 = vmul.f32 %v10400_v13, %v301_v53 }
 0x26a   :  { %v403_v32 = vmul.f32 %v10418_v27, %v301_v53  ;;  %v406_v48 = vmul.f32 %v10380_v52, %v10440_v41 }
 0x26b   :  { %v421_v63 = vpack.c.bf16 %v397_v60, %v397_v60  ;;  %v398_v0 = vmul.f32 %v10380_v52, %v304_v58  ;;  %v400_v10 = vmul.f32 %v10383_v61, %v304_v58  ;;  %v423_v12 = vpack.c.bf16 %v399_v5, %v399_v5 }
 0x26c   :  { %v402_v22 = vmul.f32 %v10400_v13, %v304_v58  ;;  %v425_v26 = vpack.c.bf16 %v401_v18, %v401_v18  ;;  %v404_v36 = vmul.f32 %v10418_v27, %v304_v58  ;;  %v427_v40 = vpack.c.bf16 %v403_v32, %v403_v32 }
 0x26d   :  { %v433_v3 = vsel %vm200_vm4, %v421_v63, 0  ;;  %v422_v4 = vpack.c.bf16 %v398_v0, %v398_v0  ;;  %v424_v15 = vpack.c.bf16 %v400_v10, %v400_v10  ;;  %v525_v16 = vsel %vm200_vm4, %v423_v12, 0 }
 0x26e   :  { %9043 = vmatpush3.bf16.xpose.msra.mxu1 %v433_v3  ;;  %v426_v29 = vpack.c.bf16 %v402_v22, %v402_v22  ;;  %v617_v30 = vsel %vm200_vm4, %v425_v26, 0  ;;  %v428_v44 = vpack.c.bf16 %v404_v36, %v404_v36  ;;  %v709_v45 = vsel %vm200_vm4, %v427_v40, 0 }
 0x26f   :  { %v479_v8 = vsel %vm200_vm4, %v422_v4, 0  ;;  %9054 = vmatprep.subr.bf16.mxu1 %v10275_v1  ;;  %v571_v21 = vsel %vm200_vm4, %v424_v15, 0  ;;  %v903_v53 = vpack.c.bf16 %v406_v48, %v406_v48 }
 0x270   :  { %9049 = vmatpush3.bf16.xpose.msra.mxu0 %v479_v8  ;;  %v663_v35 = vsel %vm200_vm4, %v426_v29, 0  ;;  %v755_v43 = vsel %vm200_vm4, %v428_v44, 0 }
 0x271   :  { %9060 = vmatprep.subr.bf16.mxu0 %v10275_v1  ;;  %v961_v56 = vsel %vm913_vm8, %v903_v53, 0 }
 0x275   :  { %9045 = vmatmul.mubr.msk.bf16.vlgmr.msra.gmra.mrb[8].mxu1 %vm200_vm4, %v413_v14 }
 0x276   :  { %9055 = vmatpush3.bf16.xpose.msra.mxu1 %v525_v16  ;;  %9056 = vmatprep.mubr.msk.bf16.mxu1 %vm10276_vm0, %v10275_v1 }
 0x277   :  { %9051 = vmatmul.mubr.msk.bf16.vlgmr.msra.gmra.mrb[8].mxu0 %vm200_vm4, %v414_v17  ;;  %9066 = vmatprep.subr.bf16.mxu1 %v10275_v1 }
 0x278   :  { %9061 = vmatpush3.bf16.xpose.msra.mxu0 %v571_v21  ;;  %9062 = vmatprep.mubr.msk.bf16.mxu0 %vm10276_vm0, %v10275_v1 }
 0x279   :  { %9072 = vmatprep.subr.bf16.mxu0 %v10275_v1 }
 0x27d   :  { %9057 = vmatmul.mubr.msk.bf16.vlgmr.msra.gmra.mrb[12].mxu1 %vm200_vm4, %v415_v28 }
 0x27e   :  { %9067 = vmatpush3.bf16.xpose.msra.mxu1 %v617_v30  ;;  %9068 = vmatprep.mubr.msk.bf16.mxu1 %vm10276_vm0, %v10275_v1 }
 0x27f   :  { %9063 = vmatmul.mubr.msk.bf16.vlgmr.msra.gmra.mrb[12].mxu0 %vm200_vm4, %v416_v31  ;;  %9078 = vmatprep.subr.bf16.mxu1 %v10275_v1 }
 0x280   :  { %9073 = vmatpush3.bf16.xpose.msra.mxu0 %v663_v35  ;;  %9074 = vmatprep.mubr.msk.bf16.mxu0 %vm10276_vm0, %v10275_v1 }
 0x281   :  { %9084 = vmatprep.subr.bf16.mxu0 %v10275_v1 }
 0x285   :  { %9069 = vmatmul.mubr.msk.bf16.vlgmr.msra.gmra.mrb[16].mxu1 %vm200_vm4, %v417_v42 }
 0x286   :  { %9079 = vmatpush3.bf16.xpose.msra.mxu1 %v709_v45  ;;  %9080 = vmatprep.mubr.msk.bf16.mxu1 %vm10276_vm0, %v10275_v1 }
 0x287   :  { %9075 = vmatmul.mubr.msk.bf16.vlgmr.msra.gmra.mrb[16].mxu0 %vm200_vm4, %v418_v46  ;;  %9090 = vmatprep.subr.bf16.mxu1 %v10275_v1 }
 0x288   :  { %9085 = vmatpush3.bf16.xpose.msra.mxu0 %v755_v43  ;;  %9086 = vmatprep.mubr.msk.bf16.mxu0 %vm10276_vm0, %v10275_v1 }
 0x289   :  { %9096 = vmatprep.subr.bf16.mxu0 %v10275_v1 }
 0x28d   :  { %9081 = vmatmul.mubr.msk.bf16.vlgmr.msra.gmra.mrb[20].mxu1 %vm200_vm4, %v419_v51 }
 0x28e   :  { %9091 = vmatpush3.bf16.msra.mxu1 %v915_v54  ;;  %9092 = vmatprep.mubr.msk.bf16.mxu1 %vm10276_vm0, %v10275_v1 }
 0x28f   :  { %9087 = vmatmul.mubr.msk.bf16.vlgmr.msra.gmra.mrb[20].mxu0 %vm200_vm4, %v420_v55  ;;  %9102 = vmatprep.subr.bf16.mxu1 %v10275_v1 }
 0x290   :  { %9097 = vmatpush3.bf16.msra.mxu0 %v961_v56  ;;  %9098 = vmatprep.mubr.msk.bf16.mxu0 %vm10276_vm0, %v10275_v1 }
 0x291   :  { %9108 = vmatprep.subr.bf16.mxu0 %v10275_v1 }
 0x348   :  { %v469_v57 = vpop.f32.mrb[8].mxu1 }
 0x349   :  { %v797_v58 = vmul.f32 0.35355338, %v469_v57  ;;  %v9046_v59 = vpop.f32.mrb[9].mxu1 }
 0x34a   :  { %v472_v60 = vpop.f32.mrb[10].mxu1  ;;  %v515_v62 = vpop.f32.mrb[8].mxu0 }
 0x34b   :  { %v798_v63 = vmul.f32 0.35355338, %v515_v62  ;;  %v9047_v0 = vpop.f32.mrb[11].mxu1  ;;  %v9052_v2 = vpop.f32.mrb[9].mxu0  ;;  %v806_v3 = vsel %vm805_vm9, %v797_v58, -inf }
 0x34c   :  { %807 = vmax.xlane.f32.xlu1 %v806_v3  ;;  %v518_v4 = vpop.f32.mrb[10].mxu0 }
 0x34d   :  { %v9053_v5 = vpop.f32.mrb[11].mxu0  ;;  %v809_v6 = vsel %vm805_vm9, %v798_v63, -inf }
 0x350   :  { %v561_v7 = vpop.f32.mrb[12].mxu1  ;;  %810 = vmax.xlane.f32.xlu1 %v809_v6 }
 0x351   :  { %v799_v8 = vmul.f32 0.35355338, %v561_v7  ;;  %v9058_v10 = vpop.f32.mrb[13].mxu1 }
 0x352   :  { %v564_v11 = vpop.f32.mrb[14].mxu1  ;;  %v607_v12 = vpop.f32.mrb[12].mxu0 }
 0x353   :  { %v800_v14 = vmul.f32 0.35355338, %v607_v12  ;;  %v9059_v15 = vpop.f32.mrb[15].mxu1  ;;  %v9064_v16 = vpop.f32.mrb[13].mxu0  ;;  %v812_v17 = vsel %vm805_vm9, %v799_v8, -inf }
 0x354   :  { %813 = vmax.xlane.f32.xlu0 %v812_v17  ;;  %v610_v18 = vpop.f32.mrb[14].mxu0 }
 0x355   :  { %v9065_v19 = vpop.f32.mrb[15].mxu0  ;;  %v815_v20 = vsel %vm805_vm9, %v800_v14, -inf }
 0x356   :  { %816 = vmax.xlane.f32.xlu1 %v815_v20 }
 0x358   :  { %v653_v21 = vpop.f32.mrb[16].mxu1 }
 0x359   :  { %v801_v22 = vmul.f32 0.35355338, %v653_v21  ;;  %v9070_v25 = vpop.f32.mrb[17].mxu1 }
 0x35a   :  { %v656_v26 = vpop.f32.mrb[18].mxu1  ;;  %v699_v28 = vpop.f32.mrb[16].mxu0 }
 0x35b   :  { %v802_v29 = vmul.f32 0.35355338, %v699_v28  ;;  %v9071_v30 = vpop.f32.mrb[19].mxu1  ;;  %v9076_v31 = vpop.f32.mrb[17].mxu0  ;;  %v818_v32 = vsel %vm805_vm9, %v801_v22, -inf }
 0x35c   :  { %819 = vmax.xlane.f32.xlu1 %v818_v32  ;;  %v702_v33 = vpop.f32.mrb[18].mxu0 }
 0x35d   :  { %v9077_v34 = vpop.f32.mrb[19].mxu0  ;;  %v821_v35 = vsel %vm805_vm9, %v802_v29, -inf }
 0x360   :  { %v745_v36 = vpop.f32.mrb[20].mxu1  ;;  %822 = vmax.xlane.f32.xlu1 %v821_v35 }
 0x361   :  { %v803_v38 = vmul.f32 0.35355338, %v745_v36  ;;  %v9082_v40 = vpop.f32.mrb[21].mxu1 }
 0x362   :  { %v748_v42 = vpop.f32.mrb[22].mxu1  ;;  %v791_v44 = vpop.f32.mrb[20].mxu0 }
 0x363   :  { %v804_v45 = vmul.f32 0.35355338, %v791_v44  ;;  %v9083_v46 = vpop.f32.mrb[23].mxu1  ;;  %v9088_v39 = vpop.f32.mrb[21].mxu0  ;;  %v824_v47 = vsel %vm805_vm9, %v803_v38, -inf }
 0x364   :  { %825 = vmax.xlane.f32.xlu1 %v824_v47  ;;  %v794_v43 = vpop.f32.mrb[22].mxu0  ;;  %v408_v46 = vmul.f32 %v10383_v61, %v10440_v41 }
 0x365   :  { %v9089_v48 = vpop.f32.mrb[23].mxu0  ;;  %v827_v49 = vsel %vm805_vm9, %v804_v45, -inf }
 0x368   :  { %828 = vmax.xlane.f32.xlu1 %v827_v49 }
 0x3d9   :  { %v808_v50 = vpop.xlane.xlu1 %807 }
 0x3da   :  { %v830_v51 = vsub.f32 %v797_v58, %v808_v50  ;;  %v905_v50 = vpack.c.bf16 %v408_v46, %v408_v46 }
 0x3dc   :  { %v838_v53 = vmul.f32 1.442695, %v830_v51  ;;  %v409_v51 = vmul.f32 %v10400_v13, %v10434_v37 }
 0x3dd   :  { %v811_v54 = vpop.xlane.xlu1 %810 }
 0x3de   :  { %9980 = vpow2.f32 %v838_v53  ;;  %v831_v55 = vsub.f32 %v798_v63, %v811_v54 }
 0x3e0   :  { %v840_v56 = vmul.f32 1.442695, %v831_v55 }
 0x3e1   :  { %v814_v57 = vpop.xlane.xlu0 %813 }
 0x3e2   :  { %9982 = vpow2.f32 %v840_v56  ;;  %v832_v59 = vsub.f32 %v799_v8, %v814_v57  ;;  %v1053_v56 = vsel %vm913_vm8, %v905_v50, 0 }
 0x3e3   :  { %v817_v60 = vpop.xlane.xlu1 %816 }
 0x3e4   :  { %v842_v62 = vmul.f32 1.442695, %v832_v59  ;;  %v833_v0 = vsub.f32 %v800_v14, %v817_v60  ;;  %v906_v59 = vpack.c.bf16 %v409_v51, %v409_v51  ;;  %v410_v60 = vmul.f32 %v10400_v13, %v10440_v41 }
 0x3e6   :  { %9984 = vpow2.f32 %v842_v62  ;;  %v844_v2 = vmul.f32 1.442695, %v833_v0 }
 0x3e8   :  { %v9981_v3 = vpop.eup %9980  ;;  %9986 = vpow2.f32 %v844_v2 }
 0x3e9   :  { %v820_v4 = vpop.xlane.xlu1 %819  ;;  %v854_v5 = vsel %vm805_vm9, %v9981_v3, 0.0 }
 0x3ea   :  { %v834_v6 = vsub.f32 %v801_v22, %v820_v4  ;;  %855 = vadd.xlane.f32.xlu1 %v854_v5  ;;  %v907_v5 = vpack.c.bf16 %v410_v60, %v410_v60 }
 0x3ec   :  { %v9983_v58 = vpop.eup %9982  ;;  %v846_v7 = vmul.f32 1.442695, %v834_v6  ;;  %v411_v6 = vmul.f32 %v10418_v27, %v10434_v37 }
 0x3ed   :  { %v823_v10 = vpop.xlane.xlu1 %822  ;;  %v857_v63 = vsel %vm805_vm9, %v9983_v58, 0.0 }
 0x3ee   :  { %9988 = vpow2.f32 %v846_v7  ;;  %v835_v11 = vsub.f32 %v802_v29, %v823_v10  ;;  %858 = vadd.xlane.f32.xlu1 %v857_v63  ;;  %v1145_v63 = vsel %vm913_vm8, %v907_v5, 0 }
 0x3f0   :  { %v9985_v8 = vpop.eup %9984  ;;  %v848_v12 = vmul.f32 1.442695, %v835_v11 }
 0x3f1   :  { %v826_v14 = vpop.xlane.xlu1 %825  ;;  %v860_v15 = vsel %vm805_vm9, %v9985_v8, 0.0 }
 0x3f2   :  { %v10481_v16 = vpop.eup %9986  ;;  %9990 = vpow2.f32 %v848_v12  ;;  %v836_v17 = vsub.f32 %v803_v38, %v826_v14  ;;  %861 = vadd.xlane.f32.xlu1 %v860_v15  ;;  %v407_v38 = vmul.f32 %v10383_v61, %v10434_v37  ;;  %v412_v37 = vmul.f32 %v10418_v27, %v10440_v41 }
 0x3f3   :  { %v863_v18 = vsel %vm805_vm9, %v10481_v16, 0.0 }
 0x3f4   :  { %v850_v19 = vmul.f32 1.442695, %v836_v17  ;;  %864 = vadd.xlane.f32.xlu0 %v863_v18  ;;  %v909_v17 = vpack.c.bf16 %v412_v37, %v412_v37 }
 0x3f5   :  { %v829_v20 = vpop.xlane.xlu1 %828 }
 0x3f6   :  { %9992 = vpow2.f32 %v850_v19  ;;  %v837_v21 = vsub.f32 %v804_v45, %v829_v20  ;;  %v904_v45 = vpack.c.bf16 %v407_v38, %v407_v38  ;;  %v1237_v19 = vsel %vm913_vm8, %v909_v17, 0 }
 0x3f8   :  { %v10485_v22 = vpop.eup %9988  ;;  %v852_v25 = vmul.f32 1.442695, %v837_v21  ;;  %v1007_v43 = vsel %vm913_vm8, %v904_v45, 0 }
 0x3f9   :  { %v866_v26 = vsel %vm805_vm9, %v10485_v22, 0.0 }
 0x3fa   :  { %9994 = vpow2.f32 %v852_v25  ;;  %867 = vadd.xlane.f32.xlu1 %v866_v26 }
 0x3fc   :  { %v10489_v28 = vpop.eup %9990 }
 0x3fd   :  { %v869_v29 = vsel %vm805_vm9, %v10489_v28, 0.0 }
 0x3fe   :  { %870 = vadd.xlane.f32.xlu0 %v869_v29  ;;  %v9909_v29 = vld [vmem:[#allocation2 + $0x68] sm:$0xff]  }
 0x400   :  { %v10493_v30 = vpop.eup %9992 }
 0x401   :  { %v872_v31 = vsel %vm805_vm9, %v10493_v30, 0.0 }
 0x402   :  { %873 = vadd.xlane.f32.xlu1 %v872_v31 }
 0x404   :  { %v10497_v32 = vpop.eup %9994 }
 0x405   :  { %v875_v33 = vsel %vm805_vm9, %v10497_v32, 0.0 }
 0x406   :  { %876 = vadd.xlane.f32.xlu0 %v875_v33 }
 0x477   :  { %v856_v34 = vpop.xlane.xlu1 %855 }
 0x478   :  { %9996 = vrcp.f32 %v856_v34 }
 0x47b   :  { %v859_v35 = vpop.xlane.xlu1 %858 }
 0x47c   :  { %9998 = vrcp.f32 %v859_v35 }
 0x47f   :  { %v862_v36 = vpop.xlane.xlu1 %861 }
 0x480   :  { %10000 = vrcp.f32 %v862_v36 }
 0x481   :  { %v865_v40 = vpop.xlane.xlu0 %864 }
 0x482   :  { %v9997_v42 = vpop.eup %9996  ;;  %10002 = vrcp.f32 %v865_v40 }
 0x483   :  { %v886_v44 = vmul.f32 %v9997_v42, %v9981_v3  ;;  %v1099_v3 = vsel %vm913_vm8, %v906_v59, 0 }
 0x485   :  { %v894_v39 = vpack.c.bf16 %v886_v44, %v886_v44 }
 0x486   :  { %v9999_v47 = vpop.eup %9998 }
 0x487   :  { %9093 = vmatmul.mubr.msk.bf16.vlgmr.msra.gmra.mrb[24].mxu1 %vm805_vm9, %v894_v39  ;;  %v868_v48 = vpop.xlane.xlu1 %867  ;;  %v887_v49 = vmul.f32 %v9999_v47, %v9983_v58 }
 0x488   :  { %9103 = vmatpush3.bf16.msra.mxu1 %v1007_v43  ;;  %10004 = vrcp.f32 %v868_v48  ;;  %9104 = vmatprep.mubr.msk.bf16.mxu1 %vm10276_vm0, %v10275_v1 }
 0x489   :  { %v895_v53 = vpack.c.bf16 %v887_v49, %v887_v49  ;;  %9114 = vmatprep.subr.bf16.mxu1 %v10275_v1 }
 0x48a   :  { %v10001_v54 = vpop.eup %10000 }
 0x48b   :  { %v871_v55 = vpop.xlane.xlu0 %870  ;;  %9099 = vmatmul.mubr.msk.bf16.vlgmr.msra.gmra.mrb[24].mxu0 %vm805_vm9, %v895_v53  ;;  %v888_v57 = vmul.f32 %v10001_v54, %v9985_v8  ;;  %v908_v8 = vpack.c.bf16 %v411_v6, %v411_v6 }
 0x48c   :  { %v10003_v62 = vpop.eup %10002  ;;  %10006 = vrcp.f32 %v871_v55  ;;  %9109 = vmatpush3.bf16.msra.mxu0 %v1053_v56  ;;  %9110 = vmatprep.mubr.msk.bf16.mxu0 %vm10276_vm0, %v10275_v1 }
 0x48d   :  { %v896_v0 = vpack.c.bf16 %v888_v57, %v888_v57  ;;  %9120 = vmatprep.subr.bf16.mxu0 %v10275_v1  ;;  %v889_v2 = vmul.f32 %v10003_v62, %v10481_v16  ;;  %v1191_v15 = vsel %vm913_vm8, %v908_v8, 0 }
 0x48f   :  { %9105 = vmatmul.mubr.msk.bf16.vlgmr.msra.gmra.mrb[28].mxu1 %vm805_vm9, %v896_v0  ;;  %v874_v4 = vpop.xlane.xlu1 %873  ;;  %v897_v58 = vpack.c.bf16 %v889_v2, %v889_v2 }
 0x490   :  { %9115 = vmatpush3.bf16.msra.mxu1 %v1099_v3  ;;  %10008 = vrcp.f32 %v874_v4  ;;  %9116 = vmatprep.mubr.msk.bf16.mxu1 %vm10276_vm0, %v10275_v1 }
 0x491   :  { %9126 = vmatprep.subr.bf16.mxu1 %v10275_v1 }
 0x492   :  { %v10005_v7 = vpop.eup %10004 }
 0x493   :  { %v877_v10 = vpop.xlane.xlu0 %876  ;;  %9111 = vmatmul.mubr.msk.bf16.vlgmr.msra.gmra.mrb[28].mxu0 %vm805_vm9, %v897_v58  ;;  %v890_v11 = vmul.f32 %v10005_v7, %v10485_v22 }
 0x494   :  { %10010 = vrcp.f32 %v877_v10  ;;  %9121 = vmatpush3.bf16.msra.mxu0 %v1145_v63  ;;  %9122 = vmatprep.mubr.msk.bf16.mxu0 %vm10276_vm0, %v10275_v1 }
 0x495   :  { %v898_v12 = vpack.c.bf16 %v890_v11, %v890_v11  ;;  %9132 = vmatprep.subr.bf16.mxu0 %v10275_v1 }
 0x496   :  { %v10007_v14 = vpop.eup %10006 }
 0x497   :  { %9117 = vmatmul.mubr.msk.bf16.vlgmr.msra.gmra.mrb[32].mxu1 %vm805_vm9, %v898_v12  ;;  %v891_v16 = vmul.f32 %v10007_v14, %v10489_v28  ;;  %v9908_v28 = vld [vmem:[#allocation2 + $0x60] sm:$0xff]  }
 0x498   :  { %9127 = vmatpush3.bf16.msra.mxu1 %v1191_v15  ;;  %9128 = vmatprep.mubr.msk.bf16.mxu1 %vm10276_vm0, %v10275_v1 }
 0x499   :  { %v899_v41 = vpack.c.bf16 %v891_v16, %v891_v16  ;;  %9138 = vmatprep.subr.bf16.mxu1 %v10275_v1 }
 0x49a   :  { %v10009_v18 = vpop.eup %10008 }
 0x49b   :  { %9123 = vmatmul.mubr.msk.bf16.vlgmr.msra.gmra.mrb[32].mxu0 %vm805_vm9, %v899_v41  ;;  %v892_v20 = vmul.f32 %v10009_v18, %v10493_v30  ;;  %v8458_v18 = vld [vmem:[#allocation4 + $0x80] ss:$0 sm:$0xff] }
 0x49c   :  { %9133 = vmatpush3.bf16.msra.mxu0 %v1237_v19  ;;  %9134 = vmatprep.mubr.msk.bf16.mxu0 %vm10276_vm0, %v10275_v1 }
 0x49d   :  { %v900_v21 = vpack.c.bf16 %v892_v20, %v892_v20  ;;  %9146 = vmatprep.subr.bf16.mxu0 %v10275_v1 }
 0x49e   :  { %v10011_v22 = vpop.eup %10010 }
 0x49f   :  { %9129 = vmatmul.mubr.msk.bf16.vlgmr.msra.gmra.mrb[36].mxu1 %vm805_vm9, %v900_v21  ;;  %v893_v25 = vmul.f32 %v10011_v22, %v10497_v32 }
 0x4a0   :  { %9142 = vmatprep.mubr.msk.bf16.mxu1 %vm10276_vm0, %v10275_v1  ;;  %9139 = vmatpush3.bf16.msra.mxu1 %v9908_v28 }
 0x4a1   :  { %v901_v26 = vpack.c.bf16 %v893_v25, %v893_v25  ;;  %9140 = vmatprep.subr.bf16.mxu1 %v10275_v1 }
 0x4a3   :  { %9135 = vmatmul.mubr.msk.bf16.vlgmr.msra.gmra.mrb[36].mxu0 %vm805_vm9, %v901_v26 }
 0x4a4   :  { %9150 = vmatprep.mubr.msk.bf16.mxu0 %vm10276_vm0, %v10275_v1  ;;  %9141 = vmatpush3.bf16.msra.mxu1 %v9909_v29 }
 0x4a5   :  { %9154 = vmatprep.subr.bf16.mxu1 %v10275_v1 }
 0x55a   :  { %v951_v30 = vpop.f32.mrb[24].mxu1 }
 0x55b   :  { %v9094_v31 = vpop.f32.mrb[25].mxu1  ;;  %v1279_v42 = vsel %vm200_vm4, %v951_v30, 0.0 }
 0x55c   :  { %v954_v32 = vpop.f32.mrb[26].mxu1 }
 0x55d   :  { %v9095_v33 = vpop.f32.mrb[27].mxu1 }
 0x55e   :  { %v997_v34 = vpop.f32.mrb[24].mxu0 }
 0x55f   :  { %v9100_v35 = vpop.f32.mrb[25].mxu0  ;;  %v1286_v48 = vsel %vm200_vm4, %v997_v34, 0.0 }
 0x560   :  { %v1000_v36 = vpop.f32.mrb[26].mxu0 }
 0x561   :  { %v9101_v38 = vpop.f32.mrb[27].mxu0 }
 0x562   :  { %v1043_v40 = vpop.f32.mrb[28].mxu1 }
 0x563   :  { %v1280_v44 = vsel %vm200_vm4, %v1043_v40, 0.0  ;;  %v9106_v45 = vpop.f32.mrb[29].mxu1 }
 0x564   :  { %v1281_v46 = vadd.f32 %v1280_v44, %v1279_v42  ;;  %v1046_v39 = vpop.f32.mrb[30].mxu1  ;;  %v9910_v45 = vld [vmem:[#allocation2 + $0x70] sm:$0xff]  }
 0x565   :  { %v9107_v47 = vpop.f32.mrb[31].mxu1  ;;  %9147 = vmatpush3.bf16.msra.mxu0 %v9910_v45  ;;  %v9913_v39 = vld [vmem:[#allocation2 + $0x88] sm:$0xff]  }
 0x566   :  { %v1089_v43 = vpop.f32.mrb[28].mxu0  ;;  %9148 = vmatprep.subr.bf16.mxu0 %v10275_v1 }
 0x567   :  { %v1287_v49 = vsel %vm200_vm4, %v1089_v43, 0.0  ;;  %v9112_v50 = vpop.f32.mrb[29].mxu0 }
 0x568   :  { %v1288_v51 = vadd.f32 %v1287_v49, %v1286_v48  ;;  %v1092_v53 = vpop.f32.mrb[30].mxu0 }
 0x569   :  { %v9113_v54 = vpop.f32.mrb[31].mxu0 }
 0x56a   :  { %v1135_v55 = vpop.f32.mrb[32].mxu1  ;;  %v8462_v54 = vld [vmem:[#allocation4 + $0x98] ss:$0 sm:$0xff] }
 0x56b   :  { %v1282_v56 = vsel %vm200_vm4, %v1135_v55, 0.0  ;;  %v9118_v57 = vpop.f32.mrb[33].mxu1 }
 0x56c   :  { %v1283_v59 = vadd.f32 %v1282_v56, %v1281_v46  ;;  %v1138_v60 = vpop.f32.mrb[34].mxu1  ;;  %v9912_v46 = vld [vmem:[#allocation2 + $0x80] sm:$0xff]  }
 0x56d   :  { %v9119_v62 = vpop.f32.mrb[35].mxu1  ;;  %v8463_v60 = vld [vmem:[#allocation4 + $0xa0] ss:$0 sm:$0xff] }
 0x56e   :  { %v1181_v0 = vpop.f32.mrb[32].mxu0 }
 0x56f   :  { %v1289_v2 = vsel %vm200_vm4, %v1181_v0, 0.0  ;;  %v9124_v3 = vpop.f32.mrb[33].mxu0 }
 0x570   :  { %v1290_v4 = vadd.f32 %v1289_v2, %v1288_v51  ;;  %v1184_v5 = vpop.f32.mrb[34].mxu0 }
 0x571   :  { %v9125_v6 = vpop.f32.mrb[35].mxu0  ;;  %v9915_v5 = vld [vmem:[#allocation2 + $0x98] sm:$0xff]  }
 0x572   :  { %v1227_v58 = vpop.f32.mrb[36].mxu1  ;;  %v8464_v6 = vld [vmem:[#allocation4 + $0x88] ss:$0 sm:$0xff] }
 0x573   :  { %v1284_v7 = vsel %vm200_vm4, %v1227_v58, 0.0  ;;  %v9130_v10 = vpop.f32.mrb[37].mxu1 }
 0x574   :  { %v1285_v63 = vadd.f32 %v1284_v7, %v1283_v59  ;;  %v1230_v11 = vpop.f32.mrb[38].mxu1 }
 0x575   :  { %v9131_v8 = vpop.f32.mrb[39].mxu1 }
 0x576   :  { %v1273_v37 = vpop.f32.mrb[36].mxu0 }
 0x577   :  { %v1291_v12 = vsel %vm200_vm4, %v1273_v37, 0.0  ;;  %v9136_v14 = vpop.f32.mrb[37].mxu0 }
 0x578   :  { %v1292_v15 = vadd.f32 %v1291_v12, %v1290_v4  ;;  %v1276_v16 = vpop.f32.mrb[38].mxu0  ;;  %v9914_v4 = vld [vmem:[#allocation2 + $0x90] sm:$0xff]  }
 0x579   :  { %v9137_v17 = vpop.f32.mrb[39].mxu0 }
 0x57a   :  { %v1297_v41 = vpack.c.bf16 %v1292_v15, %v1285_v63  ;;  %v8468_v15 = vld [vmem:[#allocation4 + $0x90] ss:$0 sm:$0xff] }
 0x57c   :  { %9143 = vmatmul.mubr.msk.bf16.vlgmr.msra.gmra.mrb[40].mxu1 %vm200_vm4, %v1297_v41 }
 0x57d   :  { %9162 = vmatprep.mubr.msk.bf16.mxu1 %vm10276_vm0, %v10275_v1  ;;  %9155 = vmatpush3.bf16.msra.mxu1 %v9912_v46 }
 0x57e   :  { %9156 = vmatprep.subr.bf16.mxu1 %v10275_v1 }
 0x581   :  { %9157 = vmatpush3.bf16.msra.mxu1 %v9913_v39 }
 0x582   :  { %9158 = vmatprep.subr.bf16.mxu1 %v10275_v1 }
 0x585   :  { %9159 = vmatpush3.bf16.msra.mxu1 %v9914_v4 }
 0x586   :  { %9160 = vmatprep.subr.bf16.mxu1 %v10275_v1 }
 0x589   :  { %9161 = vmatpush3.bf16.msra.mxu1 %v9915_v5 }
 0x58a   :  { %9182 = vmatprep.subr.bf16.mxu1 %v10275_v1 }
 0x64f   :  { %v1352_v19 = vpop.f32.mrb[40].mxu1 }
 0x650   :  { %v1353_v20 = vadd.f32 %v8458_v18, %v1352_v19  ;;  %v9144_v21 = vpop.f32.mrb[41].mxu1 }
 0x651   :  { %v1355_v22 = vpop.f32.mrb[42].mxu1 }
 0x652   :  { %v1356_v25 = vadd.f32 %v8458_v18, %v1355_v22  ;;  %v9145_v26 = vpop.f32.mrb[43].mxu1  ;;  %v1359_v28 = vadd.f32 %v1353_v20, %v10356_v23 }
 0x654   :  { %v1363_v29 = vsel %vm200_vm4, %v1359_v28, 0.0  ;;  %v1360_v30 = vadd.f32 %v1356_v25, %v10358_v24  ;;  %v9911_v24 = vld [vmem:[#allocation2 + $0x78] sm:$0xff]  }
 0x655   :  { %1364 = vadd.xlane.f32.xlu1 %v1363_v29  ;;  %9149 = vmatpush3.bf16.msra.mxu0 %v9911_v24 }
 0x656   :  { %v1366_v31 = vsel %vm200_vm4, %v1360_v30, 0.0  ;;  %9166 = vmatprep.subr.bf16.mxu0 %v10275_v1 }
 0x657   :  { %1367 = vadd.xlane.f32.xlu0 %v1366_v31 }
 0x6e2   :  { %v1365_v32 = vpop.xlane.xlu1 %1364 }
 0x6e3   :  { %v1370_v33 = vmul.f32 0.03125, %v1365_v32 }
 0x6e4   :  { %v1368_v34 = vpop.xlane.xlu0 %1367 }
 0x6e5   :  { %v1372_v35 = vsub.f32 %v1359_v28, %v1370_v33  ;;  %v1371_v36 = vmul.f32 0.03125, %v1368_v34 }
 0x6e7   :  { %v1373_v38 = vsub.f32 %v1360_v30, %v1371_v36  ;;  %v1374_v40 = vmul.f32 %v1372_v35, %v1372_v35 }
 0x6e9   :  { %v1376_v42 = vsel %vm200_vm4, %v1374_v40, 0.0  ;;  %v1375_v44 = vmul.f32 %v1373_v38, %v1373_v38  ;;  %v9916_v40 = vld [vmem:[#allocation2 + $0xa0] sm:$0xff]  }
 0x6ea   :  { %1377 = vadd.xlane.f32.xlu1 %v1376_v42  ;;  %v9917_v42 = vld [vmem:[#allocation2 + $0xc0] sm:$0xff]  }
 0x6eb   :  { %v1379_v23 = vsel %vm200_vm4, %v1375_v44, 0.0  ;;  %v9918_v44 = vld [vmem:[#allocation2 + $0xa8] sm:$0xff]  }
 0x6ec   :  { %1380 = vadd.xlane.f32.xlu0 %v1379_v23  ;;  %v9919_v23 = vld [vmem:[#allocation2 + $0xc8] sm:$0xff]  }
 0x777   :  { %v1378_v47 = vpop.xlane.xlu1 %1377 }
 0x778   :  { %v1382_v43 = vmul.f32 0.03125, %v1378_v47 }
 0x779   :  { %v1381_v48 = vpop.xlane.xlu0 %1380 }
 0x77a   :  { %v1384_v49 = vadd.f32 1e-05, %v1382_v43  ;;  %v1383_v50 = vmul.f32 0.03125, %v1381_v48 }
 0x77c   :  { %10012 = vrsqrt.f32 %v1384_v49  ;;  %v1385_v51 = vadd.f32 1e-05, %v1383_v50  ;;  %v8474_v49 = vld [vmem:[#allocation4 + $0xa8] ss:$0 sm:$0xff] }
 0x77e   :  { %10014 = vrsqrt.f32 %v1385_v51 }
 0x786   :  { %v10013_v53 = vpop.eup %10012 }
 0x787   :  { %v1388_v55 = vmul.f32 %v10013_v53, %v1372_v35 }
 0x788   :  { %v10015_v56 = vpop.eup %10014 }
 0x789   :  { %v1394_v57 = vmul.f32 %v8462_v54, %v1388_v55  ;;  %v1389_v59 = vmul.f32 %v10015_v56, %v1373_v38  ;;  %v8475_v55 = vld [vmem:[#allocation4 + $0xb0] ss:$0 sm:$0xff] }
 0x78b   :  { %v1395_v62 = vmul.f32 %v8462_v54, %v1389_v59  ;;  %v1400_v0 = vadd.f32 %v8463_v60, %v1394_v57 }
 0x78d   :  { %v1401_v2 = vadd.f32 %v8463_v60, %v1395_v62  ;;  %v9920_v60 = vld [vmem:[#allocation2 + $0xb0] sm:$0xff]  }
 0x78f   :  { %v1406_v3 = vpack.c.bf16 %v1401_v2, %v1400_v0 }
 0x791   :  { %9151 = vmatmul.mubr.msk.bf16.vlgmr.msra.gmra.mrb[40].mxu0 %vm200_vm4, %v1406_v3 }
 0x792   :  { %9170 = vmatprep.mubr.msk.bf16.mxu0 %vm10276_vm0, %v10275_v1  ;;  %9167 = vmatpush3.bf16.msra.mxu0 %v9916_v40 }
 0x793   :  { %9168 = vmatprep.subr.bf16.mxu0 %v10275_v1 }
 0x796   :  { %9169 = vmatpush3.bf16.msra.mxu0 %v9918_v44 }
 0x797   :  { %9174 = vmatprep.subr.bf16.mxu0 %v10275_v1 }
 0x864   :  { %v1461_v58 = vpop.f32.mrb[40].mxu0 }
 0x865   :  { %v1462_v7 = vadd.f32 %v8464_v6, %v1461_v58  ;;  %v9152_v10 = vpop.f32.mrb[41].mxu0 }
 0x866   :  { %v1464_v63 = vpop.f32.mrb[42].mxu0 }
 0x867   :  { %v1465_v11 = vadd.f32 %v8464_v6, %v1464_v63  ;;  %v9153_v8 = vpop.f32.mrb[43].mxu0  ;;  %v1468_v37 = vmax.f32 %v1462_v7, 0.0  ;;  %v8480_v63 = vld [vmem:[#allocation4 + $0xc0] ss:$0 sm:$0xff] }
 0x869   :  { %v1469_v12 = vmax.f32 %v1465_v11, 0.0 }
 0x86b   :  { %v1478_v14 = vpack.c.bf16 %v1469_v12, %v1468_v37  ;;  %v8476_v12 = vld [vmem:[#allocation4 + $0xb8] ss:$0 sm:$0xff] }
 0x86d   :  { %9163 = vmatmul.mubr.msk.bf16.vlgmr.msra.gmra.mrb[44].mxu1 %vm130_vm3, %v1478_v14 }
 0x86e   :  { %9186 = vmatprep.mubr.msk.bf16.mxu1 %vm10276_vm0, %v10275_v1  ;;  %9183 = vmatpush3.bf16.msra.mxu1 %v9917_v42 }
 0x86f   :  { %9184 = vmatprep.subr.bf16.mxu1 %v10275_v1 }
 0x872   :  { %9185 = vmatpush3.bf16.msra.mxu1 %v9919_v23 }
 0x873   :  { %9196 = vmatprep.subr.bf16.mxu1 %v10275_v1 }
 0x940   :  { %v1545_v16 = vpop.f32.mrb[44].mxu1 }
 0x941   :  { %v1546_v17 = vadd.f32 %v8468_v15, %v1545_v16  ;;  %v9164_v41 = vpop.f32.mrb[45].mxu1 }
 0x942   :  { %v1548_v18 = vpop.f32.mrb[46].mxu1 }
 0x943   :  { %v1549_v19 = vadd.f32 %v8468_v15, %v1548_v18  ;;  %v9165_v20 = vpop.f32.mrb[47].mxu1  ;;  %v1552_v21 = vadd.f32 %v1546_v17, %v1400_v0  ;;  %v9921_v0 = vld [vmem:[#allocation2 + $0xb8] sm:$0xff]  }
 0x945   :  { %v1556_v22 = vsel %vm200_vm4, %v1552_v21, 0.0  ;;  %v1553_v25 = vadd.f32 %v1549_v19, %v1401_v2 }
 0x946   :  { %1557 = vadd.xlane.f32.xlu1 %v1556_v22 }
 0x947   :  { %v1559_v26 = vsel %vm200_vm4, %v1553_v25, 0.0 }
 0x948   :  { %1560 = vadd.xlane.f32.xlu0 %v1559_v26 }
 0x9d3   :  { %v1558_v28 = vpop.xlane.xlu1 %1557 }
 0x9d4   :  { %v1562_v29 = vmul.f32 0.03125, %v1558_v28 }
 0x9d5   :  { %v1561_v30 = vpop.xlane.xlu0 %1560 }
 0x9d6   :  { %v1564_v31 = vsub.f32 %v1552_v21, %v1562_v29  ;;  %v1563_v32 = vmul.f32 0.03125, %v1561_v30 }
 0x9d8   :  { %v1565_v33 = vsub.f32 %v1553_v25, %v1563_v32  ;;  %v1566_v34 = vmul.f32 %v1564_v31, %v1564_v31 }
 0x9da   :  { %v1568_v35 = vsel %vm200_vm4, %v1566_v34, 0.0  ;;  %v1567_v36 = vmul.f32 %v1565_v33, %v1565_v33 }
 0x9db   :  { %1569 = vadd.xlane.f32.xlu1 %v1568_v35 }
 0x9dc   :  { %v1571_v38 = vsel %vm200_vm4, %v1567_v36, 0.0 }
 0x9dd   :  { %1572 = vadd.xlane.f32.xlu0 %v1571_v38 }
 0xa68   :  { %v1570_v45 = vpop.xlane.xlu1 %1569 }
 0xa69   :  { %v1574_v24 = vmul.f32 0.03125, %v1570_v45 }
 0xa6a   :  { %v1573_v46 = vpop.xlane.xlu0 %1572 }
 0xa6b   :  { %v1576_v39 = vadd.f32 1e-05, %v1574_v24  ;;  %v1575_v47 = vmul.f32 0.03125, %v1573_v46 }
 0xa6d   :  { %10016 = vrsqrt.f32 %v1576_v39  ;;  %v1577_v43 = vadd.f32 1e-05, %v1575_v47 }
 0xa6f   :  { %10018 = vrsqrt.f32 %v1577_v43  ;;  %v8484_v43 = vld [vmem:[#allocation4 + $0xc8] ss:$0 sm:$0xff] }
 0xa77   :  { %v10017_v48 = vpop.eup %10016 }
 0xa78   :  { %v1580_v50 = vmul.f32 %v10017_v48, %v1564_v31 }
 0xa79   :  { %v10019_v51 = vpop.eup %10018 }
 0xa7a   :  { %v1586_v53 = vmul.f32 %v8474_v49, %v1580_v50  ;;  %v1581_v54 = vmul.f32 %v10019_v51, %v1565_v33 }
 0xa7c   :  { %v1587_v56 = vmul.f32 %v8474_v49, %v1581_v54  ;;  %v10593_v57 = vadd.f32 %v8475_v55, %v1586_v53 }
 0xa7e   :  { %v10595_v59 = vadd.f32 %v8475_v55, %v1587_v56 }
 0xa80   :  { %v1598_v62 = vpack.c.bf16 %v10595_v59, %v10593_v57 }
 0xa82   :  { %9171 = vmatmul.mubr.msk.bf16.vlgmr.msra.gmra.mrb[44].mxu0 %vm200_vm4, %v1598_v62  ;;  %9187 = vmatmul.mubr.msk.bf16.vlgmr.msra.gmra.mrb[48].mxu1 %vm200_vm4, %v1598_v62 }
 0xa83   :  { %9175 = vmatpush3.bf16.msra.mxu0 %v9920_v60  ;;  %9178 = vmatprep.mubr.msk.bf16.mxu0 %vm10276_vm0, %v10275_v1 }
 0xa84   :  { %9176 = vmatprep.subr.bf16.mxu0 %v10275_v1  ;;  %9198 = vmatprep.mubr.msk.bf16.mxu1 %vm10276_vm0, %v10275_v1 }
 0xa87   :  { %9177 = vmatpush3.bf16.msra.mxu0 %v9921_v0 }
 0xa88   :  { %9190 = vmatprep.subr.bf16.mxu0 %v10275_v1 }
 0xa8a   :  { %9179 = vmatmul.mubr.msk.bf16.vlgmr.msra.gmra.mrb[48].mxu0 %vm200_vm4, %v1598_v62 }
 0xa8b   :  { %9192 = vmatprep.mubr.msk.bf16.mxu0 %vm10276_vm0, %v10275_v1 }
 0xb55   :  { %v1653_v2 = vpop.f32.mrb[44].mxu0  ;;  %v10610_v3 = vpop.f32.mrb[48].mxu1 }
 0xb56   :  { %v9172_v4 = vpop.f32.mrb[45].mxu0  ;;  %v9188_v5 = vpop.f32.mrb[49].mxu1  ;;  %v10615_v41 = vadd.f32 %v8476_v12, %v1653_v2  ;;  %v10660_v51 = vadd.f32 %v8484_v43, %v10610_v3 }
 0xb57   :  { %v1656_v6 = vpop.f32.mrb[46].mxu0  ;;  %v10612_v58 = vpop.f32.mrb[50].mxu1 }
 0xb58   :  { %v9173_v7 = vpop.f32.mrb[47].mxu0  ;;  %v9189_v10 = vpop.f32.mrb[51].mxu1  ;;  %v10618_v20 = vadd.f32 %v8476_v12, %v1656_v6  ;;  %v1784_v26 = vmul.f32 %v10615_v41, %v10380_v52  ;;  %v1786_v38 = vmul.f32 %v10615_v41, %v10383_v61  ;;  %v1788_v48 = vmul.f32 %v10615_v41, %v10400_v13 }
 0xb59   :  { %v10666_v56 = vadd.f32 %v8484_v43, %v10612_v58  ;;  %v1800_v2 = vmul.f32 %v10660_v51, %v10380_v52  ;;  %v1790_v3 = vmul.f32 %v10615_v41, %v10418_v27 }
 0xb5a   :  { %v1785_v30 = vmul.f32 %v10618_v20, %v10380_v52  ;;  %v1808_v32 = vpack.c.bf16 %v1784_v26, %v1784_v26  ;;  %v1787_v44 = vmul.f32 %v10618_v20, %v10383_v61  ;;  %v1810_v45 = vpack.c.bf16 %v1786_v38, %v1786_v38 }
 0xb5b   :  { %v1789_v53 = vmul.f32 %v10618_v20, %v10400_v13  ;;  %v1812_v55 = vpack.c.bf16 %v1788_v48, %v1788_v48  ;;  %v1801_v5 = vmul.f32 %v10666_v56, %v10380_v52  ;;  %v1791_v6 = vmul.f32 %v10618_v20, %v10418_v27 }
 0xb5c   :  { %v1809_v34 = vpack.c.bf16 %v1785_v30, %v1785_v30  ;;  %v1811_v46 = vpack.c.bf16 %v1787_v44, %v1787_v44  ;;  %v2296_v58 = vpack.c.bf16 %v1800_v2, %v1800_v2  ;;  %v1814_v7 = vpack.c.bf16 %v1790_v3, %v1790_v3 }
 0xb5d   :  { %v1715_v11 = vpop.f32.mrb[48].mxu0  ;;  %v1813_v62 = vpack.c.bf16 %v1789_v53, %v1789_v53  ;;  %v2297_v10 = vpack.c.bf16 %v1801_v5, %v1801_v5 }
 0xb5e   :  { %v1716_v8 = vadd.f32 %v8480_v63, %v1715_v11  ;;  %v9180_v37 = vpop.f32.mrb[49].mxu0  ;;  %v2308_v11 = vsel %vm913_vm8, %v2296_v58, 0 }
 0xb5f   :  { %v1718_v14 = vpop.f32.mrb[50].mxu0 }
 0xb60   :  { %v1719_v15 = vadd.f32 %v8480_v63, %v1718_v14  ;;  %v9181_v16 = vpop.f32.mrb[51].mxu0  ;;  %v1792_v17 = vmul.f32 %v1716_v8, %v10380_v52  ;;  %v1794_v25 = vmul.f32 %v1716_v8, %v10383_v61  ;;  %v1796_v36 = vmul.f32 %v1716_v8, %v10400_v13 }
 0xb61   :  { %v1798_v47 = vmul.f32 %v1716_v8, %v10418_v27  ;;  %v1815_v63 = vpack.c.bf16 %v1791_v6, %v1791_v6  ;;  %v2354_v8 = vsel %vm913_vm8, %v2297_v10, 0 }
 0xb62   :  { %v1816_v18 = vpack.c.bf16 %v1792_v17, %v1792_v17  ;;  %v1793_v19 = vmul.f32 %v1719_v15, %v10380_v52  ;;  %v1795_v29 = vmul.f32 %v1719_v15, %v10383_v61  ;;  %v1818_v31 = vpack.c.bf16 %v1794_v25, %v1794_v25 }
 0xb63   :  { %v1797_v42 = vmul.f32 %v1719_v15, %v10400_v13  ;;  %v1820_v23 = vpack.c.bf16 %v1796_v36, %v1796_v36  ;;  %v1799_v50 = vmul.f32 %v1719_v15, %v10418_v27  ;;  %v1822_v54 = vpack.c.bf16 %v1798_v47, %v1798_v47 }
 0xb64   :  { %v1828_v21 = vsel %vm200_vm4, %v1816_v18, 0  ;;  %v1817_v22 = vpack.c.bf16 %v1793_v19, %v1793_v19  ;;  %v1819_v33 = vpack.c.bf16 %v1795_v29, %v1795_v29  ;;  %v1920_v35 = vsel %vm200_vm4, %v1818_v31, 0 }
 0xb65   :  { %9191 = vmatpush3.bf16.xpose.msra.mxu0 %v1828_v21  ;;  %v1821_v24 = vpack.c.bf16 %v1797_v42, %v1797_v42  ;;  %v2012_v39 = vsel %vm200_vm4, %v1820_v23, 0  ;;  %v1823_v60 = vpack.c.bf16 %v1799_v50, %v1799_v50  ;;  %v2104_v0 = vsel %vm200_vm4, %v1822_v54, 0 }
 0xb66   :  { %v1874_v28 = vsel %vm200_vm4, %v1817_v22, 0  ;;  %9202 = vmatprep.subr.bf16.mxu0 %v10275_v1  ;;  %v1966_v40 = vsel %vm200_vm4, %v1819_v33, 0 }
 0xb67   :  { %9197 = vmatpush3.bf16.xpose.msra.mxu1 %v1874_v28  ;;  %v2058_v49 = vsel %vm200_vm4, %v1821_v24, 0  ;;  %v2150_v4 = vsel %vm200_vm4, %v1823_v60, 0 }
 0xb68   :  { %9208 = vmatprep.subr.bf16.mxu1 %v10275_v1 }
 0xb6c   :  { %9193 = vmatmul.mubr.msk.bf16.vlgmr.msra.gmra.mrb[52].mxu0 %vm200_vm4, %v1808_v32 }
 0xb6d   :  { %9203 = vmatpush3.bf16.xpose.msra.mxu0 %v1920_v35  ;;  %9204 = vmatprep.mubr.msk.bf16.mxu0 %vm10276_vm0, %v10275_v1 }
 0xb6e   :  { %9199 = vmatmul.mubr.msk.bf16.vlgmr.msra.gmra.mrb[52].mxu1 %vm200_vm4, %v1809_v34  ;;  %9214 = vmatprep.subr.bf16.mxu0 %v10275_v1 }
 0xb6f   :  { %9209 = vmatpush3.bf16.xpose.msra.mxu1 %v1966_v40  ;;  %9210 = vmatprep.mubr.msk.bf16.mxu1 %vm10276_vm0, %v10275_v1 }
 0xb70   :  { %9220 = vmatprep.subr.bf16.mxu1 %v10275_v1 }
 0xb74   :  { %9205 = vmatmul.mubr.msk.bf16.vlgmr.msra.gmra.mrb[56].mxu0 %vm200_vm4, %v1810_v45 }
 0xb75   :  { %9215 = vmatpush3.bf16.xpose.msra.mxu0 %v2012_v39  ;;  %9216 = vmatprep.mubr.msk.bf16.mxu0 %vm10276_vm0, %v10275_v1 }
 0xb76   :  { %9211 = vmatmul.mubr.msk.bf16.vlgmr.msra.gmra.mrb[56].mxu1 %vm200_vm4, %v1811_v46  ;;  %9226 = vmatprep.subr.bf16.mxu0 %v10275_v1 }
 0xb77   :  { %9221 = vmatpush3.bf16.xpose.msra.mxu1 %v2058_v49  ;;  %9222 = vmatprep.mubr.msk.bf16.mxu1 %vm10276_vm0, %v10275_v1 }
 0xb78   :  { %9232 = vmatprep.subr.bf16.mxu1 %v10275_v1 }
 0xb7c   :  { %9217 = vmatmul.mubr.msk.bf16.vlgmr.msra.gmra.mrb[60].mxu0 %vm200_vm4, %v1812_v55 }
 0xb7d   :  { %9227 = vmatpush3.bf16.xpose.msra.mxu0 %v2104_v0  ;;  %9228 = vmatprep.mubr.msk.bf16.mxu0 %vm10276_vm0, %v10275_v1 }
 0xb7e   :  { %9223 = vmatmul.mubr.msk.bf16.vlgmr.msra.gmra.mrb[60].mxu1 %vm200_vm4, %v1813_v62  ;;  %9238 = vmatprep.subr.bf16.mxu0 %v10275_v1 }
 0xb7f   :  { %9233 = vmatpush3.bf16.xpose.msra.mxu1 %v2150_v4  ;;  %9234 = vmatprep.mubr.msk.bf16.mxu1 %vm10276_vm0, %v10275_v1 }
 0xb80   :  { %9244 = vmatprep.subr.bf16.mxu1 %v10275_v1 }
 0xb84   :  { %9229 = vmatmul.mubr.msk.bf16.vlgmr.msra.gmra.mrb[64].mxu0 %vm200_vm4, %v1814_v7 }
 0xb85   :  { %9239 = vmatpush3.bf16.msra.mxu0 %v2308_v11  ;;  %9240 = vmatprep.mubr.msk.bf16.mxu0 %vm10276_vm0, %v10275_v1 }
 0xb86   :  { %9235 = vmatmul.mubr.msk.bf16.vlgmr.msra.gmra.mrb[64].mxu1 %vm200_vm4, %v1815_v63  ;;  %9250 = vmatprep.subr.bf16.mxu0 %v10275_v1 }
 0xb87   :  { %9245 = vmatpush3.bf16.msra.mxu1 %v2354_v8  ;;  %9246 = vmatprep.mubr.msk.bf16.mxu1 %vm10276_vm0, %v10275_v1 }
 0xb88   :  { %9256 = vmatprep.subr.bf16.mxu1 %v10275_v1 }
 0xc3f   :  { %v1864_v37 = vpop.f32.mrb[52].mxu0 }
 0xc40   :  { %v2192_v12 = vmul.f32 0.35355338, %v1864_v37  ;;  %v9194_v14 = vpop.f32.mrb[53].mxu0 }
 0xc41   :  { %v1867_v15 = vpop.f32.mrb[54].mxu0  ;;  %v1910_v16 = vpop.f32.mrb[52].mxu1 }
 0xc42   :  { %v2193_v17 = vmul.f32 0.35355338, %v1910_v16  ;;  %v9195_v41 = vpop.f32.mrb[55].mxu0  ;;  %v9200_v18 = vpop.f32.mrb[53].mxu1  ;;  %v2200_v19 = vsel %vm805_vm9, %v2192_v12, -inf }
 0xc43   :  { %v1913_v20 = vpop.f32.mrb[54].mxu1  ;;  %2201 = vmax.xlane.f32.xlu1 %v2200_v19 }
 0xc44   :  { %v9201_v21 = vpop.f32.mrb[55].mxu1  ;;  %v2203_v22 = vsel %vm805_vm9, %v2193_v17, -inf }
 0xc45   :  { %2204 = vmax.xlane.f32.xlu0 %v2203_v22 }
 0xc47   :  { %v1956_v25 = vpop.f32.mrb[56].mxu0 }
 0xc48   :  { %v2194_v26 = vmul.f32 0.35355338, %v1956_v25  ;;  %v9206_v28 = vpop.f32.mrb[57].mxu0 }
 0xc49   :  { %v1959_v29 = vpop.f32.mrb[58].mxu0  ;;  %v2002_v30 = vpop.f32.mrb[56].mxu1 }
 0xc4a   :  { %v2195_v31 = vmul.f32 0.35355338, %v2002_v30  ;;  %v9207_v32 = vpop.f32.mrb[59].mxu0  ;;  %v9212_v33 = vpop.f32.mrb[57].mxu1  ;;  %v2206_v34 = vsel %vm805_vm9, %v2194_v26, -inf }
 0xc4b   :  { %v2005_v35 = vpop.f32.mrb[58].mxu1  ;;  %2207 = vmax.xlane.f32.xlu1 %v2206_v34 }
 0xc4c   :  { %v9213_v36 = vpop.f32.mrb[59].mxu1  ;;  %v2209_v38 = vsel %vm805_vm9, %v2195_v31, -inf }
 0xc4d   :  { %2210 = vmax.xlane.f32.xlu0 %v2209_v38 }
 0xc4f   :  { %v2048_v40 = vpop.f32.mrb[60].mxu0 }
 0xc50   :  { %v2196_v42 = vmul.f32 0.35355338, %v2048_v40  ;;  %v9218_v44 = vpop.f32.mrb[61].mxu0 }
 0xc51   :  { %v2051_v23 = vpop.f32.mrb[62].mxu0  ;;  %v2094_v45 = vpop.f32.mrb[60].mxu1 }
 0xc52   :  { %v2197_v24 = vmul.f32 0.35355338, %v2094_v45  ;;  %v9219_v46 = vpop.f32.mrb[63].mxu0  ;;  %v9224_v39 = vpop.f32.mrb[61].mxu1  ;;  %v2212_v47 = vsel %vm805_vm9, %v2196_v42, -inf }
 0xc53   :  { %v2097_v43 = vpop.f32.mrb[62].mxu1  ;;  %2213 = vmax.xlane.f32.xlu1 %v2212_v47 }
 0xc54   :  { %v9225_v48 = vpop.f32.mrb[63].mxu1  ;;  %v2215_v49 = vsel %vm805_vm9, %v2197_v24, -inf }
 0xc55   :  { %2216 = vmax.xlane.f32.xlu0 %v2215_v49 }
 0xc57   :  { %v2140_v50 = vpop.f32.mrb[64].mxu0 }
 0xc58   :  { %v2198_v53 = vmul.f32 0.35355338, %v2140_v50  ;;  %v9230_v54 = vpop.f32.mrb[65].mxu0 }
 0xc59   :  { %v2143_v55 = vpop.f32.mrb[66].mxu0  ;;  %v2186_v60 = vpop.f32.mrb[64].mxu1 }
 0xc5a   :  { %v2199_v62 = vmul.f32 0.35355338, %v2186_v60  ;;  %v9231_v0 = vpop.f32.mrb[67].mxu0  ;;  %v9236_v2 = vpop.f32.mrb[65].mxu1  ;;  %v2218_v3 = vsel %vm805_vm9, %v2198_v53, -inf  ;;  %v1803_v55 = vmul.f32 %v10666_v56, %v10383_v61 }
 0xc5b   :  { %v2189_v4 = vpop.f32.mrb[66].mxu1  ;;  %2219 = vmax.xlane.f32.xlu1 %v2218_v3 }
 0xc5c   :  { %v9237_v5 = vpop.f32.mrb[67].mxu1  ;;  %v2221_v6 = vsel %vm805_vm9, %v2199_v62, -inf }
 0xc5d   :  { %2222 = vmax.xlane.f32.xlu0 %v2221_v6  ;;  %v2299_v5 = vpack.c.bf16 %v1803_v55, %v1803_v55 }
 0xcd0   :  { %v2202_v58 = vpop.xlane.xlu1 %2201 }
 0xcd1   :  { %v2224_v7 = vsub.f32 %v2192_v12, %v2202_v58 }
 0xcd2   :  { %v2205_v10 = vpop.xlane.xlu0 %2204 }
 0xcd3   :  { %v2232_v63 = vmul.f32 1.442695, %v2224_v7  ;;  %v2225_v11 = vsub.f32 %v2193_v17, %v2205_v10  ;;  %v1804_v10 = vmul.f32 %v10660_v51, %v10400_v13 }
 0xcd5   :  { %10020 = vpow2.f32 %v2232_v63  ;;  %v2234_v8 = vmul.f32 1.442695, %v2225_v11  ;;  %v2446_v63 = vsel %vm913_vm8, %v2299_v5, 0 }
 0xcd7   :  { %10022 = vpow2.f32 %v2234_v8  ;;  %v1805_v8 = vmul.f32 %v10666_v56, %v10400_v13 }
 0xcd8   :  { %v2208_v37 = vpop.xlane.xlu1 %2207 }
 0xcd9   :  { %v2226_v14 = vsub.f32 %v2194_v26, %v2208_v37 }
 0xcda   :  { %v2211_v15 = vpop.xlane.xlu0 %2210 }
 0xcdb   :  { %v2236_v16 = vmul.f32 1.442695, %v2226_v14  ;;  %v2227_v41 = vsub.f32 %v2195_v31, %v2211_v15  ;;  %v2300_v15 = vpack.c.bf16 %v1804_v10, %v1804_v10 }
 0xcdd   :  { %10024 = vpow2.f32 %v2236_v16  ;;  %v2238_v18 = vmul.f32 1.442695, %v2227_v41 }
 0xcdf   :  { %v10021_v19 = vpop.eup %10020  ;;  %10026 = vpow2.f32 %v2238_v18 }
 0xce0   :  { %v2214_v20 = vpop.xlane.xlu1 %2213  ;;  %v2248_v21 = vsel %vm805_vm9, %v10021_v19, 0.0 }
 0xce1   :  { %v10023_v22 = vpop.eup %10022  ;;  %v2228_v12 = vsub.f32 %v2196_v42, %v2214_v20  ;;  %2249 = vadd.xlane.f32.xlu1 %v2248_v21  ;;  %v2492_v20 = vsel %vm913_vm8, %v2300_v15, 0 }
 0xce2   :  { %v2217_v25 = vpop.xlane.xlu0 %2216  ;;  %v2251_v17 = vsel %vm805_vm9, %v10023_v22, 0.0 }
 0xce3   :  { %v2240_v28 = vmul.f32 1.442695, %v2228_v12  ;;  %v2229_v29 = vsub.f32 %v2197_v24, %v2217_v25  ;;  %2252 = vadd.xlane.f32.xlu0 %v2251_v17  ;;  %v1806_v12 = vmul.f32 %v10660_v51, %v10418_v27 }
 0xce5   :  { %10028 = vpow2.f32 %v2240_v28  ;;  %v2242_v26 = vmul.f32 1.442695, %v2229_v29  ;;  %v1807_v28 = vmul.f32 %v10666_v56, %v10418_v27 }
 0xce7   :  { %v10025_v30 = vpop.eup %10024  ;;  %10030 = vpow2.f32 %v2242_v26  ;;  %v2302_v26 = vpack.c.bf16 %v1806_v12, %v1806_v12 }
 0xce8   :  { %v2220_v31 = vpop.xlane.xlu1 %2219  ;;  %v2254_v32 = vsel %vm805_vm9, %v10025_v30, 0.0 }
 0xce9   :  { %v10027_v33 = vpop.eup %10026  ;;  %v2230_v34 = vsub.f32 %v2198_v53, %v2220_v31  ;;  %2255 = vadd.xlane.f32.xlu1 %v2254_v32  ;;  %v1802_v53 = vmul.f32 %v10660_v51, %v10383_v61  ;;  %v2584_v56 = vsel %vm913_vm8, %v2302_v26, 0 }
 0xcea   :  { %v2223_v35 = vpop.xlane.xlu0 %2222  ;;  %v2257_v36 = vsel %vm805_vm9, %v10027_v33, 0.0 }
 0xceb   :  { %v2244_v38 = vmul.f32 1.442695, %v2230_v34  ;;  %v2231_v40 = vsub.f32 %v2199_v62, %v2223_v35  ;;  %2258 = vadd.xlane.f32.xlu0 %v2257_v36  ;;  %v2298_v0 = vpack.c.bf16 %v1802_v53, %v1802_v53 }
 0xced   :  { %10032 = vpow2.f32 %v2244_v38  ;;  %v2246_v42 = vmul.f32 1.442695, %v2231_v40  ;;  %v2400_v6 = vsel %vm913_vm8, %v2298_v0, 0 }
 0xcef   :  { %v10708_v44 = vpop.eup %10028  ;;  %10034 = vpow2.f32 %v2246_v42 }
 0xcf0   :  { %v2260_v23 = vsel %vm805_vm9, %v10708_v44, 0.0 }
 0xcf1   :  { %v10712_v45 = vpop.eup %10030  ;;  %2261 = vadd.xlane.f32.xlu1 %v2260_v23 }
 0xcf2   :  { %v2263_v24 = vsel %vm805_vm9, %v10712_v45, 0.0 }
 0xcf3   :  { %2264 = vadd.xlane.f32.xlu0 %v2263_v24  ;;  %v9923_v24 = vld [vmem:[#allocation2 + $0xd8] sm:$0xff]  }
 0xcf7   :  { %v10716_v46 = vpop.eup %10032 }
 0xcf8   :  { %v2266_v39 = vsel %vm805_vm9, %v10716_v46, 0.0 }
 0xcf9   :  { %v10720_v47 = vpop.eup %10034  ;;  %2267 = vadd.xlane.f32.xlu1 %v2266_v39 }
 0xcfa   :  { %v2269_v43 = vsel %vm805_vm9, %v10720_v47, 0.0 }
 0xcfb   :  { %2270 = vadd.xlane.f32.xlu0 %v2269_v43 }
 0xd6e   :  { %v2250_v48 = vpop.xlane.xlu1 %2249 }
 0xd6f   :  { %10036 = vrcp.f32 %v2250_v48 }
 0xd70   :  { %v2253_v49 = vpop.xlane.xlu0 %2252 }
 0xd71   :  { %10038 = vrcp.f32 %v2253_v49 }
 0xd76   :  { %v2256_v50 = vpop.xlane.xlu1 %2255 }
 0xd77   :  { %10040 = vrcp.f32 %v2256_v50 }
 0xd78   :  { %v2259_v54 = vpop.xlane.xlu0 %2258 }
 0xd79   :  { %v10037_v60 = vpop.eup %10036  ;;  %10042 = vrcp.f32 %v2259_v54 }
 0xd7a   :  { %v2280_v62 = vmul.f32 %v10037_v60, %v10021_v19  ;;  %v2301_v19 = vpack.c.bf16 %v1805_v8, %v1805_v8 }
 0xd7b   :  { %v10039_v2 = vpop.eup %10038 }
 0xd7c   :  { %v2288_v3 = vpack.c.bf16 %v2280_v62, %v2280_v62  ;;  %v2281_v4 = vmul.f32 %v10039_v2, %v10023_v22  ;;  %v2538_v25 = vsel %vm913_vm8, %v2301_v19, 0 }
 0xd7e   :  { %9241 = vmatmul.mubr.msk.bf16.vlgmr.msra.gmra.mrb[68].mxu0 %vm805_vm9, %v2288_v3  ;;  %v2262_v58 = vpop.xlane.xlu1 %2261  ;;  %v2289_v7 = vpack.c.bf16 %v2281_v4, %v2281_v4 }
 0xd7f   :  { %9251 = vmatpush3.bf16.msra.mxu0 %v2400_v6  ;;  %10044 = vrcp.f32 %v2262_v58  ;;  %9252 = vmatprep.mubr.msk.bf16.mxu0 %vm10276_vm0, %v10275_v1 }
 0xd80   :  { %9247 = vmatmul.mubr.msk.bf16.vlgmr.msra.gmra.mrb[68].mxu1 %vm805_vm9, %v2289_v7  ;;  %v2265_v11 = vpop.xlane.xlu0 %2264  ;;  %9262 = vmatprep.subr.bf16.mxu0 %v10275_v1 }
 0xd81   :  { %v10041_v37 = vpop.eup %10040  ;;  %9257 = vmatpush3.bf16.msra.mxu1 %v2446_v63  ;;  %10046 = vrcp.f32 %v2265_v11  ;;  %9258 = vmatprep.mubr.msk.bf16.mxu1 %vm10276_vm0, %v10275_v1 }
 0xd82   :  { %v2282_v14 = vmul.f32 %v10041_v37, %v10025_v30  ;;  %9268 = vmatprep.subr.bf16.mxu1 %v10275_v1 }
 0xd83   :  { %v10043_v16 = vpop.eup %10042 }
 0xd84   :  { %v2290_v41 = vpack.c.bf16 %v2282_v14, %v2282_v14  ;;  %v2283_v18 = vmul.f32 %v10043_v16, %v10027_v33  ;;  %v2303_v33 = vpack.c.bf16 %v1807_v28, %v1807_v28 }
 0xd86   :  { %9253 = vmatmul.mubr.msk.bf16.vlgmr.msra.gmra.mrb[72].mxu0 %vm805_vm9, %v2290_v41  ;;  %v2268_v21 = vpop.xlane.xlu1 %2267  ;;  %v2291_v22 = vpack.c.bf16 %v2283_v18, %v2283_v18  ;;  %v2630_v35 = vsel %vm913_vm8, %v2303_v33, 0 }
 0xd87   :  { %9263 = vmatpush3.bf16.msra.mxu0 %v2492_v20  ;;  %10048 = vrcp.f32 %v2268_v21  ;;  %9264 = vmatprep.mubr.msk.bf16.mxu0 %vm10276_vm0, %v10275_v1 }
 0xd88   :  { %9259 = vmatmul.mubr.msk.bf16.vlgmr.msra.gmra.mrb[72].mxu1 %vm805_vm9, %v2291_v22  ;;  %v2271_v17 = vpop.xlane.xlu0 %2270  ;;  %9274 = vmatprep.subr.bf16.mxu0 %v10275_v1 }
 0xd89   :  { %v10045_v29 = vpop.eup %10044  ;;  %9269 = vmatpush3.bf16.msra.mxu1 %v2538_v25  ;;  %10050 = vrcp.f32 %v2271_v17  ;;  %9270 = vmatprep.mubr.msk.bf16.mxu1 %vm10276_vm0, %v10275_v1 }
 0xd8a   :  { %v2284_v51 = vmul.f32 %v10045_v29, %v10708_v44  ;;  %9280 = vmatprep.subr.bf16.mxu1 %v10275_v1 }
 0xd8b   :  { %v10047_v30 = vpop.eup %10046 }
 0xd8c   :  { %v2292_v31 = vpack.c.bf16 %v2284_v51, %v2284_v51  ;;  %v2285_v32 = vmul.f32 %v10047_v30, %v10712_v45  ;;  %v9922_v45 = vld [vmem:[#allocation2 + $0xd0] sm:$0xff]  }
 0xd8e   :  { %9265 = vmatmul.mubr.msk.bf16.vlgmr.msra.gmra.mrb[76].mxu0 %vm805_vm9, %v2292_v31  ;;  %v2293_v34 = vpack.c.bf16 %v2285_v32, %v2285_v32 }
 0xd8f   :  { %9275 = vmatpush3.bf16.msra.mxu0 %v2584_v56  ;;  %9276 = vmatprep.mubr.msk.bf16.mxu0 %vm10276_vm0, %v10275_v1 }
 0xd90   :  { %9271 = vmatmul.mubr.msk.bf16.vlgmr.msra.gmra.mrb[76].mxu1 %vm805_vm9, %v2293_v34  ;;  %9286 = vmatprep.subr.bf16.mxu0 %v10275_v1 }
 0xd91   :  { %v10049_v36 = vpop.eup %10048  ;;  %9281 = vmatpush3.bf16.msra.mxu1 %v2630_v35  ;;  %9282 = vmatprep.mubr.msk.bf16.mxu1 %vm10276_vm0, %v10275_v1  ;;  %v8504_v35 = vld [vmem:[#allocation4 + $0xd0] ss:$0 sm:$0xff] }
 0xd92   :  { %v2286_v38 = vmul.f32 %v10049_v36, %v10716_v46  ;;  %9294 = vmatprep.subr.bf16.mxu1 %v10275_v1 }
 0xd93   :  { %v10051_v40 = vpop.eup %10050 }
 0xd94   :  { %v2294_v42 = vpack.c.bf16 %v2286_v38, %v2286_v38  ;;  %v2287_v44 = vmul.f32 %v10051_v40, %v10720_v47 }
 0xd96   :  { %9277 = vmatmul.mubr.msk.bf16.vlgmr.msra.gmra.mrb[80].mxu0 %vm805_vm9, %v2294_v42  ;;  %v2295_v23 = vpack.c.bf16 %v2287_v44, %v2287_v44 }
 0xd97   :  { %9290 = vmatprep.mubr.msk.bf16.mxu0 %vm10276_vm0, %v10275_v1  ;;  %9287 = vmatpush3.bf16.msra.mxu0 %v9922_v45 }
 0xd98   :  { %9283 = vmatmul.mubr.msk.bf16.vlgmr.msra.gmra.mrb[80].mxu1 %vm805_vm9, %v2295_v23  ;;  %9288 = vmatprep.subr.bf16.mxu0 %v10275_v1 }
 0xd99   :  { %9298 = vmatprep.mubr.msk.bf16.mxu1 %vm10276_vm0, %v10275_v1 }
 0xd9b   :  { %9289 = vmatpush3.bf16.msra.mxu0 %v9923_v24 }
 0xd9c   :  { %9302 = vmatprep.subr.bf16.mxu0 %v10275_v1 }
 0xe51   :  { %v2344_v46 = vpop.f32.mrb[68].mxu0 }
 0xe52   :  { %v9242_v39 = vpop.f32.mrb[69].mxu0  ;;  %v2672_v55 = vsel %vm200_vm4, %v2344_v46, 0.0 }
 0xe53   :  { %v2347_v47 = vpop.f32.mrb[70].mxu0  ;;  %v2390_v43 = vpop.f32.mrb[68].mxu1 }
 0xe54   :  { %v9243_v48 = vpop.f32.mrb[71].mxu0  ;;  %v9248_v49 = vpop.f32.mrb[69].mxu1  ;;  %v2679_v4 = vsel %vm200_vm4, %v2390_v43, 0.0 }
 0xe55   :  { %v2393_v50 = vpop.f32.mrb[70].mxu1 }
 0xe56   :  { %v9249_v53 = vpop.f32.mrb[71].mxu1 }
 0xe59   :  { %v2436_v54 = vpop.f32.mrb[72].mxu0 }
 0xe5a   :  { %v2673_v60 = vsel %vm200_vm4, %v2436_v54, 0.0  ;;  %v9254_v62 = vpop.f32.mrb[73].mxu0 }
 0xe5b   :  { %v2674_v0 = vadd.f32 %v2673_v60, %v2672_v55  ;;  %v2439_v2 = vpop.f32.mrb[74].mxu0  ;;  %v2482_v3 = vpop.f32.mrb[72].mxu1  ;;  %v3027_v62 = vld [vmem:[%s11708_s1 + $0x8] sm:$0xff] }
 0xe5c   :  { %v2680_v5 = vsel %vm200_vm4, %v2482_v3, 0.0  ;;  %v9255_v6 = vpop.f32.mrb[75].mxu0  ;;  %v9260_v58 = vpop.f32.mrb[73].mxu1  ;;  %v9925_v2 = vld [vmem:[#allocation2 + $0xe8] sm:$0xff]   ;;  %v9930_v3 = vld [vmem:[#allocation2 + $0xf0] sm:$0xff]  }
 0xe5d   :  { %v2681_v7 = vadd.f32 %v2680_v5, %v2679_v4  ;;  %v2485_v10 = vpop.f32.mrb[74].mxu1  ;;  %v9931_v4 = vld [vmem:[#allocation2 + $0xf8] sm:$0xff]  }
 0xe5e   :  { %v9261_v63 = vpop.f32.mrb[75].mxu1 }
 0xe61   :  { %v2528_v11 = vpop.f32.mrb[76].mxu0 }
 0xe62   :  { %v2675_v8 = vsel %vm200_vm4, %v2528_v11, 0.0  ;;  %v9266_v37 = vpop.f32.mrb[77].mxu0 }
 0xe63   :  { %v2676_v14 = vadd.f32 %v2675_v8, %v2674_v0  ;;  %v2531_v15 = vpop.f32.mrb[78].mxu0  ;;  %v2574_v16 = vpop.f32.mrb[76].mxu1  ;;  %v9924_v0 = vld [vmem:[#allocation2 + $0xe0] sm:$0xff]   ;;  %v8508_v8 = vld [vmem:[#allocation4 + $0xe8] ss:$0 sm:$0xff] }
 0xe64   :  { %v2682_v41 = vsel %vm200_vm4, %v2574_v16, 0.0  ;;  %v9267_v18 = vpop.f32.mrb[79].mxu0  ;;  %v9272_v19 = vpop.f32.mrb[77].mxu1  ;;  %9295 = vmatpush3.bf16.msra.mxu1 %v9924_v0 }
 0xe65   :  { %v2683_v20 = vadd.f32 %v2682_v41, %v2681_v7  ;;  %v2577_v21 = vpop.f32.mrb[78].mxu1  ;;  %9296 = vmatprep.subr.bf16.mxu1 %v10275_v1  ;;  %v8509_v41 = vld [vmem:[#allocation4 + $0xf0] ss:$0 sm:$0xff] }
 0xe66   :  { %v9273_v22 = vpop.f32.mrb[79].mxu1  ;;  %v9926_v21 = vld [vmem:[#allocation2] sm:$0xff]  }
 0xe68   :  { %9297 = vmatpush3.bf16.msra.mxu1 %v9925_v2  ;;  %v8535_v2 = vld [vmem:[#allocation4 + $0x110] ss:$0 sm:$0xff] }
 0xe69   :  { %v2620_v12 = vpop.f32.mrb[80].mxu0  ;;  %9314 = vmatprep.subr.bf16.mxu1 %v10275_v1 }
 0xe6a   :  { %v2677_v25 = vsel %vm200_vm4, %v2620_v12, 0.0  ;;  %v9278_v17 = vpop.f32.mrb[81].mxu0  ;;  %v9927_v12 = vld [vmem:[#allocation2 + $0x8] sm:$0xff]  }
 0xe6b   :  { %v2678_v28 = vadd.f32 %v2677_v25, %v2676_v14  ;;  %v2623_v29 = vpop.f32.mrb[82].mxu0  ;;  %v2666_v51 = vpop.f32.mrb[80].mxu1 }
 0xe6c   :  { %v2684_v26 = vsel %vm200_vm4, %v2666_v51, 0.0  ;;  %v9279_v30 = vpop.f32.mrb[83].mxu0  ;;  %v9284_v31 = vpop.f32.mrb[81].mxu1  ;;  %v9929_v29 = vld [vmem:[#allocation2 + $0x18] sm:$0xff]  }
 0xe6d   :  { %v2685_v32 = vadd.f32 %v2684_v26, %v2683_v20  ;;  %v2669_v33 = vpop.f32.mrb[82].mxu1  ;;  %v9932_v31 = vld [vmem:[#allocation2 + $0x100] sm:$0xff]  }
 0xe6e   :  { %v9285_v56 = vpop.f32.mrb[83].mxu1  ;;  %v9937_v33 = vld [vmem:[#allocation2 + $0x128] sm:$0xff]  }
 0xe6f   :  { %v2690_v34 = vpack.c.bf16 %v2685_v32, %v2678_v28  ;;  %v9928_v28 = vld [vmem:[#allocation2 + $0x10] sm:$0xff]   ;;  %v9935_v32 = vld [vmem:[#allocation2 + $0x120] sm:$0xff]   ;;  %v8510_v56 = vld [vmem:[#allocation4 + $0xd8] ss:$0 sm:$0xff] }
 0xe71   :  { %9291 = vmatmul.mubr.msk.bf16.vlgmr.msra.gmra.mrb[84].mxu0 %vm200_vm4, %v2690_v34 }
 0xe72   :  { %9310 = vmatprep.mubr.msk.bf16.mxu0 %vm10276_vm0, %v10275_v1  ;;  %9303 = vmatpush3.bf16.msra.mxu0 %v9930_v3 }
 0xe73   :  { %9304 = vmatprep.subr.bf16.mxu0 %v10275_v1 }
 0xe76   :  { %9305 = vmatpush3.bf16.msra.mxu0 %v9931_v4 }
 0xe77   :  { %9306 = vmatprep.subr.bf16.mxu0 %v10275_v1 }
 0xe7a   :  { %9307 = vmatpush3.bf16.msra.mxu0 %v9932_v31 }
 0xe7b   :  { %9308 = vmatprep.subr.bf16.mxu0 %v10275_v1 }
 0xf44   :  { %v2745_v36 = vpop.f32.mrb[84].mxu0 }
 0xf45   :  { %v2746_v38 = vadd.f32 %v8504_v35, %v2745_v36  ;;  %v9292_v40 = vpop.f32.mrb[85].mxu0 }
 0xf46   :  { %v2748_v42 = vpop.f32.mrb[86].mxu0 }
 0xf47   :  { %v2749_v44 = vadd.f32 %v8504_v35, %v2748_v42  ;;  %v9293_v23 = vpop.f32.mrb[87].mxu0  ;;  %v2752_v45 = vadd.f32 %v2746_v38, %v10593_v57 }
 0xf49   :  { %v2756_v24 = vsel %vm200_vm4, %v2752_v45, 0.0  ;;  %v2753_v46 = vadd.f32 %v2749_v44, %v10595_v59  ;;  %v3026_v59 = vld [vmem:[%s11708_s1] sm:$0xff] }
 0xf4a   :  { %2757 = vadd.xlane.f32.xlu1 %v2756_v24 }
 0xf4b   :  { %v2759_v39 = vsel %vm200_vm4, %v2753_v46, 0.0 }
 0xf4c   :  { %2760 = vadd.xlane.f32.xlu0 %v2759_v39 }
 0xfd7   :  { %v2758_v47 = vpop.xlane.xlu1 %2757 }
 0xfd8   :  { %v2762_v43 = vmul.f32 0.03125, %v2758_v47  ;;  %v3117_v47 = vld [vmem:[#allocation4] sm:$0xff] }
 0xfd9   :  { %v2761_v48 = vpop.xlane.xlu0 %2760 }
 0xfda   :  { %v2764_v49 = vsub.f32 %v2752_v45, %v2762_v43  ;;  %v2763_v50 = vmul.f32 0.03125, %v2761_v48  ;;  %v9934_v45 = vld [vmem:[#allocation2 + $0x110] sm:$0xff]  }
 0xfdc   :  { %v2765_v53 = vsub.f32 %v2753_v46, %v2763_v50  ;;  %v2766_v54 = vmul.f32 %v2764_v49, %v2764_v49  ;;  %v9936_v46 = vld [vmem:[#allocation2 + $0x118] sm:$0xff]  }
 0xfde   :  { %v2768_v55 = vsel %vm200_vm4, %v2766_v54, 0.0  ;;  %v2767_v60 = vmul.f32 %v2765_v53, %v2765_v53  ;;  %v9938_v54 = vld [vmem:[#allocation2 + $0x130] sm:$0xff]  }
 0xfdf   :  { %2769 = vadd.xlane.f32.xlu1 %v2768_v55 }
 0xfe0   :  { %v2771_v57 = vsel %vm200_vm4, %v2767_v60, 0.0  ;;  %v9939_v60 = vld [vmem:[#allocation2 + $0x138] sm:$0xff]  }
 0xfe1   :  { %2772 = vadd.xlane.f32.xlu0 %v2771_v57 }
 0xff0   :  { %3029 = vperm.xlu1 %9897, %v3026_v59  }
 0xff7   :  { %3032 = vperm.xlu0 %9896, %v3027_v62  }
0x106c   :  { %v2770_v5 = vpop.xlane.xlu1 %2769 }
0x106d   :  { %v2774_v6 = vmul.f32 0.03125, %v2770_v5 }
0x106e   :  { %v2773_v58 = vpop.xlane.xlu0 %2772 }
0x106f   :  { %v2776_v7 = vadd.f32 1e-05, %v2774_v6  ;;  %v2775_v10 = vmul.f32 0.03125, %v2773_v58 }
0x1070   :  { %v3030_v25 = vpop.permute.xlu1 %3029 }
0x1071   :  { %10052 = vrsqrt.f32 %v2776_v7  ;;  %v2777_v63 = vadd.f32 1e-05, %v2775_v10  ;;  %vm3034_vm10 = vcmp.eq.s32.totalorder %v3030_v25, %v10343_v9 }
0x1072   :  { %v8524_v51 = vsel %vm3034_vm10, 1.0, %v10275_v1 }
0x1073   :  { %10054 = vrsqrt.f32 %v2777_v63 }
0x1076   :  { %v3033_v17 = vpop.permute.xlu0 %3032 }
0x1077   :  { %vm3035_vm11 = vcmp.eq.s32.totalorder %v3033_v17, %v10343_v9  ;;  %v9933_v9 = vld [vmem:[#allocation2 + $0x108] sm:$0xff]  }
0x1078   :  { %v8525_v26 = vsel %vm3035_vm11, 1.0, %v10275_v1  ;;  %9309 = vmatpush3.bf16.msra.mxu0 %v9933_v9 }
0x1079   :  { %v3040_v30 = vpack.c.bf16 %v8525_v26, %v8524_v51  ;;  %9326 = vmatprep.subr.bf16.mxu0 %v10275_v1 }
0x107b   :  { %v10053_v11 = vpop.eup %10052 }
0x107c   :  { %v2780_v37 = vmul.f32 %v10053_v11, %v2764_v49 }
0x107d   :  { %v10055_v14 = vpop.eup %10054 }
0x107e   :  { %v2786_v15 = vmul.f32 %v8508_v8, %v2780_v37  ;;  %v2781_v16 = vmul.f32 %v10055_v14, %v2765_v53 }
0x1080   :  { %v2787_v18 = vmul.f32 %v8508_v8, %v2781_v16  ;;  %v10805_v19 = vadd.f32 %v8509_v41, %v2786_v15  ;;  %v8531_v8 = vld [vmem:[#allocation4 + $0x108] ss:$0 sm:$0xff] }
0x1082   :  { %v10807_v20 = vadd.f32 %v8509_v41, %v2787_v18 }
0x1084   :  { %v2798_v22 = vpack.c.bf16 %v10807_v20, %v10805_v19 }
0x1086   :  { %9299 = vmatmul.mubr.msk.bf16.vlgmr.msra.gmra.mrb[84].mxu1 %vm200_vm4, %v2798_v22 }
0x1087   :  { %9315 = vmatpush3.bf16.msra.mxu1 %v9926_v21  ;;  %9322 = vmatprep.mubr.msk.bf16.mxu1 %vm10276_vm0, %v10275_v1 }
0x1088   :  { %9316 = vmatprep.subr.bf16.mxu1 %v10275_v1 }
0x108b   :  { %9317 = vmatpush3.bf16.msra.mxu1 %v9927_v12 }
0x108c   :  { %9318 = vmatprep.subr.bf16.mxu1 %v10275_v1 }
0x108f   :  { %9319 = vmatpush3.bf16.msra.mxu1 %v9928_v28 }
0x1090   :  { %9320 = vmatprep.subr.bf16.mxu1 %v10275_v1 }
0x1093   :  { %9321 = vmatpush3.bf16.msra.mxu1 %v9929_v29 }
0x1094   :  { %9334 = vmatprep.subr.bf16.mxu1 %v10275_v1 }
0x1096   :  { %9323 = vmatmul.mubr.msk.bf16.vlgmr.msra.gmra.mrb[88].mxu1 %vm130_vm3, %v3040_v30 }
0x1097   :  { %9338 = vmatprep.mubr.msk.bf16.mxu1 %vm10276_vm0, %v10275_v1  ;;  %9335 = vmatpush3.bf16.msra.mxu1 %v9935_v32 }
0x1098   :  { %9336 = vmatprep.subr.bf16.mxu1 %v10275_v1 }
0x109b   :  { %9337 = vmatpush3.bf16.msra.mxu1 %v9937_v33 }
0x109c   :  { %9350 = vmatprep.subr.bf16.mxu1 %v10275_v1 }
0x1159   :  { %v2853_v34 = vpop.f32.mrb[84].mxu1 }
0x115a   :  { %v2854_v35 = vadd.f32 %v8510_v56, %v2853_v34  ;;  %v9300_v36 = vpop.f32.mrb[85].mxu1 }
0x115b   :  { %v2856_v38 = vpop.f32.mrb[86].mxu1 }
0x115c   :  { %v2857_v40 = vadd.f32 %v8510_v56, %v2856_v38  ;;  %v9301_v42 = vpop.f32.mrb[87].mxu1  ;;  %v2860_v44 = vmax.f32 %v2854_v35, 0.0 }
0x115e   :  { %v2861_v23 = vmax.f32 %v2857_v40, 0.0 }
0x1160   :  { %v2870_v24 = vpack.c.bf16 %v2861_v23, %v2860_v44 }
0x1162   :  { %9311 = vmatmul.mubr.msk.bf16.vlgmr.msra.gmra.mrb[88].mxu0 %vm130_vm3, %v2870_v24 }
0x1163   :  { %9327 = vmatpush3.bf16.msra.mxu0 %v9934_v45  ;;  %9330 = vmatprep.mubr.msk.bf16.mxu0 %vm10276_vm0, %v10275_v1 }
0x1164   :  { %9328 = vmatprep.subr.bf16.mxu0 %v10275_v1 }
0x1167   :  { %9329 = vmatpush3.bf16.msra.mxu0 %v9936_v46 }
0x1168   :  { %9342 = vmatprep.subr.bf16.mxu0 %v10275_v1 }
0x1169   :  { %v3110_v39 = vpop.f32.mrb[88].mxu1 }
0x116a   :  { %v9324_v43 = vpop.f32.mrb[89].mxu1  ;;  %v10834_v49 = vadd.f32 %v3117_v47, %v3110_v39 }
0x116b   :  { %v3113_v48 = vpop.f32.mrb[90].mxu1 }
0x116c   :  { %v10836_v50 = vadd.f32 %v3117_v47, %v3113_v48  ;;  %v9325_v53 = vpop.f32.mrb[91].mxu1  ;;  %v8539_v47 = vld [vmem:[#allocation4 + $0x118] ss:$0 sm:$0xff] }
0x116e   :  { %v3124_v55 = vpack.c.bf16 %v10836_v50, %v10834_v49 }
0x1170   :  { %9331 = vmatmul.mubr.msk.bf16.vlgmr.msra.gmra.mrb[92].mxu0 %vm200_vm4, %v3124_v55  ;;  %9339 = vmatmul.mubr.msk.bf16.vlgmr.msra.gmra.mrb[92].mxu1 %vm200_vm4, %v3124_v55 }
0x1171   :  { %9343 = vmatpush3.bf16.msra.mxu0 %v9938_v54  ;;  %9346 = vmatprep.mubr.msk.bf16.mxu0 %vm10276_vm0, %v10275_v1 }
0x1172   :  { %9344 = vmatprep.subr.bf16.mxu0 %v10275_v1  ;;  %9352 = vmatprep.mubr.msk.bf16.mxu1 %vm10276_vm0, %v10275_v1 }
0x1175   :  { %9345 = vmatpush3.bf16.msra.mxu0 %v9939_v60 }
0x1176   :  { %9356 = vmatprep.subr.bf16.mxu0 %v10275_v1 }
0x1178   :  { %9347 = vmatmul.mubr.msk.bf16.vlgmr.msra.gmra.mrb[96].mxu0 %vm200_vm4, %v3124_v55 }
0x1179   :  { %9358 = vmatprep.mubr.msk.bf16.mxu0 %vm10276_vm0, %v10275_v1 }
0x1235   :  { %v10851_v57 = vpop.f32.mrb[88].mxu0 }
0x1236   :  { %v9312_v59 = vpop.f32.mrb[89].mxu0 }
0x1237   :  { %v10853_v62 = vpop.f32.mrb[90].mxu0 }
0x1238   :  { %v9313_v0 = vpop.f32.mrb[91].mxu0 }
0x1243   :  { %v3179_v3 = vpop.f32.mrb[92].mxu0  ;;  %v3241_v4 = vpop.f32.mrb[92].mxu1 }
0x1244   :  { %v3242_v5 = vadd.f32 %v8535_v2, %v3241_v4  ;;  %v9332_v6 = vpop.f32.mrb[93].mxu0  ;;  %v9340_v58 = vpop.f32.mrb[93].mxu1  ;;  %v10856_v15 = vadd.f32 %v8531_v8, %v3179_v3 }
0x1245   :  { %v3182_v7 = vpop.f32.mrb[94].mxu0  ;;  %v3244_v10 = vpop.f32.mrb[94].mxu1 }
0x1246   :  { %v9333_v63 = vpop.f32.mrb[95].mxu0  ;;  %v9341_v11 = vpop.f32.mrb[95].mxu1  ;;  %v3245_v37 = vadd.f32 %v8535_v2, %v3244_v10  ;;  %v3318_v14 = vmul.f32 %v3242_v5, %v10380_v52  ;;  %v10859_v21 = vadd.f32 %v8531_v8, %v3182_v7  ;;  %v3320_v17 = vmul.f32 %v3242_v5, %v10383_v61 }
0x1247   :  { %v3310_v29 = vmul.f32 %v10856_v15, %v10380_v52  ;;  %v3322_v35 = vmul.f32 %v3242_v5, %v10400_v13  ;;  %v3312_v36 = vmul.f32 %v10856_v15, %v10383_v61  ;;  %v3324_v39 = vmul.f32 %v3242_v5, %v10418_v27 }
0x1248   :  { %v3342_v16 = vpack.c.bf16 %v3318_v14, %v3318_v14  ;;  %v3319_v41 = vmul.f32 %v3245_v37, %v10380_v52  ;;  %v3321_v30 = vmul.f32 %v3245_v37, %v10383_v61  ;;  %v3311_v31 = vmul.f32 %v10859_v21, %v10380_v52 }
0x1249   :  { %v3344_v9 = vpack.c.bf16 %v3320_v17, %v3320_v17  ;;  %v3334_v32 = vpack.c.bf16 %v3310_v29, %v3310_v29  ;;  %v3323_v40 = vmul.f32 %v3245_v37, %v10400_v13  ;;  %v3313_v42 = vmul.f32 %v10859_v21, %v10383_v61 }
0x124a   :  { %v3354_v22 = vsel %vm200_vm4, %v3342_v16, 0  ;;  %v3343_v25 = vpack.c.bf16 %v3319_v41, %v3319_v41  ;;  %v3345_v33 = vpack.c.bf16 %v3321_v30, %v3321_v30  ;;  %v3335_v56 = vpack.c.bf16 %v3311_v31, %v3311_v31 }
0x124b   :  { %v3303_v18 = vpop.f32.mrb[96].mxu0  ;;  %9351 = vmatpush3.bf16.xpose.msra.mxu1 %v3354_v22  ;;  %v3446_v34 = vsel %vm200_vm4, %v3344_v9, 0  ;;  %v3346_v44 = vpack.c.bf16 %v3322_v35, %v3322_v35  ;;  %v3336_v23 = vpack.c.bf16 %v3312_v36, %v3312_v36  ;;  %v3347_v45 = vpack.c.bf16 %v3323_v40, %v3323_v40 }
0x124c   :  { %v9348_v12 = vpop.f32.mrb[97].mxu0  ;;  %v3400_v51 = vsel %vm200_vm4, %v3343_v25, 0  ;;  %9362 = vmatprep.subr.bf16.mxu1 %v10275_v1  ;;  %v3492_v38 = vsel %vm200_vm4, %v3345_v33, 0  ;;  %v3337_v24 = vpack.c.bf16 %v3313_v42, %v3313_v42  ;;  %v3314_v43 = vmul.f32 %v10856_v15, %v10400_v13 }
0x124d   :  { %v3306_v28 = vpop.f32.mrb[98].mxu0  ;;  %9357 = vmatpush3.bf16.xpose.msra.mxu0 %v3400_v51  ;;  %v3538_v46 = vsel %vm200_vm4, %v3346_v44, 0  ;;  %v3584_v48 = vsel %vm200_vm4, %v3347_v45, 0  ;;  %v3325_v53 = vmul.f32 %v3245_v37, %v10418_v27  ;;  %v3315_v54 = vmul.f32 %v10859_v21, %v10400_v13 }
0x124e   :  { %v9349_v26 = vpop.f32.mrb[99].mxu0  ;;  %9368 = vmatprep.subr.bf16.mxu0 %v10275_v1  ;;  %v10902_v55 = vadd.f32 %v8539_v47, %v3303_v18  ;;  %v3348_v60 = vpack.c.bf16 %v3324_v39, %v3324_v39  ;;  %v3338_v59 = vpack.c.bf16 %v3314_v43, %v3314_v43  ;;  %v10905_v0 = vadd.f32 %v8539_v47, %v3306_v28 }
0x124f   :  { %v3349_v2 = vpack.c.bf16 %v3325_v53, %v3325_v53  ;;  %v3339_v3 = vpack.c.bf16 %v3315_v54, %v3315_v54  ;;  %v3316_v6 = vmul.f32 %v10856_v15, %v10418_v27  ;;  %v3317_v10 = vmul.f32 %v10859_v21, %v10418_v27 }
0x1250   :  { %v3630_v4 = vsel %vm200_vm4, %v3348_v60, 0  ;;  %v3326_v5 = vmul.f32 %v10902_v55, %v10380_v52  ;;  %v3327_v7 = vmul.f32 %v10905_v0, %v10380_v52 }
0x1251   :  { %v3676_v58 = vsel %vm200_vm4, %v3349_v2, 0  ;;  %v3340_v11 = vpack.c.bf16 %v3316_v6, %v3316_v6  ;;  %v3341_v37 = vpack.c.bf16 %v3317_v10, %v3317_v10 }
0x1252   :  { %9353 = vmatmul.mubr.msk.bf16.vlgmr.msra.gmra.mrb[96].mxu1 %vm200_vm4, %v3334_v32  ;;  %v3822_v63 = vpack.c.bf16 %v3326_v5, %v3326_v5  ;;  %v3823_v8 = vpack.c.bf16 %v3327_v7, %v3327_v7 }
0x1253   :  { %9363 = vmatpush3.bf16.xpose.msra.mxu1 %v3446_v34  ;;  %9364 = vmatprep.mubr.msk.bf16.mxu1 %vm10276_vm0, %v10275_v1 }
0x1254   :  { %9359 = vmatmul.mubr.msk.bf16.vlgmr.msra.gmra.mrb[100].mxu0 %vm200_vm4, %v3335_v56  ;;  %9374 = vmatprep.subr.bf16.mxu1 %v10275_v1  ;;  %v3834_v14 = vsel %vm913_vm8, %v3822_v63, 0  ;;  %v3880_v15 = vsel %vm913_vm8, %v3823_v8, 0 }
0x1255   :  { %9369 = vmatpush3.bf16.xpose.msra.mxu0 %v3492_v38  ;;  %9370 = vmatprep.mubr.msk.bf16.mxu0 %vm10276_vm0, %v10275_v1 }
0x1256   :  { %9380 = vmatprep.subr.bf16.mxu0 %v10275_v1 }
0x125a   :  { %9365 = vmatmul.mubr.msk.bf16.vlgmr.msra.gmra.mrb[100].mxu1 %vm200_vm4, %v3336_v23 }
0x125b   :  { %9375 = vmatpush3.bf16.xpose.msra.mxu1 %v3538_v46  ;;  %9376 = vmatprep.mubr.msk.bf16.mxu1 %vm10276_vm0, %v10275_v1 }
0x125c   :  { %9371 = vmatmul.mubr.msk.bf16.vlgmr.msra.gmra.mrb[104].mxu0 %vm200_vm4, %v3337_v24  ;;  %9386 = vmatprep.subr.bf16.mxu1 %v10275_v1 }
0x125d   :  { %9381 = vmatpush3.bf16.xpose.msra.mxu0 %v3584_v48  ;;  %9382 = vmatprep.mubr.msk.bf16.mxu0 %vm10276_vm0, %v10275_v1 }
0x125e   :  { %9392 = vmatprep.subr.bf16.mxu0 %v10275_v1 }
0x1262   :  { %9377 = vmatmul.mubr.msk.bf16.vlgmr.msra.gmra.mrb[104].mxu1 %vm200_vm4, %v3338_v59 }
0x1263   :  { %9387 = vmatpush3.bf16.xpose.msra.mxu1 %v3630_v4  ;;  %9388 = vmatprep.mubr.msk.bf16.mxu1 %vm10276_vm0, %v10275_v1 }
0x1264   :  { %9383 = vmatmul.mubr.msk.bf16.vlgmr.msra.gmra.mrb[108].mxu0 %vm200_vm4, %v3339_v3  ;;  %9398 = vmatprep.subr.bf16.mxu1 %v10275_v1 }
0x1265   :  { %9393 = vmatpush3.bf16.xpose.msra.mxu0 %v3676_v58  ;;  %9394 = vmatprep.mubr.msk.bf16.mxu0 %vm10276_vm0, %v10275_v1 }
0x1266   :  { %9404 = vmatprep.subr.bf16.mxu0 %v10275_v1 }
0x126a   :  { %9389 = vmatmul.mubr.msk.bf16.vlgmr.msra.gmra.mrb[108].mxu1 %vm200_vm4, %v3340_v11 }
0x126b   :  { %9399 = vmatpush3.bf16.msra.mxu1 %v3834_v14  ;;  %9400 = vmatprep.mubr.msk.bf16.mxu1 %vm10276_vm0, %v10275_v1 }
0x126c   :  { %9395 = vmatmul.mubr.msk.bf16.vlgmr.msra.gmra.mrb[112].mxu0 %vm200_vm4, %v3341_v37  ;;  %9410 = vmatprep.subr.bf16.mxu1 %v10275_v1 }
0x126d   :  { %9405 = vmatpush3.bf16.msra.mxu0 %v3880_v15  ;;  %9406 = vmatprep.mubr.msk.bf16.mxu0 %vm10276_vm0, %v10275_v1 }
0x126e   :  { %9416 = vmatprep.subr.bf16.mxu0 %v10275_v1 }
0x1325   :  { %v3390_v16 = vpop.f32.mrb[96].mxu1 }
0x1326   :  { %v3718_v41 = vmul.f32 0.35355338, %v3390_v16  ;;  %v9354_v18 = vpop.f32.mrb[97].mxu1 }
0x1327   :  { %v3393_v21 = vpop.f32.mrb[98].mxu1  ;;  %v3436_v22 = vpop.f32.mrb[100].mxu0 }
0x1328   :  { %v3719_v12 = vmul.f32 0.35355338, %v3436_v22  ;;  %v9355_v25 = vpop.f32.mrb[99].mxu1  ;;  %v9360_v17 = vpop.f32.mrb[101].mxu0  ;;  %v3726_v28 = vsel %vm805_vm9, %v3718_v41, -inf }
0x1329   :  { %3727 = vmax.xlane.f32.xlu1 %v3726_v28  ;;  %v3439_v29 = vpop.f32.mrb[102].mxu0 }
0x132a   :  { %v9361_v51 = vpop.f32.mrb[103].mxu0  ;;  %v3729_v26 = vsel %vm805_vm9, %v3719_v12, -inf }
0x132b   :  { %3730 = vmax.xlane.f32.xlu0 %v3729_v26 }
0x132d   :  { %v3482_v30 = vpop.f32.mrb[100].mxu1 }
0x132e   :  { %v3720_v31 = vmul.f32 0.35355338, %v3482_v30  ;;  %v9366_v9 = vpop.f32.mrb[101].mxu1 }
0x132f   :  { %v3485_v32 = vpop.f32.mrb[102].mxu1  ;;  %v3528_v33 = vpop.f32.mrb[104].mxu0 }
0x1330   :  { %v3721_v56 = vmul.f32 0.35355338, %v3528_v33  ;;  %v9367_v34 = vpop.f32.mrb[103].mxu1  ;;  %v9372_v35 = vpop.f32.mrb[105].mxu0  ;;  %v3732_v36 = vsel %vm805_vm9, %v3720_v31, -inf }
0x1331   :  { %3733 = vmax.xlane.f32.xlu1 %v3732_v36  ;;  %v3531_v38 = vpop.f32.mrb[106].mxu0 }
0x1332   :  { %v9373_v40 = vpop.f32.mrb[107].mxu0  ;;  %v3735_v42 = vsel %vm805_vm9, %v3721_v56, -inf }
0x1333   :  { %3736 = vmax.xlane.f32.xlu0 %v3735_v42 }
0x1335   :  { %v3574_v44 = vpop.f32.mrb[104].mxu1 }
0x1336   :  { %v3722_v23 = vmul.f32 0.35355338, %v3574_v44  ;;  %v9378_v45 = vpop.f32.mrb[105].mxu1 }
0x1337   :  { %v3577_v24 = vpop.f32.mrb[106].mxu1  ;;  %v3620_v46 = vpop.f32.mrb[108].mxu0 }
0x1338   :  { %v3723_v39 = vmul.f32 0.35355338, %v3620_v46  ;;  %v9379_v47 = vpop.f32.mrb[107].mxu1  ;;  %v9384_v43 = vpop.f32.mrb[109].mxu0  ;;  %v3738_v48 = vsel %vm805_vm9, %v3722_v23, -inf }
0x1339   :  { %3739 = vmax.xlane.f32.xlu1 %v3738_v48  ;;  %v3623_v53 = vpop.f32.mrb[110].mxu0  ;;  %v8514_v48 = vld [vmem:[#allocation4 + $0xe0] ss:$0 sm:$0xff] }
0x133a   :  { %v9385_v54 = vpop.f32.mrb[111].mxu0  ;;  %v3741_v60 = vsel %vm805_vm9, %v3723_v39, -inf }
0x133b   :  { %3742 = vmax.xlane.f32.xlu0 %v3741_v60  ;;  %v2938_v54 = vadd.f32 %v8514_v48, %v10851_v57  ;;  %v2941_v60 = vadd.f32 %v8514_v48, %v10853_v62 }
0x133d   :  { %v3666_v59 = vpop.f32.mrb[108].mxu1 }
0x133e   :  { %v3724_v2 = vmul.f32 0.35355338, %v3666_v59  ;;  %v9390_v3 = vpop.f32.mrb[109].mxu1 }
0x133f   :  { %v3669_v4 = vpop.f32.mrb[110].mxu1  ;;  %v3712_v5 = vpop.f32.mrb[112].mxu0  ;;  %v10968_v3 = vadd.f32 %v2938_v54, %v10805_v19 }
0x1340   :  { %v3725_v6 = vmul.f32 0.35355338, %v3712_v5  ;;  %v9391_v58 = vpop.f32.mrb[111].mxu1  ;;  %v9396_v7 = vpop.f32.mrb[113].mxu0  ;;  %v3744_v10 = vsel %vm805_vm9, %v3724_v2, -inf }
0x1341   :  { %3745 = vmax.xlane.f32.xlu1 %v3744_v10  ;;  %v3715_v63 = vpop.f32.mrb[114].mxu0  ;;  %v2948_v57 = vsel %vm200_vm4, %v10968_v3, 0.0  ;;  %v3328_v10 = vmul.f32 %v10902_v55, %v10383_v61 }
0x1342   :  { %v9397_v11 = vpop.f32.mrb[115].mxu0  ;;  %v3747_v8 = vsel %vm805_vm9, %v3725_v6, -inf  ;;  %v3329_v63 = vmul.f32 %v10905_v0, %v10383_v61 }
0x1343   :  { %3748 = vmax.xlane.f32.xlu0 %v3747_v8 }
0x13b6   :  { %v3728_v37 = vpop.xlane.xlu1 %3727 }
0x13b7   :  { %v3750_v14 = vsub.f32 %v3718_v41, %v3728_v37  ;;  %v3824_v37 = vpack.c.bf16 %v3328_v10, %v3328_v10 }
0x13b8   :  { %v3731_v15 = vpop.xlane.xlu0 %3730 }
0x13b9   :  { %v3758_v16 = vmul.f32 1.442695, %v3750_v14  ;;  %v3751_v18 = vsub.f32 %v3719_v12, %v3731_v15 }
0x13bb   :  { %10056 = vpow2.f32 %v3758_v16  ;;  %v3760_v21 = vmul.f32 1.442695, %v3751_v18  ;;  %v3825_v18 = vpack.c.bf16 %v3329_v63, %v3329_v63  ;;  %v9941_v63 = vld [vmem:[#allocation2 + $0x148] sm:$0xff]  }
0x13bd   :  { %10058 = vpow2.f32 %v3760_v21 }
0x13be   :  { %v3734_v22 = vpop.xlane.xlu1 %3733 }
0x13bf   :  { %v3752_v25 = vsub.f32 %v3720_v31, %v3734_v22  ;;  %v3926_v22 = vsel %vm913_vm8, %v3824_v37, 0 }
0x13c0   :  { %v3737_v17 = vpop.xlane.xlu0 %3736 }
0x13c1   :  { %v3762_v28 = vmul.f32 1.442695, %v3752_v25  ;;  %v3753_v29 = vsub.f32 %v3721_v56, %v3737_v17  ;;  %v3330_v17 = vmul.f32 %v10902_v55, %v10400_v13 }
0x13c3   :  { %10060 = vpow2.f32 %v3762_v28  ;;  %v3764_v51 = vmul.f32 1.442695, %v3753_v29  ;;  %v3972_v28 = vsel %vm913_vm8, %v3825_v18, 0  ;;  %v8520_v18 = vld [vmem:[#allocation4 + $0xf8] ss:$0 sm:$0xff] }
0x13c5   :  { %v10057_v26 = vpop.eup %10056  ;;  %10062 = vpow2.f32 %v3764_v51  ;;  %v3331_v51 = vmul.f32 %v10905_v0, %v10400_v13 }
0x13c6   :  { %v3740_v30 = vpop.xlane.xlu1 %3739  ;;  %v3774_v9 = vsel %vm805_vm9, %v10057_v26, 0.0 }
0x13c7   :  { %v10059_v32 = vpop.eup %10058  ;;  %v3754_v41 = vsub.f32 %v3722_v23, %v3740_v30  ;;  %3775 = vadd.xlane.f32.xlu1 %v3774_v9  ;;  %v3826_v9 = vpack.c.bf16 %v3330_v17, %v3330_v17 }
0x13c8   :  { %v3743_v33 = vpop.xlane.xlu0 %3742  ;;  %v3777_v12 = vsel %vm805_vm9, %v10059_v32, 0.0 }
0x13c9   :  { %v3766_v34 = vmul.f32 1.442695, %v3754_v41  ;;  %v3755_v35 = vsub.f32 %v3723_v39, %v3743_v33  ;;  %3778 = vadd.xlane.f32.xlu0 %v3777_v12  ;;  %v3827_v12 = vpack.c.bf16 %v3331_v51, %v3331_v51 }
0x13cb   :  { %10064 = vpow2.f32 %v3766_v34  ;;  %v3768_v31 = vmul.f32 1.442695, %v3755_v35  ;;  %v4018_v35 = vsel %vm913_vm8, %v3826_v9, 0 }
0x13cd   :  { %v10945_v36 = vpop.eup %10060  ;;  %10066 = vpow2.f32 %v3768_v31 }
0x13ce   :  { %v3746_v56 = vpop.xlane.xlu1 %3745  ;;  %v3780_v38 = vsel %vm805_vm9, %v10945_v36, 0.0 }
0x13cf   :  { %v10949_v40 = vpop.eup %10062  ;;  %v3756_v42 = vsub.f32 %v3724_v2, %v3746_v56  ;;  %3781 = vadd.xlane.f32.xlu1 %v3780_v38  ;;  %v3332_v56 = vmul.f32 %v10902_v55, %v10418_v27 }
0x13d0   :  { %v3749_v44 = vpop.xlane.xlu0 %3748  ;;  %v3783_v23 = vsel %vm805_vm9, %v10949_v40, 0.0 }
0x13d1   :  { %v3770_v45 = vmul.f32 1.442695, %v3756_v42  ;;  %v3757_v24 = vsub.f32 %v3725_v6, %v3749_v44  ;;  %3784 = vadd.xlane.f32.xlu0 %v3783_v23  ;;  %v10975_v6 = vadd.f32 %v2941_v60, %v10807_v20  ;;  %v3828_v23 = vpack.c.bf16 %v3332_v56, %v3332_v56 }
0x13d3   :  { %10068 = vpow2.f32 %v3770_v45  ;;  %v3772_v46 = vmul.f32 1.442695, %v3757_v24  ;;  %v2951_v62 = vsel %vm200_vm4, %v10975_v6, 0.0  ;;  %v4110_v60 = vsel %vm913_vm8, %v3828_v23, 0 }
0x13d5   :  { %v10953_v39 = vpop.eup %10064  ;;  %10070 = vpow2.f32 %v3772_v46 }
0x13d6   :  { %v3786_v47 = vsel %vm805_vm9, %v10953_v39, 0.0 }
0x13d7   :  { %v10957_v43 = vpop.eup %10066  ;;  %3787 = vadd.xlane.f32.xlu1 %v3786_v47 }
0x13d8   :  { %v3789_v53 = vsel %vm805_vm9, %v10957_v43, 0.0 }
0x13d9   :  { %3790 = vadd.xlane.f32.xlu0 %v3789_v53 }
0x13dd   :  { %v10963_v59 = vpop.eup %10068 }
0x13de   :  { %v3792_v2 = vsel %vm805_vm9, %v10963_v59, 0.0 }
0x13df   :  { %v10970_v4 = vpop.eup %10070  ;;  %3793 = vadd.xlane.f32.xlu1 %v3792_v2 }
0x13e0   :  { %v3795_v5 = vsel %vm805_vm9, %v10970_v4, 0.0 }
0x13e1   :  { %3796 = vadd.xlane.f32.xlu0 %v3795_v5 }
0x13e3   :  { %2949 = vadd.xlane.f32.xlu1 %v2948_v57 }
0x13e5   :  { %2952 = vadd.xlane.f32.xlu0 %v2951_v62 }
0x1454   :  { %v3776_v19 = vpop.xlane.xlu1 %3775 }
0x1455   :  { %10072 = vrcp.f32 %v3776_v19 }
0x1456   :  { %v3779_v58 = vpop.xlane.xlu0 %3778 }
0x1457   :  { %10074 = vrcp.f32 %v3779_v58 }
0x145c   :  { %v3782_v7 = vpop.xlane.xlu1 %3781 }
0x145d   :  { %10076 = vrcp.f32 %v3782_v7 }
0x145e   :  { %v3785_v20 = vpop.xlane.xlu0 %3784 }
0x145f   :  { %v10073_v11 = vpop.eup %10072  ;;  %10078 = vrcp.f32 %v3785_v20 }
0x1460   :  { %v3806_v8 = vmul.f32 %v10073_v11, %v10057_v26 }
0x1461   :  { %v10075_v14 = vpop.eup %10074 }
0x1462   :  { %v3807_v15 = vmul.f32 %v10075_v14, %v10059_v32  ;;  %v3814_v16 = vpack.c.bf16 %v3806_v8, %v3806_v8 }
0x1464   :  { %v3788_v21 = vpop.xlane.xlu1 %3787  ;;  %9401 = vmatmul.mubr.msk.bf16.vlgmr.msra.gmra.mrb[112].mxu1 %vm805_vm9, %v3814_v16  ;;  %v3815_v25 = vpack.c.bf16 %v3807_v15, %v3807_v15 }
0x1465   :  { %10080 = vrcp.f32 %v3788_v21  ;;  %9411 = vmatpush3.bf16.msra.mxu1 %v3926_v22  ;;  %9412 = vmatprep.mubr.msk.bf16.mxu1 %vm10276_vm0, %v10275_v1 }
0x1466   :  { %9407 = vmatmul.mubr.msk.bf16.vlgmr.msra.gmra.mrb[116].mxu0 %vm805_vm9, %v3815_v25  ;;  %v3791_v29 = vpop.xlane.xlu0 %3790  ;;  %9422 = vmatprep.subr.bf16.mxu1 %v10275_v1  ;;  %v8521_v25 = vld [vmem:[#allocation4 + $0x100] ss:$0 sm:$0xff] }
0x1467   :  { %v10077_v26 = vpop.eup %10076  ;;  %9417 = vmatpush3.bf16.msra.mxu0 %v3972_v28  ;;  %10082 = vrcp.f32 %v3791_v29  ;;  %9418 = vmatprep.mubr.msk.bf16.mxu0 %vm10276_vm0, %v10275_v1 }
0x1468   :  { %v3808_v30 = vmul.f32 %v10077_v26, %v10945_v36  ;;  %9428 = vmatprep.subr.bf16.mxu0 %v10275_v1  ;;  %v4064_v36 = vsel %vm913_vm8, %v3827_v12, 0 }
0x1469   :  { %v10079_v32 = vpop.eup %10078 }
0x146a   :  { %v3809_v41 = vmul.f32 %v10079_v32, %v10949_v40  ;;  %v3816_v33 = vpack.c.bf16 %v3808_v30, %v3808_v30  ;;  %v3333_v40 = vmul.f32 %v10905_v0, %v10418_v27 }
0x146c   :  { %v3794_v34 = vpop.xlane.xlu1 %3793  ;;  %9413 = vmatmul.mubr.msk.bf16.vlgmr.msra.gmra.mrb[116].mxu1 %vm805_vm9, %v3816_v33  ;;  %v3817_v31 = vpack.c.bf16 %v3809_v41, %v3809_v41  ;;  %v3829_v53 = vpack.c.bf16 %v3333_v40, %v3333_v40 }
0x146d   :  { %10084 = vrcp.f32 %v3794_v34  ;;  %9423 = vmatpush3.bf16.msra.mxu1 %v4018_v35  ;;  %9424 = vmatprep.mubr.msk.bf16.mxu1 %vm10276_vm0, %v10275_v1 }
0x146e   :  { %9419 = vmatmul.mubr.msk.bf16.vlgmr.msra.gmra.mrb[120].mxu0 %vm805_vm9, %v3817_v31  ;;  %v3797_v38 = vpop.xlane.xlu0 %3796  ;;  %9434 = vmatprep.subr.bf16.mxu1 %v10275_v1 }
0x146f   :  { %v10081_v42 = vpop.eup %10080  ;;  %9429 = vmatpush3.bf16.msra.mxu0 %v4064_v36  ;;  %10086 = vrcp.f32 %v3797_v38  ;;  %9430 = vmatprep.mubr.msk.bf16.mxu0 %vm10276_vm0, %v10275_v1 }
0x1470   :  { %v3810_v55 = vmul.f32 %v10081_v42, %v10953_v39  ;;  %v2950_v44 = vpop.xlane.xlu1 %2949  ;;  %9440 = vmatprep.subr.bf16.mxu0 %v10275_v1 }
0x1471   :  { %v10083_v45 = vpop.eup %10082  ;;  %v2954_v24 = vmul.f32 0.03125, %v2950_v44 }
0x1472   :  { %v3811_v46 = vmul.f32 %v10083_v45, %v10957_v43  ;;  %v2953_v47 = vpop.xlane.xlu0 %2952  ;;  %v3818_v48 = vpack.c.bf16 %v3810_v55, %v3810_v55  ;;  %v4156_v43 = vsel %vm913_vm8, %v3829_v53, 0 }
0x1473   :  { %v2956_v0 = vsub.f32 %v10968_v3, %v2954_v24  ;;  %v2955_v54 = vmul.f32 0.03125, %v2953_v47 }
0x1474   :  { %9425 = vmatmul.mubr.msk.bf16.vlgmr.msra.gmra.mrb[120].mxu1 %vm805_vm9, %v3818_v48  ;;  %v3819_v2 = vpack.c.bf16 %v3811_v46, %v3811_v46 }
0x1475   :  { %v2957_v39 = vsub.f32 %v10975_v6, %v2955_v54  ;;  %9435 = vmatpush3.bf16.msra.mxu1 %v4110_v60  ;;  %v2958_v5 = vmul.f32 %v2956_v0, %v2956_v0  ;;  %9436 = vmatprep.mubr.msk.bf16.mxu1 %vm10276_vm0, %v10275_v1 }
0x1476   :  { %9431 = vmatmul.mubr.msk.bf16.vlgmr.msra.gmra.mrb[124].mxu0 %vm805_vm9, %v3819_v2  ;;  %9446 = vmatprep.subr.bf16.mxu1 %v10275_v1 }
0x1477   :  { %v10085_v3 = vpop.eup %10084  ;;  %9441 = vmatpush3.bf16.msra.mxu0 %v4156_v43  ;;  %v2960_v57 = vsel %vm200_vm4, %v2958_v5, 0.0  ;;  %v2959_v62 = vmul.f32 %v2957_v39, %v2957_v39  ;;  %9442 = vmatprep.mubr.msk.bf16.mxu0 %vm10276_vm0, %v10275_v1 }
0x1478   :  { %v3812_v6 = vmul.f32 %v10085_v3, %v10963_v59  ;;  %2961 = vadd.xlane.f32.xlu1 %v2960_v57  ;;  %9454 = vmatprep.subr.bf16.mxu0 %v10275_v1  ;;  %v9940_v59 = vld [vmem:[#allocation2 + $0x140] sm:$0xff]  }
0x1479   :  { %v10087_v19 = vpop.eup %10086  ;;  %v2963_v58 = vsel %vm200_vm4, %v2959_v62, 0.0 }
0x147a   :  { %v3813_v7 = vmul.f32 %v10087_v19, %v10970_v4  ;;  %2964 = vadd.xlane.f32.xlu0 %v2963_v58  ;;  %v3820_v10 = vpack.c.bf16 %v3812_v6, %v3812_v6 }
0x147c   :  { %9437 = vmatmul.mubr.msk.bf16.vlgmr.msra.gmra.mrb[124].mxu1 %vm805_vm9, %v3820_v10  ;;  %v3821_v20 = vpack.c.bf16 %v3813_v7, %v3813_v7 }
0x147d   :  { %9450 = vmatprep.mubr.msk.bf16.mxu1 %vm10276_vm0, %v10275_v1  ;;  %9447 = vmatpush3.bf16.msra.mxu1 %v9940_v59 }
0x147e   :  { %9443 = vmatmul.mubr.msk.bf16.vlgmr.msra.gmra.mrb[128].mxu0 %vm805_vm9, %v3821_v20  ;;  %9448 = vmatprep.subr.bf16.mxu1 %v10275_v1 }
0x147f   :  { %9458 = vmatprep.mubr.msk.bf16.mxu0 %vm10276_vm0, %v10275_v1 }
0x1481   :  { %9449 = vmatpush3.bf16.msra.mxu1 %v9941_v63 }
0x1482   :  { %9462 = vmatprep.subr.bf16.mxu1 %v10275_v1 }
0x1505   :  { %v2962_v4 = vpop.xlane.xlu1 %2961 }
0x1506   :  { %v2966_v11 = vmul.f32 0.03125, %v2962_v4 }
0x1507   :  { %v2965_v8 = vpop.xlane.xlu0 %2964 }
0x1508   :  { %v2968_v37 = vadd.f32 1e-05, %v2966_v11  ;;  %v2967_v14 = vmul.f32 0.03125, %v2965_v8 }
0x150a   :  { %10088 = vrsqrt.f32 %v2968_v37  ;;  %v2969_v15 = vadd.f32 1e-05, %v2967_v14 }
0x150c   :  { %10090 = vrsqrt.f32 %v2969_v15 }
0x1514   :  { %v10089_v16 = vpop.eup %10088 }
0x1515   :  { %v2972_v21 = vmul.f32 %v10089_v16, %v2956_v0 }
0x1516   :  { %v10091_v22 = vpop.eup %10090 }
0x1517   :  { %v2978_v17 = vmul.f32 %v8520_v18, %v2972_v21  ;;  %v2973_v28 = vmul.f32 %v10091_v22, %v2957_v39 }
0x1519   :  { %v2984_v29 = vadd.f32 %v8521_v25, %v2978_v17  ;;  %v2979_v51 = vmul.f32 %v8520_v18, %v2973_v28  ;;  %v8559_v17 = vld [vmem:[#allocation4 + $0x120] ss:$0 sm:$0xff] }
0x151b   :  { %v2988_v26 = vsel %vm200_vm4, %v2984_v29, 0.0  ;;  %v11042_v30 = vadd.f32 %v8521_v25, %v2979_v51 }
0x151c   :  { %2989 = vadd.xlane.f32.xlu1 %v2988_v26 }
0x151d   :  { %v2991_v9 = vsel %vm200_vm4, %v11042_v30, 0.0 }
0x151e   :  { %2992 = vadd.xlane.f32.xlu0 %v2991_v9 }
0x1537   :  { %v3870_v32 = vpop.f32.mrb[112].mxu1 }
0x1538   :  { %v9402_v41 = vpop.f32.mrb[113].mxu1  ;;  %v4198_v38 = vsel %vm200_vm4, %v3870_v32, 0.0 }
0x1539   :  { %v3873_v33 = vpop.f32.mrb[114].mxu1  ;;  %v3916_v12 = vpop.f32.mrb[116].mxu0 }
0x153a   :  { %v9403_v34 = vpop.f32.mrb[115].mxu1  ;;  %v9408_v35 = vpop.f32.mrb[117].mxu0  ;;  %v4205_v45 = vsel %vm200_vm4, %v3916_v12, 0.0 }
0x153b   :  { %v3919_v31 = vpop.f32.mrb[118].mxu0 }
0x153c   :  { %v9409_v56 = vpop.f32.mrb[119].mxu0 }
0x153f   :  { %v3962_v36 = vpop.f32.mrb[116].mxu1 }
0x1540   :  { %v4199_v40 = vsel %vm200_vm4, %v3962_v36, 0.0  ;;  %v9414_v42 = vpop.f32.mrb[117].mxu1 }
0x1541   :  { %v4200_v55 = vadd.f32 %v4199_v40, %v4198_v38  ;;  %v3965_v44 = vpop.f32.mrb[118].mxu1  ;;  %v4008_v23 = vpop.f32.mrb[120].mxu0 }
0x1542   :  { %v4206_v24 = vsel %vm200_vm4, %v4008_v23, 0.0  ;;  %v9415_v46 = vpop.f32.mrb[119].mxu1  ;;  %v9420_v47 = vpop.f32.mrb[121].mxu0 }
0x1543   :  { %v4207_v48 = vadd.f32 %v4206_v24, %v4205_v45  ;;  %v4011_v53 = vpop.f32.mrb[122].mxu0 }
0x1544   :  { %v9421_v0 = vpop.f32.mrb[123].mxu0 }
0x1547   :  { %v4054_v54 = vpop.f32.mrb[120].mxu1 }
0x1548   :  { %v4201_v60 = vsel %vm200_vm4, %v4054_v54, 0.0  ;;  %v9426_v2 = vpop.f32.mrb[121].mxu1 }
0x1549   :  { %v4202_v39 = vadd.f32 %v4201_v60, %v4200_v55  ;;  %v4057_v5 = vpop.f32.mrb[122].mxu1  ;;  %v4100_v43 = vpop.f32.mrb[124].mxu0  ;;  %v9943_v55 = vld [vmem:[#allocation2 + $0x168] sm:$0xff]  }
0x154a   :  { %v4208_v3 = vsel %vm200_vm4, %v4100_v43, 0.0  ;;  %v9427_v57 = vpop.f32.mrb[123].mxu1  ;;  %v9432_v62 = vpop.f32.mrb[125].mxu0 }
0x154b   :  { %v4209_v6 = vadd.f32 %v4208_v3, %v4207_v48  ;;  %v4103_v19 = vpop.f32.mrb[126].mxu0  ;;  %v8522_v3 = vld [vmem:[#allocation4 + $0x48] ss:$0 sm:$0xff] }
0x154c   :  { %v9433_v58 = vpop.f32.mrb[127].mxu0 }
0x154d   :  { %v8523_v58 = vld [vmem:[#allocation4 + $0x50] ss:$0 sm:$0xff] }
0x154f   :  { %v4146_v7 = vpop.f32.mrb[124].mxu1 }
0x1550   :  { %v4203_v10 = vsel %vm200_vm4, %v4146_v7, 0.0  ;;  %v9438_v20 = vpop.f32.mrb[125].mxu1 }
0x1551   :  { %v4204_v59 = vadd.f32 %v4203_v10, %v4202_v39  ;;  %v4149_v63 = vpop.f32.mrb[126].mxu1  ;;  %v4192_v4 = vpop.f32.mrb[128].mxu0 }
0x1552   :  { %v4210_v11 = vsel %vm200_vm4, %v4192_v4, 0.0  ;;  %v9439_v8 = vpop.f32.mrb[127].mxu1  ;;  %v9444_v37 = vpop.f32.mrb[129].mxu0  ;;  %v9944_v63 = vld [vmem:[#allocation2 + $0x150] sm:$0xff]   ;;  %v9945_v4 = vld [vmem:[#allocation2 + $0x158] sm:$0xff]  }
0x1553   :  { %v4211_v14 = vadd.f32 %v4210_v11, %v4209_v6  ;;  %v4195_v15 = vpop.f32.mrb[130].mxu0  ;;  %9455 = vmatpush3.bf16.msra.mxu0 %v9944_v63 }
0x1554   :  { %v9445_v16 = vpop.f32.mrb[131].mxu0  ;;  %9456 = vmatprep.subr.bf16.mxu0 %v10275_v1 }
0x1555   :  { %v4216_v18 = vpack.c.bf16 %v4211_v14, %v4204_v59 }
0x1557   :  { %9451 = vmatmul.mubr.msk.bf16.vlgmr.msra.gmra.mrb[128].mxu1 %vm200_vm4, %v4216_v18  ;;  %9457 = vmatpush3.bf16.msra.mxu0 %v9945_v4 }
0x1558   :  { %9466 = vmatprep.mubr.msk.bf16.mxu1 %vm10276_vm0, %v10275_v1  ;;  %9470 = vmatprep.subr.bf16.mxu0 %v10275_v1 }
0x15a9   :  { %v2990_v21 = vpop.xlane.xlu1 %2989 }
0x15aa   :  { %v2994_v25 = vmul.f32 0.03125, %v2990_v21  ;;  %v8563_v21 = vld [vmem:[#allocation4 + $0x158] ss:$0 sm:$0xff] }
0x15ab   :  { %v2993_v22 = vpop.xlane.xlu0 %2992 }
0x15ac   :  { %v2995_v28 = vmul.f32 0.03125, %v2993_v22  ;;  %v2996_v26 = vsub.f32 %v2984_v29, %v2994_v25 }
0x15ae   :  { %v2997_v33 = vsub.f32 %v11042_v30, %v2995_v28  ;;  %v2998_v36 = vmul.f32 %v2996_v26, %v2996_v26  ;;  %v9942_v30 = vld [vmem:[#allocation2 + $0x160] sm:$0xff]  }
0x15af   :  { %9463 = vmatpush3.bf16.msra.mxu1 %v9942_v30 }
0x15b0   :  { %v2999_v40 = vmul.f32 %v2997_v33, %v2997_v33  ;;  %v3000_v29 = vsel %vm200_vm4, %v2998_v36, 0.0  ;;  %9464 = vmatprep.subr.bf16.mxu1 %v10275_v1 }
0x15b2   :  { %v3003_v42 = vsel %vm200_vm4, %v2999_v40, 0.0 }
0x15b3   :  { %9465 = vmatpush3.bf16.msra.mxu1 %v9943_v55 }
0x15b4   :  { %9478 = vmatprep.subr.bf16.mxu1 %v10275_v1 }
0x162a   :  { %v4271_v51 = vpop.f32.mrb[128].mxu1 }
0x162b   :  { %v4272_v9 = vadd.f32 %v8559_v17, %v4271_v51  ;;  %v9452_v32 = vpop.f32.mrb[129].mxu1  ;;  %v8564_v51 = vld [vmem:[#allocation4 + $0x160] ss:$0 sm:$0xff] }
0x162c   :  { %v4274_v41 = vpop.f32.mrb[130].mxu1 }
0x162d   :  { %v4275_v12 = vadd.f32 %v8559_v17, %v4274_v41  ;;  %v9453_v34 = vpop.f32.mrb[131].mxu1  ;;  %v4278_v35 = vadd.f32 %v4272_v9, %v10834_v49  ;;  %v9946_v41 = vld [vmem:[#allocation2 + $0x170] sm:$0xff]  }
0x162e   :  { %v8569_v34 = vld [vmem:[#allocation4 + $0x130] ss:$0 sm:$0xff] }
0x162f   :  { %v4282_v31 = vsel %vm200_vm4, %v4278_v35, 0.0  ;;  %v4279_v56 = vadd.f32 %v4275_v12, %v10836_v50  ;;  %v9947_v12 = vld [vmem:[#allocation2 + $0x178] sm:$0xff]  }
0x1630   :  { %4283 = vadd.xlane.f32.xlu1 %v4282_v31 }
0x1631   :  { %v4285_v38 = vsel %vm200_vm4, %v4279_v56, 0.0 }
0x1632   :  { %4286 = vadd.xlane.f32.xlu0 %v4285_v38 }
0x1634   :  { %3001 = vadd.xlane.f32.xlu1 %v3000_v29 }
0x1636   :  { %3004 = vadd.xlane.f32.xlu0 %v3003_v42 }
0x16bd   :  { %v4284_v49 = vpop.xlane.xlu1 %4283 }
0x16be   :  { %v4288_v50 = vmul.f32 0.03125, %v4284_v49 }
0x16bf   :  { %v4287_v44 = vpop.xlane.xlu0 %4286 }
0x16c0   :  { %v4290_v23 = vsub.f32 %v4278_v35, %v4288_v50  ;;  %v4289_v45 = vmul.f32 0.03125, %v4287_v44  ;;  %v8565_v44 = vld [vmem:[#allocation4 + $0x128] ss:$0 sm:$0xff] }
0x16c1   :  { %v3002_v24 = vpop.xlane.xlu1 %3001 }
0x16c2   :  { %v4291_v46 = vsub.f32 %v4279_v56, %v4289_v45  ;;  %v3006_v47 = vmul.f32 0.03125, %v3002_v24  ;;  %v4292_v48 = vmul.f32 %v4290_v23, %v4290_v23 }
0x16c3   :  { %v3005_v53 = vpop.xlane.xlu0 %3004 }
0x16c4   :  { %v3008_v0 = vadd.f32 1e-05, %v3006_v47  ;;  %v3007_v54 = vmul.f32 0.03125, %v3005_v53  ;;  %v4294_v60 = vsel %vm200_vm4, %v4292_v48, 0.0  ;;  %v4293_v2 = vmul.f32 %v4291_v46, %v4291_v46 }
0x16c5   :  { %4295 = vadd.xlane.f32.xlu1 %v4294_v60 }
0x16c6   :  { %10092 = vrsqrt.f32 %v3008_v0  ;;  %v3009_v39 = vadd.f32 1e-05, %v3007_v54  ;;  %v4297_v5 = vsel %vm200_vm4, %v4293_v2, 0.0 }
0x16c7   :  { %4298 = vadd.xlane.f32.xlu0 %v4297_v5 }
0x16c8   :  { %10094 = vrsqrt.f32 %v3009_v39 }
0x16d0   :  { %v10093_v43 = vpop.eup %10092 }
0x16d1   :  { %v3012_v57 = vmul.f32 %v10093_v43, %v2996_v26 }
0x16d2   :  { %v10095_v62 = vpop.eup %10094 }
0x16d3   :  { %v3018_v6 = vmul.f32 %v8522_v3, %v3012_v57  ;;  %v3013_v19 = vmul.f32 %v10095_v62, %v2997_v33 }
0x16d5   :  { %v3019_v7 = vmul.f32 %v8522_v3, %v3013_v19  ;;  %v3024_v10 = vadd.f32 %v8523_v58, %v3018_v6 }
0x16d7   :  { %v3025_v20 = vadd.f32 %v8523_v58, %v3019_v7 }
0x16d9   :  { %v11068_v59 = vpack.c.bf16 %v3025_v20, %v3024_v10 }
0x16db   :  { %9467 = vmatmul.mubr.msk.bf16.vlgmr.msra.gmra.mrb[132].mxu1 %vm200_vm4, %v11068_v59 }
0x16dc   :  { %9480 = vmatprep.mubr.msk.bf16.mxu1 %vm10276_vm0, %v10275_v1 }
0x1752   :  { %v4296_v11 = vpop.xlane.xlu1 %4295 }
0x1753   :  { %v4300_v8 = vmul.f32 0.03125, %v4296_v11 }
0x1754   :  { %v4299_v37 = vpop.xlane.xlu0 %4298 }
0x1755   :  { %v4302_v14 = vadd.f32 1e-05, %v4300_v8  ;;  %v4301_v15 = vmul.f32 0.03125, %v4299_v37 }
0x1757   :  { %10096 = vrsqrt.f32 %v4302_v14  ;;  %v4303_v16 = vadd.f32 1e-05, %v4301_v15 }
0x1759   :  { %10098 = vrsqrt.f32 %v4303_v16  ;;  %v8573_v16 = vld [vmem:[#allocation4 + $0x138] ss:$0 sm:$0xff] }
0x1761   :  { %v10097_v18 = vpop.eup %10096 }
0x1762   :  { %v4306_v22 = vmul.f32 %v10097_v18, %v4290_v23 }
0x1763   :  { %v10099_v25 = vpop.eup %10098 }
0x1764   :  { %v4312_v17 = vmul.f32 %v8563_v21, %v4306_v22  ;;  %v4307_v28 = vmul.f32 %v10099_v25, %v4291_v46 }
0x1766   :  { %v4313_v26 = vmul.f32 %v8563_v21, %v4307_v28  ;;  %v11076_v9 = vadd.f32 %v8564_v51, %v4312_v17 }
0x1768   :  { %v11078_v32 = vadd.f32 %v8564_v51, %v4313_v26 }
0x176a   :  { %v4324_v33 = vpack.c.bf16 %v11078_v32, %v11076_v9 }
0x176c   :  { %9459 = vmatmul.mubr.msk.bf16.vlgmr.msra.gmra.mrb[132].mxu0 %vm200_vm4, %v4324_v33 }
0x176d   :  { %9471 = vmatpush3.bf16.msra.mxu0 %v9946_v41  ;;  %9474 = vmatprep.mubr.msk.bf16.mxu0 %vm10276_vm0, %v10275_v1 }
0x176e   :  { %9472 = vmatprep.subr.bf16.mxu0 %v10275_v1 }
0x1771   :  { %9473 = vmatpush3.bf16.msra.mxu0 %v9947_v12 }
0x1772   :  { %9484 = vmatprep.subr.bf16.mxu0 %v10275_v1 }
0x1774   :  { %9475 = vmatmul.mubr.msk.bf16.vlgmr.msra.gmra.mrb[136].mxu0 %vm200_vm4, %v11068_v59 }
0x1775   :  { %9486 = vmatprep.mubr.msk.bf16.mxu0 %vm10276_vm0, %v10275_v1 }
0x17ae   :  { %v4445_v35 = vpop.f32.mrb[132].mxu1 }
0x17af   :  { %v4446_v31 = vadd.f32 %v8569_v34, %v4445_v35  ;;  %v9468_v56 = vpop.f32.mrb[133].mxu1 }
0x17b0   :  { %v4448_v36 = vpop.f32.mrb[134].mxu1 }
0x17b1   :  { %v4449_v38 = vadd.f32 %v8569_v34, %v4448_v36  ;;  %v9469_v40 = vpop.f32.mrb[135].mxu1  ;;  %v4522_v29 = vmul.f32 %v4446_v31, %v10380_v52  ;;  %v4524_v23 = vmul.f32 %v4446_v31, %v10383_v61  ;;  %v4526_v3 = vmul.f32 %v4446_v31, %v10400_v13 }
0x17b2   :  { %v4528_v14 = vmul.f32 %v4446_v31, %v10418_v27 }
0x17b3   :  { %v4546_v42 = vpack.c.bf16 %v4522_v29, %v4522_v29  ;;  %v4523_v30 = vmul.f32 %v4449_v38, %v10380_v52  ;;  %v4525_v48 = vmul.f32 %v4449_v38, %v10383_v61  ;;  %v4548_v54 = vpack.c.bf16 %v4524_v23, %v4524_v23 }
0x17b4   :  { %v4527_v10 = vmul.f32 %v4449_v38, %v10400_v13  ;;  %v4550_v63 = vpack.c.bf16 %v4526_v3, %v4526_v3  ;;  %v4529_v22 = vmul.f32 %v4449_v38, %v10418_v27  ;;  %v4552_v17 = vpack.c.bf16 %v4528_v14, %v4528_v14 }
0x17b5   :  { %v4558_v55 = vsel %vm200_vm4, %v4546_v42, 0  ;;  %v4547_v49 = vpack.c.bf16 %v4523_v30, %v4523_v30  ;;  %v4549_v5 = vpack.c.bf16 %v4525_v48, %v4525_v48  ;;  %v4650_v43 = vsel %vm200_vm4, %v4548_v54, 0 }
0x17b6   :  { %9479 = vmatpush3.bf16.xpose.msra.mxu1 %v4558_v55  ;;  %v4551_v8 = vpack.c.bf16 %v4527_v10, %v4527_v10  ;;  %v4742_v37 = vsel %vm200_vm4, %v4550_v63, 0  ;;  %v4553_v41 = vpack.c.bf16 %v4529_v22, %v4529_v22  ;;  %v4834_v33 = vsel %vm200_vm4, %v4552_v17, 0 }
0x17b7   :  { %v4604_v50 = vsel %vm200_vm4, %v4547_v49, 0  ;;  %9490 = vmatprep.subr.bf16.mxu1 %v10275_v1  ;;  %v4696_v58 = vsel %vm200_vm4, %v4549_v5, 0 }
0x17b8   :  { %9485 = vmatpush3.bf16.xpose.msra.mxu0 %v4604_v50  ;;  %v4788_v21 = vsel %vm200_vm4, %v4551_v8, 0  ;;  %v4880_v31 = vsel %vm200_vm4, %v4553_v41, 0 }
0x17b9   :  { %9496 = vmatprep.subr.bf16.mxu0 %v10275_v1 }
0x183f   :  { %v4379_v45 = vpop.f32.mrb[132].mxu0 }
0x1840   :  { %v4380_v24 = vadd.f32 %v8565_v44, %v4379_v45  ;;  %v9460_v46 = vpop.f32.mrb[133].mxu0 }
0x1841   :  { %v4382_v47 = vpop.f32.mrb[134].mxu0 }
0x1842   :  { %v4514_v53 = vmul.f32 %v4380_v24, %v10380_v52  ;;  %v9461_v0 = vpop.f32.mrb[135].mxu0  ;;  %v4383_v60 = vadd.f32 %v8565_v44, %v4382_v47  ;;  %v4516_v6 = vmul.f32 %v4380_v24, %v10383_v61  ;;  %v4518_v18 = vmul.f32 %v4380_v24, %v10400_v13 }
0x1843   :  { %v4520_v35 = vmul.f32 %v4380_v24, %v10418_v27 }
0x1844   :  { %v4538_v2 = vpack.c.bf16 %v4514_v53, %v4514_v53  ;;  %v4515_v39 = vmul.f32 %v4383_v60, %v10380_v52  ;;  %v4517_v4 = vmul.f32 %v4383_v60, %v10383_v61  ;;  %v4540_v11 = vpack.c.bf16 %v4516_v6, %v4516_v6 }
0x1845   :  { %v4519_v28 = vmul.f32 %v4383_v60, %v10400_v13  ;;  %v4542_v51 = vpack.c.bf16 %v4518_v18, %v4518_v18  ;;  %v4521_v38 = vmul.f32 %v4383_v60, %v10418_v27  ;;  %v4544_v40 = vpack.c.bf16 %v4520_v35, %v4520_v35 }
0x1846   :  { %9481 = vmatmul.mubr.msk.bf16.vlgmr.msra.gmra.mrb[136].mxu1 %vm200_vm4, %v4538_v2  ;;  %v4539_v57 = vpack.c.bf16 %v4515_v39, %v4515_v39  ;;  %v4541_v15 = vpack.c.bf16 %v4517_v4, %v4517_v4 }
0x1847   :  { %9491 = vmatpush3.bf16.xpose.msra.mxu1 %v4650_v43  ;;  %v4507_v62 = vpop.f32.mrb[136].mxu0  ;;  %9492 = vmatprep.mubr.msk.bf16.mxu1 %vm10276_vm0, %v10275_v1  ;;  %v4543_v34 = vpack.c.bf16 %v4519_v28, %v4519_v28  ;;  %v4545_v30 = vpack.c.bf16 %v4521_v38, %v4521_v38 }
0x1848   :  { %v9476_v19 = vpop.f32.mrb[137].mxu0  ;;  %9502 = vmatprep.subr.bf16.mxu1 %v10275_v1  ;;  %9487 = vmatmul.mubr.msk.bf16.vlgmr.msra.gmra.mrb[140].mxu0 %vm200_vm4, %v4539_v57  ;;  %v11125_v25 = vadd.f32 %v8573_v16, %v4507_v62 }
0x1849   :  { %v4510_v7 = vpop.f32.mrb[138].mxu0  ;;  %9497 = vmatpush3.bf16.xpose.msra.mxu0 %v4696_v58  ;;  %9498 = vmatprep.mubr.msk.bf16.mxu0 %vm10276_vm0, %v10275_v1 }
0x184a   :  { %v9477_v20 = vpop.f32.mrb[139].mxu0  ;;  %9508 = vmatprep.subr.bf16.mxu0 %v10275_v1  ;;  %v11131_v26 = vadd.f32 %v8573_v16, %v4510_v7  ;;  %v4530_v12 = vmul.f32 %v11125_v25, %v10380_v52 }
0x184c   :  { %v4531_v56 = vmul.f32 %v11131_v26, %v10380_v52  ;;  %v5026_v36 = vpack.c.bf16 %v4530_v12, %v4530_v12 }
0x184e   :  { %9493 = vmatmul.mubr.msk.bf16.vlgmr.msra.gmra.mrb[140].mxu1 %vm200_vm4, %v4540_v11  ;;  %v5027_v29 = vpack.c.bf16 %v4531_v56, %v4531_v56  ;;  %v5038_v42 = vsel %vm913_vm8, %v5026_v36, 0 }
0x184f   :  { %9503 = vmatpush3.bf16.xpose.msra.mxu1 %v4742_v37  ;;  %9504 = vmatprep.mubr.msk.bf16.mxu1 %vm10276_vm0, %v10275_v1 }
0x1850   :  { %9514 = vmatprep.subr.bf16.mxu1 %v10275_v1  ;;  %9499 = vmatmul.mubr.msk.bf16.vlgmr.msra.gmra.mrb[144].mxu0 %vm200_vm4, %v4541_v15  ;;  %v5084_v55 = vsel %vm913_vm8, %v5027_v29, 0 }
0x1851   :  { %9509 = vmatpush3.bf16.xpose.msra.mxu0 %v4788_v21  ;;  %9510 = vmatprep.mubr.msk.bf16.mxu0 %vm10276_vm0, %v10275_v1 }
0x1852   :  { %9520 = vmatprep.subr.bf16.mxu0 %v10275_v1 }
0x1856   :  { %9505 = vmatmul.mubr.msk.bf16.vlgmr.msra.gmra.mrb[144].mxu1 %vm200_vm4, %v4542_v51 }
0x1857   :  { %9515 = vmatpush3.bf16.xpose.msra.mxu1 %v4834_v33  ;;  %9516 = vmatprep.mubr.msk.bf16.mxu1 %vm10276_vm0, %v10275_v1 }
0x1858   :  { %9526 = vmatprep.subr.bf16.mxu1 %v10275_v1  ;;  %9511 = vmatmul.mubr.msk.bf16.vlgmr.msra.gmra.mrb[148].mxu0 %vm200_vm4, %v4543_v34 }
0x1859   :  { %9521 = vmatpush3.bf16.xpose.msra.mxu0 %v4880_v31  ;;  %9522 = vmatprep.mubr.msk.bf16.mxu0 %vm10276_vm0, %v10275_v1 }
0x185a   :  { %9532 = vmatprep.subr.bf16.mxu0 %v10275_v1 }
0x185e   :  { %9517 = vmatmul.mubr.msk.bf16.vlgmr.msra.gmra.mrb[148].mxu1 %vm200_vm4, %v4544_v40 }
0x185f   :  { %9527 = vmatpush3.bf16.msra.mxu1 %v5038_v42  ;;  %9528 = vmatprep.mubr.msk.bf16.mxu1 %vm10276_vm0, %v10275_v1 }
0x1860   :  { %9538 = vmatprep.subr.bf16.mxu1 %v10275_v1  ;;  %9523 = vmatmul.mubr.msk.bf16.vlgmr.msra.gmra.mrb[152].mxu0 %vm200_vm4, %v4545_v30 }
0x1861   :  { %9533 = vmatpush3.bf16.msra.mxu0 %v5084_v55  ;;  %9534 = vmatprep.mubr.msk.bf16.mxu0 %vm10276_vm0, %v10275_v1 }
0x1862   :  { %9544 = vmatprep.subr.bf16.mxu0 %v10275_v1 }
0x1919   :  { %v4594_v49 = vpop.f32.mrb[136].mxu1 }
0x191a   :  { %v4922_v50 = vmul.f32 0.35355338, %v4594_v49  ;;  %v9482_v44 = vpop.f32.mrb[137].mxu1 }
0x191b   :  { %v4597_v23 = vpop.f32.mrb[138].mxu1  ;;  %v4640_v45 = vpop.f32.mrb[140].mxu0 }
0x191c   :  { %v9483_v24 = vpop.f32.mrb[139].mxu1  ;;  %v4930_v46 = vsel %vm805_vm9, %v4922_v50, -inf  ;;  %v4923_v47 = vmul.f32 0.35355338, %v4640_v45  ;;  %v9488_v48 = vpop.f32.mrb[141].mxu0 }
0x191d   :  { %4931 = vmax.xlane.f32.xlu1 %v4930_v46  ;;  %v4643_v53 = vpop.f32.mrb[142].mxu0 }
0x191e   :  { %v9489_v0 = vpop.f32.mrb[143].mxu0  ;;  %v4933_v54 = vsel %vm805_vm9, %v4923_v47, -inf }
0x191f   :  { %4934 = vmax.xlane.f32.xlu0 %v4933_v54 }
0x1921   :  { %v4686_v60 = vpop.f32.mrb[140].mxu1 }
0x1922   :  { %v4924_v2 = vmul.f32 0.35355338, %v4686_v60  ;;  %v9494_v39 = vpop.f32.mrb[141].mxu1 }
0x1923   :  { %v4689_v5 = vpop.f32.mrb[142].mxu1  ;;  %v4732_v43 = vpop.f32.mrb[144].mxu0 }
0x1924   :  { %v9495_v3 = vpop.f32.mrb[143].mxu1  ;;  %v4936_v57 = vsel %vm805_vm9, %v4924_v2, -inf  ;;  %v4925_v62 = vmul.f32 0.35355338, %v4732_v43  ;;  %v9500_v6 = vpop.f32.mrb[145].mxu0 }
0x1925   :  { %4937 = vmax.xlane.f32.xlu1 %v4936_v57  ;;  %v4735_v19 = vpop.f32.mrb[146].mxu0 }
0x1926   :  { %v9501_v58 = vpop.f32.mrb[147].mxu0  ;;  %v4939_v7 = vsel %vm805_vm9, %v4925_v62, -inf }
0x1927   :  { %4940 = vmax.xlane.f32.xlu0 %v4939_v7 }
0x1929   :  { %v4778_v10 = vpop.f32.mrb[144].mxu1 }
0x192a   :  { %v4926_v20 = vmul.f32 0.35355338, %v4778_v10  ;;  %v9506_v63 = vpop.f32.mrb[145].mxu1 }
0x192b   :  { %v4781_v4 = vpop.f32.mrb[146].mxu1  ;;  %v4824_v11 = vpop.f32.mrb[148].mxu0 }
0x192c   :  { %v9507_v8 = vpop.f32.mrb[147].mxu1  ;;  %v4942_v37 = vsel %vm805_vm9, %v4926_v20, -inf  ;;  %v4927_v14 = vmul.f32 0.35355338, %v4824_v11  ;;  %v9512_v15 = vpop.f32.mrb[149].mxu0 }
0x192d   :  { %4943 = vmax.xlane.f32.xlu1 %v4942_v37  ;;  %v4827_v16 = vpop.f32.mrb[150].mxu0 }
0x192e   :  { %v9513_v18 = vpop.f32.mrb[151].mxu0  ;;  %v4945_v21 = vsel %vm805_vm9, %v4927_v14, -inf }
0x192f   :  { %4946 = vmax.xlane.f32.xlu0 %v4945_v21 }
0x1931   :  { %v4870_v22 = vpop.f32.mrb[148].mxu1 }
0x1932   :  { %v4928_v17 = vmul.f32 0.35355338, %v4870_v22  ;;  %v9518_v28 = vpop.f32.mrb[149].mxu1 }
0x1933   :  { %v4873_v51 = vpop.f32.mrb[150].mxu1  ;;  %v4916_v41 = vpop.f32.mrb[152].mxu0 }
0x1934   :  { %v9519_v33 = vpop.f32.mrb[151].mxu1  ;;  %v4948_v12 = vsel %vm805_vm9, %v4928_v17, -inf  ;;  %v4929_v34 = vmul.f32 0.35355338, %v4916_v41  ;;  %v9524_v35 = vpop.f32.mrb[153].mxu0  ;;  %v4533_v41 = vmul.f32 %v11131_v26, %v10383_v61 }
0x1935   :  { %4949 = vmax.xlane.f32.xlu1 %v4948_v12  ;;  %v4919_v31 = vpop.f32.mrb[154].mxu0 }
0x1936   :  { %v9525_v56 = vpop.f32.mrb[155].mxu0  ;;  %v4951_v36 = vsel %vm805_vm9, %v4929_v34, -inf }
0x1937   :  { %4952 = vmax.xlane.f32.xlu0 %v4951_v36  ;;  %v5029_v56 = vpack.c.bf16 %v4533_v41, %v4533_v41 }
0x19aa   :  { %v4932_v38 = vpop.xlane.xlu1 %4931 }
0x19ab   :  { %v4954_v40 = vsub.f32 %v4922_v50, %v4932_v38 }
0x19ac   :  { %v4935_v42 = vpop.xlane.xlu0 %4934 }
0x19ad   :  { %v4962_v29 = vmul.f32 1.442695, %v4954_v40  ;;  %v4955_v30 = vsub.f32 %v4923_v47, %v4935_v42  ;;  %v4534_v40 = vmul.f32 %v11125_v25, %v10400_v13 }
0x19af   :  { %10100 = vpow2.f32 %v4962_v29  ;;  %v4964_v55 = vmul.f32 1.442695, %v4955_v30  ;;  %v5176_v30 = vsel %vm913_vm8, %v5029_v56, 0 }
0x19b1   :  { %10102 = vpow2.f32 %v4964_v55 }
0x19b2   :  { %v4938_v49 = vpop.xlane.xlu1 %4937 }
0x19b3   :  { %v4956_v44 = vsub.f32 %v4924_v2, %v4938_v49  ;;  %v4535_v49 = vmul.f32 %v11131_v26, %v10400_v13 }
0x19b4   :  { %v4941_v45 = vpop.xlane.xlu0 %4940 }
0x19b5   :  { %v4966_v23 = vmul.f32 1.442695, %v4956_v44  ;;  %v4957_v24 = vsub.f32 %v4925_v62, %v4941_v45 }
0x19b7   :  { %10104 = vpow2.f32 %v4966_v23  ;;  %v4968_v46 = vmul.f32 1.442695, %v4957_v24  ;;  %v5030_v23 = vpack.c.bf16 %v4534_v40, %v4534_v40 }
0x19b9   :  { %v10101_v48 = vpop.eup %10100  ;;  %10106 = vpow2.f32 %v4968_v46 }
0x19ba   :  { %v4944_v53 = vpop.xlane.xlu1 %4943  ;;  %v4978_v0 = vsel %vm805_vm9, %v10101_v48, 0.0 }
0x19bb   :  { %v4958_v54 = vsub.f32 %v4926_v20, %v4944_v53  ;;  %4979 = vadd.xlane.f32.xlu1 %v4978_v0  ;;  %v10103_v50 = vpop.eup %10102  ;;  %v5222_v0 = vsel %vm913_vm8, %v5030_v23, 0 }
0x19bc   :  { %v4947_v47 = vpop.xlane.xlu0 %4946  ;;  %v4981_v39 = vsel %vm805_vm9, %v10103_v50, 0.0 }
0x19bd   :  { %v4970_v60 = vmul.f32 1.442695, %v4958_v54  ;;  %v4959_v5 = vsub.f32 %v4927_v14, %v4947_v47  ;;  %4982 = vadd.xlane.f32.xlu0 %v4981_v39  ;;  %v4536_v54 = vmul.f32 %v11125_v25, %v10418_v27 }
0x19bf   :  { %10108 = vpow2.f32 %v4970_v60  ;;  %v4972_v2 = vmul.f32 1.442695, %v4959_v5  ;;  %v4537_v5 = vmul.f32 %v11131_v26, %v10418_v27 }
0x19c1   :  { %v10105_v43 = vpop.eup %10104  ;;  %10110 = vpow2.f32 %v4972_v2 }
0x19c2   :  { %v4950_v3 = vpop.xlane.xlu1 %4949  ;;  %v4984_v57 = vsel %vm805_vm9, %v10105_v43, 0.0 }
0x19c3   :  { %v4960_v62 = vsub.f32 %v4928_v17, %v4950_v3  ;;  %4985 = vadd.xlane.f32.xlu1 %v4984_v57  ;;  %v10107_v6 = vpop.eup %10106  ;;  %v4532_v17 = vmul.f32 %v11125_v25, %v10383_v61  ;;  %v5032_v25 = vpack.c.bf16 %v4536_v54, %v4536_v54 }
0x19c4   :  { %v4953_v58 = vpop.xlane.xlu0 %4952  ;;  %v4987_v7 = vsel %vm805_vm9, %v10107_v6, 0.0 }
0x19c5   :  { %v4974_v19 = vmul.f32 1.442695, %v4960_v62  ;;  %v4961_v10 = vsub.f32 %v4929_v34, %v4953_v58  ;;  %4988 = vadd.xlane.f32.xlu0 %v4987_v7  ;;  %v5028_v12 = vpack.c.bf16 %v4532_v17, %v4532_v17  ;;  %v5033_v62 = vpack.c.bf16 %v4537_v5, %v4537_v5 }
0x19c7   :  { %10112 = vpow2.f32 %v4974_v19  ;;  %v4976_v20 = vmul.f32 1.442695, %v4961_v10  ;;  %v5130_v38 = vsel %vm913_vm8, %v5028_v12, 0  ;;  %v5360_v58 = vsel %vm913_vm8, %v5033_v62, 0 }
0x19c9   :  { %v11171_v63 = vpop.eup %10108  ;;  %10114 = vpow2.f32 %v4976_v20 }
0x19ca   :  { %v4990_v4 = vsel %vm805_vm9, %v11171_v63, 0.0 }
0x19cb   :  { %4991 = vadd.xlane.f32.xlu1 %v4990_v4  ;;  %v11175_v11 = vpop.eup %10110 }
0x19cc   :  { %v4993_v8 = vsel %vm805_vm9, %v11175_v11, 0.0 }
0x19cd   :  { %4994 = vadd.xlane.f32.xlu0 %v4993_v8  ;;  %v9949_v8 = vld [vmem:[#allocation2 + $0x188] sm:$0xff]  }
0x19d1   :  { %v11179_v37 = vpop.eup %10112 }
0x19d2   :  { %v4996_v14 = vsel %vm805_vm9, %v11179_v37, 0.0 }
0x19d3   :  { %4997 = vadd.xlane.f32.xlu1 %v4996_v14  ;;  %v11183_v15 = vpop.eup %10114 }
0x19d4   :  { %v4999_v16 = vsel %vm805_vm9, %v11183_v15, 0.0 }
0x19d5   :  { %5000 = vadd.xlane.f32.xlu0 %v4999_v16 }
0x1a48   :  { %v4980_v18 = vpop.xlane.xlu1 %4979 }
0x1a49   :  { %10116 = vrcp.f32 %v4980_v18 }
0x1a4a   :  { %v4983_v21 = vpop.xlane.xlu0 %4982 }
0x1a4b   :  { %10118 = vrcp.f32 %v4983_v21 }
0x1a50   :  { %v4986_v22 = vpop.xlane.xlu1 %4985 }
0x1a51   :  { %10120 = vrcp.f32 %v4986_v22 }
0x1a52   :  { %v4989_v51 = vpop.xlane.xlu0 %4988 }
0x1a53   :  { %v10117_v28 = vpop.eup %10116  ;;  %10122 = vrcp.f32 %v4989_v51 }
0x1a54   :  { %v5010_v33 = vmul.f32 %v10117_v28, %v10101_v48  ;;  %v5031_v48 = vpack.c.bf16 %v4535_v49, %v4535_v49 }
0x1a55   :  { %v10119_v34 = vpop.eup %10118 }
0x1a56   :  { %v5018_v35 = vpack.c.bf16 %v5010_v33, %v5010_v33  ;;  %v5011_v31 = vmul.f32 %v10119_v34, %v10103_v50  ;;  %v5268_v47 = vsel %vm913_vm8, %v5031_v48, 0 }
0x1a58   :  { %v4992_v36 = vpop.xlane.xlu1 %4991  ;;  %9529 = vmatmul.mubr.msk.bf16.vlgmr.msra.gmra.mrb[152].mxu1 %vm805_vm9, %v5018_v35  ;;  %v5019_v29 = vpack.c.bf16 %v5011_v31, %v5011_v31 }
0x1a59   :  { %10124 = vrcp.f32 %v4992_v36  ;;  %9539 = vmatpush3.bf16.msra.mxu1 %v5130_v38  ;;  %9540 = vmatprep.mubr.msk.bf16.mxu1 %vm10276_vm0, %v10275_v1 }
0x1a5a   :  { %9550 = vmatprep.subr.bf16.mxu1 %v10275_v1  ;;  %9535 = vmatmul.mubr.msk.bf16.vlgmr.msra.gmra.mrb[156].mxu0 %vm805_vm9, %v5019_v29  ;;  %v4995_v55 = vpop.xlane.xlu0 %4994 }
0x1a5b   :  { %v10121_v42 = vpop.eup %10120  ;;  %9545 = vmatpush3.bf16.msra.mxu0 %v5176_v30  ;;  %10126 = vrcp.f32 %v4995_v55  ;;  %9546 = vmatprep.mubr.msk.bf16.mxu0 %vm10276_vm0, %v10275_v1 }
0x1a5c   :  { %v5012_v44 = vmul.f32 %v10121_v42, %v10105_v43  ;;  %9556 = vmatprep.subr.bf16.mxu0 %v10275_v1 }
0x1a5d   :  { %v10123_v45 = vpop.eup %10122 }
0x1a5e   :  { %v5020_v24 = vpack.c.bf16 %v5012_v44, %v5012_v44  ;;  %v5013_v46 = vmul.f32 %v10123_v45, %v10107_v6  ;;  %v5314_v6 = vsel %vm913_vm8, %v5032_v25, 0 }
0x1a60   :  { %v4998_v53 = vpop.xlane.xlu1 %4997  ;;  %9541 = vmatmul.mubr.msk.bf16.vlgmr.msra.gmra.mrb[156].mxu1 %vm805_vm9, %v5020_v24  ;;  %v5021_v50 = vpack.c.bf16 %v5013_v46, %v5013_v46 }
0x1a61   :  { %10128 = vrcp.f32 %v4998_v53  ;;  %9551 = vmatpush3.bf16.msra.mxu1 %v5222_v0  ;;  %9552 = vmatprep.mubr.msk.bf16.mxu1 %vm10276_vm0, %v10275_v1 }
0x1a62   :  { %9562 = vmatprep.subr.bf16.mxu1 %v10275_v1  ;;  %9547 = vmatmul.mubr.msk.bf16.vlgmr.msra.gmra.mrb[160].mxu0 %vm805_vm9, %v5021_v50  ;;  %v5001_v39 = vpop.xlane.xlu0 %5000 }
0x1a63   :  { %v10125_v60 = vpop.eup %10124  ;;  %9557 = vmatpush3.bf16.msra.mxu0 %v5268_v47  ;;  %10130 = vrcp.f32 %v5001_v39  ;;  %9558 = vmatprep.mubr.msk.bf16.mxu0 %vm10276_vm0, %v10275_v1 }
0x1a64   :  { %v5014_v2 = vmul.f32 %v10125_v60, %v11171_v63  ;;  %9568 = vmatprep.subr.bf16.mxu0 %v10275_v1 }
0x1a65   :  { %v10127_v43 = vpop.eup %10126 }
0x1a66   :  { %v5022_v3 = vpack.c.bf16 %v5014_v2, %v5014_v2  ;;  %v5015_v57 = vmul.f32 %v10127_v43, %v11175_v11  ;;  %v9948_v11 = vld [vmem:[#allocation2 + $0x180] sm:$0xff]  }
0x1a68   :  { %9553 = vmatmul.mubr.msk.bf16.vlgmr.msra.gmra.mrb[160].mxu1 %vm805_vm9, %v5022_v3  ;;  %v5023_v26 = vpack.c.bf16 %v5015_v57, %v5015_v57 }
0x1a69   :  { %9563 = vmatpush3.bf16.msra.mxu1 %v5314_v6  ;;  %9564 = vmatprep.mubr.msk.bf16.mxu1 %vm10276_vm0, %v10275_v1 }
0x1a6a   :  { %9574 = vmatprep.subr.bf16.mxu1 %v10275_v1  ;;  %9559 = vmatmul.mubr.msk.bf16.vlgmr.msra.gmra.mrb[164].mxu0 %vm805_vm9, %v5023_v26 }
0x1a6b   :  { %v10129_v19 = vpop.eup %10128  ;;  %9569 = vmatpush3.bf16.msra.mxu0 %v5360_v58  ;;  %9570 = vmatprep.mubr.msk.bf16.mxu0 %vm10276_vm0, %v10275_v1 }
0x1a6c   :  { %v5016_v7 = vmul.f32 %v10129_v19, %v11179_v37  ;;  %9582 = vmatprep.subr.bf16.mxu0 %v10275_v1  ;;  %v8593_v19 = vld [vmem:[#allocation4 + $0x140] ss:$0 sm:$0xff] }
0x1a6d   :  { %v10131_v10 = vpop.eup %10130 }
0x1a6e   :  { %v5024_v20 = vpack.c.bf16 %v5016_v7, %v5016_v7  ;;  %v5017_v63 = vmul.f32 %v10131_v10, %v11183_v15 }
0x1a70   :  { %9565 = vmatmul.mubr.msk.bf16.vlgmr.msra.gmra.mrb[164].mxu1 %vm805_vm9, %v5024_v20  ;;  %v5025_v4 = vpack.c.bf16 %v5017_v63, %v5017_v63 }
0x1a71   :  { %9578 = vmatprep.mubr.msk.bf16.mxu1 %vm10276_vm0, %v10275_v1  ;;  %9575 = vmatpush3.bf16.msra.mxu1 %v9948_v11 }
0x1a72   :  { %9571 = vmatmul.mubr.msk.bf16.vlgmr.msra.gmra.mrb[168].mxu0 %vm805_vm9, %v5025_v4  ;;  %9576 = vmatprep.subr.bf16.mxu1 %v10275_v1 }
0x1a73   :  { %9586 = vmatprep.mubr.msk.bf16.mxu0 %vm10276_vm0, %v10275_v1 }
0x1a75   :  { %9577 = vmatpush3.bf16.msra.mxu1 %v9949_v8 }
0x1a76   :  { %9590 = vmatprep.subr.bf16.mxu1 %v10275_v1 }
0x1b2b   :  { %v5074_v37 = vpop.f32.mrb[152].mxu1 }
0x1b2c   :  { %v9530_v14 = vpop.f32.mrb[153].mxu1  ;;  %v5402_v51 = vsel %vm200_vm4, %v5074_v37, 0.0 }
0x1b2d   :  { %v5077_v15 = vpop.f32.mrb[154].mxu1  ;;  %v5120_v16 = vpop.f32.mrb[156].mxu0 }
0x1b2e   :  { %v9531_v18 = vpop.f32.mrb[155].mxu1  ;;  %v9536_v21 = vpop.f32.mrb[157].mxu0  ;;  %v5409_v56 = vsel %vm200_vm4, %v5120_v16, 0.0 }
0x1b2f   :  { %v5123_v22 = vpop.f32.mrb[158].mxu0 }
0x1b30   :  { %v9537_v17 = vpop.f32.mrb[159].mxu0 }
0x1b33   :  { %v5166_v28 = vpop.f32.mrb[156].mxu1 }
0x1b34   :  { %v5403_v41 = vsel %vm200_vm4, %v5166_v28, 0.0  ;;  %v9542_v33 = vpop.f32.mrb[157].mxu1 }
0x1b35   :  { %v5404_v12 = vadd.f32 %v5403_v41, %v5402_v51  ;;  %v5169_v34 = vpop.f32.mrb[158].mxu1  ;;  %v5212_v35 = vpop.f32.mrb[160].mxu0  ;;  %v9950_v33 = vld [vmem:[#allocation2 + $0x190] sm:$0xff]  }
0x1b36   :  { %v9543_v31 = vpop.f32.mrb[159].mxu1  ;;  %v5410_v36 = vsel %vm200_vm4, %v5212_v35, 0.0  ;;  %v9548_v38 = vpop.f32.mrb[161].mxu0  ;;  %9583 = vmatpush3.bf16.msra.mxu0 %v9950_v33  ;;  %v9953_v34 = vld [vmem:[#allocation2 + $0x1a8] sm:$0xff]  }
0x1b37   :  { %v5411_v40 = vadd.f32 %v5410_v36, %v5409_v56  ;;  %v5215_v29 = vpop.f32.mrb[162].mxu0  ;;  %9584 = vmatprep.subr.bf16.mxu0 %v10275_v1 }
0x1b38   :  { %v9549_v42 = vpop.f32.mrb[163].mxu0 }
0x1b39   :  { %v8597_v42 = vld [vmem:[#allocation4 + $0x168] ss:$0 sm:$0xff] }
0x1b3b   :  { %v5258_v30 = vpop.f32.mrb[160].mxu1 }
0x1b3c   :  { %v5405_v55 = vsel %vm200_vm4, %v5258_v30, 0.0  ;;  %v9554_v49 = vpop.f32.mrb[161].mxu1 }
0x1b3d   :  { %v5406_v44 = vadd.f32 %v5405_v55, %v5404_v12  ;;  %v5261_v23 = vpop.f32.mrb[162].mxu1  ;;  %v5304_v45 = vpop.f32.mrb[164].mxu0  ;;  %v9952_v12 = vld [vmem:[#allocation2 + $0x1a0] sm:$0xff]  }
0x1b3e   :  { %v9555_v24 = vpop.f32.mrb[163].mxu1  ;;  %v5412_v46 = vsel %vm200_vm4, %v5304_v45, 0.0  ;;  %v9560_v48 = vpop.f32.mrb[165].mxu0  ;;  %v8598_v23 = vld [vmem:[#allocation4 + $0x170] ss:$0 sm:$0xff] }
0x1b3f   :  { %v5413_v53 = vadd.f32 %v5412_v46, %v5411_v40  ;;  %v5307_v0 = vpop.f32.mrb[166].mxu0 }
0x1b40   :  { %v9561_v54 = vpop.f32.mrb[167].mxu0  ;;  %v9955_v0 = vld [vmem:[#allocation2 + $0x1b8] sm:$0xff]  }
0x1b41   :  { %v8599_v54 = vld [vmem:[#allocation4 + $0x148] ss:$0 sm:$0xff] }
0x1b43   :  { %v5350_v50 = vpop.f32.mrb[164].mxu1 }
0x1b44   :  { %v5407_v60 = vsel %vm200_vm4, %v5350_v50, 0.0  ;;  %v9566_v47 = vpop.f32.mrb[165].mxu1 }
0x1b45   :  { %v5408_v39 = vadd.f32 %v5407_v60, %v5406_v44  ;;  %v5353_v5 = vpop.f32.mrb[166].mxu1  ;;  %v5396_v2 = vpop.f32.mrb[168].mxu0 }
0x1b46   :  { %v9567_v25 = vpop.f32.mrb[167].mxu1  ;;  %v5414_v43 = vsel %vm200_vm4, %v5396_v2, 0.0  ;;  %v9572_v3 = vpop.f32.mrb[169].mxu0 }
0x1b47   :  { %v5415_v57 = vadd.f32 %v5414_v43, %v5413_v53  ;;  %v5399_v62 = vpop.f32.mrb[170].mxu0  ;;  %v9954_v53 = vld [vmem:[#allocation2 + $0x1b0] sm:$0xff]  }
0x1b48   :  { %v9573_v6 = vpop.f32.mrb[171].mxu0 }
0x1b49   :  { %v5420_v26 = vpack.c.bf16 %v5415_v57, %v5408_v39  ;;  %v8603_v57 = vld [vmem:[#allocation4 + $0x150] ss:$0 sm:$0xff] }
0x1b4b   :  { %9579 = vmatmul.mubr.msk.bf16.vlgmr.msra.gmra.mrb[168].mxu1 %vm200_vm4, %v5420_v26 }
0x1b4c   :  { %9598 = vmatprep.mubr.msk.bf16.mxu1 %vm10276_vm0, %v10275_v1  ;;  %9591 = vmatpush3.bf16.msra.mxu1 %v9952_v12 }
0x1b4d   :  { %9592 = vmatprep.subr.bf16.mxu1 %v10275_v1 }
0x1b50   :  { %9593 = vmatpush3.bf16.msra.mxu1 %v9953_v34 }
0x1b51   :  { %9594 = vmatprep.subr.bf16.mxu1 %v10275_v1 }
0x1b54   :  { %9595 = vmatpush3.bf16.msra.mxu1 %v9954_v53 }
0x1b55   :  { %9596 = vmatprep.subr.bf16.mxu1 %v10275_v1 }
0x1b58   :  { %9597 = vmatpush3.bf16.msra.mxu1 %v9955_v0 }
0x1b59   :  { %9618 = vmatprep.subr.bf16.mxu1 %v10275_v1 }
0x1c1e   :  { %v5475_v58 = vpop.f32.mrb[168].mxu1 }
0x1c1f   :  { %v5476_v7 = vadd.f32 %v8593_v19, %v5475_v58  ;;  %v9580_v10 = vpop.f32.mrb[169].mxu1 }
0x1c20   :  { %v5478_v20 = vpop.f32.mrb[170].mxu1 }
0x1c21   :  { %v5482_v63 = vadd.f32 %v5476_v7, %v11076_v9  ;;  %v5479_v4 = vadd.f32 %v8593_v19, %v5478_v20  ;;  %v9581_v11 = vpop.f32.mrb[171].mxu1 }
0x1c23   :  { %v5486_v8 = vsel %vm200_vm4, %v5482_v63, 0.0  ;;  %v5483_v37 = vadd.f32 %v5479_v4, %v11078_v32  ;;  %v9951_v32 = vld [vmem:[#allocation2 + $0x198] sm:$0xff]  }
0x1c24   :  { %5487 = vadd.xlane.f32.xlu1 %v5486_v8  ;;  %9585 = vmatpush3.bf16.msra.mxu0 %v9951_v32 }
0x1c25   :  { %v5489_v14 = vsel %vm200_vm4, %v5483_v37, 0.0  ;;  %9602 = vmatprep.subr.bf16.mxu0 %v10275_v1 }
0x1c26   :  { %5490 = vadd.xlane.f32.xlu0 %v5489_v14 }
0x1cb1   :  { %v5488_v15 = vpop.xlane.xlu1 %5487 }
0x1cb2   :  { %v5492_v16 = vmul.f32 0.03125, %v5488_v15 }
0x1cb3   :  { %v5491_v18 = vpop.xlane.xlu0 %5490 }
0x1cb4   :  { %v5494_v21 = vsub.f32 %v5482_v63, %v5492_v16  ;;  %v5493_v22 = vmul.f32 0.03125, %v5491_v18 }
0x1cb6   :  { %v5495_v17 = vsub.f32 %v5483_v37, %v5493_v22  ;;  %v5496_v28 = vmul.f32 %v5494_v21, %v5494_v21 }
0x1cb8   :  { %v5498_v51 = vsel %vm200_vm4, %v5496_v28, 0.0  ;;  %v5497_v9 = vmul.f32 %v5495_v17, %v5495_v17  ;;  %v9956_v28 = vld [vmem:[#allocation2 + $0x1c0] sm:$0xff]  }
0x1cb9   :  { %5499 = vadd.xlane.f32.xlu1 %v5498_v51  ;;  %v9957_v51 = vld [vmem:[#allocation2 + $0x1e0] sm:$0xff]  }
0x1cba   :  { %v5501_v41 = vsel %vm200_vm4, %v5497_v9, 0.0  ;;  %v9958_v9 = vld [vmem:[#allocation2 + $0x1c8] sm:$0xff]  }
0x1cbb   :  { %5502 = vadd.xlane.f32.xlu0 %v5501_v41  ;;  %v9959_v41 = vld [vmem:[#allocation2 + $0x1e8] sm:$0xff]  }
0x1d46   :  { %v5500_v35 = vpop.xlane.xlu1 %5499 }
0x1d47   :  { %v5504_v31 = vmul.f32 0.03125, %v5500_v35 }
0x1d48   :  { %v5503_v56 = vpop.xlane.xlu0 %5502 }
0x1d49   :  { %v5506_v36 = vadd.f32 1e-05, %v5504_v31  ;;  %v5505_v38 = vmul.f32 0.03125, %v5503_v56 }
0x1d4b   :  { %10132 = vrsqrt.f32 %v5506_v36  ;;  %v5507_v40 = vadd.f32 1e-05, %v5505_v38  ;;  %v8609_v36 = vld [vmem:[#allocation4 + $0x178] ss:$0 sm:$0xff] }
0x1d4d   :  { %10134 = vrsqrt.f32 %v5507_v40 }
0x1d55   :  { %v10133_v29 = vpop.eup %10132 }
0x1d56   :  { %v5510_v30 = vmul.f32 %v10133_v29, %v5494_v21 }
0x1d57   :  { %v10135_v55 = vpop.eup %10134 }
0x1d58   :  { %v5516_v49 = vmul.f32 %v8597_v42, %v5510_v30  ;;  %v5511_v44 = vmul.f32 %v10135_v55, %v5495_v17  ;;  %v8610_v30 = vld [vmem:[#allocation4 + $0x180] ss:$0 sm:$0xff] }
0x1d5a   :  { %v5517_v45 = vmul.f32 %v8597_v42, %v5511_v44  ;;  %v5522_v24 = vadd.f32 %v8598_v23, %v5516_v49 }
0x1d5c   :  { %v5523_v46 = vadd.f32 %v8598_v23, %v5517_v45  ;;  %v9960_v23 = vld [vmem:[#allocation2 + $0x1d0] sm:$0xff]  }
0x1d5e   :  { %v5528_v48 = vpack.c.bf16 %v5523_v46, %v5522_v24 }
0x1d60   :  { %9587 = vmatmul.mubr.msk.bf16.vlgmr.msra.gmra.mrb[172].mxu0 %vm200_vm4, %v5528_v48 }
0x1d61   :  { %9606 = vmatprep.mubr.msk.bf16.mxu0 %vm10276_vm0, %v10275_v1  ;;  %9603 = vmatpush3.bf16.msra.mxu0 %v9956_v28 }
0x1d62   :  { %9604 = vmatprep.subr.bf16.mxu0 %v10275_v1 }
0x1d65   :  { %9605 = vmatpush3.bf16.msra.mxu0 %v9958_v9 }
0x1d66   :  { %9610 = vmatprep.subr.bf16.mxu0 %v10275_v1 }
0x1e33   :  { %v5583_v50 = vpop.f32.mrb[172].mxu0 }
0x1e34   :  { %v5584_v60 = vadd.f32 %v8599_v54, %v5583_v50  ;;  %v9588_v47 = vpop.f32.mrb[173].mxu0 }
0x1e35   :  { %v5586_v39 = vpop.f32.mrb[174].mxu0 }
0x1e36   :  { %v5587_v5 = vadd.f32 %v8599_v54, %v5586_v39  ;;  %v9589_v2 = vpop.f32.mrb[175].mxu0  ;;  %v5590_v25 = vmax.f32 %v5584_v60, 0.0  ;;  %v8615_v39 = vld [vmem:[#allocation4 + $0x190] ss:$0 sm:$0xff] }
0x1e38   :  { %v5591_v43 = vmax.f32 %v5587_v5, 0.0 }
0x1e3a   :  { %v5600_v3 = vpack.c.bf16 %v5591_v43, %v5590_v25  ;;  %v8611_v43 = vld [vmem:[#allocation4 + $0x188] ss:$0 sm:$0xff] }
0x1e3c   :  { %9599 = vmatmul.mubr.msk.bf16.vlgmr.msra.gmra.mrb[172].mxu1 %vm130_vm3, %v5600_v3 }
0x1e3d   :  { %9622 = vmatprep.mubr.msk.bf16.mxu1 %vm10276_vm0, %v10275_v1  ;;  %9619 = vmatpush3.bf16.msra.mxu1 %v9957_v51 }
0x1e3e   :  { %9620 = vmatprep.subr.bf16.mxu1 %v10275_v1 }
0x1e41   :  { %9621 = vmatpush3.bf16.msra.mxu1 %v9959_v41 }
0x1e42   :  { %9632 = vmatprep.subr.bf16.mxu1 %v10275_v1 }
0x1f0f   :  { %v5667_v62 = vpop.f32.mrb[172].mxu1 }
0x1f10   :  { %v5668_v6 = vadd.f32 %v8603_v57, %v5667_v62  ;;  %v9600_v26 = vpop.f32.mrb[173].mxu1 }
0x1f11   :  { %v5670_v19 = vpop.f32.mrb[174].mxu1 }
0x1f12   :  { %v5674_v58 = vadd.f32 %v5668_v6, %v5522_v24  ;;  %v5671_v7 = vadd.f32 %v8603_v57, %v5670_v19  ;;  %v9601_v10 = vpop.f32.mrb[175].mxu1  ;;  %v9961_v24 = vld [vmem:[#allocation2 + $0x1d8] sm:$0xff]  }
0x1f14   :  { %v5678_v20 = vsel %vm200_vm4, %v5674_v58, 0.0  ;;  %v5675_v63 = vadd.f32 %v5671_v7, %v5523_v46 }
0x1f15   :  { %5679 = vadd.xlane.f32.xlu1 %v5678_v20 }
0x1f16   :  { %v5681_v4 = vsel %vm200_vm4, %v5675_v63, 0.0 }
0x1f17   :  { %5682 = vadd.xlane.f32.xlu0 %v5681_v4 }
0x1fa2   :  { %v5680_v11 = vpop.xlane.xlu1 %5679 }
0x1fa3   :  { %v5684_v8 = vmul.f32 0.03125, %v5680_v11 }
0x1fa4   :  { %v5683_v37 = vpop.xlane.xlu0 %5682 }
0x1fa5   :  { %v5686_v14 = vsub.f32 %v5674_v58, %v5684_v8  ;;  %v5685_v15 = vmul.f32 0.03125, %v5683_v37 }
0x1fa7   :  { %v5687_v16 = vsub.f32 %v5675_v63, %v5685_v15  ;;  %v5688_v18 = vmul.f32 %v5686_v14, %v5686_v14 }
0x1fa9   :  { %v5690_v21 = vsel %vm200_vm4, %v5688_v18, 0.0  ;;  %v5689_v22 = vmul.f32 %v5687_v16, %v5687_v16 }
0x1faa   :  { %5691 = vadd.xlane.f32.xlu1 %v5690_v21 }
0x1fab   :  { %v5693_v17 = vsel %vm200_vm4, %v5689_v22, 0.0 }
0x1fac   :  { %5694 = vadd.xlane.f32.xlu0 %v5693_v17 }
0x2037   :  { %v5692_v33 = vpop.xlane.xlu1 %5691 }
0x2038   :  { %v5696_v32 = vmul.f32 0.03125, %v5692_v33 }
0x2039   :  { %v5695_v12 = vpop.xlane.xlu0 %5694 }
0x203a   :  { %v5698_v34 = vadd.f32 1e-05, %v5696_v32  ;;  %v5697_v35 = vmul.f32 0.03125, %v5695_v12 }
0x203c   :  { %10136 = vrsqrt.f32 %v5698_v34  ;;  %v5699_v31 = vadd.f32 1e-05, %v5697_v35 }
0x203e   :  { %10138 = vrsqrt.f32 %v5699_v31  ;;  %v8619_v31 = vld [vmem:[#allocation4 + $0x198] ss:$0 sm:$0xff] }
0x2046   :  { %v10137_v56 = vpop.eup %10136 }
0x2047   :  { %v5702_v38 = vmul.f32 %v10137_v56, %v5686_v14 }
0x2048   :  { %v10139_v40 = vpop.eup %10138 }
0x2049   :  { %v5708_v29 = vmul.f32 %v8609_v36, %v5702_v38  ;;  %v5703_v42 = vmul.f32 %v10139_v40, %v5687_v16 }
0x204b   :  { %v5709_v55 = vmul.f32 %v8609_v36, %v5703_v42  ;;  %v11278_v49 = vadd.f32 %v8610_v30, %v5708_v29 }
0x204d   :  { %v11280_v44 = vadd.f32 %v8610_v30, %v5709_v55 }
0x204f   :  { %v5720_v45 = vpack.c.bf16 %v11280_v44, %v11278_v49 }
0x2051   :  { %9607 = vmatmul.mubr.msk.bf16.vlgmr.msra.gmra.mrb[176].mxu0 %vm200_vm4, %v5720_v45  ;;  %9623 = vmatmul.mubr.msk.bf16.vlgmr.msra.gmra.mrb[176].mxu1 %vm200_vm4, %v5720_v45 }
0x2052   :  { %9611 = vmatpush3.bf16.msra.mxu0 %v9960_v23  ;;  %9614 = vmatprep.mubr.msk.bf16.mxu0 %vm10276_vm0, %v10275_v1 }
0x2053   :  { %9612 = vmatprep.subr.bf16.mxu0 %v10275_v1  ;;  %9634 = vmatprep.mubr.msk.bf16.mxu1 %vm10276_vm0, %v10275_v1 }
0x2056   :  { %9613 = vmatpush3.bf16.msra.mxu0 %v9961_v24 }
0x2057   :  { %9626 = vmatprep.subr.bf16.mxu0 %v10275_v1 }
0x2059   :  { %9615 = vmatmul.mubr.msk.bf16.vlgmr.msra.gmra.mrb[180].mxu0 %vm200_vm4, %v5720_v45 }
0x205a   :  { %9628 = vmatprep.mubr.msk.bf16.mxu0 %vm10276_vm0, %v10275_v1 }
0x2124   :  { %v5775_v46 = vpop.f32.mrb[176].mxu0  ;;  %v11295_v48 = vpop.f32.mrb[176].mxu1 }
0x2125   :  { %v9608_v53 = vpop.f32.mrb[177].mxu0  ;;  %v9624_v0 = vpop.f32.mrb[177].mxu1  ;;  %v11300_v26 = vadd.f32 %v8611_v43, %v5775_v46  ;;  %v11345_v40 = vadd.f32 %v8619_v31, %v11295_v48 }
0x2126   :  { %v5778_v54 = vpop.f32.mrb[178].mxu0  ;;  %v11297_v50 = vpop.f32.mrb[178].mxu1 }
0x2127   :  { %v9609_v60 = vpop.f32.mrb[179].mxu0  ;;  %v9625_v47 = vpop.f32.mrb[179].mxu1  ;;  %v11303_v7 = vadd.f32 %v8611_v43, %v5778_v54  ;;  %v5906_v4 = vmul.f32 %v11300_v26, %v10380_v52  ;;  %v5908_v17 = vmul.f32 %v11300_v26, %v10383_v61  ;;  %v5910_v56 = vmul.f32 %v11300_v26, %v10400_v13 }
0x2128   :  { %v11351_v55 = vadd.f32 %v8619_v31, %v11297_v50  ;;  %v5922_v46 = vmul.f32 %v11345_v40, %v10380_v52  ;;  %v5912_v48 = vmul.f32 %v11300_v26, %v10418_v27 }
0x2129   :  { %v5907_v37 = vmul.f32 %v11303_v7, %v10380_v52  ;;  %v5930_v15 = vpack.c.bf16 %v5906_v4, %v5906_v4  ;;  %v5909_v9 = vmul.f32 %v11303_v7, %v10383_v61  ;;  %v5932_v33 = vpack.c.bf16 %v5908_v17, %v5908_v17 }
0x212a   :  { %v5911_v29 = vmul.f32 %v11303_v7, %v10400_v13  ;;  %v5934_v30 = vpack.c.bf16 %v5910_v56, %v5910_v56  ;;  %v5923_v0 = vmul.f32 %v11351_v55, %v10380_v52  ;;  %v5913_v54 = vmul.f32 %v11303_v7, %v10418_v27 }
0x212b   :  { %v5931_v18 = vpack.c.bf16 %v5907_v37, %v5907_v37  ;;  %v5933_v12 = vpack.c.bf16 %v5909_v9, %v5909_v9  ;;  %v6418_v50 = vpack.c.bf16 %v5922_v46, %v5922_v46  ;;  %v5936_v60 = vpack.c.bf16 %v5912_v48, %v5912_v48 }
0x212c   :  { %v5837_v5 = vpop.f32.mrb[180].mxu0  ;;  %v5935_v45 = vpack.c.bf16 %v5911_v29, %v5911_v29  ;;  %v6419_v47 = vpack.c.bf16 %v5923_v0, %v5923_v0 }
0x212d   :  { %v5838_v2 = vadd.f32 %v8615_v39, %v5837_v5  ;;  %v9616_v25 = vpop.f32.mrb[181].mxu0  ;;  %v6430_v5 = vsel %vm913_vm8, %v6418_v50, 0 }
0x212e   :  { %v5840_v3 = vpop.f32.mrb[182].mxu0 }
0x212f   :  { %v5841_v57 = vadd.f32 %v8615_v39, %v5840_v3  ;;  %v9617_v62 = vpop.f32.mrb[183].mxu0  ;;  %v5914_v6 = vmul.f32 %v5838_v2, %v10380_v52  ;;  %v5916_v63 = vmul.f32 %v5838_v2, %v10383_v61  ;;  %v5918_v22 = vmul.f32 %v5838_v2, %v10400_v13 }
0x2130   :  { %v5920_v35 = vmul.f32 %v5838_v2, %v10418_v27  ;;  %v5937_v39 = vpack.c.bf16 %v5913_v54, %v5913_v54  ;;  %v6476_v2 = vsel %vm913_vm8, %v6419_v47, 0 }
0x2131   :  { %v5938_v19 = vpack.c.bf16 %v5914_v6, %v5914_v6  ;;  %v5915_v58 = vmul.f32 %v5841_v57, %v10380_v52  ;;  %v5917_v8 = vmul.f32 %v5841_v57, %v10383_v61  ;;  %v5940_v14 = vpack.c.bf16 %v5916_v63, %v5916_v63 }
0x2132   :  { %v5919_v51 = vmul.f32 %v5841_v57, %v10400_v13  ;;  %v5942_v41 = vpack.c.bf16 %v5918_v22, %v5918_v22  ;;  %v5921_v38 = vmul.f32 %v5841_v57, %v10418_v27  ;;  %v5944_v42 = vpack.c.bf16 %v5920_v35, %v5920_v35 }
0x2133   :  { %v5950_v10 = vsel %vm200_vm4, %v5938_v19, 0  ;;  %v5939_v20 = vpack.c.bf16 %v5915_v58, %v5915_v58  ;;  %v5941_v16 = vpack.c.bf16 %v5917_v8, %v5917_v8  ;;  %v6042_v21 = vsel %vm200_vm4, %v5940_v14, 0 }
0x2134   :  { %9627 = vmatpush3.bf16.xpose.msra.mxu0 %v5950_v10  ;;  %v5943_v32 = vpack.c.bf16 %v5919_v51, %v5919_v51  ;;  %v6134_v34 = vsel %vm200_vm4, %v5942_v41, 0  ;;  %v5945_v23 = vpack.c.bf16 %v5921_v38, %v5921_v38  ;;  %v6226_v24 = vsel %vm200_vm4, %v5944_v42, 0 }
0x2135   :  { %v5996_v11 = vsel %vm200_vm4, %v5939_v20, 0  ;;  %9638 = vmatprep.subr.bf16.mxu0 %v10275_v1  ;;  %v6088_v28 = vsel %vm200_vm4, %v5941_v16, 0 }
0x2136   :  { %9633 = vmatpush3.bf16.xpose.msra.mxu1 %v5996_v11  ;;  %v6180_v36 = vsel %vm200_vm4, %v5943_v32, 0  ;;  %v6272_v53 = vsel %vm200_vm4, %v5945_v23, 0 }
0x2137   :  { %9644 = vmatprep.subr.bf16.mxu1 %v10275_v1 }
0x213b   :  { %9629 = vmatmul.mubr.msk.bf16.vlgmr.msra.gmra.mrb[184].mxu0 %vm200_vm4, %v5930_v15 }
0x213c   :  { %9639 = vmatpush3.bf16.xpose.msra.mxu0 %v6042_v21  ;;  %9640 = vmatprep.mubr.msk.bf16.mxu0 %vm10276_vm0, %v10275_v1 }
0x213d   :  { %9635 = vmatmul.mubr.msk.bf16.vlgmr.msra.gmra.mrb[180].mxu1 %vm200_vm4, %v5931_v18  ;;  %9650 = vmatprep.subr.bf16.mxu0 %v10275_v1 }
0x213e   :  { %9645 = vmatpush3.bf16.xpose.msra.mxu1 %v6088_v28  ;;  %9646 = vmatprep.mubr.msk.bf16.mxu1 %vm10276_vm0, %v10275_v1 }
0x213f   :  { %9656 = vmatprep.subr.bf16.mxu1 %v10275_v1 }
0x2143   :  { %9641 = vmatmul.mubr.msk.bf16.vlgmr.msra.gmra.mrb[188].mxu0 %vm200_vm4, %v5932_v33 }
0x2144   :  { %9651 = vmatpush3.bf16.xpose.msra.mxu0 %v6134_v34  ;;  %9652 = vmatprep.mubr.msk.bf16.mxu0 %vm10276_vm0, %v10275_v1 }
0x2145   :  { %9647 = vmatmul.mubr.msk.bf16.vlgmr.msra.gmra.mrb[184].mxu1 %vm200_vm4, %v5933_v12  ;;  %9662 = vmatprep.subr.bf16.mxu0 %v10275_v1 }
0x2146   :  { %9657 = vmatpush3.bf16.xpose.msra.mxu1 %v6180_v36  ;;  %9658 = vmatprep.mubr.msk.bf16.mxu1 %vm10276_vm0, %v10275_v1 }
0x2147   :  { %9668 = vmatprep.subr.bf16.mxu1 %v10275_v1 }
0x214b   :  { %9653 = vmatmul.mubr.msk.bf16.vlgmr.msra.gmra.mrb[192].mxu0 %vm200_vm4, %v5934_v30 }
0x214c   :  { %9663 = vmatpush3.bf16.xpose.msra.mxu0 %v6226_v24  ;;  %9664 = vmatprep.mubr.msk.bf16.mxu0 %vm10276_vm0, %v10275_v1 }
0x214d   :  { %9659 = vmatmul.mubr.msk.bf16.vlgmr.msra.gmra.mrb[188].mxu1 %vm200_vm4, %v5935_v45  ;;  %9674 = vmatprep.subr.bf16.mxu0 %v10275_v1 }
0x214e   :  { %9669 = vmatpush3.bf16.xpose.msra.mxu1 %v6272_v53  ;;  %9670 = vmatprep.mubr.msk.bf16.mxu1 %vm10276_vm0, %v10275_v1 }
0x214f   :  { %9680 = vmatprep.subr.bf16.mxu1 %v10275_v1 }
0x2153   :  { %9665 = vmatmul.mubr.msk.bf16.vlgmr.msra.gmra.mrb[196].mxu0 %vm200_vm4, %v5936_v60 }
0x2154   :  { %9675 = vmatpush3.bf16.msra.mxu0 %v6430_v5  ;;  %9676 = vmatprep.mubr.msk.bf16.mxu0 %vm10276_vm0, %v10275_v1 }
0x2155   :  { %9671 = vmatmul.mubr.msk.bf16.vlgmr.msra.gmra.mrb[192].mxu1 %vm200_vm4, %v5937_v39  ;;  %9686 = vmatprep.subr.bf16.mxu0 %v10275_v1 }
0x2156   :  { %9681 = vmatpush3.bf16.msra.mxu1 %v6476_v2  ;;  %9682 = vmatprep.mubr.msk.bf16.mxu1 %vm10276_vm0, %v10275_v1 }
0x2157   :  { %9692 = vmatprep.subr.bf16.mxu1 %v10275_v1 }
0x220e   :  { %v5986_v25 = vpop.f32.mrb[184].mxu0 }
0x220f   :  { %v6314_v43 = vmul.f32 0.35355338, %v5986_v25  ;;  %v9630_v3 = vpop.f32.mrb[185].mxu0 }
0x2210   :  { %v5989_v57 = vpop.f32.mrb[186].mxu0  ;;  %v6032_v62 = vpop.f32.mrb[180].mxu1 }
0x2211   :  { %v6315_v6 = vmul.f32 0.35355338, %v6032_v62  ;;  %v9631_v26 = vpop.f32.mrb[187].mxu0  ;;  %v9636_v19 = vpop.f32.mrb[181].mxu1  ;;  %v6322_v58 = vsel %vm805_vm9, %v6314_v43, -inf }
0x2212   :  { %v6035_v7 = vpop.f32.mrb[182].mxu1  ;;  %6323 = vmax.xlane.f32.xlu1 %v6322_v58 }
0x2213   :  { %v9637_v10 = vpop.f32.mrb[183].mxu1  ;;  %v6325_v20 = vsel %vm805_vm9, %v6315_v6, -inf }
0x2214   :  { %6326 = vmax.xlane.f32.xlu0 %v6325_v20 }
0x2216   :  { %v6078_v63 = vpop.f32.mrb[188].mxu0 }
0x2217   :  { %v6316_v4 = vmul.f32 0.35355338, %v6078_v63  ;;  %v9642_v11 = vpop.f32.mrb[189].mxu0 }
0x2218   :  { %v6081_v8 = vpop.f32.mrb[190].mxu0  ;;  %v6124_v37 = vpop.f32.mrb[184].mxu1 }
0x2219   :  { %v6317_v14 = vmul.f32 0.35355338, %v6124_v37  ;;  %v9643_v15 = vpop.f32.mrb[191].mxu0  ;;  %v9648_v16 = vpop.f32.mrb[185].mxu1  ;;  %v6328_v18 = vsel %vm805_vm9, %v6316_v4, -inf }
0x221a   :  { %v6127_v21 = vpop.f32.mrb[186].mxu1  ;;  %6329 = vmax.xlane.f32.xlu1 %v6328_v18 }
0x221b   :  { %v9649_v22 = vpop.f32.mrb[187].mxu1  ;;  %v6331_v17 = vsel %vm805_vm9, %v6317_v14, -inf }
0x221c   :  { %6332 = vmax.xlane.f32.xlu0 %v6331_v17 }
0x221e   :  { %v6170_v28 = vpop.f32.mrb[192].mxu0 }
0x221f   :  { %v6318_v51 = vmul.f32 0.35355338, %v6170_v28  ;;  %v9654_v9 = vpop.f32.mrb[193].mxu0 }
0x2220   :  { %v6173_v41 = vpop.f32.mrb[194].mxu0  ;;  %v6216_v33 = vpop.f32.mrb[188].mxu1 }
0x2221   :  { %v6319_v32 = vmul.f32 0.35355338, %v6216_v33  ;;  %v9655_v12 = vpop.f32.mrb[195].mxu0  ;;  %v9660_v34 = vpop.f32.mrb[189].mxu1  ;;  %v6334_v35 = vsel %vm805_vm9, %v6318_v51, -inf }
0x2222   :  { %v6219_v31 = vpop.f32.mrb[190].mxu1  ;;  %6335 = vmax.xlane.f32.xlu1 %v6334_v35 }
0x2223   :  { %v9661_v56 = vpop.f32.mrb[191].mxu1  ;;  %v6337_v36 = vsel %vm805_vm9, %v6319_v32, -inf }
0x2224   :  { %6338 = vmax.xlane.f32.xlu0 %v6337_v36 }
0x2226   :  { %v6262_v38 = vpop.f32.mrb[196].mxu0 }
0x2227   :  { %v6320_v29 = vmul.f32 0.35355338, %v6262_v38  ;;  %v9666_v42 = vpop.f32.mrb[197].mxu0 }
0x2228   :  { %v6265_v30 = vpop.f32.mrb[198].mxu0  ;;  %v6308_v23 = vpop.f32.mrb[192].mxu1 }
0x2229   :  { %v6321_v45 = vmul.f32 0.35355338, %v6308_v23  ;;  %v9667_v24 = vpop.f32.mrb[199].mxu0  ;;  %v9672_v46 = vpop.f32.mrb[193].mxu1  ;;  %v6340_v48 = vsel %vm805_vm9, %v6320_v29, -inf  ;;  %v5925_v30 = vmul.f32 %v11351_v55, %v10383_v61 }
0x222a   :  { %v6311_v53 = vpop.f32.mrb[194].mxu1  ;;  %6341 = vmax.xlane.f32.xlu1 %v6340_v48 }
0x222b   :  { %v9673_v0 = vpop.f32.mrb[195].mxu1  ;;  %v6343_v54 = vsel %vm805_vm9, %v6321_v45, -inf }
0x222c   :  { %6344 = vmax.xlane.f32.xlu0 %v6343_v54  ;;  %v6421_v0 = vpack.c.bf16 %v5925_v30, %v5925_v30 }
0x229f   :  { %v6324_v50 = vpop.xlane.xlu1 %6323 }
0x22a0   :  { %v6346_v60 = vsub.f32 %v6314_v43, %v6324_v50 }
0x22a1   :  { %v6327_v47 = vpop.xlane.xlu0 %6326 }
0x22a2   :  { %v6354_v39 = vmul.f32 1.442695, %v6346_v60  ;;  %v6347_v5 = vsub.f32 %v6315_v6, %v6327_v47  ;;  %v5926_v47 = vmul.f32 %v11345_v40, %v10400_v13 }
0x22a4   :  { %10140 = vpow2.f32 %v6354_v39  ;;  %v6356_v2 = vmul.f32 1.442695, %v6347_v5  ;;  %v6568_v39 = vsel %vm913_vm8, %v6421_v0, 0 }
0x22a6   :  { %10142 = vpow2.f32 %v6356_v2  ;;  %v5927_v2 = vmul.f32 %v11351_v55, %v10400_v13 }
0x22a7   :  { %v6330_v25 = vpop.xlane.xlu1 %6329 }
0x22a8   :  { %v6348_v3 = vsub.f32 %v6316_v4, %v6330_v25 }
0x22a9   :  { %v6333_v57 = vpop.xlane.xlu0 %6332 }
0x22aa   :  { %v6358_v62 = vmul.f32 1.442695, %v6348_v3  ;;  %v6349_v26 = vsub.f32 %v6317_v14, %v6333_v57  ;;  %v6422_v57 = vpack.c.bf16 %v5926_v47, %v5926_v47 }
0x22ac   :  { %10144 = vpow2.f32 %v6358_v62  ;;  %v6360_v19 = vmul.f32 1.442695, %v6349_v26 }
0x22ae   :  { %v10141_v58 = vpop.eup %10140  ;;  %10146 = vpow2.f32 %v6360_v19 }
0x22af   :  { %v6336_v7 = vpop.xlane.xlu1 %6335  ;;  %v6370_v10 = vsel %vm805_vm9, %v10141_v58, 0.0 }
0x22b0   :  { %v10143_v20 = vpop.eup %10142  ;;  %v6350_v43 = vsub.f32 %v6318_v51, %v6336_v7  ;;  %6371 = vadd.xlane.f32.xlu1 %v6370_v10  ;;  %v6614_v7 = vsel %vm913_vm8, %v6422_v57, 0 }
0x22b1   :  { %v6339_v63 = vpop.xlane.xlu0 %6338  ;;  %v6373_v6 = vsel %vm805_vm9, %v10143_v20, 0.0 }
0x22b2   :  { %v6362_v11 = vmul.f32 1.442695, %v6350_v43  ;;  %v6351_v8 = vsub.f32 %v6319_v32, %v6339_v63  ;;  %6374 = vadd.xlane.f32.xlu0 %v6373_v6  ;;  %v5928_v43 = vmul.f32 %v11345_v40, %v10418_v27 }
0x22b4   :  { %10148 = vpow2.f32 %v6362_v11  ;;  %v6364_v4 = vmul.f32 1.442695, %v6351_v8  ;;  %v5929_v11 = vmul.f32 %v11351_v55, %v10418_v27 }
0x22b6   :  { %v10145_v37 = vpop.eup %10144  ;;  %10150 = vpow2.f32 %v6364_v4  ;;  %v6424_v4 = vpack.c.bf16 %v5928_v43, %v5928_v43 }
0x22b7   :  { %v6342_v14 = vpop.xlane.xlu1 %6341  ;;  %v6376_v15 = vsel %vm805_vm9, %v10145_v37, 0.0 }
0x22b8   :  { %v10147_v16 = vpop.eup %10146  ;;  %v6352_v18 = vsub.f32 %v6320_v29, %v6342_v14  ;;  %6377 = vadd.xlane.f32.xlu1 %v6376_v15  ;;  %v5924_v29 = vmul.f32 %v11345_v40, %v10383_v61  ;;  %v6706_v55 = vsel %vm913_vm8, %v6424_v4, 0 }
0x22b9   :  { %v6345_v21 = vpop.xlane.xlu0 %6344  ;;  %v6379_v22 = vsel %vm805_vm9, %v10147_v16, 0.0 }
0x22ba   :  { %v6366_v17 = vmul.f32 1.442695, %v6352_v18  ;;  %v6353_v28 = vsub.f32 %v6321_v45, %v6345_v21  ;;  %6380 = vadd.xlane.f32.xlu0 %v6379_v22  ;;  %v6420_v24 = vpack.c.bf16 %v5924_v29, %v5924_v29 }
0x22bc   :  { %10152 = vpow2.f32 %v6366_v17  ;;  %v6368_v51 = vmul.f32 1.442695, %v6353_v28  ;;  %v6522_v54 = vsel %vm913_vm8, %v6420_v24, 0 }
0x22be   :  { %v11393_v9 = vpop.eup %10148  ;;  %10154 = vpow2.f32 %v6368_v51 }
0x22bf   :  { %v6382_v41 = vsel %vm805_vm9, %v11393_v9, 0.0 }
0x22c0   :  { %v11397_v33 = vpop.eup %10150  ;;  %6383 = vadd.xlane.f32.xlu1 %v6382_v41 }
0x22c1   :  { %v6385_v32 = vsel %vm805_vm9, %v11397_v33, 0.0 }
0x22c2   :  { %6386 = vadd.xlane.f32.xlu0 %v6385_v32  ;;  %v9963_v32 = vld [vmem:[#allocation2 + $0x1f8] sm:$0xff]  }
0x22c6   :  { %v11401_v12 = vpop.eup %10152 }
0x22c7   :  { %v6388_v34 = vsel %vm805_vm9, %v11401_v12, 0.0 }
0x22c8   :  { %v11405_v35 = vpop.eup %10154  ;;  %6389 = vadd.xlane.f32.xlu1 %v6388_v34 }
0x22c9   :  { %v6391_v31 = vsel %vm805_vm9, %v11405_v35, 0.0 }
0x22ca   :  { %6392 = vadd.xlane.f32.xlu0 %v6391_v31 }
0x233d   :  { %v6372_v56 = vpop.xlane.xlu1 %6371 }
0x233e   :  { %10156 = vrcp.f32 %v6372_v56 }
0x233f   :  { %v6375_v36 = vpop.xlane.xlu0 %6374 }
0x2340   :  { %10158 = vrcp.f32 %v6375_v36 }
0x2345   :  { %v6378_v38 = vpop.xlane.xlu1 %6377 }
0x2346   :  { %10160 = vrcp.f32 %v6378_v38 }
0x2347   :  { %v6381_v42 = vpop.xlane.xlu0 %6380 }
0x2348   :  { %v10157_v23 = vpop.eup %10156  ;;  %10162 = vrcp.f32 %v6381_v42 }
0x2349   :  { %v6402_v45 = vmul.f32 %v10157_v23, %v10141_v58  ;;  %v6423_v58 = vpack.c.bf16 %v5927_v2, %v5927_v2 }
0x234a   :  { %v10159_v46 = vpop.eup %10158 }
0x234b   :  { %v6403_v48 = vmul.f32 %v10159_v46, %v10143_v20  ;;  %v6410_v53 = vpack.c.bf16 %v6402_v45, %v6402_v45  ;;  %v6660_v63 = vsel %vm913_vm8, %v6423_v58, 0 }
0x234d   :  { %9677 = vmatmul.mubr.msk.bf16.vlgmr.msra.gmra.mrb[200].mxu0 %vm805_vm9, %v6410_v53  ;;  %v6384_v50 = vpop.xlane.xlu1 %6383  ;;  %v6411_v60 = vpack.c.bf16 %v6403_v48, %v6403_v48 }
0x234e   :  { %9687 = vmatpush3.bf16.msra.mxu0 %v6522_v54  ;;  %10164 = vrcp.f32 %v6384_v50  ;;  %9688 = vmatprep.mubr.msk.bf16.mxu0 %vm10276_vm0, %v10275_v1 }
0x234f   :  { %9683 = vmatmul.mubr.msk.bf16.vlgmr.msra.gmra.mrb[196].mxu1 %vm805_vm9, %v6411_v60  ;;  %v6387_v5 = vpop.xlane.xlu0 %6386  ;;  %9698 = vmatprep.subr.bf16.mxu0 %v10275_v1 }
0x2350   :  { %v10161_v25 = vpop.eup %10160  ;;  %9693 = vmatpush3.bf16.msra.mxu1 %v6568_v39  ;;  %10166 = vrcp.f32 %v6387_v5  ;;  %9694 = vmatprep.mubr.msk.bf16.mxu1 %vm10276_vm0, %v10275_v1 }
0x2351   :  { %v6404_v3 = vmul.f32 %v10161_v25, %v10145_v37  ;;  %9704 = vmatprep.subr.bf16.mxu1 %v10275_v1 }
0x2352   :  { %v10163_v62 = vpop.eup %10162 }
0x2353   :  { %v6405_v26 = vmul.f32 %v10163_v62, %v10147_v16  ;;  %v6412_v19 = vpack.c.bf16 %v6404_v3, %v6404_v3  ;;  %v6425_v16 = vpack.c.bf16 %v5929_v11, %v5929_v11 }
0x2355   :  { %9689 = vmatmul.mubr.msk.bf16.vlgmr.msra.gmra.mrb[204].mxu0 %vm805_vm9, %v6412_v19  ;;  %v6390_v10 = vpop.xlane.xlu1 %6389  ;;  %v6413_v20 = vpack.c.bf16 %v6405_v26, %v6405_v26  ;;  %v6752_v21 = vsel %vm913_vm8, %v6425_v16, 0 }
0x2356   :  { %9699 = vmatpush3.bf16.msra.mxu0 %v6614_v7  ;;  %10168 = vrcp.f32 %v6390_v10  ;;  %9700 = vmatprep.mubr.msk.bf16.mxu0 %vm10276_vm0, %v10275_v1 }
0x2357   :  { %9695 = vmatmul.mubr.msk.bf16.vlgmr.msra.gmra.mrb[200].mxu1 %vm805_vm9, %v6413_v20  ;;  %v6393_v6 = vpop.xlane.xlu0 %6392  ;;  %9710 = vmatprep.subr.bf16.mxu0 %v10275_v1 }
0x2358   :  { %v10165_v8 = vpop.eup %10164  ;;  %9705 = vmatpush3.bf16.msra.mxu1 %v6660_v63  ;;  %10170 = vrcp.f32 %v6393_v6  ;;  %9706 = vmatprep.mubr.msk.bf16.mxu1 %vm10276_vm0, %v10275_v1 }
0x2359   :  { %v6406_v40 = vmul.f32 %v10165_v8, %v11393_v9  ;;  %9716 = vmatprep.subr.bf16.mxu1 %v10275_v1 }
0x235a   :  { %v10167_v37 = vpop.eup %10166 }
0x235b   :  { %v6407_v14 = vmul.f32 %v10167_v37, %v11397_v33  ;;  %v6414_v15 = vpack.c.bf16 %v6406_v40, %v6406_v40  ;;  %v9962_v33 = vld [vmem:[#allocation2 + $0x1f0] sm:$0xff]  }
0x235d   :  { %9701 = vmatmul.mubr.msk.bf16.vlgmr.msra.gmra.mrb[208].mxu0 %vm805_vm9, %v6414_v15  ;;  %v6415_v18 = vpack.c.bf16 %v6407_v14, %v6407_v14 }
0x235e   :  { %9711 = vmatpush3.bf16.msra.mxu0 %v6706_v55  ;;  %9712 = vmatprep.mubr.msk.bf16.mxu0 %vm10276_vm0, %v10275_v1 }
0x235f   :  { %9707 = vmatmul.mubr.msk.bf16.vlgmr.msra.gmra.mrb[204].mxu1 %vm805_vm9, %v6415_v18  ;;  %9722 = vmatprep.subr.bf16.mxu0 %v10275_v1  ;;  %v9964_v18 = vld [vmem:[#allocation2 + $0x210] sm:$0xff]  }
0x2360   :  { %v10169_v22 = vpop.eup %10168  ;;  %9717 = vmatpush3.bf16.msra.mxu1 %v6752_v21  ;;  %9718 = vmatprep.mubr.msk.bf16.mxu1 %vm10276_vm0, %v10275_v1 }
0x2361   :  { %v6408_v17 = vmul.f32 %v10169_v22, %v11401_v12  ;;  %9730 = vmatprep.subr.bf16.mxu1 %v10275_v1  ;;  %v9965_v22 = vld [vmem:[#allocation2 + $0x218] sm:$0xff]  }
0x2362   :  { %v10171_v28 = vpop.eup %10170 }
0x2363   :  { %v6409_v51 = vmul.f32 %v10171_v28, %v11405_v35  ;;  %v6416_v9 = vpack.c.bf16 %v6408_v17, %v6408_v17  ;;  %v8639_v17 = vld [vmem:[#allocation4 + $0x1a0] ss:$0 sm:$0xff] }
0x2365   :  { %9713 = vmatmul.mubr.msk.bf16.vlgmr.msra.gmra.mrb[212].mxu0 %vm805_vm9, %v6416_v9  ;;  %v6417_v41 = vpack.c.bf16 %v6409_v51, %v6409_v51 }
0x2366   :  { %9726 = vmatprep.mubr.msk.bf16.mxu0 %vm10276_vm0, %v10275_v1  ;;  %9723 = vmatpush3.bf16.msra.mxu0 %v9962_v33 }
0x2367   :  { %9719 = vmatmul.mubr.msk.bf16.vlgmr.msra.gmra.mrb[208].mxu1 %vm805_vm9, %v6417_v41  ;;  %9724 = vmatprep.subr.bf16.mxu0 %v10275_v1 }
0x2368   :  { %9734 = vmatprep.mubr.msk.bf16.mxu1 %vm10276_vm0, %v10275_v1 }
0x236a   :  { %9725 = vmatpush3.bf16.msra.mxu0 %v9963_v32 }
0x236b   :  { %9738 = vmatprep.subr.bf16.mxu0 %v10275_v1 }
0x2420   :  { %v6466_v12 = vpop.f32.mrb[200].mxu0 }
0x2421   :  { %v9678_v34 = vpop.f32.mrb[201].mxu0  ;;  %v6794_v30 = vsel %vm200_vm4, %v6466_v12, 0.0 }
0x2422   :  { %v6469_v35 = vpop.f32.mrb[202].mxu0  ;;  %v6512_v31 = vpop.f32.mrb[196].mxu1 }
0x2423   :  { %v9679_v56 = vpop.f32.mrb[203].mxu0  ;;  %v9684_v36 = vpop.f32.mrb[197].mxu1  ;;  %v6801_v53 = vsel %vm200_vm4, %v6512_v31, 0.0  ;;  %v8649_v31 = vld [vmem:[#allocation4 + $0x1b0] ss:$0 sm:$0xff] }
0x2424   :  { %v6515_v38 = vpop.f32.mrb[198].mxu1 }
0x2425   :  { %v9685_v29 = vpop.f32.mrb[199].mxu1 }
0x2428   :  { %v6558_v42 = vpop.f32.mrb[204].mxu0 }
0x2429   :  { %v6795_v23 = vsel %vm200_vm4, %v6558_v42, 0.0  ;;  %v9690_v45 = vpop.f32.mrb[205].mxu0 }
0x242a   :  { %v6796_v24 = vadd.f32 %v6795_v23, %v6794_v30  ;;  %v6561_v46 = vpop.f32.mrb[206].mxu0  ;;  %v6604_v48 = vpop.f32.mrb[200].mxu1 }
0x242b   :  { %v6802_v0 = vsel %vm200_vm4, %v6604_v48, 0.0  ;;  %v9691_v54 = vpop.f32.mrb[207].mxu0  ;;  %v9696_v50 = vpop.f32.mrb[201].mxu1 }
0x242c   :  { %v6803_v60 = vadd.f32 %v6802_v0, %v6801_v53  ;;  %v6607_v47 = vpop.f32.mrb[202].mxu1 }
0x242d   :  { %v9697_v39 = vpop.f32.mrb[203].mxu1 }
0x2430   :  { %v6650_v5 = vpop.f32.mrb[208].mxu0 }
0x2431   :  { %v6797_v2 = vsel %vm200_vm4, %v6650_v5, 0.0  ;;  %v9702_v25 = vpop.f32.mrb[209].mxu0  ;;  %v9966_v5 = vld [vmem:[#allocation2 + $0x200] sm:$0xff]  }
0x2432   :  { %v6798_v3 = vadd.f32 %v6797_v2, %v6796_v24  ;;  %v6653_v57 = vpop.f32.mrb[210].mxu0  ;;  %v6696_v62 = vpop.f32.mrb[204].mxu1  ;;  %9731 = vmatpush3.bf16.msra.mxu1 %v9966_v5  ;;  %v9967_v2 = vld [vmem:[#allocation2 + $0x208] sm:$0xff]  }
0x2433   :  { %v6804_v26 = vsel %vm200_vm4, %v6696_v62, 0.0  ;;  %v9703_v19 = vpop.f32.mrb[211].mxu0  ;;  %v9708_v58 = vpop.f32.mrb[205].mxu1  ;;  %9732 = vmatprep.subr.bf16.mxu1 %v10275_v1 }
0x2434   :  { %v6805_v7 = vadd.f32 %v6804_v26, %v6803_v60  ;;  %v6699_v10 = vpop.f32.mrb[206].mxu1 }
0x2435   :  { %v9709_v20 = vpop.f32.mrb[207].mxu1 }
0x2436   :  { %9733 = vmatpush3.bf16.msra.mxu1 %v9967_v2 }
0x2437   :  { %9746 = vmatprep.subr.bf16.mxu1 %v10275_v1 }
0x2438   :  { %v6742_v43 = vpop.f32.mrb[212].mxu0 }
0x2439   :  { %v6799_v63 = vsel %vm200_vm4, %v6742_v43, 0.0  ;;  %v9714_v6 = vpop.f32.mrb[213].mxu0 }
0x243a   :  { %v6800_v11 = vadd.f32 %v6799_v63, %v6798_v3  ;;  %v6745_v8 = vpop.f32.mrb[214].mxu0  ;;  %v6788_v40 = vpop.f32.mrb[208].mxu1  ;;  %v8644_v6 = vld [vmem:[#allocation4 + $0x1e0] ss:$0 sm:$0xff] }
0x243b   :  { %v6806_v4 = vsel %vm200_vm4, %v6788_v40, 0.0  ;;  %v9715_v37 = vpop.f32.mrb[215].mxu0  ;;  %v9720_v14 = vpop.f32.mrb[209].mxu1 }
0x243c   :  { %v6807_v15 = vadd.f32 %v6806_v4, %v6805_v7  ;;  %v6791_v16 = vpop.f32.mrb[210].mxu1  ;;  %v8643_v7 = vld [vmem:[#allocation4 + $0x1d8] ss:$0 sm:$0xff]  ;;  %v9968_v4 = vld [vmem:[#allocation2 + $0x220] sm:$0xff]  }
0x243d   :  { %v9721_v55 = vpop.f32.mrb[211].mxu1  ;;  %v9969_v14 = vld [vmem:[#allocation2 + $0x228] sm:$0xff]  }
0x243e   :  { %v6812_v21 = vpack.c.bf16 %v6807_v15, %v6800_v11 }
0x2440   :  { %9727 = vmatmul.mubr.msk.bf16.vlgmr.msra.gmra.mrb[216].mxu0 %vm200_vm4, %v6812_v21 }
0x2441   :  { %9739 = vmatpush3.bf16.msra.mxu0 %v9964_v18  ;;  %9742 = vmatprep.mubr.msk.bf16.mxu0 %vm10276_vm0, %v10275_v1  ;;  %v8645_v18 = vld [vmem:[#allocation4 + $0x1a8] ss:$0 sm:$0xff] }
0x2442   :  { %9740 = vmatprep.subr.bf16.mxu0 %v10275_v1 }
0x2445   :  { %9741 = vmatpush3.bf16.msra.mxu0 %v9965_v22 }
0x2446   :  { %9754 = vmatprep.subr.bf16.mxu0 %v10275_v1 }
0x2448   :  { %9743 = vmatmul.mubr.msk.bf16.vlgmr.msra.gmra.mrb[220].mxu0 %vm200_vm4, %v11068_v59 }
0x2449   :  { %9756 = vmatprep.mubr.msk.bf16.mxu0 %vm10276_vm0, %v10275_v1 }
0x2513   :  { %v6867_v28 = vpop.f32.mrb[216].mxu0 }
0x2514   :  { %v6868_v51 = vadd.f32 %v8639_v17, %v6867_v28  ;;  %v9728_v9 = vpop.f32.mrb[217].mxu0 }
0x2515   :  { %v6870_v41 = vpop.f32.mrb[218].mxu0 }
0x2516   :  { %v6874_v33 = vadd.f32 %v6868_v51, %v11278_v49  ;;  %v6871_v32 = vadd.f32 %v8639_v17, %v6870_v41  ;;  %v9729_v12 = vpop.f32.mrb[219].mxu0 }
0x2518   :  { %v6875_v34 = vadd.f32 %v6871_v32, %v11280_v44  ;;  %v6878_v35 = vsel %vm200_vm4, %v6874_v33, 0.0 }
0x2519   :  { %6879 = vadd.xlane.f32.xlu1 %v6878_v35 }
0x251a   :  { %v6881_v56 = vsel %vm200_vm4, %v6875_v34, 0.0 }
0x251b   :  { %6882 = vadd.xlane.f32.xlu0 %v6881_v56  ;;  %v7037_v36 = vpop.f32.mrb[220].mxu0 }
0x251c   :  { %v11484_v38 = vadd.f32 %v8649_v31, %v7037_v36  ;;  %v9744_v29 = vpop.f32.mrb[221].mxu0 }
0x251d   :  { %v7040_v42 = vpop.f32.mrb[222].mxu0 }
0x251e   :  { %v11486_v30 = vadd.f32 %v8649_v31, %v7040_v42  ;;  %v9745_v23 = vpop.f32.mrb[223].mxu0  ;;  %v7114_v49 = vmul.f32 %v11484_v38, %v10380_v52  ;;  %v7116_v21 = vmul.f32 %v11484_v38, %v10383_v61  ;;  %v7118_v56 = vmul.f32 %v11484_v38, %v10400_v13 }
0x2520   :  { %v7138_v45 = vpack.c.bf16 %v7114_v49, %v7114_v49  ;;  %v7115_v15 = vmul.f32 %v11486_v30, %v10380_v52  ;;  %v7121_v2 = vmul.f32 %v11486_v30, %v10418_v27 }
0x2522   :  { %v7150_v44 = vsel %vm200_vm4, %v7138_v45, 0  ;;  %v7139_v16 = vpack.c.bf16 %v7115_v15, %v7115_v15 }
0x2523   :  { %9755 = vmatpush3.bf16.xpose.msra.mxu0 %v7150_v44  ;;  %v7119_v44 = vmul.f32 %v11486_v30, %v10400_v13 }
0x2524   :  { %9766 = vmatprep.subr.bf16.mxu0 %v10275_v1  ;;  %v7196_v55 = vsel %vm200_vm4, %v7139_v16, 0 }
0x25a6   :  { %v6880_v24 = vpop.xlane.xlu1 %6879 }
0x25a7   :  { %v6884_v46 = vmul.f32 0.03125, %v6880_v24 }
0x25a8   :  { %v6883_v48 = vpop.xlane.xlu0 %6882 }
0x25a9   :  { %v6886_v53 = vsub.f32 %v6874_v33, %v6884_v46  ;;  %v6885_v0 = vmul.f32 0.03125, %v6883_v48  ;;  %v7140_v33 = vpack.c.bf16 %v7116_v21, %v7116_v21  ;;  %v7142_v46 = vpack.c.bf16 %v7118_v56, %v7118_v56 }
0x25ab   :  { %v6887_v54 = vsub.f32 %v6875_v34, %v6885_v0  ;;  %v6888_v50 = vmul.f32 %v6886_v53, %v6886_v53  ;;  %v7242_v31 = vsel %vm200_vm4, %v7140_v33, 0  ;;  %v7143_v0 = vpack.c.bf16 %v7119_v44, %v7119_v44 }
0x25ad   :  { %v6890_v60 = vsel %vm200_vm4, %v6888_v50, 0.0  ;;  %v6889_v47 = vmul.f32 %v6887_v54, %v6887_v54  ;;  %v7120_v50 = vmul.f32 %v11484_v38, %v10418_v27  ;;  %v7380_v5 = vsel %vm200_vm4, %v7143_v0, 0 }
0x25ae   :  { %6891 = vadd.xlane.f32.xlu1 %v6890_v60 }
0x25af   :  { %v6893_v39 = vsel %vm200_vm4, %v6889_v47, 0.0  ;;  %v8653_v47 = vld [vmem:[#allocation4 + $0x1b8] ss:$0 sm:$0xff]  ;;  %v7144_v38 = vpack.c.bf16 %v7120_v50, %v7120_v50 }
0x25b0   :  { %6894 = vadd.xlane.f32.xlu0 %v6893_v39 }
0x263b   :  { %v6892_v25 = vpop.xlane.xlu1 %6891 }
0x263c   :  { %v6896_v3 = vmul.f32 0.03125, %v6892_v25 }
0x263d   :  { %v6895_v57 = vpop.xlane.xlu0 %6894 }
0x263e   :  { %v6898_v62 = vadd.f32 1e-05, %v6896_v3  ;;  %v6897_v26 = vmul.f32 0.03125, %v6895_v57 }
0x2640   :  { %10172 = vrsqrt.f32 %v6898_v62  ;;  %v6899_v19 = vadd.f32 1e-05, %v6897_v26  ;;  %v7145_v26 = vpack.c.bf16 %v7121_v2, %v7121_v2 }
0x2642   :  { %10174 = vrsqrt.f32 %v6899_v19  ;;  %v7426_v19 = vsel %vm200_vm4, %v7144_v38, 0 }
0x264a   :  { %v10173_v58 = vpop.eup %10172 }
0x264b   :  { %v6902_v10 = vmul.f32 %v10173_v58, %v6886_v53 }
0x264c   :  { %v10175_v20 = vpop.eup %10174 }
0x264d   :  { %v6908_v43 = vmul.f32 %v8643_v7, %v6902_v10  ;;  %v6903_v63 = vmul.f32 %v10175_v20, %v6887_v54  ;;  %v7334_v54 = vsel %vm200_vm4, %v7142_v46, 0  ;;  %v7472_v10 = vsel %vm200_vm4, %v7145_v26, 0 }
0x264f   :  { %v6909_v11 = vmul.f32 %v8643_v7, %v6903_v63  ;;  %v11496_v8 = vadd.f32 %v8644_v6, %v6908_v43 }
0x2651   :  { %v11498_v40 = vadd.f32 %v8644_v6, %v6909_v11 }
0x2653   :  { %v6920_v37 = vpack.c.bf16 %v11498_v40, %v11496_v8 }
0x2655   :  { %9735 = vmatmul.mubr.msk.bf16.vlgmr.msra.gmra.mrb[212].mxu1 %vm200_vm4, %v6920_v37 }
0x2656   :  { %9747 = vmatpush3.bf16.msra.mxu1 %v9968_v4  ;;  %9750 = vmatprep.mubr.msk.bf16.mxu1 %vm10276_vm0, %v10275_v1 }
0x2657   :  { %9748 = vmatprep.subr.bf16.mxu1 %v10275_v1 }
0x265a   :  { %9749 = vmatpush3.bf16.msra.mxu1 %v9969_v14 }
0x265b   :  { %9760 = vmatprep.subr.bf16.mxu1 %v10275_v1 }
0x265d   :  { %9751 = vmatmul.mubr.msk.bf16.vlgmr.msra.gmra.mrb[216].mxu1 %vm200_vm4, %v11068_v59  ;;  %v7117_v59 = vmul.f32 %v11486_v30, %v10383_v61 }
0x265e   :  { %9762 = vmatprep.mubr.msk.bf16.mxu1 %vm10276_vm0, %v10275_v1 }
0x265f   :  { %v7141_v35 = vpack.c.bf16 %v7117_v59, %v7117_v59 }
0x2661   :  { %v7288_v49 = vsel %vm200_vm4, %v7141_v35, 0 }
0x2663   :  { %9761 = vmatpush3.bf16.xpose.msra.mxu1 %v7196_v55 }
0x2664   :  { %9772 = vmatprep.subr.bf16.mxu1 %v10275_v1 }
0x2728   :  { %v6975_v22 = vpop.f32.mrb[212].mxu1 }
0x2729   :  { %v6976_v17 = vadd.f32 %v8645_v18, %v6975_v22  ;;  %v9736_v28 = vpop.f32.mrb[213].mxu1 }
0x272a   :  { %v6978_v51 = vpop.f32.mrb[214].mxu1 }
0x272b   :  { %v7106_v9 = vmul.f32 %v6976_v17, %v10380_v52  ;;  %v9737_v41 = vpop.f32.mrb[215].mxu1  ;;  %v6979_v32 = vadd.f32 %v8645_v18, %v6978_v51  ;;  %v7108_v42 = vmul.f32 %v6976_v17, %v10383_v61  ;;  %v7110_v39 = vmul.f32 %v6976_v17, %v10400_v13 }
0x272c   :  { %v7112_v7 = vmul.f32 %v6976_v17, %v10418_v27 }
0x272d   :  { %v7130_v12 = vpack.c.bf16 %v7106_v9, %v7106_v9  ;;  %v7107_v34 = vmul.f32 %v6979_v32, %v10380_v52  ;;  %v7109_v48 = vmul.f32 %v6979_v32, %v10383_v61  ;;  %v7132_v53 = vpack.c.bf16 %v7108_v42, %v7108_v42 }
0x272e   :  { %v7111_v3 = vmul.f32 %v6979_v32, %v10400_v13  ;;  %v7134_v57 = vpack.c.bf16 %v7110_v39, %v7110_v39  ;;  %v7113_v63 = vmul.f32 %v6979_v32, %v10418_v27  ;;  %v7136_v6 = vpack.c.bf16 %v7112_v7, %v7112_v7 }
0x272f   :  { %9757 = vmatmul.mubr.msk.bf16.vlgmr.msra.gmra.mrb[224].mxu0 %vm200_vm4, %v7130_v12  ;;  %v7131_v36 = vpack.c.bf16 %v7107_v34, %v7107_v34  ;;  %v7133_v60 = vpack.c.bf16 %v7109_v48, %v7109_v48 }
0x2730   :  { %9767 = vmatpush3.bf16.xpose.msra.mxu0 %v7242_v31  ;;  %v7099_v29 = vpop.f32.mrb[216].mxu1  ;;  %9768 = vmatprep.mubr.msk.bf16.mxu0 %vm10276_vm0, %v10275_v1  ;;  %v7135_v58 = vpack.c.bf16 %v7111_v3, %v7111_v3  ;;  %v7137_v37 = vpack.c.bf16 %v7113_v63, %v7113_v63 }
0x2731   :  { %v9752_v23 = vpop.f32.mrb[217].mxu1  ;;  %9778 = vmatprep.subr.bf16.mxu0 %v10275_v1  ;;  %9763 = vmatmul.mubr.msk.bf16.vlgmr.msra.gmra.mrb[220].mxu1 %vm200_vm4, %v7131_v36  ;;  %v11549_v25 = vadd.f32 %v8653_v47, %v7099_v29 }
0x2732   :  { %v7102_v45 = vpop.f32.mrb[218].mxu1  ;;  %9773 = vmatpush3.bf16.xpose.msra.mxu1 %v7288_v49  ;;  %9774 = vmatprep.mubr.msk.bf16.mxu1 %vm10276_vm0, %v10275_v1 }
0x2733   :  { %v9753_v24 = vpop.f32.mrb[219].mxu1  ;;  %9784 = vmatprep.subr.bf16.mxu1 %v10275_v1  ;;  %v11555_v62 = vadd.f32 %v8653_v47, %v7102_v45  ;;  %v7122_v30 = vmul.f32 %v11549_v25, %v10380_v52 }
0x2735   :  { %v7123_v20 = vmul.f32 %v11555_v62, %v10380_v52  ;;  %v7618_v43 = vpack.c.bf16 %v7122_v30, %v7122_v30 }
0x2737   :  { %9769 = vmatmul.mubr.msk.bf16.vlgmr.msra.gmra.mrb[228].mxu0 %vm200_vm4, %v7132_v53  ;;  %v7619_v11 = vpack.c.bf16 %v7123_v20, %v7123_v20  ;;  %v7630_v4 = vsel %vm913_vm8, %v7618_v43, 0 }
0x2738   :  { %9779 = vmatpush3.bf16.xpose.msra.mxu0 %v7334_v54  ;;  %9780 = vmatprep.mubr.msk.bf16.mxu0 %vm10276_vm0, %v10275_v1 }
0x2739   :  { %9790 = vmatprep.subr.bf16.mxu0 %v10275_v1  ;;  %9775 = vmatmul.mubr.msk.bf16.vlgmr.msra.gmra.mrb[224].mxu1 %vm200_vm4, %v7133_v60  ;;  %v7676_v52 = vsel %vm913_vm8, %v7619_v11, 0 }
0x273a   :  { %9785 = vmatpush3.bf16.xpose.msra.mxu1 %v7380_v5  ;;  %9786 = vmatprep.mubr.msk.bf16.mxu1 %vm10276_vm0, %v10275_v1 }
0x273b   :  { %9796 = vmatprep.subr.bf16.mxu1 %v10275_v1 }
0x273f   :  { %9781 = vmatmul.mubr.msk.bf16.vlgmr.msra.gmra.mrb[232].mxu0 %vm200_vm4, %v7134_v57 }
0x2740   :  { %9791 = vmatpush3.bf16.xpose.msra.mxu0 %v7426_v19  ;;  %9792 = vmatprep.mubr.msk.bf16.mxu0 %vm10276_vm0, %v10275_v1 }
0x2741   :  { %9802 = vmatprep.subr.bf16.mxu0 %v10275_v1  ;;  %9787 = vmatmul.mubr.msk.bf16.vlgmr.msra.gmra.mrb[228].mxu1 %vm200_vm4, %v7135_v58 }
0x2742   :  { %9797 = vmatpush3.bf16.xpose.msra.mxu1 %v7472_v10  ;;  %9798 = vmatprep.mubr.msk.bf16.mxu1 %vm10276_vm0, %v10275_v1 }
0x2743   :  { %9808 = vmatprep.subr.bf16.mxu1 %v10275_v1 }
0x2747   :  { %9793 = vmatmul.mubr.msk.bf16.vlgmr.msra.gmra.mrb[236].mxu0 %vm200_vm4, %v7136_v6 }
0x2748   :  { %9803 = vmatpush3.bf16.msra.mxu0 %v7630_v4  ;;  %9804 = vmatprep.mubr.msk.bf16.mxu0 %vm10276_vm0, %v10275_v1 }
0x2749   :  { %9814 = vmatprep.subr.bf16.mxu0 %v10275_v1  ;;  %9799 = vmatmul.mubr.msk.bf16.vlgmr.msra.gmra.mrb[232].mxu1 %vm200_vm4, %v7137_v37 }
0x274a   :  { %9809 = vmatpush3.bf16.msra.mxu1 %v7676_v52  ;;  %9810 = vmatprep.mubr.msk.bf16.mxu1 %vm10276_vm0, %v10275_v1 }
0x274b   :  { %9820 = vmatprep.subr.bf16.mxu1 %v10275_v1 }
0x2802   :  { %v7186_v14 = vpop.f32.mrb[224].mxu0 }
0x2803   :  { %v7514_v15 = vmul.f32 0.35355338, %v7186_v14  ;;  %v9758_v16 = vpop.f32.mrb[225].mxu0 }
0x2804   :  { %v7189_v55 = vpop.f32.mrb[226].mxu0  ;;  %v7232_v18 = vpop.f32.mrb[220].mxu1 }
0x2805   :  { %v9759_v21 = vpop.f32.mrb[227].mxu0  ;;  %v7522_v22 = vsel %vm805_vm9, %v7514_v15, -inf  ;;  %v7515_v17 = vmul.f32 0.35355338, %v7232_v18  ;;  %v9764_v28 = vpop.f32.mrb[221].mxu1 }
0x2806   :  { %7523 = vmax.xlane.f32.xlu1 %v7522_v22  ;;  %v7235_v51 = vpop.f32.mrb[222].mxu1 }
0x2807   :  { %v9765_v59 = vpop.f32.mrb[223].mxu1  ;;  %v7525_v9 = vsel %vm805_vm9, %v7515_v17, -inf }
0x2808   :  { %7526 = vmax.xlane.f32.xlu0 %v7525_v9 }
0x280a   :  { %v7278_v41 = vpop.f32.mrb[228].mxu0 }
0x280b   :  { %v7516_v33 = vmul.f32 0.35355338, %v7278_v41  ;;  %v9770_v32 = vpop.f32.mrb[229].mxu0 }
0x280c   :  { %v7281_v12 = vpop.f32.mrb[230].mxu0  ;;  %v7324_v34 = vpop.f32.mrb[224].mxu1 }
0x280d   :  { %v9771_v35 = vpop.f32.mrb[231].mxu0  ;;  %v7528_v31 = vsel %vm805_vm9, %v7516_v33, -inf  ;;  %v7517_v56 = vmul.f32 0.35355338, %v7324_v34  ;;  %v9776_v36 = vpop.f32.mrb[225].mxu1 }
0x280e   :  { %7529 = vmax.xlane.f32.xlu1 %v7528_v31  ;;  %v7327_v29 = vpop.f32.mrb[226].mxu1 }
0x280f   :  { %v9777_v42 = vpop.f32.mrb[227].mxu1  ;;  %v7531_v23 = vsel %vm805_vm9, %v7517_v56, -inf }
0x2810   :  { %7532 = vmax.xlane.f32.xlu0 %v7531_v23 }
0x2812   :  { %v7370_v49 = vpop.f32.mrb[232].mxu0 }
0x2813   :  { %v7518_v45 = vmul.f32 0.35355338, %v7370_v49  ;;  %v9782_v44 = vpop.f32.mrb[233].mxu0 }
0x2814   :  { %v7373_v24 = vpop.f32.mrb[234].mxu0  ;;  %v7416_v46 = vpop.f32.mrb[228].mxu1 }
0x2815   :  { %v9783_v48 = vpop.f32.mrb[235].mxu0  ;;  %v7534_v53 = vsel %vm805_vm9, %v7518_v45, -inf  ;;  %v7519_v0 = vmul.f32 0.35355338, %v7416_v46  ;;  %v9788_v54 = vpop.f32.mrb[229].mxu1 }
0x2816   :  { %7535 = vmax.xlane.f32.xlu1 %v7534_v53  ;;  %v7419_v50 = vpop.f32.mrb[230].mxu1 }
0x2817   :  { %v9789_v60 = vpop.f32.mrb[231].mxu1  ;;  %v7537_v47 = vsel %vm805_vm9, %v7519_v0, -inf }
0x2818   :  { %7538 = vmax.xlane.f32.xlu0 %v7537_v47  ;;  %v7124_v47 = vmul.f32 %v11549_v25, %v10383_v61 }
0x281a   :  { %v7462_v39 = vpop.f32.mrb[236].mxu0 }
0x281b   :  { %v7520_v5 = vmul.f32 0.35355338, %v7462_v39  ;;  %v9794_v2 = vpop.f32.mrb[237].mxu0 }
0x281c   :  { %v7465_v38 = vpop.f32.mrb[238].mxu0  ;;  %v7508_v3 = vpop.f32.mrb[232].mxu1  ;;  %v7125_v2 = vmul.f32 %v11555_v62, %v10383_v61 }
0x281d   :  { %v9795_v57 = vpop.f32.mrb[239].mxu0  ;;  %v7540_v26 = vsel %vm805_vm9, %v7520_v5, -inf  ;;  %v7521_v19 = vmul.f32 0.35355338, %v7508_v3  ;;  %v9800_v30 = vpop.f32.mrb[233].mxu1  ;;  %v7620_v3 = vpack.c.bf16 %v7124_v47, %v7124_v47 }
0x281e   :  { %7541 = vmax.xlane.f32.xlu1 %v7540_v26  ;;  %v7511_v58 = vpop.f32.mrb[234].mxu1  ;;  %v7621_v30 = vpack.c.bf16 %v7125_v2, %v7125_v2 }
0x281f   :  { %v9801_v7 = vpop.f32.mrb[235].mxu1  ;;  %v7543_v10 = vsel %vm805_vm9, %v7521_v19, -inf  ;;  %v7722_v58 = vsel %vm913_vm8, %v7620_v3, 0 }
0x2820   :  { %7544 = vmax.xlane.f32.xlu0 %v7543_v10  ;;  %v7126_v10 = vmul.f32 %v11549_v25, %v10400_v13 }
0x2893   :  { %v7524_v20 = vpop.xlane.xlu1 %7523 }
0x2894   :  { %v7546_v43 = vsub.f32 %v7514_v15, %v7524_v20 }
0x2895   :  { %v7527_v6 = vpop.xlane.xlu0 %7526 }
0x2896   :  { %v7554_v63 = vmul.f32 1.442695, %v7546_v43  ;;  %v7547_v11 = vsub.f32 %v7515_v17, %v7527_v6  ;;  %v7768_v43 = vsel %vm913_vm8, %v7621_v30, 0  ;;  %v7127_v6 = vmul.f32 %v11555_v62, %v10400_v13 }
0x2897   :  { %v7128_v13 = vmul.f32 %v11549_v25, %v10418_v27 }
0x2898   :  { %10176 = vpow2.f32 %v7554_v63  ;;  %v7556_v4 = vmul.f32 1.442695, %v7547_v11 }
0x2899   :  { %v7624_v25 = vpack.c.bf16 %v7128_v13, %v7128_v13 }
0x289a   :  { %10178 = vpow2.f32 %v7556_v4  ;;  %v7622_v4 = vpack.c.bf16 %v7126_v10, %v7126_v10 }
0x289b   :  { %v7530_v37 = vpop.xlane.xlu1 %7529 }
0x289c   :  { %v7548_v52 = vsub.f32 %v7516_v33, %v7530_v37 }
0x289d   :  { %v7533_v16 = vpop.xlane.xlu0 %7532 }
0x289e   :  { %v7558_v14 = vmul.f32 1.442695, %v7548_v52  ;;  %v7549_v55 = vsub.f32 %v7517_v56, %v7533_v16  ;;  %v7623_v16 = vpack.c.bf16 %v7127_v6, %v7127_v6 }
0x28a0   :  { %10180 = vpow2.f32 %v7558_v14  ;;  %v7560_v18 = vmul.f32 1.442695, %v7549_v55  ;;  %v7814_v55 = vsel %vm913_vm8, %v7622_v4, 0 }
0x28a2   :  { %v10177_v21 = vpop.eup %10176  ;;  %10182 = vpow2.f32 %v7560_v18 }
0x28a3   :  { %v7536_v22 = vpop.xlane.xlu1 %7535  ;;  %v7570_v28 = vsel %vm805_vm9, %v10177_v21, 0.0 }
0x28a4   :  { %v7550_v51 = vsub.f32 %v7518_v45, %v7536_v22  ;;  %7571 = vadd.xlane.f32.xlu1 %v7570_v28  ;;  %v10179_v15 = vpop.eup %10178  ;;  %v7860_v28 = vsel %vm913_vm8, %v7623_v16, 0 }
0x28a5   :  { %v7539_v17 = vpop.xlane.xlu0 %7538  ;;  %v7573_v9 = vsel %vm805_vm9, %v10179_v15, 0.0 }
0x28a6   :  { %v7562_v59 = vmul.f32 1.442695, %v7550_v51  ;;  %v7551_v41 = vsub.f32 %v7519_v0, %v7539_v17  ;;  %7574 = vadd.xlane.f32.xlu0 %v7573_v9 }
0x28a8   :  { %10184 = vpow2.f32 %v7562_v59  ;;  %v7564_v33 = vmul.f32 1.442695, %v7551_v41 }
0x28aa   :  { %v10181_v32 = vpop.eup %10180  ;;  %10186 = vpow2.f32 %v7564_v33 }
0x28ab   :  { %v7542_v12 = vpop.xlane.xlu1 %7541  ;;  %v7576_v34 = vsel %vm805_vm9, %v10181_v32, 0.0 }
0x28ac   :  { %v7552_v35 = vsub.f32 %v7520_v5, %v7542_v12  ;;  %7577 = vadd.xlane.f32.xlu1 %v7576_v34  ;;  %v10183_v31 = vpop.eup %10182 }
0x28ad   :  { %v7545_v36 = vpop.xlane.xlu0 %7544  ;;  %v7579_v29 = vsel %vm805_vm9, %v10183_v31, 0.0 }
0x28ae   :  { %v7566_v56 = vmul.f32 1.442695, %v7552_v35  ;;  %v7553_v42 = vsub.f32 %v7521_v19, %v7545_v36  ;;  %7580 = vadd.xlane.f32.xlu0 %v7579_v29  ;;  %v9970_v29 = vld [vmem:[#allocation2 + $0x230] sm:$0xff]  }
0x28b0   :  { %10188 = vpow2.f32 %v7566_v56  ;;  %v7568_v23 = vmul.f32 1.442695, %v7553_v42  ;;  %v9971_v42 = vld [vmem:[#allocation2 + $0x238] sm:$0xff]  }
0x28b2   :  { %v11595_v49 = vpop.eup %10184  ;;  %10190 = vpow2.f32 %v7568_v23 }
0x28b3   :  { %v7582_v45 = vsel %vm805_vm9, %v11595_v49, 0.0 }
0x28b4   :  { %7583 = vadd.xlane.f32.xlu1 %v7582_v45  ;;  %v11599_v44 = vpop.eup %10186 }
0x28b5   :  { %v7585_v24 = vsel %vm805_vm9, %v11599_v44, 0.0 }
0x28b6   :  { %7586 = vadd.xlane.f32.xlu0 %v7585_v24 }
0x28ba   :  { %v11603_v46 = vpop.eup %10188 }
0x28bb   :  { %v7588_v48 = vsel %vm805_vm9, %v11603_v46, 0.0 }
0x28bc   :  { %7589 = vadd.xlane.f32.xlu1 %v7588_v48  ;;  %v11607_v53 = vpop.eup %10190 }
0x28bd   :  { %v7591_v0 = vsel %vm805_vm9, %v11607_v53, 0.0 }
0x28be   :  { %7592 = vadd.xlane.f32.xlu0 %v7591_v0 }
0x2931   :  { %v7572_v54 = vpop.xlane.xlu1 %7571 }
0x2932   :  { %10192 = vrcp.f32 %v7572_v54 }
0x2933   :  { %v7575_v50 = vpop.xlane.xlu0 %7574 }
0x2934   :  { %10194 = vrcp.f32 %v7575_v50 }
0x2939   :  { %v7578_v60 = vpop.xlane.xlu1 %7577 }
0x293a   :  { %10196 = vrcp.f32 %v7578_v60 }
0x293b   :  { %v7581_v5 = vpop.xlane.xlu0 %7580 }
0x293c   :  { %v10193_v39 = vpop.eup %10192  ;;  %10198 = vrcp.f32 %v7581_v5 }
0x293d   :  { %v7602_v38 = vmul.f32 %v10193_v39, %v10177_v21 }
0x293e   :  { %v10195_v57 = vpop.eup %10194 }
0x293f   :  { %v7610_v26 = vpack.c.bf16 %v7602_v38, %v7602_v38  ;;  %v7603_v19 = vmul.f32 %v10195_v57, %v10179_v15  ;;  %v7129_v15 = vmul.f32 %v11555_v62, %v10418_v27 }
0x2941   :  { %9805 = vmatmul.mubr.msk.bf16.vlgmr.msra.gmra.mrb[240].mxu0 %vm805_vm9, %v7610_v26  ;;  %v7584_v7 = vpop.xlane.xlu1 %7583  ;;  %v7611_v20 = vpack.c.bf16 %v7603_v19, %v7603_v19  ;;  %v7625_v33 = vpack.c.bf16 %v7129_v15, %v7129_v15 }
0x2942   :  { %9815 = vmatpush3.bf16.msra.mxu0 %v7722_v58  ;;  %10200 = vrcp.f32 %v7584_v7  ;;  %9816 = vmatprep.mubr.msk.bf16.mxu0 %vm10276_vm0, %v10275_v1 }
0x2943   :  { %9826 = vmatprep.subr.bf16.mxu0 %v10275_v1  ;;  %9811 = vmatmul.mubr.msk.bf16.vlgmr.msra.gmra.mrb[236].mxu1 %vm805_vm9, %v7611_v20  ;;  %v7587_v63 = vpop.xlane.xlu0 %7586  ;;  %v7952_v12 = vsel %vm913_vm8, %v7625_v33, 0 }
0x2944   :  { %v10197_v61 = vpop.eup %10196  ;;  %9821 = vmatpush3.bf16.msra.mxu1 %v7768_v43  ;;  %10202 = vrcp.f32 %v7587_v63  ;;  %9822 = vmatprep.mubr.msk.bf16.mxu1 %vm10276_vm0, %v10275_v1 }
0x2945   :  { %v7604_v11 = vmul.f32 %v10197_v61, %v10181_v32  ;;  %9832 = vmatprep.subr.bf16.mxu1 %v10275_v1  ;;  %v7906_v32 = vsel %vm913_vm8, %v7624_v25, 0 }
0x2946   :  { %v10199_v37 = vpop.eup %10198 }
0x2947   :  { %v7612_v52 = vpack.c.bf16 %v7604_v11, %v7604_v11  ;;  %v7605_v14 = vmul.f32 %v10199_v37, %v10183_v31 }
0x2949   :  { %9817 = vmatmul.mubr.msk.bf16.vlgmr.msra.gmra.mrb[244].mxu0 %vm805_vm9, %v7612_v52  ;;  %v7590_v18 = vpop.xlane.xlu1 %7589  ;;  %v7613_v21 = vpack.c.bf16 %v7605_v14, %v7605_v14 }
0x294a   :  { %9827 = vmatpush3.bf16.msra.mxu0 %v7814_v55  ;;  %10204 = vrcp.f32 %v7590_v18  ;;  %9828 = vmatprep.mubr.msk.bf16.mxu0 %vm10276_vm0, %v10275_v1 }
0x294b   :  { %9838 = vmatprep.subr.bf16.mxu0 %v10275_v1  ;;  %9823 = vmatmul.mubr.msk.bf16.vlgmr.msra.gmra.mrb[240].mxu1 %vm805_vm9, %v7613_v21  ;;  %v7593_v51 = vpop.xlane.xlu0 %7592 }
0x294c   :  { %v10201_v22 = vpop.eup %10200  ;;  %9833 = vmatpush3.bf16.msra.mxu1 %v7860_v28  ;;  %10206 = vrcp.f32 %v7593_v51  ;;  %9834 = vmatprep.mubr.msk.bf16.mxu1 %vm10276_vm0, %v10275_v1 }
0x294d   :  { %v7606_v59 = vmul.f32 %v10201_v22, %v11595_v49  ;;  %9844 = vmatprep.subr.bf16.mxu1 %v10275_v1 }
0x294e   :  { %v10203_v17 = vpop.eup %10202 }
0x294f   :  { %v7614_v9 = vpack.c.bf16 %v7606_v59, %v7606_v59  ;;  %v7607_v41 = vmul.f32 %v10203_v17, %v11599_v44 }
0x2951   :  { %9829 = vmatmul.mubr.msk.bf16.vlgmr.msra.gmra.mrb[248].mxu0 %vm805_vm9, %v7614_v9  ;;  %v7615_v27 = vpack.c.bf16 %v7607_v41, %v7607_v41  ;;  %v8673_v9 = vld [vmem:[#allocation4 + $0x1c0] ss:$0 sm:$0xff] }
0x2952   :  { %9839 = vmatpush3.bf16.msra.mxu0 %v7906_v32  ;;  %9840 = vmatprep.mubr.msk.bf16.mxu0 %vm10276_vm0, %v10275_v1 }
0x2953   :  { %9850 = vmatprep.subr.bf16.mxu0 %v10275_v1  ;;  %9835 = vmatmul.mubr.msk.bf16.vlgmr.msra.gmra.mrb[244].mxu1 %vm805_vm9, %v7615_v27 }
0x2954   :  { %v10205_v62 = vpop.eup %10204  ;;  %9845 = vmatpush3.bf16.msra.mxu1 %v7952_v12  ;;  %9846 = vmatprep.mubr.msk.bf16.mxu1 %vm10276_vm0, %v10275_v1 }
0x2955   :  { %v7608_v34 = vmul.f32 %v10205_v62, %v11603_v46  ;;  %9858 = vmatprep.subr.bf16.mxu1 %v10275_v1 }
0x2956   :  { %v10207_v35 = vpop.eup %10206 }
0x2957   :  { %v7616_v31 = vpack.c.bf16 %v7608_v34, %v7608_v34  ;;  %v7609_v56 = vmul.f32 %v10207_v35, %v11607_v53 }
0x2959   :  { %9841 = vmatmul.mubr.msk.bf16.vlgmr.msra.gmra.mrb[252].mxu0 %vm805_vm9, %v7616_v31  ;;  %v7617_v36 = vpack.c.bf16 %v7609_v56, %v7609_v56 }
0x295a   :  { %9854 = vmatprep.mubr.msk.bf16.mxu0 %vm10276_vm0, %v10275_v1  ;;  %9851 = vmatpush3.bf16.msra.mxu0 %v9970_v29 }
0x295b   :  { %9847 = vmatmul.mubr.msk.bf16.vlgmr.msra.gmra.mrb[248].mxu1 %vm805_vm9, %v7617_v36  ;;  %9852 = vmatprep.subr.bf16.mxu0 %v10275_v1 }
0x295c   :  { %9862 = vmatprep.mubr.msk.bf16.mxu1 %vm10276_vm0, %v10275_v1 }
0x295e   :  { %9853 = vmatpush3.bf16.msra.mxu0 %v9971_v42 }
0x295f   :  { %9866 = vmatprep.subr.bf16.mxu0 %v10275_v1 }
0x2a14   :  { %v7666_v23 = vpop.f32.mrb[240].mxu0 }
0x2a15   :  { %v9806_v49 = vpop.f32.mrb[241].mxu0  ;;  %v7994_v54 = vsel %vm200_vm4, %v7666_v23, 0.0 }
0x2a16   :  { %v7669_v45 = vpop.f32.mrb[242].mxu0  ;;  %v7712_v44 = vpop.f32.mrb[236].mxu1 }
0x2a17   :  { %v9807_v24 = vpop.f32.mrb[243].mxu0  ;;  %v9812_v46 = vpop.f32.mrb[237].mxu1  ;;  %v8001_v38 = vsel %vm200_vm4, %v7712_v44, 0.0 }
0x2a18   :  { %v7715_v48 = vpop.f32.mrb[238].mxu1 }
0x2a19   :  { %v9813_v53 = vpop.f32.mrb[239].mxu1  ;;  %v9973_v48 = vld [vmem:[#allocation2 + $0x248] sm:$0xff]  }
0x2a1a   :  { %v9974_v53 = vld [vmem:[#allocation2 + $0x250] sm:$0xff]  }
0x2a1c   :  { %v7758_v0 = vpop.f32.mrb[244].mxu0 }
0x2a1d   :  { %v7995_v50 = vsel %vm200_vm4, %v7758_v0, 0.0  ;;  %v9818_v60 = vpop.f32.mrb[245].mxu0  ;;  %v9975_v0 = vld [vmem:[#allocation2 + $0x258] sm:$0xff]  }
0x2a1e   :  { %v7996_v47 = vadd.f32 %v7995_v50, %v7994_v54  ;;  %v7761_v39 = vpop.f32.mrb[246].mxu0  ;;  %v7804_v5 = vpop.f32.mrb[240].mxu1 }
0x2a1f   :  { %v9819_v2 = vpop.f32.mrb[247].mxu0  ;;  %v8002_v3 = vsel %vm200_vm4, %v7804_v5, 0.0  ;;  %v9824_v57 = vpop.f32.mrb[241].mxu1 }
0x2a20   :  { %v8003_v26 = vadd.f32 %v8002_v3, %v8001_v38  ;;  %v7807_v19 = vpop.f32.mrb[242].mxu1  ;;  %v8677_v38 = vld [vmem:[#allocation4 + $0x1e8] ss:$0 sm:$0xff] }
0x2a21   :  { %v9825_v30 = vpop.f32.mrb[243].mxu1 }
0x2a22   :  { %v8678_v30 = vld [vmem:[#allocation4 + $0x1f0] ss:$0 sm:$0xff] }
0x2a24   :  { %v7850_v58 = vpop.f32.mrb[248].mxu0 }
0x2a25   :  { %v7997_v7 = vsel %vm200_vm4, %v7850_v58, 0.0  ;;  %v9830_v10 = vpop.f32.mrb[249].mxu0 }
0x2a26   :  { %v7998_v20 = vadd.f32 %v7997_v7, %v7996_v47  ;;  %v7853_v61 = vpop.f32.mrb[250].mxu0  ;;  %v7896_v43 = vpop.f32.mrb[244].mxu1 }
0x2a27   :  { %v9831_v63 = vpop.f32.mrb[251].mxu0  ;;  %v8004_v6 = vsel %vm200_vm4, %v7896_v43, 0.0  ;;  %v9836_v11 = vpop.f32.mrb[245].mxu1  ;;  %v9976_v61 = vld [vmem:[#allocation2 + $0x260] sm:$0xff]   ;;  %v9977_v43 = vld [vmem:[#allocation2 + $0x268] sm:$0xff]  }
0x2a28   :  { %v8005_v4 = vadd.f32 %v8004_v6, %v8003_v26  ;;  %v7899_v37 = vpop.f32.mrb[246].mxu1  ;;  %v8679_v63 = vld [vmem:[#allocation4 + $0x1c8] ss:$0 sm:$0xff] }
0x2a29   :  { %v9837_v52 = vpop.f32.mrb[247].mxu1 }
0x2a2c   :  { %v7942_v14 = vpop.f32.mrb[252].mxu0 }
0x2a2d   :  { %v7999_v16 = vsel %vm200_vm4, %v7942_v14, 0.0  ;;  %v9842_v55 = vpop.f32.mrb[253].mxu0 }
0x2a2e   :  { %v8000_v18 = vadd.f32 %v7999_v16, %v7998_v20  ;;  %v7945_v13 = vpop.f32.mrb[254].mxu0  ;;  %v7988_v21 = vpop.f32.mrb[248].mxu1 }
0x2a2f   :  { %v9843_v22 = vpop.f32.mrb[255].mxu0  ;;  %v8006_v28 = vsel %vm200_vm4, %v7988_v21, 0.0  ;;  %v9848_v51 = vpop.f32.mrb[249].mxu1  ;;  %v8683_v13 = vld [vmem:[#allocation4 + $0x1d0] ss:$0 sm:$0xff] }
0x2a30   :  { %v8007_v15 = vadd.f32 %v8006_v28, %v8005_v4  ;;  %v7991_v59 = vpop.f32.mrb[250].mxu1 }
0x2a31   :  { %v9849_v25 = vpop.f32.mrb[251].mxu1 }
0x2a32   :  { %v8012_v17 = vpack.c.bf16 %v8007_v15, %v8000_v18 }
0x2a34   :  { %9855 = vmatmul.mubr.msk.bf16.vlgmr.msra.gmra.mrb[0].mxu0 %vm200_vm4, %v8012_v17 }
0x2a35   :  { %9874 = vmatprep.mubr.msk.bf16.mxu0 %vm10276_vm0, %v10275_v1  ;;  %9867 = vmatpush3.bf16.msra.mxu0 %v9974_v53 }
0x2a36   :  { %9868 = vmatprep.subr.bf16.mxu0 %v10275_v1 }
0x2a39   :  { %9869 = vmatpush3.bf16.msra.mxu0 %v9975_v0 }
0x2a3a   :  { %9870 = vmatprep.subr.bf16.mxu0 %v10275_v1 }
0x2a3d   :  { %9871 = vmatpush3.bf16.msra.mxu0 %v9976_v61 }
0x2a3e   :  { %9872 = vmatprep.subr.bf16.mxu0 %v10275_v1 }
0x2a41   :  { %9873 = vmatpush3.bf16.msra.mxu0 %v9977_v43 }
0x2b07   :  { %v8067_v41 = vpop.f32.mrb[0].mxu0 }
0x2b08   :  { %v8068_v33 = vadd.f32 %v8673_v9, %v8067_v41  ;;  %v9856_v32 = vpop.f32.mrb[1].mxu0 }
0x2b09   :  { %v8070_v27 = vpop.f32.mrb[2].mxu0 }
0x2b0a   :  { %v8074_v62 = vadd.f32 %v8068_v33, %v11496_v8  ;;  %v8071_v12 = vadd.f32 %v8673_v9, %v8070_v27  ;;  %v9857_v34 = vpop.f32.mrb[3].mxu0 }
0x2b0c   :  { %v8075_v35 = vadd.f32 %v8071_v12, %v11498_v40  ;;  %v8078_v31 = vsel %vm200_vm4, %v8074_v62, 0.0  ;;  %v9972_v40 = vld [vmem:[#allocation2 + $0x240] sm:$0xff]  }
0x2b0d   :  { %8079 = vadd.xlane.f32.xlu1 %v8078_v31  ;;  %9859 = vmatpush3.bf16.msra.mxu1 %v9972_v40 }
0x2b0e   :  { %v8081_v56 = vsel %vm200_vm4, %v8075_v35, 0.0  ;;  %9860 = vmatprep.subr.bf16.mxu1 %v10275_v1 }
0x2b0f   :  { %8082 = vadd.xlane.f32.xlu0 %v8081_v56 }
0x2b11   :  { %9861 = vmatpush3.bf16.msra.mxu1 %v9973_v48  ;;  %v8690_v48 = vld [vmem:[#allocation4 + $0x200] ss:$0 sm:$0xff] }
0x2b12   :  { %9878 = vmatprep.subr.bf16.mxu1 %v10275_v1 }
0x2b9a   :  { %v8080_v36 = vpop.xlane.xlu1 %8079 }
0x2b9b   :  { %v8084_v29 = vmul.f32 0.03125, %v8080_v36 }
0x2b9c   :  { %v8083_v42 = vpop.xlane.xlu0 %8082 }
0x2b9d   :  { %v8086_v23 = vsub.f32 %v8074_v62, %v8084_v29  ;;  %v8085_v49 = vmul.f32 0.03125, %v8083_v42 }
0x2b9f   :  { %v8087_v45 = vsub.f32 %v8075_v35, %v8085_v49  ;;  %v8088_v44 = vmul.f32 %v8086_v23, %v8086_v23 }
0x2ba1   :  { %v8090_v24 = vsel %vm200_vm4, %v8088_v44, 0.0  ;;  %v8089_v8 = vmul.f32 %v8087_v45, %v8087_v45 }
0x2ba2   :  { %8091 = vadd.xlane.f32.xlu1 %v8090_v24 }
0x2ba3   :  { %v8093_v46 = vsel %vm200_vm4, %v8089_v8, 0.0  ;;  %v8689_v8 = vld [vmem:[#allocation4 + $0x1f8] ss:$0 sm:$0xff] }
0x2ba4   :  { %8094 = vadd.xlane.f32.xlu0 %v8093_v46 }
0x2c2f   :  { %v8092_v54 = vpop.xlane.xlu1 %8091 }
0x2c30   :  { %v8096_v50 = vmul.f32 0.03125, %v8092_v54 }
0x2c31   :  { %v8095_v60 = vpop.xlane.xlu0 %8094 }
0x2c32   :  { %v8098_v47 = vadd.f32 1e-05, %v8096_v50  ;;  %v8097_v39 = vmul.f32 0.03125, %v8095_v60 }
0x2c34   :  { %10208 = vrsqrt.f32 %v8098_v47  ;;  %v8099_v5 = vadd.f32 1e-05, %v8097_v39 }
0x2c36   :  { %10210 = vrsqrt.f32 %v8099_v5 }
0x2c3e   :  { %v10209_v2 = vpop.eup %10208 }
0x2c3f   :  { %v8102_v3 = vmul.f32 %v10209_v2, %v8086_v23 }
0x2c40   :  { %v10211_v57 = vpop.eup %10210 }
0x2c41   :  { %v8108_v26 = vmul.f32 %v8677_v38, %v8102_v3  ;;  %v8103_v19 = vmul.f32 %v10211_v57, %v8087_v45 }
0x2c43   :  { %v8109_v58 = vmul.f32 %v8677_v38, %v8103_v19  ;;  %v8114_v7 = vadd.f32 %v8678_v30, %v8108_v26 }
0x2c45   :  { %v8115_v10 = vadd.f32 %v8678_v30, %v8109_v58 }
0x2c47   :  { %v8120_v20 = vpack.c.bf16 %v8115_v10, %v8114_v7 }
0x2c49   :  { %9863 = vmatmul.mubr.msk.bf16.vlgmr.msra.gmra.mrb[252].mxu1 %vm200_vm4, %v8120_v20  ;;  %v9979_v20 = vld [vmem:[#allocation2 + $0x28] sm:$0xff]  }
0x2c4a   :  { %9882 = vmatprep.mubr.msk.bf16.mxu1 %vm10276_vm0, %v10275_v1 }
0x2d1c   :  { %v8175_v6 = vpop.f32.mrb[252].mxu1 }
0x2d1d   :  { %v8176_v11 = vadd.f32 %v8679_v63, %v8175_v6  ;;  %v9864_v4 = vpop.f32.mrb[253].mxu1 }
0x2d1e   :  { %v8178_v37 = vpop.f32.mrb[254].mxu1 }
0x2d1f   :  { %v8179_v52 = vadd.f32 %v8679_v63, %v8178_v37  ;;  %v9865_v14 = vpop.f32.mrb[255].mxu1  ;;  %v8182_v16 = vmax.f32 %v8176_v11, 0.0 }
0x2d21   :  { %v8183_v55 = vmax.f32 %v8179_v52, 0.0  ;;  %v8691_v52 = vld [vmem:[#allocation4 + $0x58] ss:$0 sm:$0xff] }
0x2d23   :  { %v8192_v18 = vpack.c.bf16 %v8183_v55, %v8182_v16 }
0x2d25   :  { %9875 = vmatmul.mubr.msk.bf16.vlgmr.msra.gmra.mrb[4].mxu0 %vm130_vm3, %v8192_v18 }
0x2df8   :  { %v8259_v21 = vpop.f32.mrb[4].mxu0 }
0x2df9   :  { %v8260_v22 = vadd.f32 %v8683_v13, %v8259_v21  ;;  %v9876_v28 = vpop.f32.mrb[5].mxu0 }
0x2dfa   :  { %v8262_v51 = vpop.f32.mrb[6].mxu0 }
0x2dfb   :  { %v8266_v15 = vadd.f32 %v8260_v22, %v8114_v7  ;;  %v8263_v59 = vadd.f32 %v8683_v13, %v8262_v51  ;;  %v9877_v25 = vpop.f32.mrb[7].mxu0  ;;  %v8692_v13 = vld [vmem:[#allocation4 + $0x60] ss:$0 sm:$0xff] }
0x2dfc   :  { %v8693_v51 = vld [vmem:[#allocation4 + $0x40] ss:$0 sm:$0xff] }
0x2dfd   :  { %v8267_v17 = vadd.f32 %v8263_v59, %v8115_v10  ;;  %v8270_v9 = vsel %vm200_vm4, %v8266_v15, 0.0  ;;  %v9978_v10 = vld [vmem:[#allocation2 + $0x20] sm:$0xff]  }
0x2dfe   :  { %8271 = vadd.xlane.f32.xlu1 %v8270_v9  ;;  %9879 = vmatpush3.bf16.msra.mxu1 %v9978_v10 }
0x2dff   :  { %v8273_v41 = vsel %vm200_vm4, %v8267_v17, 0.0  ;;  %9880 = vmatprep.subr.bf16.mxu1 %v10275_v1 }
0x2e00   :  { %8274 = vadd.xlane.f32.xlu0 %v8273_v41 }
0x2e02   :  { %9881 = vmatpush3.bf16.msra.mxu1 %v9979_v20 }
0x2e8b   :  { %v8272_v33 = vpop.xlane.xlu1 %8271 }
0x2e8c   :  { %v8276_v32 = vmul.f32 0.03125, %v8272_v33 }
0x2e8d   :  { %v8275_v27 = vpop.xlane.xlu0 %8274 }
0x2e8e   :  { %v8278_v62 = vsub.f32 %v8266_v15, %v8276_v32  ;;  %v8277_v12 = vmul.f32 0.03125, %v8275_v27 }
0x2e90   :  { %v8279_v34 = vsub.f32 %v8267_v17, %v8277_v12  ;;  %v8280_v35 = vmul.f32 %v8278_v62, %v8278_v62 }
0x2e92   :  { %v8282_v31 = vsel %vm200_vm4, %v8280_v35, 0.0  ;;  %v8281_v56 = vmul.f32 %v8279_v34, %v8279_v34 }
0x2e93   :  { %8283 = vadd.xlane.f32.xlu1 %v8282_v31 }
0x2e94   :  { %v8285_v36 = vsel %vm200_vm4, %v8281_v56, 0.0 }
0x2e95   :  { %8286 = vadd.xlane.f32.xlu0 %v8285_v36 }
0x2f20   :  { %v8284_v29 = vpop.xlane.xlu1 %8283 }
0x2f21   :  { %v8288_v42 = vmul.f32 0.03125, %v8284_v29 }
0x2f22   :  { %v8287_v23 = vpop.xlane.xlu0 %8286 }
0x2f23   :  { %v8290_v49 = vadd.f32 1e-05, %v8288_v42  ;;  %v8289_v45 = vmul.f32 0.03125, %v8287_v23 }
0x2f25   :  { %10212 = vrsqrt.f32 %v8290_v49  ;;  %v8291_v44 = vadd.f32 1e-05, %v8289_v45 }
0x2f27   :  { %10214 = vrsqrt.f32 %v8291_v44 }
0x2f2f   :  { %v10213_v24 = vpop.eup %10212 }
0x2f30   :  { %v8294_v46 = vmul.f32 %v10213_v24, %v8278_v62 }
0x2f31   :  { %v10215_v40 = vpop.eup %10214 }
0x2f32   :  { %v8300_v53 = vmul.f32 %v8689_v8, %v8294_v46  ;;  %v8295_v0 = vmul.f32 %v10215_v40, %v8279_v34 }
0x2f34   :  { %v8306_v54 = vadd.f32 %v8690_v48, %v8300_v53  ;;  %v8301_v50 = vmul.f32 %v8689_v8, %v8295_v0 }
0x2f36   :  { %v8310_v60 = vsel %vm200_vm4, %v8306_v54, 0.0  ;;  %v8307_v47 = vadd.f32 %v8690_v48, %v8301_v50 }
0x2f37   :  { %8311 = vadd.xlane.f32.xlu1 %v8310_v60 }
0x2f38   :  { %v8313_v39 = vsel %vm200_vm4, %v8307_v47, 0.0 }
0x2f39   :  { %8314 = vadd.xlane.f32.xlu0 %v8313_v39 }
0x2fc4   :  { %v8312_v5 = vpop.xlane.xlu1 %8311 }
0x2fc5   :  { %v8316_v2 = vmul.f32 0.03125, %v8312_v5 }
0x2fc6   :  { %v8315_v38 = vpop.xlane.xlu0 %8314 }
0x2fc7   :  { %v8318_v3 = vsub.f32 %v8306_v54, %v8316_v2  ;;  %v8317_v57 = vmul.f32 0.03125, %v8315_v38 }
0x2fc9   :  { %v8319_v26 = vsub.f32 %v8307_v47, %v8317_v57  ;;  %v8320_v19 = vmul.f32 %v8318_v3, %v8318_v3 }
0x2fcb   :  { %v8322_v30 = vsel %vm200_vm4, %v8320_v19, 0.0  ;;  %v8321_v58 = vmul.f32 %v8319_v26, %v8319_v26 }
0x2fcc   :  { %8323 = vadd.xlane.f32.xlu1 %v8322_v30 }
0x2fcd   :  { %v8325_v7 = vsel %vm200_vm4, %v8321_v58, 0.0 }
0x2fce   :  { %8326 = vadd.xlane.f32.xlu0 %v8325_v7 }
0x3059   :  { %v8324_v61 = vpop.xlane.xlu1 %8323 }
0x305a   :  { %v8328_v43 = vmul.f32 0.03125, %v8324_v61 }
0x305b   :  { %v8327_v63 = vpop.xlane.xlu0 %8326 }
0x305c   :  { %v8330_v6 = vadd.f32 1e-05, %v8328_v43  ;;  %v8329_v11 = vmul.f32 0.03125, %v8327_v63 }
0x305e   :  { %10216 = vrsqrt.f32 %v8330_v6  ;;  %v8331_v4 = vadd.f32 1e-05, %v8329_v11 }
0x3060   :  { %10218 = vrsqrt.f32 %v8331_v4 }
0x3068   :  { %v10217_v37 = vpop.eup %10216 }
0x3069   :  { %v8334_v14 = vmul.f32 %v10217_v37, %v8318_v3 }
0x306a   :  { %v10219_v16 = vpop.eup %10218 }
0x306b   :  { %v8340_v55 = vmul.f32 %v8691_v52, %v8334_v14  ;;  %v8335_v18 = vmul.f32 %v10219_v16, %v8319_v26 }
0x306d   :  { %v8341_v21 = vmul.f32 %v8691_v52, %v8335_v18  ;;  %v8346_v22 = vadd.f32 %v8692_v13, %v8340_v55 }
0x306f   :  { %v8347_v28 = vadd.f32 %v8692_v13, %v8341_v21 }
0x3071   :  { %v8352_v1 = vpack.c.bf16 %v8347_v28, %v8346_v22 }
0x3073   :  { %9883 = vmatmul.mubr.msk.bf16.vlgmr.msra.gmra.mrb[0].mxu1 %vm200_vm4, %v8352_v1 }
0x3146   :  { %v8407_v15 = vpop.f32.mrb[0].mxu1 }
0x3147   :  { %v8408_v59 = vadd.f32 %v8693_v51, %v8407_v15  ;;  %v9884_v25 = vpop.f32.mrb[1].mxu1 }
0x3148   :  { %v8410_v17 = vpop.f32.mrb[2].mxu1 }
0x3149   :  { %8414 = vst [vmem:[%s11711_s4] sm:$0xff] %v8408_v59  ;;  %v8411_v9 = vadd.f32 %v8693_v51, %v8410_v17  ;;  %v9885_v41 = vpop.f32.mrb[3].mxu1 }
0x314b   :  { %8415 = vst [vmem:[%s11711_s4 + $0x8] sm:$0xff] %v8411_v9 }
0x314c   :  { %8420 = vsyncpa [#allocation3], 1 }
0x314d   :  { %8421 = vsyncpa [#allocation5], 1 }

</bundles_post_ra>
